<compile_context>
chip_gen: v7x
topology: tpu7x:2x2x1
jax: 0.10.0
libtpu: 0.0.40
codegen_flags: <defaults>
</compile_context>

<pallas_src>
import math

import jax
import jax.numpy as jnp
from jax.experimental import pallas as pl
from jax.experimental.pallas import tpu as pltpu


def _make_kernel(S, H, NH, NKV, HD, I, eps):
    N_REP = NH // NKV
    QW = NH * HD            # packed q width
    KW = NKV * HD           # packed k width
    QKW = QW + KW           # packed [q|k] width (RoPE applied to this slab)
    scale = 1.0 / math.sqrt(HD)

    def kernel(x_ref, cos_ref, sin_ref, bias_ref,
               w_in_ref, w_post_ref,
               w_qkv_ref, w_o_ref, w_gu_ref, w_dn_ref,
               o_ref, attn_scr):
        f32 = jnp.float32
        bf16 = jnp.bfloat16
        x = x_ref[...]                                    # (S, H) f32

        def rmsnorm(v, w):                                # f32 elementwise
            ms = jnp.mean(v * v, axis=-1, keepdims=True)
            return (v * jax.lax.rsqrt(ms + eps)) * w      # w is (1, H)

        # ---- attention branch -------------------------------------------------
        xn = rmsnorm(x, w_in_ref[...]).astype(bf16)
        # fused QKV projection: (S, H) @ (H, (NH+2*NKV)*HD), bf16 in / f32 acc
        qkv = jnp.dot(xn, w_qkv_ref[...], preferred_element_type=f32)

        # RoPE on the packed [q|k] slab: full-width vreg math.
        # rotate_half per head == select(-roll(x, -HD/2), roll(x, +HD/2)) per lane.
        qk = qkv[:, :QKW]                                 # (S, QKW) f32
        lane = jax.lax.broadcasted_iota(jnp.int32, (S, QKW), 1)
        is_lo = (lane % HD) < (HD // 2)
        r_fwd = pltpu.roll(qk, HD // 2, axis=1)           # x[c - HD/2]
        r_bwd = pltpu.roll(qk, QKW - HD // 2, axis=1)     # x[c + HD/2]
        rot = jnp.where(is_lo, -r_bwd, r_fwd)
        qk = qk * cos_ref[...] + rot * sin_ref[...]       # f32 RoPE
        qk = qk.astype(bf16)
        q = qk[:, :QW]                                    # (S, NH*HD)  bf16
        k = qk[:, QW:]                                    # (S, NKV*HD) bf16
        v = qkv[:, QKW:].astype(bf16)                     # (S, NKV*HD) bf16

        bias = bias_ref[...]                              # (N_REP*S, S) additive causal bias

        for g in range(NKV):                              # loop over KV groups (small)
            # stack the N_REP query heads sharing this KV head along rows
            q_g = jnp.concatenate(
                [q[:, (g * N_REP + r) * HD:(g * N_REP + r + 1) * HD]
                 for r in range(N_REP)], axis=0)          # (N_REP*S, HD)
            k_g = k[:, g * HD:(g + 1) * HD]               # (S, HD)
            v_g = v[:, g * HD:(g + 1) * HD]               # (S, HD)

            # scores: contraction over HD without materializing k_g.T
            s_g = jax.lax.dot_general(q_g, k_g, (((1,), (1,)), ((), ())),
                                      preferred_element_type=f32)   # (N_REP*S, S)
            s_g = s_g * scale + bias
            m = jnp.max(s_g, axis=-1, keepdims=True)
            e = jnp.exp(s_g - m)
            p = e * pl.reciprocal(jnp.sum(e, axis=-1, keepdims=True), approx=True)
            o_g = jnp.dot(p.astype(bf16), v_g, preferred_element_type=f32)  # (N_REP*S, HD)

            # write each head's (S, HD) output into its (S, H) scratch slice
            for r in range(N_REP):
                h = g * N_REP + r
                attn_scr[:, h * HD:(h + 1) * HD] = (
                    o_g[r * S:(r + 1) * S, :].astype(bf16))

        attn = jnp.dot(attn_scr[...], w_o_ref[...], preferred_element_type=f32)
        h1 = x + attn                                     # first residual (f32)

        # ---- feed-forward branch (SwiGLU, fused gate|up) ----------------------
        h2 = rmsnorm(h1, w_post_ref[...]).astype(bf16)
        gu = jnp.dot(h2, w_gu_ref[...], preferred_element_type=f32)  # (S, 2I)
        g_ = gu[:, :I]
        u_ = gu[:, I:]
        act = (g_ * jax.nn.sigmoid(g_)) * u_              # SiLU * up, f32
        ffn = jnp.dot(act.astype(bf16), w_dn_ref[...], preferred_element_type=f32)

        o_ref[...] = h1 + ffn                             # second residual

    return kernel


def minimind_block(x, cos, sin, params, *, num_heads, num_kv_heads, eps=1e-5):
    """x: (B, S, H) f32.  cos/sin: (S, head_dim) f32.  Returns (B, S, H) f32."""
    B, S, H = x.shape
    NH, NKV = num_heads, num_kv_heads
    HD = H // NH
    N_REP = NH // NKV
    I = params["w_gate"].shape[0]

    bf16 = jnp.bfloat16
    f32 = jnp.float32

    # ---- wrapper-side prep (free at trace time) --------------------------------
    # pre-transposed (in, out) + fused weights, cast to bf16 once
    w_qkv_t = jnp.concatenate(
        [params["w_q"], params["w_k"], params["w_v"]], axis=0).T.astype(bf16)   # (H, (NH+2NKV)*HD)
    w_o_t = params["w_o"].T.astype(bf16)                                        # (NH*HD, H)
    w_gu_t = jnp.concatenate(
        [params["w_gate"], params["w_up"]], axis=0).T.astype(bf16)              # (H, 2I)
    w_dn_t = params["w_down"].T.astype(bf16)                                    # (I, H)
    w_in = params["w_norm_in"].astype(f32)                                      # (1, H)
    w_post = params["w_norm_post"].astype(f32)                                  # (1, H)

    # lane-dense cos/sin tiled over the packed [q|k] heads
    cos_t = jnp.tile(cos.astype(f32), (1, NH + NKV))                            # (S, (NH+NKV)*HD)
    sin_t = jnp.tile(sin.astype(f32), (1, NH + NKV))

    # additive causal bias, tiled for the (N_REP*S, S) stacked-head scores
    tri = jnp.tril(jnp.ones((S, S), dtype=bool))
    bias = jnp.tile(jnp.where(tri, 0.0, -1e30).astype(f32), (N_REP, 1))         # (N_REP*S, S)

    kernel = _make_kernel(S, H, NH, NKV, HD, I, eps)

    const_inputs = [cos_t, sin_t, bias, w_in, w_post, w_qkv_t, w_o_t, w_gu_t, w_dn_t]

    # explicit VMEM limit computed from the actual resident tiles (+ headroom)
    def nbytes(a):
        return int(a.size) * a.dtype.itemsize
    block_bytes = 2 * S * H * 4 + sum(nbytes(a) for a in const_inputs)          # x, out, consts
    scratch_bytes = S * NH * HD * 2
    interm_bytes = 16 * S * max(H, 2 * I, (NH + NKV) * HD) * 4                  # rough upper bound
    vmem_limit = int(min(64 * 2**20,
                         max(16 * 2**20, 2 * block_bytes + scratch_bytes + interm_bytes)))

    def run(single_buffer_consts):
        ckw = {}
        if single_buffer_consts and hasattr(pl, "Buffered"):
            # constant index maps -> no need to double-buffer weights / tables
            ckw = dict(pipeline_mode=pl.Buffered(1))

        def const_spec(a):
            n = len(a.shape)
            return pl.BlockSpec(a.shape, lambda b, _n=n: (0,) * _n, **ckw)

        in_specs = ([pl.BlockSpec((None, S, H), lambda b: (b, 0, 0))] +
                    [const_spec(a) for a in const_inputs])
        out_spec = pl.BlockSpec((None, S, H), lambda b: (b, 0, 0))

        return pl.pallas_call(
            kernel,
            out_shape=jax.ShapeDtypeStruct((B, S, H), f32),
            grid_spec=pltpu.PrefetchScalarGridSpec(
                num_scalar_prefetch=0,
                grid=(B,),
                in_specs=in_specs,
                out_specs=out_spec,
                scratch_shapes=[pltpu.VMEM((S, NH * HD), bf16)],
            ),
            compiler_params=pltpu.CompilerParams(
                dimension_semantics=("parallel",),      # batch is independent (v7x 2 TCs)
                vmem_limit_bytes=vmem_limit,
            ),
        )(x, cos_t, sin_t, bias, w_in, w_post, w_qkv_t, w_o_t, w_gu_t, w_dn_t)

    try:
        return run(True)
    except Exception:
        # fallback for jax versions without Buffered(1) single-buffered specs
        return run(False)


def minimind_block_reference(x, cos, sin, params, *, num_heads, num_kv_heads, eps=1e-5):
    """Pure-JAX fp32 reference (mirrors the PyTorch module exactly)."""
    B, S, H = x.shape
    NH, NKV = num_heads, num_kv_heads
    HD = H // NH
    n_rep = NH // NKV
    hp = jax.lax.Precision.HIGHEST

    def rms(v, w):
        return (v * jax.lax.rsqrt(jnp.mean(v * v, -1, keepdims=True) + eps)) * w.reshape(1, 1, H)

    def rot_half(t):
        return jnp.concatenate([-t[..., HD // 2:], t[..., :HD // 2]], axis=-1)

    xn = rms(x, params["w_norm_in"])
    q = jnp.einsum("bsh,oh->bso", xn, params["w_q"], precision=hp).reshape(B, S, NH, HD)
    k = jnp.einsum("bsh,oh->bso", xn, params["w_k"], precision=hp).reshape(B, S, NKV, HD)
    v = jnp.einsum("bsh,oh->bso", xn, params["w_v"], precision=hp).reshape(B, S, NKV, HD)
    cos4, sin4 = cos[None, :, None, :], sin[None, :, None, :]
    q = q * cos4 + rot_half(q) * sin4
    k = k * cos4 + rot_half(k) * sin4
    k = jnp.repeat(k, n_rep, axis=2)
    v = jnp.repeat(v, n_rep, axis=2)
    s = jnp.einsum("bqhd,bkhd->bhqk", q, k, precision=hp) / math.sqrt(HD)
    causal = jnp.tril(jnp.ones((S, S), dtype=bool))
    s = jnp.where(causal[None, None], s, -jnp.inf)
    p = jax.nn.softmax(s, axis=-1)
    o = jnp.einsum("bhqk,bkhd->bqhd", p, v, precision=hp).reshape(B, S, H)
    o = jnp.einsum("bso,ho->bsh", o, params["w_o"], precision=hp)
    h1 = x + o
    h2 = rms(h1, params["w_norm_post"])
    g = jnp.einsum("bsh,ih->bsi", h2, params["w_gate"], precision=hp)
    u = jnp.einsum("bsh,ih->bsi", h2, params["w_up"], precision=hp)
    ffn = jnp.einsum("bsi,hi->bsh", (g * jax.nn.sigmoid(g)) * u, params["w_down"], precision=hp)
    return h1 + ffn


def rope_tables(seq_len, head_dim, theta=1e6):
    inv_freq = 1.0 / (theta ** (jnp.arange(0, head_dim, 2, dtype=jnp.float32) / head_dim))
    pos = jnp.arange(seq_len, dtype=jnp.float32)
    freqs = pos[:, None] * inv_freq[None, :]              # (S, HD/2)
    emb = jnp.concatenate([freqs, freqs], axis=-1)        # (S, HD)
    return jnp.cos(emb), jnp.sin(emb)


if __name__ == "__main__":
    # small config consistent with MiniMindConfig structure (head_dim=64 as in the real model)
    B, S = 2, 64
    NH, NKV = 4, 2               # num_attention_heads, num_key_value_heads
    HD = 64                      # head_dim
    H = NH * HD                  # hidden_size = 256
    I = 64 * ((int(H * 8 / 3) + 63) // 64)   # intermediate_size = 704

    key = jax.random.PRNGKey(0)
    ks = jax.random.split(key, 10)
    init = lambda k, shp: jax.random.normal(k, shp, dtype=jnp.float32) * 0.05

    params = {
        "w_norm_in":   1.0 + 0.1 * jax.random.normal(ks[8], (1, H), jnp.float32),
        "w_norm_post": 1.0 + 0.1 * jax.random.normal(ks[9], (1, H), jnp.float32),
        "w_q":    init(ks[0], (NH * HD, H)),              # nn.Linear weight layout: (out, in)
        "w_k":    init(ks[1], (NKV * HD, H)),
        "w_v":    init(ks[2], (NKV * HD, H)),
        "w_o":    init(ks[3], (H, NH * HD)),
        "w_gate": init(ks[4], (I, H)),
        "w_up":   init(ks[5], (I, H)),
        "w_down": init(ks[6], (H, I)),
    }

    x = jax.random.normal(ks[7], (B, S, H), dtype=jnp.float32)
    cos, sin = rope_tables(S, HD, theta=1e6)

    out = minimind_block(x, cos, sin, params, num_heads=NH, num_kv_heads=NKV)
    out = jax.block_until_ready(out)
    assert out.shape == (B, S, H)
    assert bool(jnp.all(jnp.isfinite(out)))

    ref = minimind_block_reference(x, cos, sin, params, num_heads=NH, num_kv_heads=NKV)
    max_err = float(jnp.max(jnp.abs(out - ref)))
    assert max_err < 1e-1, f"max abs err vs fp32 reference too large: {max_err}"
    print("KERNEL_OK")
</pallas_src>

<mosaic_0001>
module attributes {stable_mosaic.version = 11 : i64} {
  func.func @kernel(%arg0: i32, %arg1: memref<1x64x256xf32, #tpu.memory_space<vmem>>, %arg2: memref<64x384xf32, #tpu.memory_space<vmem>>, %arg3: memref<64x384xf32, #tpu.memory_space<vmem>>, %arg4: memref<128x64xf32, #tpu.memory_space<vmem>>, %arg5: memref<1x256xf32, #tpu.memory_space<vmem>>, %arg6: memref<1x256xf32, #tpu.memory_space<vmem>>, %arg7: memref<256x512xbf16, #tpu.memory_space<vmem>>, %arg8: memref<256x256xbf16, #tpu.memory_space<vmem>>, %arg9: memref<256x1408xbf16, #tpu.memory_space<vmem>>, %arg10: memref<704x256xbf16, #tpu.memory_space<vmem>>, %arg11: memref<1x64x256xf32, #tpu.memory_space<vmem>>, %arg12: memref<64x256xbf16, #tpu.memory_space<vmem>>) attributes {dimension_semantics = [#tpu.dimension_semantics<parallel>], iteration_bounds = array<i64: 2>, scalar_prefetch = 0 : i64, scratch_operands = 1 : i64, tpu.core_type = #tpu.core_type<tc>, window_params = [{transform_indices = @transform_0, window_bounds = array<i64: 1, 64, 256>}, {pipeline_mode = #tpu.pipeline_mode<synchronous>, transform_indices = @transform_1, window_bounds = array<i64: 64, 384>}, {pipeline_mode = #tpu.pipeline_mode<synchronous>, transform_indices = @transform_2, window_bounds = array<i64: 64, 384>}, {pipeline_mode = #tpu.pipeline_mode<synchronous>, transform_indices = @transform_3, window_bounds = array<i64: 128, 64>}, {pipeline_mode = #tpu.pipeline_mode<synchronous>, transform_indices = @transform_4, window_bounds = array<i64: 1, 256>}, {pipeline_mode = #tpu.pipeline_mode<synchronous>, transform_indices = @transform_5, window_bounds = array<i64: 1, 256>}, {pipeline_mode = #tpu.pipeline_mode<synchronous>, transform_indices = @transform_6, window_bounds = array<i64: 256, 512>}, {pipeline_mode = #tpu.pipeline_mode<synchronous>, transform_indices = @transform_7, window_bounds = array<i64: 256, 256>}, {pipeline_mode = #tpu.pipeline_mode<synchronous>, transform_indices = @transform_8, window_bounds = array<i64: 256, 1408>}, {pipeline_mode = #tpu.pipeline_mode<synchronous>, transform_indices = @transform_9, window_bounds = array<i64: 704, 256>}, {transform_indices = @transform_10, window_bounds = array<i64: 1, 64, 256>}]} {
    %c0 = arith.constant 0 : index
    %c0_0 = arith.constant 0 : index
    %c0_1 = arith.constant 0 : index
    %0 = vector.load %arg1[%c0, %c0_0, %c0_1] : memref<1x64x256xf32, #tpu.memory_space<vmem>>, vector<1x64x256xf32>
    %1 = vector.shape_cast %0 : vector<1x64x256xf32> to vector<64x256xf32>
    %c0_2 = arith.constant 0 : index
    %c0_3 = arith.constant 0 : index
    %2 = vector.load %arg5[%c0_2, %c0_3] : memref<1x256xf32, #tpu.memory_space<vmem>>, vector<1x256xf32>
    %3 = arith.mulf %1, %1 : vector<64x256xf32>
    %cst = arith.constant dense<0.000000e+00> : vector<64xf32>
    %4 = vector.multi_reduction <add>, %3, %cst [1] : vector<64x256xf32> to vector<64xf32>
    %5 = vector.shape_cast %4 : vector<64xf32> to vector<64x1xf32>
    %cst_4 = arith.constant 2.560000e+02 : f32
    %6 = vector.broadcast %cst_4 : f32 to vector<64x1xf32>
    %7 = arith.divf %5, %6 : vector<64x1xf32>
    %cst_5 = arith.constant 9.99999974E-6 : f32
    %8 = vector.broadcast %cst_5 : f32 to vector<64x1xf32>
    %9 = arith.addf %7, %8 : vector<64x1xf32>
    %10 = math.rsqrt %9 : vector<64x1xf32>
    %11 = vector.broadcast %10 : vector<64x1xf32> to vector<64x256xf32>
    %12 = arith.mulf %1, %11 : vector<64x256xf32>
    %13 = vector.broadcast %2 : vector<1x256xf32> to vector<64x256xf32>
    %14 = arith.mulf %12, %13 : vector<64x256xf32>
    %15 = arith.truncf %14 : vector<64x256xf32> to vector<64x256xbf16>
    %c0_6 = arith.constant 0 : index
    %c0_7 = arith.constant 0 : index
    %16 = vector.load %arg7[%c0_6, %c0_7] : memref<256x512xbf16, #tpu.memory_space<vmem>>, vector<256x512xbf16>
    %cst_8 = arith.constant dense<0.000000e+00> : vector<64x512xf32>
    %17 = tpu.matmul %15, %16, %cst_8 {dimension_numbers = #tpu.dot_dimension_numbers<[1], [0], [0], [1], [0, 0, 1, 1], [], []>} : vector<64x256xbf16>, vector<256x512xbf16>, vector<64x512xf32> -> vector<64x512xf32>
    %18 = vector.extract_strided_slice %17 {offsets = [0, 0], sizes = [64, 384], strides = [1, 1]} : vector<64x512xf32> to vector<64x384xf32>
    %19 = tpu.iota {dimensions = array<i32: 1>} : vector<64x384xi32>
    %c64_i32 = arith.constant 64 : i32
    %c0_i32 = arith.constant 0 : i32
    %20 = arith.cmpi eq, %c64_i32, %c0_i32 : i32
    %c1_i32 = arith.constant 1 : i32
    %21 = arith.select %20, %c1_i32, %c64_i32 : i32
    %22 = vector.broadcast %21 : i32 to vector<64x384xi32>
    %23 = arith.remsi %19, %22 : vector<64x384xi32>
    %c0_i32_9 = arith.constant 0 : i32
    %24 = vector.broadcast %c0_i32_9 : i32 to vector<64x384xi32>
    %25 = arith.cmpi ne, %23, %24 : vector<64x384xi32>
    %c0_i32_10 = arith.constant 0 : i32
    %26 = vector.broadcast %c0_i32_10 : i32 to vector<64x384xi32>
    %27 = arith.cmpi slt, %23, %26 : vector<64x384xi32>
    %c0_i32_11 = arith.constant 0 : i32
    %28 = arith.cmpi slt, %21, %c0_i32_11 : i32
    %29 = vector.broadcast %28 : i1 to vector<64x384xi1>
    %30 = vector.broadcast %29 : vector<64x384xi1> to vector<64x384xi1>
    %31 = arith.xori %27, %30 : vector<64x384xi1>
    %32 = arith.andi %31, %25 : vector<64x384xi1>
    %33 = vector.broadcast %21 : i32 to vector<64x384xi32>
    %34 = arith.addi %23, %33 : vector<64x384xi32>
    %35 = arith.select %32, %34, %23 : vector<64x384xi1>, vector<64x384xi32>
    %c32_i32 = arith.constant 32 : i32
    %36 = vector.broadcast %c32_i32 : i32 to vector<64x384xi32>
    %37 = arith.cmpi slt, %35, %36 : vector<64x384xi32>
    %c32_i32_12 = arith.constant 32 : i32
    %38 = tpu.dynamic_rotate %18 by %c32_i32_12 dim 1 : vector<64x384xf32>, i32 -> vector<64x384xf32>
    %c352_i32 = arith.constant 352 : i32
    %39 = tpu.dynamic_rotate %18 by %c352_i32 dim 1 : vector<64x384xf32>, i32 -> vector<64x384xf32>
    %cst_13 = arith.constant 0.000000e+00 : f32
    %40 = vector.broadcast %cst_13 : f32 to vector<64x384xf32>
    %41 = arith.subf %40, %39 : vector<64x384xf32>
    %42 = arith.select %37, %41, %38 : vector<64x384xi1>, vector<64x384xf32>
    %c0_14 = arith.constant 0 : index
    %c0_15 = arith.constant 0 : index
    %43 = vector.load %arg2[%c0_14, %c0_15] : memref<64x384xf32, #tpu.memory_space<vmem>>, vector<64x384xf32>
    %44 = arith.mulf %18, %43 : vector<64x384xf32>
    %c0_16 = arith.constant 0 : index
    %c0_17 = arith.constant 0 : index
    %45 = vector.load %arg3[%c0_16, %c0_17] : memref<64x384xf32, #tpu.memory_space<vmem>>, vector<64x384xf32>
    %46 = arith.mulf %42, %45 : vector<64x384xf32>
    %47 = arith.addf %44, %46 : vector<64x384xf32>
    %48 = arith.truncf %47 : vector<64x384xf32> to vector<64x384xbf16>
    %49 = vector.extract_strided_slice %48 {offsets = [0, 0], sizes = [64, 256], strides = [1, 1]} : vector<64x384xbf16> to vector<64x256xbf16>
    %50 = vector.extract_strided_slice %48 {offsets = [0, 256], sizes = [64, 128], strides = [1, 1]} : vector<64x384xbf16> to vector<64x128xbf16>
    %51 = vector.extract_strided_slice %17 {offsets = [0, 384], sizes = [64, 128], strides = [1, 1]} : vector<64x512xf32> to vector<64x128xf32>
    %52 = arith.truncf %51 : vector<64x128xf32> to vector<64x128xbf16>
    %c0_18 = arith.constant 0 : index
    %c0_19 = arith.constant 0 : index
    %53 = vector.load %arg4[%c0_18, %c0_19] : memref<128x64xf32, #tpu.memory_space<vmem>>, vector<128x64xf32>
    %54 = vector.extract_strided_slice %49 {offsets = [0, 0], sizes = [64, 64], strides = [1, 1]} : vector<64x256xbf16> to vector<64x64xbf16>
    %55 = vector.extract_strided_slice %49 {offsets = [0, 64], sizes = [64, 64], strides = [1, 1]} : vector<64x256xbf16> to vector<64x64xbf16>
    %56 = tpu.concatenate %54, %55 in 0 : vector<64x64xbf16>, vector<64x64xbf16> -> vector<128x64xbf16>
    %57 = vector.extract_strided_slice %50 {offsets = [0, 0], sizes = [64, 64], strides = [1, 1]} : vector<64x128xbf16> to vector<64x64xbf16>
    %58 = vector.extract_strided_slice %52 {offsets = [0, 0], sizes = [64, 64], strides = [1, 1]} : vector<64x128xbf16> to vector<64x64xbf16>
    %cst_20 = arith.constant dense<0.000000e+00> : vector<128x64xf32>
    %59 = tpu.matmul %56, %57, %cst_20 {dimension_numbers = #tpu.dot_dimension_numbers<[1], [1], [0], [0], [0, 0, 1, 0], [], []>} : vector<128x64xbf16>, vector<64x64xbf16>, vector<128x64xf32> -> vector<128x64xf32>
    %cst_21 = arith.constant 1.250000e-01 : f32
    %60 = vector.broadcast %cst_21 : f32 to vector<128x64xf32>
    %61 = arith.mulf %59, %60 : vector<128x64xf32>
    %62 = arith.addf %61, %53 : vector<128x64xf32>
    %cst_22 = arith.constant dense<0xFF800000> : vector<128xf32>
    %63 = vector.multi_reduction <maximumf>, %62, %cst_22 [1] : vector<128x64xf32> to vector<128xf32>
    %64 = vector.shape_cast %63 : vector<128xf32> to vector<128x1xf32>
    %65 = vector.broadcast %64 : vector<128x1xf32> to vector<128x64xf32>
    %66 = arith.subf %62, %65 : vector<128x64xf32>
    %67 = math.exp %66 : vector<128x64xf32>
    %cst_23 = arith.constant dense<0.000000e+00> : vector<128xf32>
    %68 = vector.multi_reduction <add>, %67, %cst_23 [1] : vector<128x64xf32> to vector<128xf32>
    %69 = vector.shape_cast %68 : vector<128xf32> to vector<128x1xf32>
    %70 = tpu.reciprocal %69 {approx = true} : vector<128x1xf32> -> vector<128x1xf32>
    %71 = vector.broadcast %70 : vector<128x1xf32> to vector<128x64xf32>
    %72 = arith.mulf %67, %71 : vector<128x64xf32>
    %73 = arith.truncf %72 : vector<128x64xf32> to vector<128x64xbf16>
    %cst_24 = arith.constant dense<0.000000e+00> : vector<128x64xf32>
    %74 = tpu.matmul %73, %58, %cst_24 {dimension_numbers = #tpu.dot_dimension_numbers<[1], [0], [0], [1], [0, 0, 1, 1], [], []>} : vector<128x64xbf16>, vector<64x64xbf16>, vector<128x64xf32> -> vector<128x64xf32>
    %75 = vector.extract_strided_slice %74 {offsets = [0, 0], sizes = [64, 64], strides = [1, 1]} : vector<128x64xf32> to vector<64x64xf32>
    %76 = arith.truncf %75 : vector<64x64xf32> to vector<64x64xbf16>
    %c0_25 = arith.constant 0 : index
    %c0_26 = arith.constant 0 : index
    %77 = vector.load %arg12[%c0_25, %c0_26] : memref<64x256xbf16, #tpu.memory_space<vmem>>, vector<64x64xbf16>
    tpu.vector_store %arg12[%c0_25, %c0_26], %76 {strides = array<i32>} : memref<64x256xbf16, #tpu.memory_space<vmem>>, vector<64x64xbf16>,
    %78 = vector.extract_strided_slice %74 {offsets = [64, 0], sizes = [64, 64], strides = [1, 1]} : vector<128x64xf32> to vector<64x64xf32>
    %79 = arith.truncf %78 : vector<64x64xf32> to vector<64x64xbf16>
    %c0_27 = arith.constant 0 : index
    %c64 = arith.constant 64 : index
    %80 = vector.load %arg12[%c0_27, %c64] : memref<64x256xbf16, #tpu.memory_space<vmem>>, vector<64x64xbf16>
    tpu.vector_store %arg12[%c0_27, %c64], %79 {strides = array<i32>} : memref<64x256xbf16, #tpu.memory_space<vmem>>, vector<64x64xbf16>,
    %81 = vector.extract_strided_slice %49 {offsets = [0, 128], sizes = [64, 64], strides = [1, 1]} : vector<64x256xbf16> to vector<64x64xbf16>
    %82 = vector.extract_strided_slice %49 {offsets = [0, 192], sizes = [64, 64], strides = [1, 1]} : vector<64x256xbf16> to vector<64x64xbf16>
    %83 = tpu.concatenate %81, %82 in 0 : vector<64x64xbf16>, vector<64x64xbf16> -> vector<128x64xbf16>
    %84 = vector.extract_strided_slice %50 {offsets = [0, 64], sizes = [64, 64], strides = [1, 1]} : vector<64x128xbf16> to vector<64x64xbf16>
    %85 = vector.extract_strided_slice %52 {offsets = [0, 64], sizes = [64, 64], strides = [1, 1]} : vector<64x128xbf16> to vector<64x64xbf16>
    %cst_28 = arith.constant dense<0.000000e+00> : vector<128x64xf32>
    %86 = tpu.matmul %83, %84, %cst_28 {dimension_numbers = #tpu.dot_dimension_numbers<[1], [1], [0], [0], [0, 0, 1, 0], [], []>} : vector<128x64xbf16>, vector<64x64xbf16>, vector<128x64xf32> -> vector<128x64xf32>
    %cst_29 = arith.constant 1.250000e-01 : f32
    %87 = vector.broadcast %cst_29 : f32 to vector<128x64xf32>
    %88 = arith.mulf %86, %87 : vector<128x64xf32>
    %89 = arith.addf %88, %53 : vector<128x64xf32>
    %cst_30 = arith.constant dense<0xFF800000> : vector<128xf32>
    %90 = vector.multi_reduction <maximumf>, %89, %cst_30 [1] : vector<128x64xf32> to vector<128xf32>
    %91 = vector.shape_cast %90 : vector<128xf32> to vector<128x1xf32>
    %92 = vector.broadcast %91 : vector<128x1xf32> to vector<128x64xf32>
    %93 = arith.subf %89, %92 : vector<128x64xf32>
    %94 = math.exp %93 : vector<128x64xf32>
    %cst_31 = arith.constant dense<0.000000e+00> : vector<128xf32>
    %95 = vector.multi_reduction <add>, %94, %cst_31 [1] : vector<128x64xf32> to vector<128xf32>
    %96 = vector.shape_cast %95 : vector<128xf32> to vector<128x1xf32>
    %97 = tpu.reciprocal %96 {approx = true} : vector<128x1xf32> -> vector<128x1xf32>
    %98 = vector.broadcast %97 : vector<128x1xf32> to vector<128x64xf32>
    %99 = arith.mulf %94, %98 : vector<128x64xf32>
    %100 = arith.truncf %99 : vector<128x64xf32> to vector<128x64xbf16>
    %cst_32 = arith.constant dense<0.000000e+00> : vector<128x64xf32>
    %101 = tpu.matmul %100, %85, %cst_32 {dimension_numbers = #tpu.dot_dimension_numbers<[1], [0], [0], [1], [0, 0, 1, 1], [], []>} : vector<128x64xbf16>, vector<64x64xbf16>, vector<128x64xf32> -> vector<128x64xf32>
    %102 = vector.extract_strided_slice %101 {offsets = [0, 0], sizes = [64, 64], strides = [1, 1]} : vector<128x64xf32> to vector<64x64xf32>
    %103 = arith.truncf %102 : vector<64x64xf32> to vector<64x64xbf16>
    %c0_33 = arith.constant 0 : index
    %c128 = arith.constant 128 : index
    %104 = vector.load %arg12[%c0_33, %c128] : memref<64x256xbf16, #tpu.memory_space<vmem>>, vector<64x64xbf16>
    tpu.vector_store %arg12[%c0_33, %c128], %103 {strides = array<i32>} : memref<64x256xbf16, #tpu.memory_space<vmem>>, vector<64x64xbf16>,
    %105 = vector.extract_strided_slice %101 {offsets = [64, 0], sizes = [64, 64], strides = [1, 1]} : vector<128x64xf32> to vector<64x64xf32>
    %106 = arith.truncf %105 : vector<64x64xf32> to vector<64x64xbf16>
    %c0_34 = arith.constant 0 : index
    %c192 = arith.constant 192 : index
    %107 = vector.load %arg12[%c0_34, %c192] : memref<64x256xbf16, #tpu.memory_space<vmem>>, vector<64x64xbf16>
    tpu.vector_store %arg12[%c0_34, %c192], %106 {strides = array<i32>} : memref<64x256xbf16, #tpu.memory_space<vmem>>, vector<64x64xbf16>,
    %c0_35 = arith.constant 0 : index
    %c0_36 = arith.constant 0 : index
    %108 = vector.load %arg12[%c0_35, %c0_36] : memref<64x256xbf16, #tpu.memory_space<vmem>>, vector<64x256xbf16>
    %c0_37 = arith.constant 0 : index
    %c0_38 = arith.constant 0 : index
    %109 = vector.load %arg8[%c0_37, %c0_38] : memref<256x256xbf16, #tpu.memory_space<vmem>>, vector<256x256xbf16>
    %cst_39 = arith.constant dense<0.000000e+00> : vector<64x256xf32>
    %110 = tpu.matmul %108, %109, %cst_39 {dimension_numbers = #tpu.dot_dimension_numbers<[1], [0], [0], [1], [0, 0, 1, 1], [], []>} : vector<64x256xbf16>, vector<256x256xbf16>, vector<64x256xf32> -> vector<64x256xf32>
    %111 = arith.addf %1, %110 : vector<64x256xf32>
    %c0_40 = arith.constant 0 : index
    %c0_41 = arith.constant 0 : index
    %112 = vector.load %arg6[%c0_40, %c0_41] : memref<1x256xf32, #tpu.memory_space<vmem>>, vector<1x256xf32>
    %113 = arith.mulf %111, %111 : vector<64x256xf32>
    %cst_42 = arith.constant dense<0.000000e+00> : vector<64xf32>
    %114 = vector.multi_reduction <add>, %113, %cst_42 [1] : vector<64x256xf32> to vector<64xf32>
    %115 = vector.shape_cast %114 : vector<64xf32> to vector<64x1xf32>
    %cst_43 = arith.constant 2.560000e+02 : f32
    %116 = vector.broadcast %cst_43 : f32 to vector<64x1xf32>
    %117 = arith.divf %115, %116 : vector<64x1xf32>
    %cst_44 = arith.constant 9.99999974E-6 : f32
    %118 = vector.broadcast %cst_44 : f32 to vector<64x1xf32>
    %119 = arith.addf %117, %118 : vector<64x1xf32>
    %120 = math.rsqrt %119 : vector<64x1xf32>
    %121 = vector.broadcast %120 : vector<64x1xf32> to vector<64x256xf32>
    %122 = arith.mulf %111, %121 : vector<64x256xf32>
    %123 = vector.broadcast %112 : vector<1x256xf32> to vector<64x256xf32>
    %124 = arith.mulf %122, %123 : vector<64x256xf32>
    %125 = arith.truncf %124 : vector<64x256xf32> to vector<64x256xbf16>
    %c0_45 = arith.constant 0 : index
    %c0_46 = arith.constant 0 : index
    %126 = vector.load %arg9[%c0_45, %c0_46] : memref<256x1408xbf16, #tpu.memory_space<vmem>>, vector<256x1408xbf16>
    %cst_47 = arith.constant dense<0.000000e+00> : vector<64x1408xf32>
    %127 = tpu.matmul %125, %126, %cst_47 {dimension_numbers = #tpu.dot_dimension_numbers<[1], [0], [0], [1], [0, 0, 1, 1], [], []>} : vector<64x256xbf16>, vector<256x1408xbf16>, vector<64x1408xf32> -> vector<64x1408xf32>
    %128 = vector.extract_strided_slice %127 {offsets = [0, 0], sizes = [64, 704], strides = [1, 1]} : vector<64x1408xf32> to vector<64x704xf32>
    %129 = vector.extract_strided_slice %127 {offsets = [0, 704], sizes = [64, 704], strides = [1, 1]} : vector<64x1408xf32> to vector<64x704xf32>
    %130 = arith.negf %128 : vector<64x704xf32>
    %131 = math.exp %130 : vector<64x704xf32>
    %cst_48 = arith.constant 1.000000e+00 : f32
    %132 = vector.broadcast %cst_48 : f32 to vector<64x704xf32>
    %133 = arith.addf %132, %131 : vector<64x704xf32>
    %134 = arith.divf %132, %133 : vector<64x704xf32>
    %135 = arith.mulf %128, %134 : vector<64x704xf32>
    %136 = arith.mulf %135, %129 : vector<64x704xf32>
    %137 = arith.truncf %136 : vector<64x704xf32> to vector<64x704xbf16>
    %c0_49 = arith.constant 0 : index
    %c0_50 = arith.constant 0 : index
    %138 = vector.load %arg10[%c0_49, %c0_50] : memref<704x256xbf16, #tpu.memory_space<vmem>>, vector<704x256xbf16>
    %cst_51 = arith.constant dense<0.000000e+00> : vector<64x256xf32>
    %139 = tpu.matmul %137, %138, %cst_51 {dimension_numbers = #tpu.dot_dimension_numbers<[1], [0], [0], [1], [0, 0, 1, 1], [], []>} : vector<64x704xbf16>, vector<704x256xbf16>, vector<64x256xf32> -> vector<64x256xf32>
    %140 = arith.addf %111, %139 : vector<64x256xf32>
    %c0_52 = arith.constant 0 : index
    %c0_53 = arith.constant 0 : index
    %c0_54 = arith.constant 0 : index
    %141 = vector.load %arg11[%c0_52, %c0_53, %c0_54] : memref<1x64x256xf32, #tpu.memory_space<vmem>>, vector<1x64x256xf32>
    %142 = vector.shape_cast %141 : vector<1x64x256xf32> to vector<64x256xf32>
    %143 = vector.shape_cast %140 : vector<64x256xf32> to vector<1x64x256xf32>
    tpu.vector_store %arg11[%c0_52, %c0_53, %c0_54], %143 {strides = array<i32>} : memref<1x64x256xf32, #tpu.memory_space<vmem>>, vector<1x64x256xf32>,
    return
  }
  func.func @transform_0(%arg0: i32) -> (i32, i32, i32) {
    %c0_i32 = arith.constant 0 : i32
    %c0_i32_0 = arith.constant 0 : i32
    %c0_i32_1 = arith.constant 0 : i32
    return %arg0, %c0_i32, %c0_i32_0 : i32, i32, i32
  }
  func.func @transform_1(%arg0: i32) -> (i32, i32) {
    %c0_i32 = arith.constant 0 : i32
    %c0_i32_0 = arith.constant 0 : i32
    %c0_i32_1 = arith.constant 0 : i32
    return %c0_i32, %c0_i32_0 : i32, i32
  }
  func.func @transform_2(%arg0: i32) -> (i32, i32) {
    %c0_i32 = arith.constant 0 : i32
    %c0_i32_0 = arith.constant 0 : i32
    %c0_i32_1 = arith.constant 0 : i32
    return %c0_i32, %c0_i32_0 : i32, i32
  }
  func.func @transform_3(%arg0: i32) -> (i32, i32) {
    %c0_i32 = arith.constant 0 : i32
    %c0_i32_0 = arith.constant 0 : i32
    %c0_i32_1 = arith.constant 0 : i32
    return %c0_i32, %c0_i32_0 : i32, i32
  }
  func.func @transform_4(%arg0: i32) -> (i32, i32) {
    %c0_i32 = arith.constant 0 : i32
    %c0_i32_0 = arith.constant 0 : i32
    %c0_i32_1 = arith.constant 0 : i32
    return %c0_i32, %c0_i32_0 : i32, i32
  }
  func.func @transform_5(%arg0: i32) -> (i32, i32) {
    %c0_i32 = arith.constant 0 : i32
    %c0_i32_0 = arith.constant 0 : i32
    %c0_i32_1 = arith.constant 0 : i32
    return %c0_i32, %c0_i32_0 : i32, i32
  }
  func.func @transform_6(%arg0: i32) -> (i32, i32) {
    %c0_i32 = arith.constant 0 : i32
    %c0_i32_0 = arith.constant 0 : i32
    %c0_i32_1 = arith.constant 0 : i32
    return %c0_i32, %c0_i32_0 : i32, i32
  }
  func.func @transform_7(%arg0: i32) -> (i32, i32) {
    %c0_i32 = arith.constant 0 : i32
    %c0_i32_0 = arith.constant 0 : i32
    %c0_i32_1 = arith.constant 0 : i32
    return %c0_i32, %c0_i32_0 : i32, i32
  }
  func.func @transform_8(%arg0: i32) -> (i32, i32) {
    %c0_i32 = arith.constant 0 : i32
    %c0_i32_0 = arith.constant 0 : i32
    %c0_i32_1 = arith.constant 0 : i32
    return %c0_i32, %c0_i32_0 : i32, i32
  }
  func.func @transform_9(%arg0: i32) -> (i32, i32) {
    %c0_i32 = arith.constant 0 : i32
    %c0_i32_0 = arith.constant 0 : i32
    %c0_i32_1 = arith.constant 0 : i32
    return %c0_i32, %c0_i32_0 : i32, i32
  }
  func.func @transform_10(%arg0: i32) -> (i32, i32, i32) {
    %c0_i32 = arith.constant 0 : i32
    %c0_i32_0 = arith.constant 0 : i32
    %c0_i32_1 = arith.constant 0 : i32
    return %arg0, %c0_i32, %c0_i32_0 : i32, i32, i32
  }
}

module attributes {stable_mosaic.version = 11 : i64} {
  func.func @kernel(%arg0: i32, %arg1: memref<1x64x256xf32, #tpu.memory_space<vmem>>, %arg2: memref<64x384xf32, #tpu.memory_space<vmem>>, %arg3: memref<64x384xf32, #tpu.memory_space<vmem>>, %arg4: memref<128x64xf32, #tpu.memory_space<vmem>>, %arg5: memref<1x256xf32, #tpu.memory_space<vmem>>, %arg6: memref<1x256xf32, #tpu.memory_space<vmem>>, %arg7: memref<256x512xbf16, #tpu.memory_space<vmem>>, %arg8: memref<256x256xbf16, #tpu.memory_space<vmem>>, %arg9: memref<256x1408xbf16, #tpu.memory_space<vmem>>, %arg10: memref<704x256xbf16, #tpu.memory_space<vmem>>, %arg11: memref<1x64x256xf32, #tpu.memory_space<vmem>>, %arg12: memref<64x256xbf16, #tpu.memory_space<vmem>>) attributes {dimension_semantics = [#tpu.dimension_semantics<parallel>], iteration_bounds = array<i64: 2>, scalar_prefetch = 0 : i64, scratch_operands = 1 : i64, tpu.core_type = #tpu.core_type<tc>, window_params = [{transform_indices = @transform_0, window_bounds = array<i64: 1, 64, 256>}, {pipeline_mode = #tpu.pipeline_mode<synchronous>, transform_indices = @transform_1, window_bounds = array<i64: 64, 384>}, {pipeline_mode = #tpu.pipeline_mode<synchronous>, transform_indices = @transform_2, window_bounds = array<i64: 64, 384>}, {pipeline_mode = #tpu.pipeline_mode<synchronous>, transform_indices = @transform_3, window_bounds = array<i64: 128, 64>}, {pipeline_mode = #tpu.pipeline_mode<synchronous>, transform_indices = @transform_4, window_bounds = array<i64: 1, 256>}, {pipeline_mode = #tpu.pipeline_mode<synchronous>, transform_indices = @transform_5, window_bounds = array<i64: 1, 256>}, {pipeline_mode = #tpu.pipeline_mode<synchronous>, transform_indices = @transform_6, window_bounds = array<i64: 256, 512>}, {pipeline_mode = #tpu.pipeline_mode<synchronous>, transform_indices = @transform_7, window_bounds = array<i64: 256, 256>}, {pipeline_mode = #tpu.pipeline_mode<synchronous>, transform_indices = @transform_8, window_bounds = array<i64: 256, 1408>}, {pipeline_mode = #tpu.pipeline_mode<synchronous>, transform_indices = @transform_9, window_bounds = array<i64: 704, 256>}, {transform_indices = @transform_10, window_bounds = array<i64: 1, 64, 256>}]} {
    %c0 = arith.constant 0 : index
    %c0_0 = arith.constant 0 : index
    %c0_1 = arith.constant 0 : index
    %0 = vector.load %arg1[%c0, %c0_0, %c0_1] : memref<1x64x256xf32, #tpu.memory_space<vmem>>, vector<1x64x256xf32>
    %1 = vector.shape_cast %0 : vector<1x64x256xf32> to vector<64x256xf32>
    %c0_2 = arith.constant 0 : index
    %c0_3 = arith.constant 0 : index
    %2 = vector.load %arg5[%c0_2, %c0_3] : memref<1x256xf32, #tpu.memory_space<vmem>>, vector<1x256xf32>
    %3 = arith.mulf %1, %1 : vector<64x256xf32>
    %cst = arith.constant dense<0.000000e+00> : vector<64xf32>
    %4 = vector.multi_reduction <add>, %3, %cst [1] : vector<64x256xf32> to vector<64xf32>
    %5 = vector.shape_cast %4 : vector<64xf32> to vector<64x1xf32>
    %cst_4 = arith.constant 2.560000e+02 : f32
    %6 = vector.broadcast %cst_4 : f32 to vector<64x1xf32>
    %7 = arith.divf %5, %6 : vector<64x1xf32>
    %cst_5 = arith.constant 9.99999974E-6 : f32
    %8 = vector.broadcast %cst_5 : f32 to vector<64x1xf32>
    %9 = arith.addf %7, %8 : vector<64x1xf32>
    %10 = math.rsqrt %9 : vector<64x1xf32>
    %11 = vector.broadcast %10 : vector<64x1xf32> to vector<64x256xf32>
    %12 = arith.mulf %1, %11 : vector<64x256xf32>
    %13 = vector.broadcast %2 : vector<1x256xf32> to vector<64x256xf32>
    %14 = arith.mulf %12, %13 : vector<64x256xf32>
    %15 = arith.truncf %14 : vector<64x256xf32> to vector<64x256xbf16>
    %c0_6 = arith.constant 0 : index
    %c0_7 = arith.constant 0 : index
    %16 = vector.load %arg7[%c0_6, %c0_7] : memref<256x512xbf16, #tpu.memory_space<vmem>>, vector<256x512xbf16>
    %cst_8 = arith.constant dense<0.000000e+00> : vector<64x512xf32>
    %17 = tpu.matmul %15, %16, %cst_8 {dimension_numbers = #tpu.dot_dimension_numbers<[1], [0], [0], [1], [0, 0, 1, 1], [], []>} : vector<64x256xbf16>, vector<256x512xbf16>, vector<64x512xf32> -> vector<64x512xf32>
    %18 = vector.extract_strided_slice %17 {offsets = [0, 0], sizes = [64, 384], strides = [1, 1]} : vector<64x512xf32> to vector<64x384xf32>
    %19 = tpu.iota {dimensions = array<i32: 1>} : vector<64x384xi32>
    %c64_i32 = arith.constant 64 : i32
    %c0_i32 = arith.constant 0 : i32
    %20 = arith.cmpi eq, %c64_i32, %c0_i32 : i32
    %c1_i32 = arith.constant 1 : i32
    %21 = arith.select %20, %c1_i32, %c64_i32 : i32
    %22 = vector.broadcast %21 : i32 to vector<64x384xi32>
    %23 = arith.remsi %19, %22 : vector<64x384xi32>
    %c0_i32_9 = arith.constant 0 : i32
    %24 = vector.broadcast %c0_i32_9 : i32 to vector<64x384xi32>
    %25 = arith.cmpi ne, %23, %24 : vector<64x384xi32>
    %c0_i32_10 = arith.constant 0 : i32
    %26 = vector.broadcast %c0_i32_10 : i32 to vector<64x384xi32>
    %27 = arith.cmpi slt, %23, %26 : vector<64x384xi32>
    %c0_i32_11 = arith.constant 0 : i32
    %28 = arith.cmpi slt, %21, %c0_i32_11 : i32
    %29 = vector.broadcast %28 : i1 to vector<64x384xi1>
    %30 = vector.broadcast %29 : vector<64x384xi1> to vector<64x384xi1>
    %31 = arith.xori %27, %30 : vector<64x384xi1>
    %32 = arith.andi %31, %25 : vector<64x384xi1>
    %33 = vector.broadcast %21 : i32 to vector<64x384xi32>
    %34 = arith.addi %23, %33 : vector<64x384xi32>
    %35 = arith.select %32, %34, %23 : vector<64x384xi1>, vector<64x384xi32>
    %c32_i32 = arith.constant 32 : i32
    %36 = vector.broadcast %c32_i32 : i32 to vector<64x384xi32>
    %37 = arith.cmpi slt, %35, %36 : vector<64x384xi32>
    %c32_i32_12 = arith.constant 32 : i32
    %38 = tpu.dynamic_rotate %18 by %c32_i32_12 dim 1 : vector<64x384xf32>, i32 -> vector<64x384xf32>
    %c352_i32 = arith.constant 352 : i32
    %39 = tpu.dynamic_rotate %18 by %c352_i32 dim 1 : vector<64x384xf32>, i32 -> vector<64x384xf32>
    %cst_13 = arith.constant 0.000000e+00 : f32
    %40 = vector.broadcast %cst_13 : f32 to vector<64x384xf32>
    %41 = arith.subf %40, %39 : vector<64x384xf32>
    %42 = arith.select %37, %41, %38 : vector<64x384xi1>, vector<64x384xf32>
    %c0_14 = arith.constant 0 : index
    %c0_15 = arith.constant 0 : index
    %43 = vector.load %arg2[%c0_14, %c0_15] : memref<64x384xf32, #tpu.memory_space<vmem>>, vector<64x384xf32>
    %44 = arith.mulf %18, %43 : vector<64x384xf32>
    %c0_16 = arith.constant 0 : index
    %c0_17 = arith.constant 0 : index
    %45 = vector.load %arg3[%c0_16, %c0_17] : memref<64x384xf32, #tpu.memory_space<vmem>>, vector<64x384xf32>
    %46 = arith.mulf %42, %45 : vector<64x384xf32>
    %47 = arith.addf %44, %46 : vector<64x384xf32>
    %48 = arith.truncf %47 : vector<64x384xf32> to vector<64x384xbf16>
    %49 = vector.extract_strided_slice %48 {offsets = [0, 0], sizes = [64, 256], strides = [1, 1]} : vector<64x384xbf16> to vector<64x256xbf16>
    %50 = vector.extract_strided_slice %48 {offsets = [0, 256], sizes = [64, 128], strides = [1, 1]} : vector<64x384xbf16> to vector<64x128xbf16>
    %51 = vector.extract_strided_slice %17 {offsets = [0, 384], sizes = [64, 128], strides = [1, 1]} : vector<64x512xf32> to vector<64x128xf32>
    %52 = arith.truncf %51 : vector<64x128xf32> to vector<64x128xbf16>
    %c0_18 = arith.constant 0 : index
    %c0_19 = arith.constant 0 : index
    %53 = vector.load %arg4[%c0_18, %c0_19] : memref<128x64xf32, #tpu.memory_space<vmem>>, vector<128x64xf32>
    %54 = vector.extract_strided_slice %49 {offsets = [0, 0], sizes = [64, 64], strides = [1, 1]} : vector<64x256xbf16> to vector<64x64xbf16>
    %55 = vector.extract_strided_slice %49 {offsets = [0, 64], sizes = [64, 64], strides = [1, 1]} : vector<64x256xbf16> to vector<64x64xbf16>
    %56 = tpu.concatenate %54, %55 in 0 : vector<64x64xbf16>, vector<64x64xbf16> -> vector<128x64xbf16>
    %57 = vector.extract_strided_slice %50 {offsets = [0, 0], sizes = [64, 64], strides = [1, 1]} : vector<64x128xbf16> to vector<64x64xbf16>
    %58 = vector.extract_strided_slice %52 {offsets = [0, 0], sizes = [64, 64], strides = [1, 1]} : vector<64x128xbf16> to vector<64x64xbf16>
    %cst_20 = arith.constant dense<0.000000e+00> : vector<128x64xf32>
    %59 = tpu.matmul %56, %57, %cst_20 {dimension_numbers = #tpu.dot_dimension_numbers<[1], [1], [0], [0], [0, 0, 1, 0], [], []>} : vector<128x64xbf16>, vector<64x64xbf16>, vector<128x64xf32> -> vector<128x64xf32>
    %cst_21 = arith.constant 1.250000e-01 : f32
    %60 = vector.broadcast %cst_21 : f32 to vector<128x64xf32>
    %61 = arith.mulf %59, %60 : vector<128x64xf32>
    %62 = arith.addf %61, %53 : vector<128x64xf32>
    %cst_22 = arith.constant dense<0xFF800000> : vector<128xf32>
    %63 = vector.multi_reduction <maximumf>, %62, %cst_22 [1] : vector<128x64xf32> to vector<128xf32>
    %64 = vector.shape_cast %63 : vector<128xf32> to vector<128x1xf32>
    %65 = vector.broadcast %64 : vector<128x1xf32> to vector<128x64xf32>
    %66 = arith.subf %62, %65 : vector<128x64xf32>
    %67 = math.exp %66 : vector<128x64xf32>
    %cst_23 = arith.constant dense<0.000000e+00> : vector<128xf32>
    %68 = vector.multi_reduction <add>, %67, %cst_23 [1] : vector<128x64xf32> to vector<128xf32>
    %69 = vector.shape_cast %68 : vector<128xf32> to vector<128x1xf32>
    %70 = tpu.reciprocal %69 {approx = true} : vector<128x1xf32> -> vector<128x1xf32>
    %71 = vector.broadcast %70 : vector<128x1xf32> to vector<128x64xf32>
    %72 = arith.mulf %67, %71 : vector<128x64xf32>
    %73 = arith.truncf %72 : vector<128x64xf32> to vector<128x64xbf16>
    %cst_24 = arith.constant dense<0.000000e+00> : vector<128x64xf32>
    %74 = tpu.matmul %73, %58, %cst_24 {dimension_numbers = #tpu.dot_dimension_numbers<[1], [0], [0], [1], [0, 0, 1, 1], [], []>} : vector<128x64xbf16>, vector<64x64xbf16>, vector<128x64xf32> -> vector<128x64xf32>
    %75 = vector.extract_strided_slice %74 {offsets = [0, 0], sizes = [64, 64], strides = [1, 1]} : vector<128x64xf32> to vector<64x64xf32>
    %76 = arith.truncf %75 : vector<64x64xf32> to vector<64x64xbf16>
    %c0_25 = arith.constant 0 : index
    %c0_26 = arith.constant 0 : index
    %77 = vector.load %arg12[%c0_25, %c0_26] : memref<64x256xbf16, #tpu.memory_space<vmem>>, vector<64x64xbf16>
    tpu.vector_store %arg12[%c0_25, %c0_26], %76 {strides = array<i32>} : memref<64x256xbf16, #tpu.memory_space<vmem>>, vector<64x64xbf16>,
    %78 = vector.extract_strided_slice %74 {offsets = [64, 0], sizes = [64, 64], strides = [1, 1]} : vector<128x64xf32> to vector<64x64xf32>
    %79 = arith.truncf %78 : vector<64x64xf32> to vector<64x64xbf16>
    %c0_27 = arith.constant 0 : index
    %c64 = arith.constant 64 : index
    %80 = vector.load %arg12[%c0_27, %c64] : memref<64x256xbf16, #tpu.memory_space<vmem>>, vector<64x64xbf16>
    tpu.vector_store %arg12[%c0_27, %c64], %79 {strides = array<i32>} : memref<64x256xbf16, #tpu.memory_space<vmem>>, vector<64x64xbf16>,
    %81 = vector.extract_strided_slice %49 {offsets = [0, 128], sizes = [64, 64], strides = [1, 1]} : vector<64x256xbf16> to vector<64x64xbf16>
    %82 = vector.extract_strided_slice %49 {offsets = [0, 192], sizes = [64, 64], strides = [1, 1]} : vector<64x256xbf16> to vector<64x64xbf16>
    %83 = tpu.concatenate %81, %82 in 0 : vector<64x64xbf16>, vector<64x64xbf16> -> vector<128x64xbf16>
    %84 = vector.extract_strided_slice %50 {offsets = [0, 64], sizes = [64, 64], strides = [1, 1]} : vector<64x128xbf16> to vector<64x64xbf16>
    %85 = vector.extract_strided_slice %52 {offsets = [0, 64], sizes = [64, 64], strides = [1, 1]} : vector<64x128xbf16> to vector<64x64xbf16>
    %cst_28 = arith.constant dense<0.000000e+00> : vector<128x64xf32>
    %86 = tpu.matmul %83, %84, %cst_28 {dimension_numbers = #tpu.dot_dimension_numbers<[1], [1], [0], [0], [0, 0, 1, 0], [], []>} : vector<128x64xbf16>, vector<64x64xbf16>, vector<128x64xf32> -> vector<128x64xf32>
    %cst_29 = arith.constant 1.250000e-01 : f32
    %87 = vector.broadcast %cst_29 : f32 to vector<128x64xf32>
    %88 = arith.mulf %86, %87 : vector<128x64xf32>
    %89 = arith.addf %88, %53 : vector<128x64xf32>
    %cst_30 = arith.constant dense<0xFF800000> : vector<128xf32>
    %90 = vector.multi_reduction <maximumf>, %89, %cst_30 [1] : vector<128x64xf32> to vector<128xf32>
    %91 = vector.shape_cast %90 : vector<128xf32> to vector<128x1xf32>
    %92 = vector.broadcast %91 : vector<128x1xf32> to vector<128x64xf32>
    %93 = arith.subf %89, %92 : vector<128x64xf32>
    %94 = math.exp %93 : vector<128x64xf32>
    %cst_31 = arith.constant dense<0.000000e+00> : vector<128xf32>
    %95 = vector.multi_reduction <add>, %94, %cst_31 [1] : vector<128x64xf32> to vector<128xf32>
    %96 = vector.shape_cast %95 : vector<128xf32> to vector<128x1xf32>
    %97 = tpu.reciprocal %96 {approx = true} : vector<128x1xf32> -> vector<128x1xf32>
    %98 = vector.broadcast %97 : vector<128x1xf32> to vector<128x64xf32>
    %99 = arith.mulf %94, %98 : vector<128x64xf32>
    %100 = arith.truncf %99 : vector<128x64xf32> to vector<128x64xbf16>
    %cst_32 = arith.constant dense<0.000000e+00> : vector<128x64xf32>
    %101 = tpu.matmul %100, %85, %cst_32 {dimension_numbers = #tpu.dot_dimension_numbers<[1], [0], [0], [1], [0, 0, 1, 1], [], []>} : vector<128x64xbf16>, vector<64x64xbf16>, vector<128x64xf32> -> vector<128x64xf32>
    %102 = vector.extract_strided_slice %101 {offsets = [0, 0], sizes = [64, 64], strides = [1, 1]} : vector<128x64xf32> to vector<64x64xf32>
    %103 = arith.truncf %102 : vector<64x64xf32> to vector<64x64xbf16>
    %c0_33 = arith.constant 0 : index
    %c128 = arith.constant 128 : index
    %104 = vector.load %arg12[%c0_33, %c128] : memref<64x256xbf16, #tpu.memory_space<vmem>>, vector<64x64xbf16>
    tpu.vector_store %arg12[%c0_33, %c128], %103 {strides = array<i32>} : memref<64x256xbf16, #tpu.memory_space<vmem>>, vector<64x64xbf16>,
    %105 = vector.extract_strided_slice %101 {offsets = [64, 0], sizes = [64, 64], strides = [1, 1]} : vector<128x64xf32> to vector<64x64xf32>
    %106 = arith.truncf %105 : vector<64x64xf32> to vector<64x64xbf16>
    %c0_34 = arith.constant 0 : index
    %c192 = arith.constant 192 : index
    %107 = vector.load %arg12[%c0_34, %c192] : memref<64x256xbf16, #tpu.memory_space<vmem>>, vector<64x64xbf16>
    tpu.vector_store %arg12[%c0_34, %c192], %106 {strides = array<i32>} : memref<64x256xbf16, #tpu.memory_space<vmem>>, vector<64x64xbf16>,
    %c0_35 = arith.constant 0 : index
    %c0_36 = arith.constant 0 : index
    %108 = vector.load %arg12[%c0_35, %c0_36] : memref<64x256xbf16, #tpu.memory_space<vmem>>, vector<64x256xbf16>
    %c0_37 = arith.constant 0 : index
    %c0_38 = arith.constant 0 : index
    %109 = vector.load %arg8[%c0_37, %c0_38] : memref<256x256xbf16, #tpu.memory_space<vmem>>, vector<256x256xbf16>
    %cst_39 = arith.constant dense<0.000000e+00> : vector<64x256xf32>
    %110 = tpu.matmul %108, %109, %cst_39 {dimension_numbers = #tpu.dot_dimension_numbers<[1], [0], [0], [1], [0, 0, 1, 1], [], []>} : vector<64x256xbf16>, vector<256x256xbf16>, vector<64x256xf32> -> vector<64x256xf32>
    %111 = arith.addf %1, %110 : vector<64x256xf32>
    %c0_40 = arith.constant 0 : index
    %c0_41 = arith.constant 0 : index
    %112 = vector.load %arg6[%c0_40, %c0_41] : memref<1x256xf32, #tpu.memory_space<vmem>>, vector<1x256xf32>
    %113 = arith.mulf %111, %111 : vector<64x256xf32>
    %cst_42 = arith.constant dense<0.000000e+00> : vector<64xf32>
    %114 = vector.multi_reduction <add>, %113, %cst_42 [1] : vector<64x256xf32> to vector<64xf32>
    %115 = vector.shape_cast %114 : vector<64xf32> to vector<64x1xf32>
    %cst_43 = arith.constant 2.560000e+02 : f32
    %116 = vector.broadcast %cst_43 : f32 to vector<64x1xf32>
    %117 = arith.divf %115, %116 : vector<64x1xf32>
    %cst_44 = arith.constant 9.99999974E-6 : f32
    %118 = vector.broadcast %cst_44 : f32 to vector<64x1xf32>
    %119 = arith.addf %117, %118 : vector<64x1xf32>
    %120 = math.rsqrt %119 : vector<64x1xf32>
    %121 = vector.broadcast %120 : vector<64x1xf32> to vector<64x256xf32>
    %122 = arith.mulf %111, %121 : vector<64x256xf32>
    %123 = vector.broadcast %112 : vector<1x256xf32> to vector<64x256xf32>
    %124 = arith.mulf %122, %123 : vector<64x256xf32>
    %125 = arith.truncf %124 : vector<64x256xf32> to vector<64x256xbf16>
    %c0_45 = arith.constant 0 : index
    %c0_46 = arith.constant 0 : index
    %126 = vector.load %arg9[%c0_45, %c0_46] : memref<256x1408xbf16, #tpu.memory_space<vmem>>, vector<256x1408xbf16>
    %cst_47 = arith.constant dense<0.000000e+00> : vector<64x1408xf32>
    %127 = tpu.matmul %125, %126, %cst_47 {dimension_numbers = #tpu.dot_dimension_numbers<[1], [0], [0], [1], [0, 0, 1, 1], [], []>} : vector<64x256xbf16>, vector<256x1408xbf16>, vector<64x1408xf32> -> vector<64x1408xf32>
    %128 = vector.extract_strided_slice %127 {offsets = [0, 0], sizes = [64, 704], strides = [1, 1]} : vector<64x1408xf32> to vector<64x704xf32>
    %129 = vector.extract_strided_slice %127 {offsets = [0, 704], sizes = [64, 704], strides = [1, 1]} : vector<64x1408xf32> to vector<64x704xf32>
    %130 = arith.negf %128 : vector<64x704xf32>
    %131 = math.exp %130 : vector<64x704xf32>
    %cst_48 = arith.constant 1.000000e+00 : f32
    %132 = vector.broadcast %cst_48 : f32 to vector<64x704xf32>
    %133 = arith.addf %132, %131 : vector<64x704xf32>
    %134 = arith.divf %132, %133 : vector<64x704xf32>
    %135 = arith.mulf %128, %134 : vector<64x704xf32>
    %136 = arith.mulf %135, %129 : vector<64x704xf32>
    %137 = arith.truncf %136 : vector<64x704xf32> to vector<64x704xbf16>
    %c0_49 = arith.constant 0 : index
    %c0_50 = arith.constant 0 : index
    %138 = vector.load %arg10[%c0_49, %c0_50] : memref<704x256xbf16, #tpu.memory_space<vmem>>, vector<704x256xbf16>
    %cst_51 = arith.constant dense<0.000000e+00> : vector<64x256xf32>
    %139 = tpu.matmul %137, %138, %cst_51 {dimension_numbers = #tpu.dot_dimension_numbers<[1], [0], [0], [1], [0, 0, 1, 1], [], []>} : vector<64x704xbf16>, vector<704x256xbf16>, vector<64x256xf32> -> vector<64x256xf32>
    %140 = arith.addf %111, %139 : vector<64x256xf32>
    %c0_52 = arith.constant 0 : index
    %c0_53 = arith.constant 0 : index
    %c0_54 = arith.constant 0 : index
    %141 = vector.load %arg11[%c0_52, %c0_53, %c0_54] : memref<1x64x256xf32, #tpu.memory_space<vmem>>, vector<1x64x256xf32>
    %142 = vector.shape_cast %141 : vector<1x64x256xf32> to vector<64x256xf32>
    %143 = vector.shape_cast %140 : vector<64x256xf32> to vector<1x64x256xf32>
    tpu.vector_store %arg11[%c0_52, %c0_53, %c0_54], %143 {strides = array<i32>} : memref<1x64x256xf32, #tpu.memory_space<vmem>>, vector<1x64x256xf32>,
    return
  }
  func.func @transform_0(%arg0: i32) -> (i32, i32, i32) {
    %c0_i32 = arith.constant 0 : i32
    %c0_i32_0 = arith.constant 0 : i32
    %c0_i32_1 = arith.constant 0 : i32
    return %arg0, %c0_i32, %c0_i32_0 : i32, i32, i32
  }
  func.func @transform_1(%arg0: i32) -> (i32, i32) {
    %c0_i32 = arith.constant 0 : i32
    %c0_i32_0 = arith.constant 0 : i32
    %c0_i32_1 = arith.constant 0 : i32
    return %c0_i32, %c0_i32_0 : i32, i32
  }
  func.func @transform_2(%arg0: i32) -> (i32, i32) {
    %c0_i32 = arith.constant 0 : i32
    %c0_i32_0 = arith.constant 0 : i32
    %c0_i32_1 = arith.constant 0 : i32
    return %c0_i32, %c0_i32_0 : i32, i32
  }
  func.func @transform_3(%arg0: i32) -> (i32, i32) {
    %c0_i32 = arith.constant 0 : i32
    %c0_i32_0 = arith.constant 0 : i32
    %c0_i32_1 = arith.constant 0 : i32
    return %c0_i32, %c0_i32_0 : i32, i32
  }
  func.func @transform_4(%arg0: i32) -> (i32, i32) {
    %c0_i32 = arith.constant 0 : i32
    %c0_i32_0 = arith.constant 0 : i32
    %c0_i32_1 = arith.constant 0 : i32
    return %c0_i32, %c0_i32_0 : i32, i32
  }
  func.func @transform_5(%arg0: i32) -> (i32, i32) {
    %c0_i32 = arith.constant 0 : i32
    %c0_i32_0 = arith.constant 0 : i32
    %c0_i32_1 = arith.constant 0 : i32
    return %c0_i32, %c0_i32_0 : i32, i32
  }
  func.func @transform_6(%arg0: i32) -> (i32, i32) {
    %c0_i32 = arith.constant 0 : i32
    %c0_i32_0 = arith.constant 0 : i32
    %c0_i32_1 = arith.constant 0 : i32
    return %c0_i32, %c0_i32_0 : i32, i32
  }
  func.func @transform_7(%arg0: i32) -> (i32, i32) {
    %c0_i32 = arith.constant 0 : i32
    %c0_i32_0 = arith.constant 0 : i32
    %c0_i32_1 = arith.constant 0 : i32
    return %c0_i32, %c0_i32_0 : i32, i32
  }
  func.func @transform_8(%arg0: i32) -> (i32, i32) {
    %c0_i32 = arith.constant 0 : i32
    %c0_i32_0 = arith.constant 0 : i32
    %c0_i32_1 = arith.constant 0 : i32
    return %c0_i32, %c0_i32_0 : i32, i32
  }
  func.func @transform_9(%arg0: i32) -> (i32, i32) {
    %c0_i32 = arith.constant 0 : i32
    %c0_i32_0 = arith.constant 0 : i32
    %c0_i32_1 = arith.constant 0 : i32
    return %c0_i32, %c0_i32_0 : i32, i32
  }
  func.func @transform_10(%arg0: i32) -> (i32, i32, i32) {
    %c0_i32 = arith.constant 0 : i32
    %c0_i32_0 = arith.constant 0 : i32
    %c0_i32_1 = arith.constant 0 : i32
    return %arg0, %c0_i32, %c0_i32_0 : i32, i32, i32
  }
}

</mosaic_0001>

<bundles_post_ra>
// kernel: tpu_custom_call.1
= control target key start
LH: loop header
LB: loop body
LE: loop exit
PB: predicated region body
PF: predicated region fallthrough
CT: control target
= control target key end

     0   :  { %s10411_s0 = inlined_call_operand.hbm [shape: f32[2,64,256], index: 0, kind: input, shape index: {}]   ;;  %s10412_s1 = inlined_call_operand.vmem [shape: f32[64,384], index: 1, kind: input, shape index: {}]   ;;  %s10413_s2 = inlined_call_operand.hbm [shape: f32[64,384], index: 2, kind: input, shape index: {}]   ;;  %s10414_s3 = inlined_call_operand.vmem [shape: f32[128,64], index: 3, kind: input, shape index: {}]   ;;  %s10415_s4 = inlined_call_operand.vmem [shape: f32[1,256], index: 4, kind: input, shape index: {}]   ;;  %s10416_s5 = inlined_call_operand.vmem [shape: f32[1,256], index: 5, kind: input, shape index: {}]   ;;  %s10417_s6 = inlined_call_operand.hbm [shape: bf16[256,512], index: 6, kind: input, shape index: {}]   ;;  %s10418_s7 = inlined_call_operand.hbm [shape: bf16[256,256], index: 7, kind: input, shape index: {}]   ;;  %s10419_s8 = inlined_call_operand.hbm [shape: bf16[256,1408], index: 8, kind: input, shape index: {}]   ;;  %s10420_s9 = inlined_call_operand.hbm [shape: bf16[704,256], index: 9, kind: input, shape index: {}]   ;;  %s10421_s10 = inlined_call_operand.hbm [shape: f32[2,64,256], index: 10, kind: output, shape index: {}]  }
   0x1   :  { %10484 = sst [smem:[#allocation52_spill]] %s10416_s5 }
   0x2   :  { %10485 = sst [smem:[#allocation53_spill]] %s10421_s10 }
   0x3   :  { %15 = vsyncpa [#allocation4], 0 }
   0x4   :  { %17 = vsyncpa [#allocation4 + $0x1], 0 }
   0x5   :  { %18 = vsyncpa [#allocation7], 0 }
   0x6   :  { %19 = vsyncpa [#allocation10], 0 }
   0x7   :  { %20 = vsyncpa [#allocation13], 0 }
   0x8   :  { %21 = vsyncpa [#allocation5], 0 }
   0x9   :  { %23 = vsyncpa [#allocation5 + $0x1], 0  ;;  %s8096_s13 = smov 0   ;;  %s8098_s14 = smov 0  }
   0xa   :  { %s8100_s15 = smov 0   ;;  %s8102_s16 = smov 0  }
   0xb LB: > { %s8021_s17 = smov [#allocation6]   ;;  %s8117_s19 = sadd.s32 4294967295, %s8019_s16   ;;  %s8019_s16 = sphi %s8102_s16, %s10660_s16   ;;  %s8015_s15 = sphi %s8100_s15, %s10659_s15   ;;  %s8011_s14 = sphi %s8098_s14, %s10658_s14   ;;  %s8007_s13 = sphi %s8096_s13, %s10657_s13  }
   0xc   : > { %s290_s18 = sshll.u32 %s8021_s17, 4  ;;  %p6052_p0 = scmp.ge.s32.totalorder %s8019_s16, 1  ;;  %s8122_s18 = int_to_ptr.vmem [resolvable:$true] %s290_s18 }
   0xd   : > { %p10423_p1 = scmp.eq.s32.totalorder %s8117_s19, 0  ;;  %p275_p2 = scmp.lt.s32.totalorder %s8019_s16, 3 }
   0xe   : > { %s8022_s21 = smov [#allocation9]   ;;  %s8023_s24 = smov [#allocation8]  }
   0xf   : > { %p8124_p3 = pnand %p6052_p0, %p275_p2  ;;  %s325_s22 = sshll.u32 %s8022_s21, 4  ;;  %s8137_s22 = int_to_ptr.vmem [resolvable:$true] %s325_s22 }
  0x10   : > { %s8139_s25 = sshll.u32 %s8023_s24, 4  ;;  %s7771_s28 = scalar_lea.hbm %s10413_s2, 3072  ;;  %s313_s25 = int_to_ptr.vmem [resolvable:$true] %s8139_s25 }
  0x11   : > { %s10486_s20 = scalar_select %p8124_p3, 1, 0 }
  0x12   : > { %p6769_p5 = pneg %p8124_p3  ;;  %p7772_p7 = scmp.ne.s32.totalorder %s10413_s2, %s7771_s28 }
  0x13   : > { %p7778_p11 = scmp.lt.u32.totalorder %s7771_s28, %s10413_s2 }
  0x14   : > { %p8133_p6 = pnand %p6769_p5, %p10423_p1 }
  0x16   : > { %p8149_p8 = pneg %p8133_p6 }
  0x18   : > { %p7774_p9 = pnand %p8149_p8, %p7772_p7 }
  0x1a   : > { %p7775_p10 = pneg %p7774_p9 }
  0x1c   : > { %p7780_p12 = pnand %p7778_p11, %p7775_p10 }
  0x1e   : > { %7783 = shalt.err (!%p7780_p12)
}
  0x1f   : > { %s7784_s21 = scalar_lea.vmem %s8122_s18, 3072  ;;  %p7792_p5 = scmp.lt.s32.totalorder %s8122_s18, %s8122_s18 }
  0x20   : > { %p7785_p13 = scmp.ne.s32.totalorder %s8122_s18, %s7784_s21  ;;  %p7793_p4 = scmp.lt.s32.totalorder %s7784_s21, %s7784_s21 }
  0x22   : > { %p7787_p0 = pnand %p7785_p13, %p8149_p8  ;;  %p7794_p7 = por %p7793_p4, %p7792_p5 }
  0x24   : > { %p7788_p2 = pneg %p7787_p0 }
  0x26   : > { %p7795_p9 = pnand %p7794_p7, %p7788_p2 }
  0x28   : > { %7798 = shalt.err (!%p7795_p9)
}
  0x29   : > { %s8024_s24 = smov 384   ;;  %s8025_s26 = smov 24  }
  0x2a   : > { %6772 = dma.hbm_to_vmem [thread:$0]  (!%p8133_p6), %s10413_s2, 3072, %s8122_s18, [#allocation7], %s8024_s24, %s8024_s24, %s8025_s26  }
  0x2b   : > { %s7799_s12 = scalar_lea.hbm %s10418_s7, 4096 }
  0x2c   : > { %p7800_p4 = scmp.ne.s32.totalorder %s10418_s7, %s7799_s12  ;;  %p7806_p12 = scmp.lt.u32.totalorder %s7799_s12, %s10418_s7 }
  0x2e   : > { %p7802_p10 = pnand %p7800_p4, %p8149_p8 }
  0x30   : > { %p7803_p11 = pneg %p7802_p10 }
  0x32   : > { %p7808_p13 = pnand %p7806_p12, %p7803_p11 }
  0x34   : > { %7811 = shalt.err (!%p7808_p13)
}
  0x35   : > { %s7812_s18 = scalar_lea.vmem %s8137_s22, 4096  ;;  %p7820_p7 = scmp.lt.s32.totalorder %s8137_s22, %s8137_s22 }
  0x36   : > { %p7813_p0 = scmp.ne.s32.totalorder %s8137_s22, %s7812_s18  ;;  %p7821_p9 = scmp.lt.s32.totalorder %s7812_s18, %s7812_s18 }
  0x38   : > { %p7815_p2 = pnand %p7813_p0, %p8149_p8  ;;  %p7822_p4 = por %p7821_p9, %p7820_p7 }
  0x3a   : > { %p7816_p5 = pneg %p7815_p2 }
  0x3c   : > { %p7823_p10 = pnand %p7822_p4, %p7816_p5 }
  0x3e   : > { %7826 = shalt.err (!%p7823_p10)
}
  0x3f   : > { %s10425_s10 = smov 128   ;;  %s10426_s5 = smov 8  }
  0x40   : > { %6778 = dma.hbm_to_vmem [thread:$0]  (!%p8133_p6), %s10418_s7, 4096, %s8137_s22, [#allocation10], %s10425_s10, %s10425_s10, %s10426_s5  }
  0x41   : > { %s7827_s29 = scalar_lea.hbm %s10417_s6, 8192 }
  0x42   : > { %p7828_p11 = scmp.ne.s32.totalorder %s10417_s6, %s7827_s29  ;;  %p7834_p0 = scmp.lt.u32.totalorder %s7827_s29, %s10417_s6 }
  0x44   : > { %p7830_p12 = pnand %p7828_p11, %p8149_p8 }
  0x46   : > { %p7831_p13 = pneg %p7830_p12 }
  0x48   : > { %p7836_p2 = pnand %p7834_p0, %p7831_p13 }
  0x4a   : > { %7839 = shalt.err (!%p7836_p2)
}
  0x4b   : > { %s7840_s18 = scalar_lea.vmem %s313_s25, 8192  ;;  %p7848_p4 = scmp.lt.s32.totalorder %s313_s25, %s313_s25 }
  0x4c   : > { %p7841_p5 = scmp.ne.s32.totalorder %s313_s25, %s7840_s18  ;;  %p7849_p10 = scmp.lt.s32.totalorder %s7840_s18, %s7840_s18 }
  0x4e   : > { %p7843_p7 = pnand %p7841_p5, %p8149_p8  ;;  %p7850_p1 = por %p7849_p10, %p7848_p4 }
  0x50   : > { %p7844_p9 = pneg %p7843_p7 }
  0x52   : > { %p7851_p3 = pnand %p7850_p1, %p7844_p9 }
  0x54   : > { %7854 = shalt.err (!%p7851_p3)
}
  0x55   : > { %s10427_s22 = smov 256   ;;  %s10428_s24 = smov 16  }
  0x56   : > { %6775 = dma.hbm_to_vmem [thread:$0]  (!%p8133_p6), %s10417_s6, 8192, %s313_s25, [#allocation7], %s10427_s22, %s10427_s22, %s10428_s24  }
  0x57   : > { %s8030_s28 = smov [#allocation11]   ;;  %s7855_s17 = scalar_lea.hbm %s10419_s8, 22528 }
  0x58   : > { %s338_s29 = sshll.u32 %s8030_s28, 4  ;;  %p7856_p1 = scmp.ne.s32.totalorder %s10419_s8, %s7855_s17  ;;  %s339_s29 = int_to_ptr.vmem [resolvable:$true] %s338_s29 }
  0x59   : > { %p7862_p12 = scmp.lt.u32.totalorder %s7855_s17, %s10419_s8 }
  0x5a   : > { %p7858_p3 = pnand %p7856_p1, %p8149_p8 }
  0x5c   : > { %p7859_p11 = pneg %p7858_p3 }
  0x5e   : > { %p7864_p13 = pnand %p7862_p12, %p7859_p11 }
  0x60   : > { %7867 = shalt.err (!%p7864_p13)
}
  0x61   : > { %s7868_s25 = scalar_lea.vmem %s339_s29, 22528  ;;  %p7876_p7 = scmp.lt.s32.totalorder %s339_s29, %s339_s29 }
  0x62   : > { %p7869_p0 = scmp.ne.s32.totalorder %s339_s29, %s7868_s25  ;;  %p7877_p9 = scmp.lt.s32.totalorder %s7868_s25, %s7868_s25 }
  0x64   : > { %p7871_p2 = pnand %p7869_p0, %p8149_p8  ;;  %p7878_p4 = por %p7877_p9, %p7876_p7 }
  0x66   : > { %p7872_p5 = pneg %p7871_p2 }
  0x68   : > { %p7879_p10 = pnand %p7878_p4, %p7872_p5 }
  0x6a   : > { %7882 = shalt.err (!%p7879_p10)
}
  0x6b   : > { %s8031_s26 = smov 704   ;;  %s8032_s27 = smov 44  }
  0x6c   : > { %6781 = dma.hbm_to_vmem [thread:$0]  (!%p8133_p6), %s10419_s8, 22528, %s339_s29, [#allocation10], %s8031_s26, %s8031_s26, %s8032_s27  }
  0x6d   : > { %s8033_s28 = smov [#allocation12]   ;;  %s7883_s21 = scalar_lea.hbm %s10420_s9, 11264 }
  0x6e   : > { %s351_s30 = sshll.u32 %s8033_s28, 4  ;;  %p7884_p1 = scmp.ne.s32.totalorder %s10420_s9, %s7883_s21  ;;  %s352_s30 = int_to_ptr.vmem [resolvable:$true] %s351_s30 }
  0x6f   : > { %p7890_p12 = scmp.lt.u32.totalorder %s7883_s21, %s10420_s9 }
  0x70   : > { %p7886_p3 = pnand %p7884_p1, %p8149_p8 }
  0x72   : > { %p7887_p11 = pneg %p7886_p3 }
  0x74   : > { %p7892_p13 = pnand %p7890_p12, %p7887_p11 }
  0x76   : > { %7895 = shalt.err (!%p7892_p13)
}
  0x77   : > { %s7896_s29 = scalar_lea.vmem %s352_s30, 11264  ;;  %p7904_p7 = scmp.lt.s32.totalorder %s352_s30, %s352_s30 }
  0x78   : > { %p7897_p0 = scmp.ne.s32.totalorder %s352_s30, %s7896_s29  ;;  %p7905_p9 = scmp.lt.s32.totalorder %s7896_s29, %s7896_s29 }
  0x7a   : > { %p7899_p2 = pnand %p7897_p0, %p8149_p8  ;;  %p7906_p4 = por %p7905_p9, %p7904_p7 }
  0x7c   : > { %p7900_p5 = pneg %p7899_p2 }
  0x7e   : > { %p7907_p10 = pnand %p7906_p4, %p7900_p5 }
  0x80   : > { %7910 = shalt.err (!%p7907_p10)
}
  0x81   : > { %s10489_s26 = smov 8   ;;  %s10490_s27 = smov 128  }
  0x82   : > { %6784 = dma.hbm_to_vmem [thread:$0]  (!%p8133_p6), %s10420_s9, 11264, %s352_s30, [#allocation13], %s10490_s27, %s10490_s27, %s10489_s26  }
  0x83   : > { %s6051_s23 = sadd.s32 4294967294, %s8019_s16   ;;  %s8259_s11 = sadd.s32 1, %s8019_s16  }
  0x84   : > { %s36_s10 = sadd.s32 1, %s8015_s15  ;;  %s33_s5 = ssub.s32 %s8019_s16, %s8259_s11 }
  0x85   : > { %p43_p8 = scmp.ne.s32.totalorder %s8015_s15, %s8011_s14  ;;  %p34_p1 = scmp.eq.s32.totalorder %s33_s5, 0 }
  0x86   : > { %p44_p3 = scmp.eq.s32.totalorder %s8019_s16, 0  ;;  %p49_p11 = scmp.ne.s32.totalorder %s8011_s14, %s8007_s13 }
  0x87   : > { %p262_p12 = scmp.eq.s32.totalorder %s8117_s19, 1  ;;  %p10491_p0 = scmp.eq.s32.totalorder %s8117_s19, 0 }
  0x88   : > { %s8271_s28 = scalar_select %p34_p1, %s8015_s15, %s36_s10  }
  0x89   : > { %p45_p13 = por %p44_p3, %p43_p8  ;;  %p8275_p2 = por %p10491_p0, %p49_p11 }
  0x8a   : > { %p8279_p6 = por %p262_p12, %p43_p8  ;;  %p268_p5 = scmp.eq.s32.totalorder %s6051_s23, 1 }
  0x8b   : > { %p6798_p7 = scmp.lt.s32.totalorder %s8019_s16, 2  ;;  %s365_s17 = sand.u32 1, %s8015_s15  }
  0x8c   : > { %s10493_s30 = scalar_select %p8279_p6, 1, 0 }
  0x8d   : > { %p8285_p9 = por %p268_p5, %p49_p11  ;;  %s6059_s18 = sshll.u32 %s365_s17, 7 }
  0x8e   : > { %s6519_s25 = sshll.u32 %s8019_s16, 11  ;;  %s369_s22 = scalar_lea.vmem [#allocation3], %s6059_s18 }
  0x8f   : > { %s10494_s21 = scalar_select %p8285_p9, 1, 0 }
  0x90   : > { %s8293_s27 = scalar_lea.hbm %s10411_s0, %s6519_s25  ;;  %s376_s24 = sshll.u32 %s369_s22, 4  ;;  %s8299_s24 = int_to_ptr.vmem [resolvable:$true] %s376_s24 }
  0x91   : > { %p8295_p4 = pnand %p6798_p7, %p45_p13  ;;  %s8301_s10 = scalar_lea.sflag [#allocation4], %s365_s17 }
  0x92   : > { %s7911_s5 = scalar_lea.hbm %s8293_s27, 2048  ;;  %s7916_s29 = scalar_lea.hbm %s10411_s0, 4096 }
  0x93   : > { %p7912_p10 = scmp.ne.s32.totalorder %s8293_s27, %s7911_s5  ;;  %p7913_p8 = pneg %p8295_p4 }
  0x94   : > { %p7917_p11 = scmp.lt.u32.totalorder %s8293_s27, %s10411_s0  ;;  %p7918_p12 = scmp.lt.u32.totalorder %s7916_s29, %s7911_s5 }
  0x95   : > { %p7914_p1 = pnand %p7913_p8, %p7912_p10  ;;  %p7920_p0 = scmp.lt.u32.totalorder %s7911_s5, %s8293_s27 }
  0x96   : > { %p7919_p13 = por %p7918_p12, %p7917_p11 }
  0x97   : > { %p7915_p3 = pneg %p7914_p1 }
  0x98   : > { %p7921_p5 = por %p7920_p0, %p7919_p13 }
  0x9a   : > { %p7922_p7 = pnand %p7921_p5, %p7915_p3 }
  0x9c   : > { %7925 = shalt.err (!%p7922_p7)
}
  0x9d   : > { %s7926_s17 = scalar_lea.vmem %s8299_s24, 2048  ;;  %s8034_s18 = smov [#allocation3]  }
  0x9e   : > { %p7927_p10 = scmp.ne.s32.totalorder %s8299_s24, %s7926_s17  ;;  %s7931_s25 = sshll.u32 %s8034_s18, 4  ;;  %s7932_s25 = int_to_ptr.vmem [resolvable:$false] %s7931_s25 }
  0x9f   : > { %s7933_s26 = scalar_lea.vmem %s7932_s25, 4096  ;;  %p7934_p6 = scmp.lt.s32.totalorder %s8299_s24, %s7932_s25 }
  0xa0   : > { %p7929_p1 = pnand %p7927_p10, %p7913_p8  ;;  %p7935_p11 = scmp.lt.s32.totalorder %s7933_s26, %s7926_s17 }
  0xa2   : > { %p7930_p9 = pneg %p7929_p1  ;;  %p7936_p12 = por %p7935_p11, %p7934_p6 }
  0xa4   : > { %p7937_p13 = pnand %p7936_p12, %p7930_p9 }
  0xa6   : > { %7940 = shalt.err (!%p7937_p13)
}
  0xa7   : > { %s10496_s5 = smov 16   ;;  %s10497_s29 = smov 256  }
  0xa8   : > { %6788 = dma.hbm_to_vmem [thread:$0]  (!%p8295_p4), %s8293_s27, 2048, %s8299_s24, %s8301_s10, %s10497_s29, %s10497_s29, %s10496_s5  }
  0xa9   : > { %p10498_p8 = scmp.ne.s32.totalorder %s10486_s20, 0 }
  0xab   : > { %388 = sbr.rel (%p10498_p8) target bundleno = 3007 (0xbbf), region = 60 }
  0xb2   : > { %s8335_s22 = sand.u32 1, %s8011_s14  }
  0xb3   : > { %s6063_s17 = sshll.u32 %s8335_s22, 7  ;;  %s391_s18 = scalar_lea.sflag [#allocation4], %s8335_s22 }
  0xb4   : > { %s8341_s23 = scalar_lea.vmem [#allocation3], %s6063_s17 }
  0xb5   : > { %7986 = dma.done.wait (%p8275_p2), %s391_s18, 2048  }
  0xb6   : > { %7988 = vsyncadd (%p8275_p2), %s391_s18, 4294965248  ;;  %p10499_p6 = scmp.eq.s32.totalorder %s8117_s19, 0 }
  0xb8   : > { %7990 = dma.done.wait (%p10499_p6), [#allocation7], 11264   ;;  %p10500_p9 = pmov %p10499_p6 }
  0xb9   : > { %p10501_p4 = pmov %p10499_p6 }
  0xba   : > { %7992 = vsyncadd (%p10500_p9), [#allocation7], 4294956032 }
  0xbb   : > { %7994 = dma.done.wait (%p10501_p4), [#allocation10], 26624   ;;  %p10502_p3 = pmov %p10501_p4 }
  0xbd   : > { %7996 = vsyncadd (%p10502_p3), [#allocation10], 4294940672  ;;  %p10503_p0 = pmov %p10502_p3 }
  0xbf   : > { %7998 = dma.done.wait (%p10503_p0), [#allocation13], 11264   ;;  %p10504_p5 = pmov %p10503_p0 }
  0xc0   : > { %v452_v0 = vld [vmem:[%s8341_s23] sm:$0xff]  ;;  %v453_v1 = vld [vmem:[%s8341_s23 + $0x8] sm:$0xff]  ;;  %v454_v2 = vld [vmem:[%s8341_s23 + $0x10] sm:$0xff]  ;;  %s8035_s27 = smov 96   ;;  %s8036_s24 = smov 32   ;;  %vm1516_vm5 = vcmask 523264  }
  0xc1   : > { %8000 = vsyncadd (%p10504_p5), [#allocation13], 4294956032  ;;  %v469_v3 = vmul.f32 %v452_v0, %v452_v0  ;;  %v470_v4 = vmul.f32 %v453_v1, %v453_v1  ;;  %v455_v5 = vld [vmem:[%s8341_s23 + $0x18] sm:$0xff]  ;;  %v471_v6 = vmul.f32 %v454_v2, %v454_v2  ;;  %v456_v7 = vld [vmem:[%s8341_s23 + $0x20] sm:$0xff]  ;;  %vm2015_vm6 = vcmask 1048064   ;;  %s10607_s18 = sld [smem:[#allocation52_spill]] }
  0xc2   : > { %v457_v8 = vld [vmem:[%s8341_s23 + $0x28] sm:$0xff]  ;;  %v472_v9 = vmul.f32 %v455_v5, %v455_v5  ;;  %v473_v10 = vmul.f32 %v456_v7, %v456_v7  ;;  %v458_v12 = vld [vmem:[%s8341_s23 + $0x30] sm:$0xff]  ;;  %v459_v13 = vld [vmem:[%s8341_s23 + $0x38] sm:$0xff]  ;;  %s10652_s10 = sld [smem:[#allocation53_spill]]  ;;  %p10654_p7 = scmp.ne.s32.totalorder %s10493_s30, 0 }
  0xc3   : > { %v474_v11 = vmul.f32 %v457_v8, %v457_v8  ;;  %v462_v14 = vld [vmem:[%s8341_s23 + $0x50] sm:$0xff]  ;;  %v485_v15 = vadd.f32 %v470_v4, %v469_v3  ;;  %v475_v16 = vmul.f32 %v458_v12, %v458_v12  ;;  %v476_v17 = vmul.f32 %v459_v13, %v459_v13  ;;  %v463_v18 = vld [vmem:[%s8341_s23 + $0x58] sm:$0xff]  ;;  %v460_v19 = vld [vmem:[%s8341_s23 + $0x40] sm:$0xff]  ;;  %s8038_s5 = smov [#allocation14]  }
  0xc4   : > { %v461_v20 = vld [vmem:[%s8341_s23 + $0x48] sm:$0xff]  ;;  %v464_v22 = vld [vmem:[%s8341_s23 + $0x60] sm:$0xff]  ;;  %v488_v23 = vadd.f32 %v472_v9, %v471_v6  ;;  %v477_v24 = vmul.f32 %v460_v19, %v460_v19  ;;  %v466_v26 = vld [vmem:[%s8341_s23 + $0x70] sm:$0xff]  ;;  %v479_v29 = vmul.f32 %v462_v14, %v462_v14  ;;  %v480_v30 = vmul.f32 %v463_v18, %v463_v18 }
  0xc5   : > { %v491_v21 = vadd.f32 %v474_v11, %v473_v10  ;;  %486 = vadd.xlane.f32.xlu0 %v485_v15  ;;  %v478_v25 = vmul.f32 %v461_v20, %v461_v20  ;;  %v465_v27 = vld [vmem:[%s8341_s23 + $0x68] sm:$0xff]  ;;  %v494_v28 = vadd.f32 %v476_v17, %v475_v16  ;;  %v6855_v31 = vld [vmem:[#allocation8 + $0x4] ss:$16 sps:$4 sm:$0xff]   ;;  %v6857_v32 = vld [vmem:[#allocation8] ss:$16 sps:$4 sm:$0xff]   ;;  %v481_v36 = vmul.f32 %v464_v22, %v464_v22 }
  0xc6   : > { %v467_v33 = vld [vmem:[%s8341_s23 + $0x78] sm:$0xff]  ;;  %v6858_v34 = vld [vmem:[#allocation8 + $0x24] ss:$16 sps:$4 sm:$0xff]   ;;  %969 = vmatprep.subr.bf16.mxu0 %v6855_v31  ;;  %v482_v37 = vmul.f32 %v465_v27, %v465_v27  ;;  %v6860_v38 = vld [vmem:[#allocation8 + $0x20] ss:$16 sps:$4 sm:$0xff]   ;;  %v500_v39 = vadd.f32 %v480_v30, %v479_v29  ;;  %v483_v40 = vmul.f32 %v466_v26, %v466_v26  ;;  %v551_v18 = vlaneseq }
  0xc7   : > { %492 = vadd.xlane.f32.xlu1 %v491_v21  ;;  %v497_v35 = vadd.f32 %v478_v25, %v477_v24  ;;  %970 = vmatpush1.bf16.msra.mxu0 %v6857_v32  ;;  %v484_v41 = vmul.f32 %v467_v33, %v467_v33  ;;  %v6861_v42 = vld [vmem:[#allocation8 + $0x44] ss:$16 sps:$4 sm:$0xff]   ;;  %v6863_v44 = vld [vmem:[#allocation8 + $0x40] ss:$16 sps:$4 sm:$0xff]   ;;  %v6905_v8 = vld [vmem:[#allocation8 + $0xc] ss:$16 sps:$4 sm:$0xff]  }
  0xc8   : > { %971 = vmatprep.subr.bf16.mxu0 %v6858_v34  ;;  %v503_v43 = vadd.f32 %v482_v37, %v481_v36  ;;  %v6864_v46 = vld [vmem:[#allocation8 + $0x64] ss:$16 sps:$4 sm:$0xff]   ;;  %v6866_v47 = vld [vmem:[#allocation8 + $0x60] ss:$16 sps:$4 sm:$0xff]   ;;  %v8376_v25 = vshrl.u32 %v551_v18, 7 }
  0xc9   : > { %489 = vadd.xlane.f32.xlu0 %v488_v23  ;;  %v506_v45 = vadd.f32 %v484_v41, %v483_v40  ;;  %v6867_v48 = vld [vmem:[#allocation8 + $0x84] ss:$16 sps:$4 sm:$0xff]   ;;  %v6869_v49 = vld [vmem:[#allocation8 + $0x80] ss:$16 sps:$4 sm:$0xff]   ;;  %v7739_v41 = vld [vmem:[%s8341_s23 + $0x28] sm:$0xff] }
  0xca   : > { %v6870_v50 = vld [vmem:[#allocation8 + $0xa4] ss:$16 sps:$4 sm:$0xff]   ;;  %v6872_v51 = vld [vmem:[#allocation8 + $0xa0] ss:$16 sps:$4 sm:$0xff]   ;;  %10505 = vst [vmem:[#allocation20_spill] sm:$0xff] %v8376_v25  ;;  %v10431_v30 = vsub.s32 0, %v8376_v25 }
  0xcb   : > { %495 = vadd.xlane.f32.xlu1 %v494_v28  ;;  %972 = vmatpush1.bf16.msra.mxu0 %v6860_v38  ;;  %v6873_v52 = vld [vmem:[#allocation8 + $0xc4] ss:$16 sps:$4 sm:$0xff]   ;;  %v6875_v53 = vld [vmem:[#allocation8 + $0xc0] ss:$16 sps:$4 sm:$0xff]   ;;  %v10430_v34 = vsub.s32 1, %v8376_v25  ;;  %v1359_v25 = vld [vmem:[%s10412_s1 + $0x38] sm:$0xff] }
  0xcc   : > { %973 = vmatprep.subr.bf16.mxu0 %v6861_v42  ;;  %v6876_v54 = vld [vmem:[#allocation8 + $0xe4] ss:$16 sps:$4 sm:$0xff]   ;;  %v6878_v55 = vld [vmem:[#allocation8 + $0xe0] ss:$16 sps:$4 sm:$0xff]  }
  0xcd   : > { %498 = vadd.xlane.f32.xlu0 %v497_v35  ;;  %v6879_v56 = vld [vmem:[#allocation8 + $0x104] ss:$16 sps:$4 sm:$0xff]   ;;  %v6881_v57 = vld [vmem:[#allocation8 + $0x100] ss:$16 sps:$4 sm:$0xff]  }
  0xce   : > { %v6882_v58 = vld [vmem:[#allocation8 + $0x124] ss:$16 sps:$4 sm:$0xff]   ;;  %v6884_v59 = vld [vmem:[#allocation8 + $0x120] ss:$16 sps:$4 sm:$0xff]  }
  0xcf   : > { %501 = vadd.xlane.f32.xlu1 %v500_v39  ;;  %974 = vmatpush1.bf16.msra.mxu0 %v6863_v44  ;;  %v6885_v60 = vld [vmem:[#allocation8 + $0x144] ss:$16 sps:$4 sm:$0xff]   ;;  %v6887_v61 = vld [vmem:[#allocation8 + $0x140] ss:$16 sps:$4 sm:$0xff]  }
  0xd0   : > { %975 = vmatprep.subr.bf16.mxu0 %v6864_v46  ;;  %v6888_v62 = vld [vmem:[#allocation8 + $0x164] ss:$16 sps:$4 sm:$0xff]   ;;  %v6890_v63 = vld [vmem:[#allocation8 + $0x160] ss:$16 sps:$4 sm:$0xff]  }
  0xd1   : > { %504 = vadd.xlane.f32.xlu0 %v503_v43  ;;  %v6891_v0 = vld [vmem:[#allocation8 + $0x184] ss:$16 sps:$4 sm:$0xff]   ;;  %v6893_v1 = vld [vmem:[#allocation8 + $0x180] ss:$16 sps:$4 sm:$0xff]   ;;  %v7740_v43 = vld [vmem:[%s8341_s23 + $0x8] sm:$0xff] }
  0xd2   : > { %v6894_v2 = vld [vmem:[#allocation8 + $0x1a4] ss:$16 sps:$4 sm:$0xff]   ;;  %v6896_v3 = vld [vmem:[#allocation8 + $0x1a0] ss:$16 sps:$4 sm:$0xff]  }
  0xd3   : > { %507 = vadd.xlane.f32.xlu1 %v506_v45  ;;  %976 = vmatpush1.bf16.msra.mxu0 %v6866_v47  ;;  %v6897_v4 = vld [vmem:[#allocation8 + $0x1c4] ss:$16 sps:$4 sm:$0xff]   ;;  %v6899_v5 = vld [vmem:[#allocation8 + $0x1c0] ss:$16 sps:$4 sm:$0xff]  }
  0xd4   : > { %977 = vmatprep.subr.bf16.mxu0 %v6867_v48  ;;  %v6900_v6 = vld [vmem:[#allocation8 + $0x1e4] ss:$16 sps:$4 sm:$0xff]   ;;  %v6902_v7 = vld [vmem:[#allocation8 + $0x1e0] ss:$16 sps:$4 sm:$0xff]  }
  0xd5   : > { %v468_v33 = vld [vmem:[%s10415_s4] sm:$0x3] }
  0xd6   : > { %v8385_v40 = vrot.slane %v468_v33, %v10431_v30  ;;  %v8391_v45 = vrot.slane %v468_v33, %v10430_v34  ;;  %v7741_v46 = vld [vmem:[%s8341_s23] sm:$0xff]  ;;  %v7752_v33 = vld [vmem:[%s8341_s23 + $0x78] sm:$0xff]  ;;  %v1358_v30 = vld [vmem:[%s10412_s1 + $0x30] sm:$0xff] }
  0xd7   : > { %978 = vmatpush1.bf16.msra.mxu0 %v6869_v49 }
  0xd8   : > { %979 = vmatprep.subr.bf16.mxu0 %v6870_v50  ;;  %v7742_v50 = vld [vmem:[%s8341_s23 + $0x18] sm:$0xff] }
  0xdb   : > { %980 = vmatpush1.bf16.msra.mxu0 %v6872_v51 }
  0xdc   : > { %981 = vmatprep.subr.bf16.mxu0 %v6873_v52  ;;  %v7743_v52 = vld [vmem:[%s8341_s23 + $0x10] sm:$0xff] }
  0xdf   : > { %982 = vmatpush1.bf16.msra.mxu0 %v6875_v53 }
  0xe0   : > { %983 = vmatprep.subr.bf16.mxu0 %v6876_v54  ;;  %v7744_v54 = vld [vmem:[%s8341_s23 + $0x38] sm:$0xff] }
  0xe3   : > { %984 = vmatpush1.bf16.msra.mxu0 %v6878_v55 }
  0xe4   : > { %985 = vmatprep.subr.bf16.mxu0 %v6879_v56 }
  0xe7   : > { %986 = vmatpush1.bf16.msra.mxu0 %v6881_v57 }
  0xe8   : > { %987 = vmatprep.subr.bf16.mxu0 %v6882_v58 }
  0xeb   : > { %988 = vmatpush1.bf16.msra.mxu0 %v6884_v59 }
  0xec   : > { %989 = vmatprep.subr.bf16.mxu0 %v6885_v60 }
  0xef   : > { %990 = vmatpush1.bf16.msra.mxu0 %v6887_v61 }
  0xf0   : > { %991 = vmatprep.subr.bf16.mxu0 %v6888_v62 }
  0xf3   : > { %992 = vmatpush1.bf16.msra.mxu0 %v6890_v63  ;;  %v7745_v63 = vld [vmem:[%s8341_s23 + $0x20] sm:$0xff] }
  0xf4   : > { %993 = vmatprep.subr.bf16.mxu0 %v6891_v0 }
  0xf7   : > { %994 = vmatpush1.bf16.msra.mxu0 %v6893_v1  ;;  %v7746_v1 = vld [vmem:[%s8341_s23 + $0x30] sm:$0xff] }
  0xf8   : > { %995 = vmatprep.subr.bf16.mxu0 %v6894_v2 }
  0xfb   : > { %996 = vmatpush1.bf16.msra.mxu0 %v6896_v3 }
  0xfc   : > { %997 = vmatprep.subr.bf16.mxu0 %v6897_v4 }
  0xff   : > { %998 = vmatpush1.bf16.msra.mxu0 %v6899_v5  ;;  %v6903_v5 = vld [vmem:[#allocation8 + $0x8] ss:$16 sps:$4 sm:$0xff]  }
 0x100   : > { %999 = vmatprep.subr.bf16.mxu0 %v6900_v6 }
 0x103   : > { %1000 = vmatpush1.bf16.msra.mxu0 %v6902_v7  ;;  %v7747_v7 = vld [vmem:[%s8341_s23 + $0x48] sm:$0xff] }
 0x104   : > { %1042 = vmatprep.subr.bf16.mxu0 %v6905_v8 }
 0x152   : > { %v487_v9 = vpop.xlane.xlu0 %486 }
 0x153   : > { %v510_v10 = vmul.f32 0.00390625, %v487_v9  ;;  %v6908_v9 = vld [vmem:[#allocation8 + $0x2c] ss:$16 sps:$4 sm:$0xff]  }
 0x154   : > { %v493_v11 = vpop.xlane.xlu1 %492 }
 0x155   : > { %v512_v12 = vmul.f32 0.00390625, %v493_v11  ;;  %v518_v13 = vadd.f32 1e-05, %v510_v10  ;;  %v7748_v11 = vld [vmem:[%s8341_s23 + $0x58] sm:$0xff] }
 0x156   : > { %v490_v14 = vpop.xlane.xlu0 %489 }
 0x157   : > { %v520_v15 = vadd.f32 1e-05, %v512_v12  ;;  %7387 = vrsqrt.f32 %v518_v13  ;;  %v511_v16 = vmul.f32 0.00390625, %v490_v14 }
 0x158   : > { %v496_v17 = vpop.xlane.xlu1 %495 }
 0x159   : > { %7389 = vrsqrt.f32 %v520_v15  ;;  %v513_v19 = vmul.f32 0.00390625, %v496_v17  ;;  %v519_v20 = vadd.f32 1e-05, %v511_v16  ;;  %v6906_v16 = vld [vmem:[#allocation8 + $0x28] ss:$16 sps:$4 sm:$0xff]  }
 0x15a   : > { %v499_v22 = vpop.xlane.xlu0 %498 }
 0x15b   : > { %v521_v21 = vadd.f32 1e-05, %v513_v19  ;;  %7391 = vrsqrt.f32 %v519_v20  ;;  %v514_v24 = vmul.f32 0.00390625, %v499_v22 }
 0x15c   : > { %v502_v23 = vpop.xlane.xlu1 %501 }
 0x15d   : > { %7393 = vrsqrt.f32 %v521_v21  ;;  %v515_v26 = vmul.f32 0.00390625, %v502_v23  ;;  %v522_v27 = vadd.f32 1e-05, %v514_v24  ;;  %v6911_v21 = vld [vmem:[#allocation8 + $0x4c] ss:$16 sps:$4 sm:$0xff]   ;;  %v7749_v23 = vld [vmem:[%s8341_s23 + $0x40] sm:$0xff] }
 0x15e   : > { %v505_v29 = vpop.xlane.xlu0 %504 }
 0x15f   : > { %v523_v28 = vadd.f32 1e-05, %v515_v26  ;;  %7395 = vrsqrt.f32 %v522_v27  ;;  %v516_v32 = vmul.f32 0.00390625, %v505_v29  ;;  %v7750_v26 = vld [vmem:[%s8341_s23 + $0x50] sm:$0xff] }
 0x160   : > { %v508_v31 = vpop.xlane.xlu1 %507 }
 0x161   : > { %7397 = vrsqrt.f32 %v523_v28  ;;  %v517_v35 = vmul.f32 0.00390625, %v508_v31  ;;  %v7388_v36 = vpop.eup %7387  ;;  %v524_v37 = vadd.f32 1e-05, %v516_v32  ;;  %v6909_v28 = vld [vmem:[#allocation8 + $0x48] ss:$16 sps:$4 sm:$0xff]  }
 0x162   : > { %v535_v44 = vmul.f32 %v7740_v43, %v7388_v36  ;;  %v534_v47 = vmul.f32 %v7741_v46, %v7388_v36  ;;  %v7751_v31 = vld [vmem:[%s8341_s23 + $0x68] sm:$0xff]  ;;  %v7753_v46 = vld [vmem:[%s8341_s23 + $0x60] sm:$0xff] }
 0x163   : > { %v7390_v38 = vpop.eup %7389  ;;  %v525_v39 = vadd.f32 1e-05, %v517_v35  ;;  %7399 = vrsqrt.f32 %v524_v37  ;;  %v6914_v36 = vld [vmem:[#allocation8 + $0x6c] ss:$16 sps:$4 sm:$0xff]  }
 0x164   : > { %v539_v42 = vmul.f32 %v7739_v41, %v7390_v38  ;;  %v562_v57 = vmul.f32 %v8391_v45, %v535_v44  ;;  %v561_v59 = vmul.f32 %v8385_v40, %v534_v47  ;;  %v538_v0 = vmul.f32 %v7745_v63, %v7390_v38  ;;  %v6917_v43 = vld [vmem:[#allocation8 + $0x8c] ss:$16 sps:$4 sm:$0xff]  }
 0x165   : > { %v7392_v48 = vpop.eup %7391  ;;  %7401 = vrsqrt.f32 %v525_v39  ;;  %v6912_v39 = vld [vmem:[#allocation8 + $0x68] ss:$16 sps:$4 sm:$0xff]   ;;  %v6935_v63 = vld [vmem:[#allocation8 + $0x14c] ss:$16 sps:$4 sm:$0xff]  }
 0x166   : > { %v537_v51 = vmul.f32 %v7742_v50, %v7392_v48  ;;  %v536_v53 = vmul.f32 %v7743_v52, %v7392_v48  ;;  %v566_v56 = vmul.f32 %v8391_v45, %v539_v42  ;;  %v565_v13 = vmul.f32 %v8385_v40, %v538_v0  ;;  %v7754_v48 = vld [vmem:[%s8341_s23 + $0x70] sm:$0xff]  ;;  %v6915_v50 = vld [vmem:[#allocation8 + $0x88] ss:$16 sps:$4 sm:$0xff]   ;;  %v6920_v52 = vld [vmem:[#allocation8 + $0xac] ss:$16 sps:$4 sm:$0xff]  }
 0x167   : > { %v7394_v49 = vpop.eup %7393  ;;  %v6933_v0 = vld [vmem:[#allocation8 + $0x148] ss:$16 sps:$4 sm:$0xff]  }
 0x168   : > { %v541_v55 = vmul.f32 %v7744_v54, %v7394_v49  ;;  %v564_v58 = vmul.f32 %v8391_v45, %v537_v51  ;;  %v563_v60 = vmul.f32 %v8385_v40, %v536_v53  ;;  %v540_v2 = vmul.f32 %v7746_v1, %v7394_v49  ;;  %v6938_v1 = vld [vmem:[#allocation8 + $0x16c] ss:$16 sps:$4 sm:$0xff]  }
 0x169   : > { %v7396_v61 = vpop.eup %7395 }
 0x16a   : > { %v568_v62 = vmul.f32 %v8391_v45, %v541_v55  ;;  %v8405_v4 = vpack.c.bf16 %v564_v58, %v562_v57  ;;  %v8407_v6 = vpack.c.bf16 %v563_v60, %v561_v59  ;;  %v543_v8 = vmul.f32 %v7747_v7, %v7396_v61  ;;  %v6923_v55 = vld [vmem:[#allocation8 + $0xcc] ss:$16 sps:$4 sm:$0xff]   ;;  %v6921_v57 = vld [vmem:[#allocation8 + $0xc8] ss:$16 sps:$4 sm:$0xff]  }
 0x16b   : > { %v7398_v3 = vpop.eup %7397  ;;  %v567_v14 = vmul.f32 %v8385_v40, %v540_v2  ;;  %v542_v24 = vmul.f32 %v7749_v23, %v7396_v61  ;;  %v6926_v58 = vld [vmem:[#allocation8 + $0xec] ss:$16 sps:$4 sm:$0xff]   ;;  %v6924_v59 = vld [vmem:[#allocation8 + $0xe8] ss:$16 sps:$4 sm:$0xff]  }
 0x16c   : > { %v8410_v10 = vpack.c.bf16 %v568_v62, %v566_v56  ;;  %v545_v12 = vmul.f32 %v7748_v11, %v7398_v3  ;;  %1001 = vmatprep.mubr.bf16.mxu0 %v8405_v4  ;;  %v570_v17 = vmul.f32 %v8391_v45, %v543_v8  ;;  %v544_v27 = vmul.f32 %v7750_v26, %v7398_v3  ;;  %v6929_v60 = vld [vmem:[#allocation8 + $0x10c] ss:$16 sps:$4 sm:$0xff]   ;;  %v6927_v61 = vld [vmem:[#allocation8 + $0x108] ss:$16 sps:$4 sm:$0xff]  }
 0x16d   : > { %1002 = vmatmul.mubr.bf16.vlgmr.msra.gmra.mrb[0].mxu0 %v8407_v6  ;;  %v7400_v15 = vpop.eup %7399  ;;  %v8420_v22 = vpack.c.bf16 %v567_v14, %v565_v13  ;;  %v569_v37 = vmul.f32 %v8385_v40, %v542_v24  ;;  %v6930_v62 = vld [vmem:[#allocation8 + $0x128] ss:$16 sps:$4 sm:$0xff]   ;;  %v6941_v3 = vld [vmem:[#allocation8 + $0x18c] ss:$16 sps:$4 sm:$0xff]  }
 0x16e   : > { %1043 = vmatpush1.bf16.msra.mxu0 %v6903_v5  ;;  %1011 = vmatprep.mubr.bf16.mxu0 %v8410_v10  ;;  %v572_v19 = vmul.f32 %v8391_v45, %v545_v12  ;;  %v547_v32 = vmul.f32 %v7751_v31, %v7400_v15  ;;  %v571_v38 = vmul.f32 %v8385_v40, %v544_v27  ;;  %v6936_v2 = vld [vmem:[#allocation8 + $0x168] ss:$16 sps:$4 sm:$0xff]   ;;  %v6944_v5 = vld [vmem:[#allocation8 + $0x1ac] ss:$16 sps:$4 sm:$0xff]  }
 0x16f   : > { %v7402_v20 = vpop.eup %7401  ;;  %1044 = vmatprep.subr.bf16.mxu0 %v6908_v9  ;;  %v546_v47 = vmul.f32 %v7753_v46, %v7400_v15  ;;  %v6942_v7 = vld [vmem:[#allocation8 + $0x1a8] ss:$16 sps:$4 sm:$0xff]   ;;  %v6947_v8 = vld [vmem:[#allocation8 + $0x1cc] ss:$16 sps:$4 sm:$0xff]  }
 0x170   : > { %v8424_v29 = vpack.c.bf16 %v572_v19, %v570_v17  ;;  %v549_v35 = vmul.f32 %v7752_v33, %v7402_v20  ;;  %v574_v41 = vmul.f32 %v8391_v45, %v547_v32  ;;  %v8434_v44 = vpack.c.bf16 %v571_v38, %v569_v37  ;;  %v6945_v9 = vld [vmem:[#allocation8 + $0x1c8] ss:$16 sps:$4 sm:$0xff]   ;;  %v6950_v11 = vld [vmem:[#allocation8 + $0x1ec] ss:$16 sps:$4 sm:$0xff]  }
 0x171   : > { %v548_v49 = vmul.f32 %v7754_v48, %v7402_v20  ;;  %v573_v53 = vmul.f32 %v8385_v40, %v546_v47  ;;  %v6948_v12 = vld [vmem:[#allocation8 + $0x1e8] ss:$16 sps:$4 sm:$0xff]  }
 0x172   : > { %1045 = vmatpush1.bf16.msra.mxu0 %v6906_v16  ;;  %v576_v42 = vmul.f32 %v8391_v45, %v549_v35  ;;  %v6918_v45 = vld [vmem:[#allocation8 + $0xa8] ss:$16 sps:$4 sm:$0xff]  }
 0x173   : > { %1046 = vmatprep.subr.bf16.mxu0 %v6911_v21  ;;  %v575_v54 = vmul.f32 %v8385_v40, %v548_v49  ;;  %v6932_v40 = vld [vmem:[#allocation8 + $0x12c] ss:$16 sps:$4 sm:$0xff]  }
 0x174   : > { %v584_v51 = vpack.c.bf16 %v576_v42, %v574_v41 }
 0x175   : > { %1012 = vmatmul.mubr.bf16.gmra.mrb[4].mxu0 %v8420_v22  ;;  %v583_v56 = vpack.c.bf16 %v575_v54, %v573_v53 }
 0x176   : > { %1047 = vmatpush1.bf16.msra.mxu0 %v6909_v28  ;;  %1021 = vmatprep.mubr.bf16.mxu0 %v8424_v29 }
 0x177   : > { %1048 = vmatprep.subr.bf16.mxu0 %v6914_v36 }
 0x17a   : > { %1049 = vmatpush1.bf16.msra.mxu0 %v6912_v39 }
 0x17b   : > { %1050 = vmatprep.subr.bf16.mxu0 %v6917_v43 }
 0x17d   : > { %1022 = vmatmul.mubr.bf16.gmra.mrb[8].mxu0 %v8434_v44 }
 0x17e   : > { %1051 = vmatpush1.bf16.msra.mxu0 %v6915_v50  ;;  %1031 = vmatprep.mubr.bf16.mxu0 %v584_v51 }
 0x17f   : > { %1052 = vmatprep.subr.bf16.mxu0 %v6920_v52 }
 0x182   : > { %1053 = vmatpush1.bf16.msra.mxu0 %v6918_v45 }
 0x183   : > { %1054 = vmatprep.subr.bf16.mxu0 %v6923_v55 }
 0x185   : > { %1032 = vmatmul.mubr.bf16.gmra.mrb[12].mxu0 %v583_v56 }
 0x186   : > { %1055 = vmatpush1.bf16.msra.mxu0 %v6921_v57  ;;  %1074 = vmatprep.mubr.bf16.mxu0 %v8405_v4  ;;  %v6939_v4 = vld [vmem:[#allocation8 + $0x188] ss:$16 sps:$4 sm:$0xff]  }
 0x187   : > { %1056 = vmatprep.subr.bf16.mxu0 %v6926_v58 }
 0x18a   : > { %1057 = vmatpush1.bf16.msra.mxu0 %v6924_v59 }
 0x18b   : > { %1058 = vmatprep.subr.bf16.mxu0 %v6929_v60 }
 0x18e   : > { %1059 = vmatpush1.bf16.msra.mxu0 %v6927_v61 }
 0x18f   : > { %1060 = vmatprep.subr.bf16.mxu0 %v6932_v40 }
 0x192   : > { %1061 = vmatpush1.bf16.msra.mxu0 %v6930_v62 }
 0x193   : > { %1062 = vmatprep.subr.bf16.mxu0 %v6935_v63 }
 0x196   : > { %1063 = vmatpush1.bf16.msra.mxu0 %v6933_v0 }
 0x197   : > { %1064 = vmatprep.subr.bf16.mxu0 %v6938_v1 }
 0x19a   : > { %1065 = vmatpush1.bf16.msra.mxu0 %v6936_v2 }
 0x19b   : > { %1066 = vmatprep.subr.bf16.mxu0 %v6941_v3 }
 0x19e   : > { %1067 = vmatpush1.bf16.msra.mxu0 %v6939_v4 }
 0x19f   : > { %1068 = vmatprep.subr.bf16.mxu0 %v6944_v5 }
 0x1a2   : > { %1069 = vmatpush1.bf16.msra.mxu0 %v6942_v7 }
 0x1a3   : > { %1070 = vmatprep.subr.bf16.mxu0 %v6947_v8 }
 0x1a6   : > { %1071 = vmatpush1.bf16.msra.mxu0 %v6945_v9 }
 0x1a7   : > { %1072 = vmatprep.subr.bf16.mxu0 %v6950_v11 }
 0x1aa   : > { %1073 = vmatpush1.bf16.msra.mxu0 %v6948_v12 }
 0x1ad   : > { %1075 = vmatmul.mubr.bf16.vlgmr.msra.gmra.mrb[16].mxu0 %v8407_v6 }
 0x1ae   : > { %1084 = vmatprep.mubr.bf16.mxu0 %v8410_v10 }
 0x1b5   : > { %1085 = vmatmul.mubr.bf16.gmra.mrb[20].mxu0 %v8420_v22 }
 0x1b6   : > { %1094 = vmatprep.mubr.bf16.mxu0 %v8424_v29 }
 0x1bd   : > { %1095 = vmatmul.mubr.bf16.gmra.mrb[24].mxu0 %v8434_v44 }
 0x1be   : > { %1104 = vmatprep.mubr.bf16.mxu0 %v584_v51 }
 0x1c5   : > { %1105 = vmatmul.mubr.bf16.gmra.mrb[28].mxu0 %v583_v56 }
 0x240   : > { %v8447_v13 = vpop.f32.mrb[0].mxu0 }
 0x241   : > { %1231 = vrot.lane.b32.xlu0 %v8447_v13, %s8035_s27  ;;  %v8451_v14 = vpop.f32.mrb[1].mxu0 }
 0x242   : > { %v8453_v15 = vpop.f32.mrb[2].mxu0 }
 0x243   : > { %1233 = vrot.lane.b32.xlu1 %v8453_v15, %s8035_s27  ;;  %v8457_v6 = vpop.f32.mrb[3].mxu0 }
 0x245   : > { %1158 = vrot.lane.b32.xlu0 %v8447_v13, %s8036_s24 }
 0x247   : > { %1160 = vrot.lane.b32.xlu1 %v8453_v15, %s8036_s24 }
 0x248   : > { %v8463_v10 = vpop.f32.mrb[4].mxu0 }
 0x249   : > { %1174 = vrot.lane.b32.xlu0 %v8451_v14, %s8036_s24  ;;  %v8467_v16 = vpop.f32.mrb[5].mxu0 }
 0x24a   : > { %v8469_v17 = vpop.f32.mrb[6].mxu0 }
 0x24b   : > { %1176 = vrot.lane.b32.xlu1 %v8457_v6, %s8036_s24  ;;  %v8473_v19 = vpop.f32.mrb[7].mxu0 }
 0x24d   : > { %1247 = vrot.lane.b32.xlu0 %v8451_v14, %s8035_s27 }
 0x24f   : > { %1249 = vrot.lane.b32.xlu1 %v8457_v6, %s8035_s27 }
 0x250   : > { %v8479_v20 = vpop.f32.mrb[8].mxu0 }
 0x251   : > { %1235 = vrot.lane.b32.xlu0 %v8463_v10, %s8035_s27  ;;  %v8483_v21 = vpop.f32.mrb[9].mxu0 }
 0x252   : > { %v8485_v22 = vpop.f32.mrb[10].mxu0 }
 0x253   : > { %1237 = vrot.lane.b32.xlu1 %v8469_v17, %s8035_s27  ;;  %v8489_v23 = vpop.f32.mrb[11].mxu0 }
 0x255   : > { %1162 = vrot.lane.b32.xlu0 %v8463_v10, %s8036_s24 }
 0x257   : > { %1164 = vrot.lane.b32.xlu1 %v8469_v17, %s8036_s24 }
 0x258   : > { %v8495_v24 = vpop.f32.mrb[12].mxu0 }
 0x259   : > { %1178 = vrot.lane.b32.xlu0 %v8467_v16, %s8036_s24  ;;  %v8499_v26 = vpop.f32.mrb[13].mxu0 }
 0x25a   : > { %v8501_v27 = vpop.f32.mrb[14].mxu0 }
 0x25b   : > { %1180 = vrot.lane.b32.xlu1 %v8473_v19, %s8036_s24  ;;  %v8505_v28 = vpop.f32.mrb[15].mxu0 }
 0x25d   : > { %1251 = vrot.lane.b32.xlu0 %v8467_v16, %s8035_s27 }
 0x25f   : > { %1253 = vrot.lane.b32.xlu1 %v8473_v19, %s8035_s27 }
 0x261   : > { %1239 = vrot.lane.b32.xlu0 %v8479_v20, %s8035_s27 }
 0x263   : > { %1241 = vrot.lane.b32.xlu1 %v8485_v22, %s8035_s27 }
 0x265   : > { %1166 = vrot.lane.b32.xlu0 %v8479_v20, %s8036_s24 }
 0x267   : > { %1168 = vrot.lane.b32.xlu1 %v8485_v22, %s8036_s24 }
 0x269   : > { %1182 = vrot.lane.b32.xlu0 %v8483_v21, %s8036_s24 }
 0x26b   : > { %1184 = vrot.lane.b32.xlu1 %v8489_v23, %s8036_s24 }
 0x26d   : > { %1255 = vrot.lane.b32.xlu0 %v8483_v21, %s8035_s27 }
 0x26f   : > { %1257 = vrot.lane.b32.xlu1 %v8489_v23, %s8035_s27 }
 0x271   : > { %1243 = vrot.lane.b32.xlu0 %v8495_v24, %s8035_s27 }
 0x273   : > { %1245 = vrot.lane.b32.xlu1 %v8501_v27, %s8035_s27 }
 0x275   : > { %1170 = vrot.lane.b32.xlu0 %v8495_v24, %s8036_s24 }
 0x277   : > { %1172 = vrot.lane.b32.xlu1 %v8501_v27, %s8036_s24 }
 0x279   : > { %1259 = vrot.lane.b32.xlu0 %v8499_v26, %s8035_s27 }
 0x27b   : > { %1261 = vrot.lane.b32.xlu1 %v8505_v28, %s8035_s27 }
 0x27d   : > { %1186 = vrot.lane.b32.xlu0 %v8499_v26, %s8036_s24 }
 0x27f   : > { %1188 = vrot.lane.b32.xlu1 %v8505_v28, %s8036_s24 }
 0x280   : > { %v8543_v29 = vpop.f32.mrb[16].mxu0 }
 0x281   : > { %v1078_v31 = vpop.f32.mrb[17].mxu0  ;;  %1190 = vrot.lane.b32.xlu0 %v8543_v29, %s8036_s24 }
 0x282   : > { %v8547_v32 = vpop.f32.mrb[18].mxu0 }
 0x283   : > { %v1082_v33 = vpop.f32.mrb[19].mxu0  ;;  %1263 = vrot.lane.b32.xlu1 %v8543_v29, %s8035_s27 }
 0x284   : > { %v8551_v35 = vpack.c.bf16 %v1082_v33, %v1078_v31 }
 0x286   : > { %10506 = vst [vmem:[#allocation21_spill] sm:$0xff] %v8551_v35  ;;  %6633 = vmatprep.subr.bf16.mxu1 %v8551_v35 }
 0x287   : > { %6634 = vmatpush3.bf16.msra.mxu1 %v8551_v35  ;;  %1265 = vrot.lane.b32.xlu1 %v8547_v32, %s8035_s27  ;;  %v1364_v35 = vld [vmem:[%s10412_s1 + $0x60] sm:$0xff] }
 0x288   : > { %v8557_v36 = vpop.f32.mrb[20].mxu0 }
 0x289   : > { %1267 = vrot.lane.b32.xlu0 %v8557_v36, %s8035_s27  ;;  %v1088_v37 = vpop.f32.mrb[21].mxu0 }
 0x28a   : > { %v8561_v38 = vpop.f32.mrb[22].mxu0 }
 0x28b   : > { %v1092_v39 = vpop.f32.mrb[23].mxu0  ;;  %1192 = vrot.lane.b32.xlu1 %v8547_v32, %s8036_s24 }
 0x28c   : > { %v8565_v41 = vpack.c.bf16 %v1092_v39, %v1088_v37  ;;  %v8660_v37 = vand.u32 127, %v551_v18  ;;  %v1356_v18 = vld [vmem:[%s10412_s1 + $0x20] sm:$0xff] }
 0x28d   : > { %1194 = vrot.lane.b32.xlu0 %v8557_v36, %s8036_s24 }
 0x28e   : > { %10507 = vst [vmem:[#allocation22_spill] sm:$0xff] %v8565_v41  ;;  %6635 = vmatprep.subr.bf16.mxu1 %v8565_v41  ;;  %v1118_v34 = vadd.s32 256, %v8660_v37  ;;  %vm1206_vm0 = vcmp.lt.s32.totalorder %v8660_v37, 32  ;;  %vm1279_vm1 = vcmp.lt.s32.totalorder %v8660_v37, 96 }
 0x28f   : > { %6636 = vmatpush3.bf16.msra.mxu1 %v8565_v41  ;;  %1269 = vrot.lane.b32.xlu1 %v8561_v38, %s8035_s27 }
 0x290   : > { %v8573_v42 = vpop.f32.mrb[24].mxu0 }
 0x291   : > { %1271 = vrot.lane.b32.xlu0 %v8573_v42, %s8035_s27  ;;  %v1098_v43 = vpop.f32.mrb[25].mxu0 }
 0x292   : > { %v8577_v44 = vpop.f32.mrb[26].mxu0 }
 0x293   : > { %v1102_v46 = vpop.f32.mrb[27].mxu0  ;;  %1196 = vrot.lane.b32.xlu1 %v8561_v38, %s8036_s24 }
 0x294   : > { %v8581_v47 = vpack.c.bf16 %v1102_v46, %v1098_v43  ;;  %v1352_v43 = vld [vmem:[%s10412_s1] sm:$0xff]  ;;  %v1353_v46 = vld [vmem:[%s10412_s1 + $0x8] sm:$0xff] }
 0x295   : > { %1198 = vrot.lane.b32.xlu0 %v8573_v42, %s8036_s24 }
 0x296   : > { %10508 = vst [vmem:[#allocation23_spill] sm:$0xff] %v8581_v47  ;;  %6637 = vmatprep.subr.bf16.mxu1 %v8581_v47 }
 0x297   : > { %6638 = vmatpush3.bf16.msra.mxu1 %v8581_v47  ;;  %1273 = vrot.lane.b32.xlu1 %v8577_v44, %s8035_s27  ;;  %v1362_v47 = vld [vmem:[%s10412_s1 + $0x50] sm:$0xff] }
 0x298   : > { %v8589_v48 = vpop.f32.mrb[28].mxu0 }
 0x299   : > { %1275 = vrot.lane.b32.xlu0 %v8589_v48, %s8035_s27  ;;  %v1108_v49 = vpop.f32.mrb[29].mxu0 }
 0x29a   : > { %v8593_v50 = vpop.f32.mrb[30].mxu0 }
 0x29b   : > { %v1112_v51 = vpop.f32.mrb[31].mxu0  ;;  %1200 = vrot.lane.b32.xlu1 %v8577_v44, %s8036_s24 }
 0x29c   : > { %v8597_v52 = vpack.c.bf16 %v1112_v51, %v1108_v49  ;;  %v1355_v49 = vld [vmem:[%s10412_s1 + $0x18] sm:$0xff]  ;;  %v1117_v51 = vadd.s32 128, %v8660_v37 }
 0x29d   : > { %1202 = vrot.lane.b32.xlu0 %v8589_v48, %s8036_s24 }
 0x29e   : > { %10509 = vst [vmem:[#allocation24_spill] sm:$0xff] %v8597_v52  ;;  %6639 = vmatprep.subr.bf16.mxu1 %v8597_v52 }
 0x29f   : > { %6640 = vmatpush3.bf16.msra.mxu1 %v8597_v52  ;;  %1277 = vrot.lane.b32.xlu1 %v8593_v50, %s8035_s27  ;;  %v1361_v52 = vld [vmem:[%s10412_s1 + $0x48] sm:$0xff]  ;;  %s8037_s27 = smov 64  }
 0x2a3   : > { %1204 = vrot.lane.b32.xlu1 %v8593_v50, %s8036_s24 }
 0x2b3   : > { %v8607_v53 = vpop.permute.xlu0 %1231 }
 0x2b5   : > { %v8609_v54 = vpop.permute.xlu1 %1233 }
 0x2b7   : > { %v8611_v45 = vpop.permute.xlu0 %1158 }
 0x2b9   : > { %v8613_v55 = vpop.permute.xlu1 %1160 }
 0x2bb   : > { %v8615_v56 = vpop.permute.xlu0 %1174 }
 0x2bd   : > { %v8617_v57 = vpop.permute.xlu1 %1176 }
 0x2bf   : > { %v8619_v58 = vpop.permute.xlu0 %1247 }
 0x2c1   : > { %v8621_v59 = vpop.permute.xlu1 %1249 }
 0x2c3   : > { %v8623_v60 = vpop.permute.xlu0 %1235 }
 0x2c5   : > { %v8625_v61 = vpop.permute.xlu1 %1237 }
 0x2c7   : > { %v8627_v40 = vpop.permute.xlu0 %1162 }
 0x2c9   : > { %v8629_v62 = vpop.permute.xlu1 %1164 }
 0x2cb   : > { %v8631_v63 = vpop.permute.xlu0 %1178 }
 0x2cd   : > { %v8633_v0 = vpop.permute.xlu1 %1180 }
 0x2cf   : > { %v8635_v1 = vpop.permute.xlu0 %1251 }
 0x2d1   : > { %v8637_v2 = vpop.permute.xlu1 %1253 }
 0x2d3   : > { %v8639_v3 = vpop.permute.xlu0 %1239 }
 0x2d5   : > { %v8641_v4 = vpop.permute.xlu1 %1241 }
 0x2d6   : > { %10510 = vst [vmem:[#allocation25_spill] sm:$0xff] %v8641_v4 }
 0x2d7   : > { %v8643_v5 = vpop.permute.xlu0 %1166 }
 0x2d8   : > { %10511 = vst [vmem:[#allocation26_spill] sm:$0xff] %v8643_v5  ;;  %v1137_v5 = vand.u32 63, %v1118_v34  ;;  %v8745_v34 = vmul.f32 %v1362_v47, %v8473_v19 }
 0x2d9   : > { %v8645_v7 = vpop.permute.xlu1 %1168 }
 0x2da   : > { %10512 = vst [vmem:[#allocation27_spill] sm:$0xff] %v8645_v7  ;;  %v8699_v7 = vmul.f32 %v1353_v46, %v8451_v14  ;;  %v8715_v14 = vmul.f32 %v1355_v49, %v8453_v15  ;;  %v1371_v46 = vld [vmem:[%s10412_s1 + $0x98] sm:$0xff]  ;;  %v8731_v15 = vmul.f32 %v1358_v30, %v8463_v10  ;;  %v8734_v49 = vmul.f32 %v1359_v25, %v8467_v16  ;;  %v1354_v10 = vld [vmem:[%s10412_s1 + $0x10] sm:$0xff]  ;;  %v1357_v16 = vld [vmem:[%s10412_s1 + $0x28] sm:$0xff] }
 0x2db   : > { %v8647_v8 = vpop.permute.xlu0 %1182  ;;  %10524 = vst [vmem:[#allocation39_spill] sm:$0xff] %v8745_v34  ;;  %vm8805_vm4 = vcmp.lt.s32.totalorder %v1137_v5, 32 }
 0x2dc   : > { %10513 = vst [vmem:[#allocation28_spill] sm:$0xff] %v8647_v8  ;;  %10520 = vst [vmem:[#allocation35_spill] sm:$0xff] %v8699_v7  ;;  %v1373_v7 = vld [vmem:[%s10412_s1 + $0xa8] sm:$0xff]  ;;  %v1374_v8 = vld [vmem:[%s10412_s1 + $0xb0] sm:$0xff] }
 0x2dd   : > { %v8649_v9 = vpop.permute.xlu1 %1184  ;;  %10522 = vst [vmem:[#allocation37_spill] sm:$0xff] %v8715_v14  ;;  %v8737_v14 = vmul.f32 %v1361_v52, %v8469_v17  ;;  %v1360_v17 = vld [vmem:[%s10412_s1 + $0x40] sm:$0xff] }
 0x2de   : > { %10514 = vst [vmem:[#allocation29_spill] sm:$0xff] %v8649_v9  ;;  %v1367_v9 = vld [vmem:[%s10412_s1 + $0x78] sm:$0xff] }
 0x2df   : > { %v8651_v11 = vpop.permute.xlu0 %1255  ;;  %v8754_v25 = vmul.f32 %v1367_v9, %v8485_v22  ;;  %v8775_v22 = vmul.f32 %v1373_v7, %v8501_v27  ;;  %v1375_v27 = vld [vmem:[%s10412_s1 + $0xb8] sm:$0xff]  ;;  %v8813_v9 = vmul.f32 %v1357_v16, %v8547_v32  ;;  %v8840_v32 = vsel %vm1279_vm1, %v8623_v60, %v8635_v1 }
 0x2e0   : > { %v1217_v16 = vsel %vm1206_vm0, %v8627_v40, %v8631_v63 }
 0x2e1   : > { %v8653_v12 = vpop.permute.xlu1 %1257  ;;  %10526 = vst [vmem:[#allocation41_spill] sm:$0xff] %v8754_v25  ;;  %10530 = vst [vmem:[#allocation45_spill] sm:$0xff] %v8775_v22  ;;  %v1403_v25 = vld [vmem:[#allocation6 + $0x18] sm:$0xff] }
 0x2e3   : > { %v8655_v31 = vpop.permute.xlu0 %1243 }
 0x2e4   : > { %10515 = vst [vmem:[#allocation30_spill] sm:$0xff] %v8655_v31  ;;  %v1130_v31 = vand.u32 63, %v1117_v51 }
 0x2e5   : > { %v8657_v33 = vpop.permute.xlu1 %1245 }
 0x2e6   : > { %10516 = vst [vmem:[#allocation31_spill] sm:$0xff] %v8657_v33  ;;  %v1368_v33 = vld [vmem:[%s10412_s1 + $0x80] sm:$0xff]  ;;  %vm8801_vm3 = vcmp.lt.s32.totalorder %v1130_v31, 32  ;;  %v1288_v31 = vsel %vm1279_vm1, %v8607_v53, %v8619_v58 }
 0x2e7   : > { %v8662_v39 = vpop.permute.xlu0 %1170  ;;  %v8766_v19 = vmul.f32 %v1368_v33, %v8489_v23  ;;  %v8786_v23 = vmul.f32 %v1374_v8, %v8505_v28  ;;  %v8810_v8 = vmul.f32 %v1354_v10, %v8543_v29  ;;  %v8816_v33 = vmul.f32 %v1360_v17, %v8557_v36 }
 0x2e8   : > { %10517 = vst [vmem:[#allocation32_spill] sm:$0xff] %v8662_v39  ;;  %v8696_v39 = vmul.f32 %v1352_v43, %v8447_v13  ;;  %v1370_v43 = vld [vmem:[%s10412_s1 + $0x90] sm:$0xff]  ;;  %v8834_v29 = vsel %vm1279_vm1, %v8609_v54, %v8621_v59  ;;  %v1304_v10 = vsub.f32 0.0, %v1288_v31  ;;  %v8877_v17 = vsel %vm1206_vm0, %v8629_v62, %v8633_v0  ;;  %v10584_v28 = vld [vmem:[#allocation45_spill] sm:$0xff] }
 0x2e9   : > { %v8684_v41 = vpop.permute.xlu1 %1172  ;;  %10527 = vst [vmem:[#allocation42_spill] sm:$0xff] %v8766_v19  ;;  %10531 = vst [vmem:[#allocation46_spill] sm:$0xff] %v8786_v23  ;;  %v10546_v23 = vld [vmem:[#allocation26_spill] sm:$0xff] }
 0x2ea   : > { %10518 = vst [vmem:[#allocation33_spill] sm:$0xff] %v8684_v41  ;;  %10519 = vst [vmem:[#allocation34_spill] sm:$0xff] %v8696_v39  ;;  %v1365_v41 = vld [vmem:[%s10412_s1 + $0x68] sm:$0xff]  ;;  %v1123_v39 = vand.u32 63, %v8660_v37 }
 0x2eb   : > { %v8712_v13 = vpop.permute.xlu0 %1259  ;;  %v8751_v30 = vmul.f32 %v1365_v41, %v8483_v21  ;;  %v8772_v21 = vmul.f32 %v1371_v46, %v8499_v26  ;;  %v1366_v41 = vld [vmem:[%s10412_s1 + $0x70] sm:$0xff]  ;;  %v1372_v26 = vld [vmem:[%s10412_s1 + $0xa0] sm:$0xff]  ;;  %v1216_v46 = vsel %vm1206_vm0, %v8613_v55, %v8617_v57 }
 0x2ec   : > { %10521 = vst [vmem:[#allocation36_spill] sm:$0xff] %v8712_v13  ;;  %v8728_v13 = vmul.f32 %v1356_v18, %v8457_v6  ;;  %v8748_v6 = vmul.f32 %v1364_v35, %v8479_v20  ;;  %v8769_v20 = vmul.f32 %v1370_v43, %v8495_v24  ;;  %v1363_v35 = vld [vmem:[%s10412_s1 + $0x58] sm:$0xff]  ;;  %v1369_v24 = vld [vmem:[%s10412_s1 + $0x88] sm:$0xff]  ;;  %vm8797_vm2 = vcmp.lt.s32.totalorder %v1123_v39, 32 }
 0x2ed   : > { %v8742_v4 = vpop.permute.xlu1 %1261  ;;  %10525 = vst [vmem:[#allocation40_spill] sm:$0xff] %v8751_v30  ;;  %10529 = vst [vmem:[#allocation44_spill] sm:$0xff] %v8772_v21  ;;  %v8825_v5 = vmul.f32 %v1363_v35, %v8561_v38  ;;  %v8828_v51 = vmul.f32 %v1366_v41, %v8573_v42  ;;  %v8843_v36 = vmul.f32 %v1369_v24, %v8577_v44  ;;  %v10543_v24 = vld [vmem:[#allocation25_spill] sm:$0xff]  ;;  %v1400_v35 = vld [vmem:[#allocation6] sm:$0xff] }
 0x2ee   : > { %10523 = vst [vmem:[#allocation38_spill] sm:$0xff] %v8742_v4  ;;  %10528 = vst [vmem:[#allocation43_spill] sm:$0xff] %v8769_v20  ;;  %v8846_v38 = vmul.f32 %v1372_v26, %v8589_v48  ;;  %v8849_v42 = vmul.f32 %v1375_v27, %v8593_v50  ;;  %v1215_v18 = vsel %vm1206_vm0, %v8611_v45, %v8615_v56  ;;  %v1307_v50 = vsub.f32 0.0, %v8834_v29  ;;  %v10545_v20 = vld [vmem:[#allocation28_spill] sm:$0xff] }
 0x2ef   : > { %v8783_v47 = vpop.permute.xlu0 %1186  ;;  %10539 = vst [vmem:[#allocation48_spill] sm:$0xff] %v8828_v51  ;;  %10540 = vst [vmem:[#allocation49_spill] sm:$0xff] %v8843_v36  ;;  %v8863_v44 = vsel %vm1279_vm1, %v8625_v61, %v8637_v2  ;;  %v8890_v26 = vsel %vm1279_vm1, %v10543_v24, %v8653_v12  ;;  %v8905_v21 = vsel %vm1206_vm0, %v10546_v23, %v10545_v20  ;;  %v1405_v36 = vld [vmem:[#allocation6 + $0x28] sm:$0xff] }
 0x2f0   : > { %10541 = vst [vmem:[#allocation50_spill] sm:$0xff] %v8846_v38  ;;  %10542 = vst [vmem:[#allocation51_spill] sm:$0xff] %v8849_v42 }
 0x2f1   : > { %v8822_v39 = vpop.permute.xlu1 %1188  ;;  %10544 = vst [vmem:[#allocation25_spill] sm:$0xff] %v8890_v26 }
 0x2f2   : > { %10538 = vst [vmem:[#allocation47_spill] sm:$0xff] %v8822_v39 }
 0x2f3   : > { %v1191_v43 = vpop.permute.xlu0 %1190  ;;  %v10547_v19 = vld [vmem:[#allocation36_spill] sm:$0xff] }
 0x2f4   : > { %v1223_v48 = vsel %vm1206_vm0, %v1191_v43, %v8611_v45  ;;  %v8884_v45 = vsel %vm1279_vm1, %v8639_v3, %v8651_v11 }
 0x2f5   : > { %v1264_v41 = vpop.permute.xlu1 %1263  ;;  %v1328_v42 = vsel %vm8797_vm2, %v1304_v10, %v1223_v48  ;;  %v1207_v10 = vsel %vm1206_vm0, %v8615_v56, %v1191_v43  ;;  %v1402_v48 = vld [vmem:[#allocation6 + $0x10] sm:$0xff]  ;;  %v10583_v52 = vld [vmem:[#allocation43_spill] sm:$0xff] }
 0x2f6   : > { %v1280_v27 = vsel %vm1279_vm1, %v8619_v58, %v1264_v41  ;;  %v1296_v31 = vsel %vm1279_vm1, %v1264_v41, %v8607_v53  ;;  %v10548_v58 = vld [vmem:[#allocation30_spill] sm:$0xff]  ;;  %v10550_v53 = vld [vmem:[#allocation31_spill] sm:$0xff] }
 0x2f7   : > { %v1305_v38 = vsub.f32 0.0, %v1280_v27  ;;  %v1306_v22 = vsub.f32 0.0, %v1296_v31  ;;  %v8911_v30 = vsel %vm1279_vm1, %v10548_v58, %v10547_v19  ;;  %v8917_v41 = vsel %vm1279_vm1, %v10550_v53, %v8742_v4  ;;  %v10552_v27 = vld [vmem:[#allocation29_spill] sm:$0xff]  ;;  %v10553_v31 = vld [vmem:[#allocation27_spill] sm:$0xff] }
 0x2f8   : > { %10549 = vst [vmem:[#allocation28_spill] sm:$0xff] %v8911_v30  ;;  %10551 = vst [vmem:[#allocation26_spill] sm:$0xff] %v8917_v41  ;;  %v8926_v29 = vsel %vm1206_vm0, %v10553_v31, %v10552_v27  ;;  %v1424_v4 = vmul.f32 %v1400_v35, %v1328_v42  ;;  %v1401_v31 = vld [vmem:[#allocation6 + $0x8] sm:$0xff]  ;;  %v1404_v35 = vld [vmem:[#allocation6 + $0x20] sm:$0xff] }
 0x2f9   : > { %v1330_v51 = vsel %vm8805_vm4, %v1306_v22, %v1207_v10  ;;  %v1266_v53 = vpop.permute.xlu1 %1265  ;;  %v1329_v34 = vsel %vm8801_vm3, %v1305_v38, %v1215_v18  ;;  %v10554_v38 = vld [vmem:[#allocation32_spill] sm:$0xff]  ;;  %v10557_v30 = vld [vmem:[#allocation34_spill] sm:$0xff] }
 0x2fa   : > { %v1281_v56 = vsel %vm1279_vm1, %v8621_v59, %v1266_v53  ;;  %v1297_v43 = vsel %vm1279_vm1, %v1266_v53, %v8609_v54  ;;  %v1426_v42 = vmul.f32 %v1402_v48, %v1330_v51  ;;  %v8946_v18 = vsel %vm1206_vm0, %v10554_v38, %v8783_v47  ;;  %v10556_v59 = vld [vmem:[#allocation33_spill] sm:$0xff] }
 0x2fb   : > { %v1308_v26 = vsub.f32 0.0, %v1281_v56  ;;  %v1268_v22 = vpop.permute.xlu0 %1267  ;;  %10555 = vst [vmem:[#allocation36_spill] sm:$0xff] %v8946_v18  ;;  %v8952_v54 = vsel %vm1206_vm0, %v10556_v59, %v8822_v39  ;;  %v1309_v10 = vsub.f32 0.0, %v1297_v43  ;;  %v1425_v18 = vmul.f32 %v1401_v31, %v1329_v34 }
 0x2fc   : > { %v1282_v53 = vsel %vm1279_vm1, %v8635_v1, %v1268_v22  ;;  %v1298_v51 = vsel %vm1279_vm1, %v1268_v22, %v8623_v60  ;;  %v1448_v59 = vadd.f32 %v1424_v4, %v10557_v30  ;;  %v1408_v22 = vld [vmem:[#allocation6 + $0x40] sm:$0xff]  ;;  %v1450_v4 = vadd.f32 %v1426_v42, %v8810_v8  ;;  %v1407_v8 = vld [vmem:[#allocation6 + $0x38] sm:$0xff] }
 0x2fd   : > { %v1332_v48 = vsel %vm8801_vm3, %v1308_v26, %v1216_v46  ;;  %v1311_v56 = vsub.f32 0.0, %v1282_v53  ;;  %v1193_v41 = vpop.permute.xlu1 %1192  ;;  %v1312_v43 = vsub.f32 0.0, %v1298_v51  ;;  %v1406_v51 = vld [vmem:[#allocation6 + $0x30] sm:$0xff] }
 0x2fe   : > { %v1208_v39 = vsel %vm1206_vm0, %v8617_v57, %v1193_v41  ;;  %v1224_v1 = vsel %vm1206_vm0, %v1193_v41, %v8613_v55  ;;  %v1428_v60 = vmul.f32 %v1404_v35, %v1332_v48  ;;  %v10558_v35 = vld [vmem:[#allocation35_spill] sm:$0xff] }
 0x2ff   : > { %v1331_v46 = vsel %vm8797_vm2, %v1307_v50, %v1224_v1  ;;  %v1333_v26 = vsel %vm8805_vm4, %v1309_v10, %v1208_v39  ;;  %v1195_v34 = vpop.permute.xlu0 %1194  ;;  %v1335_v50 = vsel %vm8801_vm3, %v1311_v56, %v1217_v16  ;;  %v1449_v53 = vadd.f32 %v1425_v18, %v10558_v35 }
 0x300   : > { %v1427_v30 = vmul.f32 %v1403_v25, %v1331_v46  ;;  %v1429_v31 = vmul.f32 %v1405_v36, %v1333_v26  ;;  %v1209_v57 = vsel %vm1206_vm0, %v8631_v63, %v1195_v34  ;;  %v1225_v55 = vsel %vm1206_vm0, %v1195_v34, %v8627_v40  ;;  %v10559_v36 = vld [vmem:[#allocation37_spill] sm:$0xff]  ;;  %v1411_v34 = vld [vmem:[#allocation6 + $0x58] sm:$0xff] }
 0x301   : > { %v1336_v39 = vsel %vm8805_vm4, %v1312_v43, %v1209_v57  ;;  %v1270_v41 = vpop.permute.xlu1 %1269  ;;  %v1452_v25 = vadd.f32 %v1428_v60, %v8728_v13  ;;  %v10560_v63 = vsub.f32 0.0, %v8840_v32 }
 0x302   : > { %v1451_v42 = vadd.f32 %v1427_v30, %v10559_v36  ;;  %v1432_v10 = vmul.f32 %v1408_v22, %v1336_v39  ;;  %v1283_v16 = vsel %vm1279_vm1, %v8637_v2, %v1270_v41  ;;  %v1299_v18 = vsel %vm1279_vm1, %v1270_v41, %v8625_v61  ;;  %v1409_v61 = vld [vmem:[#allocation6 + $0x48] sm:$0xff]  ;;  %v1410_v39 = vld [vmem:[#allocation6 + $0x50] sm:$0xff] }
 0x303   : > { %v1334_v40 = vsel %vm8797_vm2, %v10560_v63, %v1225_v55  ;;  %v1314_v48 = vsub.f32 0.0, %v1283_v16  ;;  %v1272_v13 = vpop.permute.xlu0 %1271  ;;  %v1453_v56 = vadd.f32 %v1429_v31, %v8813_v9  ;;  %v8998_v1 = vpack.c.bf16 %v1452_v25, %v1449_v53 }
 0x304   : > { %v1284_v32 = vsel %vm1279_vm1, %v8651_v11, %v1272_v13  ;;  %v1300_v60 = vsel %vm1279_vm1, %v1272_v13, %v8639_v3  ;;  %v1472_v43 = vpack.c.bf16 %v1451_v42, %v1448_v59  ;;  %v1431_v2 = vmul.f32 %v1407_v8, %v1335_v50  ;;  %v1414_v8 = vld [vmem:[#allocation6 + $0x70] sm:$0xff] }
 0x305   : > { %v1430_v46 = vmul.f32 %v1406_v51, %v1334_v40  ;;  %v1315_v26 = vsub.f32 0.0, %v1299_v18  ;;  %v1317_v22 = vsub.f32 0.0, %v1284_v32  ;;  %v1197_v30 = vpop.permute.xlu1 %1196  ;;  %v1474_v57 = vpack.c.bf16 %v1453_v56, %v1450_v4 }
 0x306   : > { %v1338_v9 = vsel %vm8801_vm3, %v1314_v48, %v8877_v17  ;;  %v1318_v31 = vsub.f32 0.0, %v1300_v60  ;;  %v1210_v11 = vsel %vm1206_vm0, %v8633_v0, %v1197_v30  ;;  %v1226_v3 = vsel %vm1206_vm0, %v1197_v30, %v8629_v62  ;;  %6617 = vmatprep.mubr.msk.bf16.mxu0 %vm1516_vm5, %v1472_v43  ;;  %v1412_v0 = vld [vmem:[#allocation6 + $0x60] sm:$0xff]  ;;  %v1417_v60 = vld [vmem:[#allocation6 + $0x88] sm:$0xff] }
 0x307   : > { %v10561_v59 = vsub.f32 0.0, %v8863_v44  ;;  %v1339_v55 = vsel %vm8805_vm4, %v1315_v26, %v1210_v11  ;;  %2036 = vrot.lane.b32.xlu0 %v1474_v57, %s8037_s27  ;;  %6737 = vmatprep.subr.msk.bf16.mxu0 %vm1516_vm5, %v1474_v57  ;;  %v1199_v17 = vpop.permute.xlu0 %1198  ;;  %v1542_v50 = vsel %vm1516_vm5, %v1474_v57, 0  ;;  %v1456_v62 = vadd.f32 %v1432_v10, %v8816_v33  ;;  %v10564_v26 = vld [vmem:[#allocation39_spill] sm:$0xff] }
 0x308   : > { %v1435_v44 = vmul.f32 %v1411_v34, %v1339_v55  ;;  %v1211_v35 = vsel %vm1206_vm0, %v10545_v20, %v1199_v17  ;;  %v1227_v53 = vsel %vm1206_vm0, %v1199_v17, %v10546_v23  ;;  %6610 = vmatpush3.bf16.xpose.msra.mxu0 %v1542_v50  ;;  %v1341_v25 = vsel %vm8801_vm3, %v1317_v22, %v8905_v21  ;;  %v10565_v34 = vld [vmem:[#allocation25_spill] sm:$0xff]  ;;  %v1420_v55 = vld [vmem:[#allocation6 + $0xa0] sm:$0xff] }
 0x309   : > { %v1337_v4 = vsel %vm8797_vm2, %v10561_v59, %v1226_v3  ;;  %v10562_v36 = vsub.f32 0.0, %v8884_v45  ;;  %v1342_v42 = vsel %vm8805_vm4, %v1318_v31, %v1211_v35  ;;  %v1274_v51 = vpop.permute.xlu1 %1273  ;;  %v1454_v20 = vadd.f32 %v1430_v46, %v8731_v15  ;;  %v1418_v3 = vld [vmem:[#allocation6 + $0x90] sm:$0xff] }
 0x30a   : > { %v1433_v41 = vmul.f32 %v1409_v61, %v1337_v4  ;;  %v1285_v23 = vsel %vm1279_vm1, %v8653_v12, %v1274_v51  ;;  %v1301_v21 = vsel %vm1279_vm1, %v1274_v51, %v10543_v24  ;;  %v1434_v40 = vmul.f32 %v1410_v39, %v1338_v9 }
 0x30b   : > { %v1340_v33 = vsel %vm8797_vm2, %v10562_v36, %v1227_v53  ;;  %v1320_v45 = vsub.f32 0.0, %v1285_v23  ;;  %1508 = vrot.lane.b32.xlu0 %v1472_v43, %s8037_s27  ;;  %v1276_v10 = vpop.permute.xlu0 %1275  ;;  %v1459_v16 = vadd.f32 %v1435_v44, %v8825_v5  ;;  %v1455_v15 = vadd.f32 %v1431_v2, %v8734_v49  ;;  %v1415_v5 = vld [vmem:[#allocation6 + $0x78] sm:$0xff]  ;;  %v1416_v44 = vld [vmem:[#allocation6 + $0x80] sm:$0xff] }
 0x30c   : > { %v1436_v63 = vmul.f32 %v1412_v0, %v1340_v33  ;;  %v1457_v18 = vadd.f32 %v1433_v41, %v8737_v14  ;;  %v1438_v48 = vmul.f32 %v1414_v8, %v1342_v42  ;;  %v1321_v13 = vsub.f32 0.0, %v1301_v21  ;;  %v10567_v0 = vld [vmem:[#allocation28_spill] sm:$0xff]  ;;  %v10571_v36 = vld [vmem:[#allocation31_spill] sm:$0xff] }
 0x30d   : > { %v1286_v12 = vsel %vm1279_vm1, %v10547_v19, %v1276_v10  ;;  %v1302_v24 = vsel %vm1279_vm1, %v1276_v10, %v10548_v58  ;;  %v1344_v56 = vsel %vm8801_vm3, %v1320_v45, %v8926_v29  ;;  %v1201_v14 = vpop.permute.xlu1 %1200  ;;  %v1477_v43 = vpack.c.bf16 %v1459_v16, %v1456_v62  ;;  %v10563_v19 = vld [vmem:[#allocation27_spill] sm:$0xff]  ;;  %v1413_v29 = vld [vmem:[#allocation6 + $0x68] sm:$0xff]  ;;  %v10572_v42 = vld [vmem:[#allocation48_spill] sm:$0xff] }
 0x30e   : > { %v1323_v32 = vsub.f32 0.0, %v1286_v12  ;;  %v1460_v49 = vadd.f32 %v1436_v63, %v8748_v6  ;;  %v1212_v2 = vsel %vm1206_vm0, %v10552_v27, %v1201_v14  ;;  %v1228_v46 = vsel %vm1206_vm0, %v1201_v14, %v10563_v19  ;;  %v1422_v10 = vld [vmem:[#allocation6 + $0xb0] sm:$0xff] }
 0x30f   : > { %v9068_v58 = vpack.c.bf16 %v1457_v18, %v1454_v20  ;;  %v1458_v22 = vadd.f32 %v1434_v40, %v10564_v26  ;;  %v1324_v61 = vsub.f32 0.0, %v1302_v24  ;;  %v10566_v30 = vsub.f32 0.0, %v10565_v34  ;;  %2038 = vrot.lane.b32.xlu1 %v1477_v43, %s8037_s27  ;;  %6738 = vmatprep.subr.msk.bf16.mxu0 %vm1516_vm5, %v1477_v43  ;;  %v1203_v27 = vpop.permute.xlu0 %1202  ;;  %v1419_v20 = vld [vmem:[#allocation6 + $0x98] sm:$0xff]  ;;  %v10574_v40 = vld [vmem:[#allocation49_spill] sm:$0xff]  ;;  %v10578_v26 = vld [vmem:[#allocation42_spill] sm:$0xff] }
 0x310   : > { %v1345_v6 = vsel %vm8805_vm4, %v1321_v13, %v1212_v2  ;;  %v1545_v9 = vsel %vm1516_vm5, %v1477_v43, 0  ;;  %v1213_v59 = vsel %vm1206_vm0, %v8783_v47, %v1203_v27  ;;  %v1229_v4 = vsel %vm1206_vm0, %v1203_v27, %v10554_v38  ;;  %v10569_v47 = vld [vmem:[#allocation36_spill] sm:$0xff]  ;;  %v10570_v38 = vld [vmem:[#allocation38_spill] sm:$0xff]  ;;  %v1421_v24 = vld [vmem:[#allocation6 + $0xa8] sm:$0xff] }
 0x311   : > { %v1343_v57 = vsel %vm8797_vm2, %v10566_v30, %v1228_v46  ;;  %v1441_v11 = vmul.f32 %v1417_v60, %v1345_v6  ;;  %6612 = vmatpush3.bf16.xpose.msra.mxu0 %v1545_v9  ;;  %v10568_v17 = vsub.f32 0.0, %v10567_v0  ;;  %v1348_v62 = vsel %vm8805_vm4, %v1324_v61, %v1213_v59  ;;  %v1278_v39 = vpop.permute.xlu1 %1277  ;;  %v10575_v13 = vld [vmem:[#allocation40_spill] sm:$0xff]  ;;  %v10576_v2 = vld [vmem:[#allocation47_spill] sm:$0xff]  ;;  %v10577_v46 = vld [vmem:[#allocation33_spill] sm:$0xff] }
 0x312   : > { %v1439_v31 = vmul.f32 %v1415_v5, %v1343_v57  ;;  %v9092_v41 = vpack.c.bf16 %v1458_v22, %v1455_v15  ;;  %v1437_v35 = vmul.f32 %v1413_v29, %v1341_v25  ;;  %v1347_v53 = vsel %vm8801_vm3, %v1323_v32, %v10569_v47  ;;  %v10573_v25 = vld [vmem:[#allocation41_spill] sm:$0xff]  ;;  %v1423_v32 = vld [vmem:[#allocation6 + $0xb8] sm:$0xff]  ;;  %v10579_v61 = vld [vmem:[#allocation26_spill] sm:$0xff] }
 0x313   : > { %v1346_v50 = vsel %vm8797_vm2, %v10568_v17, %v1229_v4  ;;  %v1287_v8 = vsel %vm1279_vm1, %v10570_v38, %v1278_v39  ;;  %v1303_v33 = vsel %vm1279_vm1, %v1278_v39, %v10571_v36  ;;  %v1462_v51 = vadd.f32 %v1438_v48, %v10572_v42  ;;  %1510 = vrot.lane.b32.xlu1 %v9068_v58, %s8037_s27  ;;  %v10581_v30 = vld [vmem:[#allocation44_spill] sm:$0xff]  ;;  %v10582_v9 = vld [vmem:[#allocation46_spill] sm:$0xff] }
 0x314   : > { %v1442_v63 = vmul.f32 %v1418_v3, %v1346_v50  ;;  %v1326_v23 = vsub.f32 0.0, %v1287_v8  ;;  %v1463_v21 = vadd.f32 %v1439_v31, %v10573_v25  ;;  %v1465_v45 = vadd.f32 %v1441_v11, %v10574_v40  ;;  %v10585_v59 = vld [vmem:[#allocation50_spill] sm:$0xff] }
 0x315   : > { %v1444_v16 = vmul.f32 %v1420_v55, %v1348_v62  ;;  %v1327_v18 = vsub.f32 0.0, %v1303_v33  ;;  %v1440_v15 = vmul.f32 %v1416_v44, %v1344_v56  ;;  %v1461_v12 = vadd.f32 %v1437_v35, %v10575_v13  ;;  %v1205_v5 = vpop.permute.xlu1 %1204  ;;  %v10586_v55 = vld [vmem:[#allocation51_spill] sm:$0xff] }
 0x316   : > { %v1350_v48 = vsel %vm8801_vm3, %v1326_v23, %v8952_v54  ;;  %v1478_v60 = vpack.c.bf16 %v1463_v21, %v1460_v49  ;;  %v1480_v14 = vpack.c.bf16 %v1465_v45, %v1462_v51  ;;  %v1443_v43 = vmul.f32 %v1419_v20, %v1347_v53 }
 0x317   : > { %v1214_v19 = vsel %vm1206_vm0, %v10576_v2, %v1205_v5  ;;  %v1230_v56 = vsel %vm1206_vm0, %v1205_v5, %v10577_v46  ;;  %v1464_v22 = vadd.f32 %v1440_v15, %v10578_v26  ;;  %v1446_v29 = vmul.f32 %v1422_v10, %v1350_v48 }
 0x318   : > { %v10580_v7 = vsub.f32 0.0, %v10579_v61  ;;  %v1351_v49 = vsel %vm8805_vm4, %v1327_v18, %v1214_v19  ;;  %1512 = vrot.lane.b32.xlu1 %v1478_v60, %s8037_s27  ;;  %2040 = vrot.lane.b32.xlu0 %v1480_v14, %s8037_s27  ;;  %v1548_v34 = vsel %vm1516_vm5, %v1480_v14, 0  ;;  %v1467_v37 = vadd.f32 %v1443_v43, %v10581_v30  ;;  %v9179_v18 = vld [vmem:[%s10414_s3] sm:$0xff]  ;;  %v9217_v61 = vld [vmem:[%s10414_s3 + $0x30] sm:$0xff] }
 0x319   : > { %v1447_v6 = vmul.f32 %v1423_v32, %v1351_v49  ;;  %6739 = vmatprep.subr.msk.bf16.mxu0 %vm1516_vm5, %v1480_v14  ;;  %v1479_v27 = vpack.c.bf16 %v1464_v22, %v1461_v12  ;;  %v1470_v31 = vadd.f32 %v1446_v29, %v10582_v9  ;;  %v1466_v11 = vadd.f32 %v1442_v63, %v10583_v52  ;;  %v9187_v12 = vld [vmem:[%s10414_s3 + $0x8] sm:$0xff]  ;;  %v9200_v14 = vld [vmem:[%s10414_s3 + $0x18] sm:$0xff] }
 0x31a   : > { %v1349_v54 = vsel %vm8797_vm2, %v10580_v7, %v1230_v56  ;;  %6614 = vmatpush3.bf16.xpose.msra.mxu0 %v1548_v34  ;;  %v1468_v4 = vadd.f32 %v1444_v16, %v10585_v59  ;;  %v9212_v29 = vld [vmem:[%s10414_s3 + $0x38] sm:$0xff]  ;;  %v9222_v34 = vld [vmem:[%s10414_s3 + $0x28] sm:$0xff] }
 0x31b   : > { %v1445_v57 = vmul.f32 %v1421_v24, %v1349_v54  ;;  %v1471_v0 = vadd.f32 %v1447_v6, %v10586_v55  ;;  %v1482_v17 = vpack.c.bf16 %v1470_v31, %v1467_v37 }
 0x31d   : > { %v1469_v3 = vadd.f32 %v1445_v57, %v10584_v28  ;;  %v1483_v62 = vpack.c.bf16 %v1471_v0, %v1468_v4  ;;  %v9254_v4 = vld [vmem:[%s10414_s3 + $0x50] sm:$0xff] }
 0x31f   : > { %v1481_v50 = vpack.c.bf16 %v1469_v3, %v1466_v11  ;;  %2042 = vrot.lane.b32.xlu1 %v1483_v62, %s8037_s27  ;;  %v1551_v39 = vsel %vm1516_vm5, %v1483_v62, 0  ;;  %6740 = vmatprep.subr.msk.bf16.mxu0 %vm1516_vm5, %v1483_v62  ;;  %v9259_v62 = vld [vmem:[%s10414_s3 + $0x58] sm:$0xff] }
 0x321   : > { %1514 = vrot.lane.b32.xlu0 %v1481_v50, %s8037_s27 }
 0x322   : > { %6616 = vmatpush3.bf16.xpose.msra.mxu0 %v1551_v39  ;;  %v9264_v39 = vld [vmem:[%s10414_s3 + $0x40] sm:$0xff] }
 0x323   : > { %2026 = vrot.lane.b32.xlu1 %v9092_v41, %s8037_s27 }
 0x325   : > { %2024 = vrot.lane.b32.xlu0 %v8998_v1, %s8037_s27 }
 0x327   : > { %2030 = vrot.lane.b32.xlu1 %v1482_v17, %s8037_s27 }
 0x329   : > { %2028 = vrot.lane.b32.xlu0 %v1479_v27, %s8037_s27  ;;  %6618 = vmatmul.mubr.msk.bf16.vlgmr.msra.gmra.mrb[32].mxu0 %vm1516_vm5, %v9068_v58 }
 0x32a   : > { %6621 = vmatprep.mubr.msk.bf16.mxu0 %vm1516_vm5, %v1478_v60 }
 0x331   : > { %6622 = vmatmul.mubr.msk.bf16.gmra.mrb[36].mxu0 %vm1516_vm5, %v1481_v50 }
 0x379   : > { %v2037_v44 = vpop.permute.xlu0 %2036 }
 0x37a   : > { %6741 = vmatprep.subr.msk.bf16.mxu0 %vm1516_vm5, %v2037_v44  ;;  %v2069_v35 = vsel %vm1516_vm5, %v2037_v44, 0 }
 0x37b   : > { %6658 = vmatpush3.bf16.xpose.msra.mxu0 %v2069_v35 }
 0x37d   : > { %v1509_v47 = vpop.permute.xlu0 %1508 }
 0x37e   : > { %6625 = vmatprep.mubr.msk.bf16.mxu0 %vm1516_vm5, %v1509_v47 }
 0x381   : > { %v2039_v53 = vpop.permute.xlu1 %2038 }
 0x382   : > { %6742 = vmatprep.subr.msk.bf16.mxu0 %vm1516_vm5, %v2039_v53  ;;  %v2072_v38 = vsel %vm1516_vm5, %v2039_v53, 0 }
 0x383   : > { %6660 = vmatpush3.bf16.xpose.msra.mxu0 %v2072_v38  ;;  %v9272_v38 = vld [vmem:[%s10414_s3 + $0x48] sm:$0xff] }
 0x385   : > { %v1511_v58 = vpop.permute.xlu1 %1510 }
 0x386   : > { %6626 = vmatmul.mubr.msk.bf16.gmra.mrb[40].mxu0 %vm1516_vm5, %v1511_v58 }
 0x38a   : > { %v1513_v8 = vpop.permute.xlu1 %1512  ;;  %v2041_v36 = vpop.permute.xlu0 %2040 }
 0x38b   : > { %6629 = vmatprep.mubr.msk.bf16.mxu0 %vm1516_vm5, %v1513_v8  ;;  %6743 = vmatprep.subr.msk.bf16.mxu0 %vm1516_vm5, %v2041_v36  ;;  %v2075_v33 = vsel %vm1516_vm5, %v2041_v36, 0 }
 0x38c   : > { %6662 = vmatpush3.bf16.xpose.msra.mxu0 %v2075_v33 }
 0x391   : > { %v2043_v42 = vpop.permute.xlu1 %2042 }
 0x392   : > { %6744 = vmatprep.subr.msk.bf16.mxu0 %vm1516_vm5, %v2043_v42  ;;  %v2078_v20 = vsel %vm1516_vm5, %v2043_v42, 0 }
 0x393   : > { %v1515_v51 = vpop.permute.xlu0 %1514 }
 0x394   : > { %6630 = vmatmul.mubr.msk.bf16.gmra.mrb[44].mxu0 %vm1516_vm5, %v1515_v51 }
 0x395   : > { %6665 = vmatprep.mubr.msk.bf16.mxu0 %vm1516_vm5, %v8998_v1  ;;  %6664 = vmatpush3.bf16.xpose.msra.mxu0 %v2078_v20  ;;  %v2027_v23 = vpop.permute.xlu1 %2026 }
 0x397   : > { %v2025_v63 = vpop.permute.xlu0 %2024 }
 0x399   : > { %v2031_v21 = vpop.permute.xlu1 %2030 }
 0x39b   : > { %v2029_v25 = vpop.permute.xlu0 %2028 }
 0x39c   : > { %6666 = vmatmul.mubr.msk.bf16.vlgmr.msra.gmra.mrb[48].mxu0 %vm1516_vm5, %v9092_v41  ;;  %v9174_v41 = vld [vmem:[%s10414_s3 + $0x10] sm:$0xff] }
 0x39d   : > { %6669 = vmatprep.mubr.msk.bf16.mxu0 %vm1516_vm5, %v1479_v27  ;;  %v9235_v27 = vld [vmem:[%s10414_s3 + $0x20] sm:$0xff] }
 0x3a4   : > { %6670 = vmatmul.mubr.msk.bf16.gmra.mrb[52].mxu0 %vm1516_vm5, %v1482_v17 }
 0x3a5   : > { %6673 = vmatprep.mubr.msk.bf16.mxu0 %vm1516_vm5, %v2025_v63 }
 0x3ac   : > { %6674 = vmatmul.mubr.msk.bf16.gmra.mrb[56].mxu0 %vm1516_vm5, %v2027_v23  ;;  %v9294_v23 = vld [vmem:[%s10414_s3 + $0x70] sm:$0xff] }
 0x3ad   : > { %6677 = vmatprep.mubr.msk.bf16.mxu0 %vm1516_vm5, %v2029_v25 }
 0x3b4   : > { %6678 = vmatmul.mubr.msk.bf16.gmra.mrb[60].mxu0 %vm1516_vm5, %v2031_v21 }
 0x3fc   : > { %v6619_v1 = vpop.f32.mrb[32].mxu0 }
 0x3fd   : > { %v1652_v40 = vmul.f32 0.125, %v6619_v1  ;;  %v1587_v45 = vpop.f32.mrb[33].mxu0 }
 0x3fe   : > { %v1650_v10 = vmul.f32 0.125, %v1587_v45  ;;  %v6620_v16 = vpop.f32.mrb[34].mxu0  ;;  %v9299_v45 = vld [vmem:[%s10414_s3 + $0x78] sm:$0xff] }
 0x3ff   : > { %v1590_v15 = vpop.f32.mrb[35].mxu0  ;;  %v9182_v13 = vadd.f32 %v1652_v40, %v9174_v41  ;;  %v1653_v24 = vmul.f32 0.125, %v6620_v16 }
 0x400   : > { %v1651_v48 = vmul.f32 0.125, %v1590_v15  ;;  %v9192_v5 = vadd.f32 %v1650_v10, %v9179_v18  ;;  %v9304_v10 = vld [vmem:[%s10414_s3 + $0x60] sm:$0xff] }
 0x401   : > { %v1688_v32 = vsel %vm1516_vm5, %v9182_v13, -inf  ;;  %v9207_v26 = vadd.f32 %v1653_v24, %v9200_v14 }
 0x402   : > { %1689 = vmax.xlane.f32.xlu0 %v1688_v32  ;;  %v9195_v60 = vadd.f32 %v1651_v48, %v9187_v12  ;;  %v1682_v56 = vsel %vm1516_vm5, %v9192_v5, -inf  ;;  %v9312_v32 = vld [vmem:[%s10414_s3 + $0x68] sm:$0xff] }
 0x403   : > { %v1691_v37 = vsel %vm1516_vm5, %v9207_v26, -inf }
 0x404   : > { %v6623_v43 = vpop.f32.mrb[36].mxu0  ;;  %v1685_v2 = vsel %vm1516_vm5, %v9195_v60, -inf }
 0x405   : > { %v1656_v19 = vmul.f32 0.125, %v6623_v43  ;;  %1686 = vmax.xlane.f32.xlu1 %v1685_v2  ;;  %v1603_v46 = vpop.f32.mrb[37].mxu0 }
 0x406   : > { %1683 = vmax.xlane.f32.xlu0 %v1682_v56  ;;  %v6624_v22 = vpop.f32.mrb[38].mxu0  ;;  %v1654_v30 = vmul.f32 0.125, %v1603_v46 }
 0x407   : > { %v1657_v7 = vmul.f32 0.125, %v6624_v22  ;;  %v1606_v54 = vpop.f32.mrb[39].mxu0  ;;  %v9230_v6 = vadd.f32 %v1656_v19, %v9217_v61 }
 0x408   : > { %v1655_v49 = vmul.f32 0.125, %v1606_v54  ;;  %v9245_v11 = vadd.f32 %v1654_v30, %v9235_v27 }
 0x409   : > { %v9227_v57 = vadd.f32 %v1657_v7, %v9212_v29  ;;  %v1700_v52 = vsel %vm1516_vm5, %v9230_v6, -inf }
 0x40a   : > { %1692 = vmax.xlane.f32.xlu0 %v1691_v37  ;;  %v9240_v31 = vadd.f32 %v1655_v49, %v9222_v34  ;;  %v1694_v3 = vsel %vm1516_vm5, %v9245_v11, -inf }
 0x40b   : > { %v1703_v9 = vsel %vm1516_vm5, %v9227_v57, -inf }
 0x40c   : > { %1704 = vmax.xlane.f32.xlu1 %v1703_v9  ;;  %v1697_v28 = vsel %vm1516_vm5, %v9240_v31, -inf }
 0x40e   : > { %1701 = vmax.xlane.f32.xlu0 %v1700_v52 }
 0x410   : > { %1698 = vmax.xlane.f32.xlu1 %v1697_v28 }
 0x412   : > { %1695 = vmax.xlane.f32.xlu0 %v1694_v3 }
 0x459   : > { %v6627_v59 = vpop.f32.mrb[40].mxu0 }
 0x45a   : > { %v1660_v55 = vmul.f32 0.125, %v6627_v59  ;;  %v1619_v0 = vpop.f32.mrb[41].mxu0 }
 0x45b   : > { %v1658_v17 = vmul.f32 0.125, %v1619_v0  ;;  %v6628_v50 = vpop.f32.mrb[42].mxu0 }
 0x45c   : > { %v1661_v44 = vmul.f32 0.125, %v6628_v50  ;;  %v1622_v35 = vpop.f32.mrb[43].mxu0  ;;  %v9267_v47 = vadd.f32 %v1660_v55, %v9254_v4 }
 0x45d   : > { %v1659_v53 = vmul.f32 0.125, %v1622_v35  ;;  %v9280_v36 = vadd.f32 %v1658_v17, %v9264_v39 }
 0x45e   : > { %v1712_v58 = vsel %vm1516_vm5, %v9267_v47, -inf  ;;  %v9277_v8 = vadd.f32 %v1661_v44, %v9259_v62 }
 0x45f   : > { %1713 = vmax.xlane.f32.xlu0 %v1712_v58  ;;  %v9285_v42 = vadd.f32 %v1659_v53, %v9272_v38  ;;  %v1706_v51 = vsel %vm1516_vm5, %v9280_v36, -inf }
 0x460   : > { %v1715_v33 = vsel %vm1516_vm5, %v9277_v8, -inf }
 0x461   : > { %1716 = vmax.xlane.f32.xlu1 %v1715_v33  ;;  %v1709_v20 = vsel %vm1516_vm5, %v9285_v42, -inf }
 0x463   : > { %1707 = vmax.xlane.f32.xlu0 %v1706_v51 }
 0x465   : > { %1710 = vmax.xlane.f32.xlu1 %v1709_v20 }
 0x467   : > { %v6631_v63 = vpop.f32.mrb[44].mxu0 }
 0x468   : > { %v1664_v25 = vmul.f32 0.125, %v6631_v63  ;;  %v1635_v21 = vpop.f32.mrb[45].mxu0 }
 0x469   : > { %v1662_v1 = vmul.f32 0.125, %v1635_v21  ;;  %v6632_v40 = vpop.f32.mrb[46].mxu0 }
 0x46a   : > { %v1665_v16 = vmul.f32 0.125, %v6632_v40  ;;  %v1638_v15 = vpop.f32.mrb[47].mxu0  ;;  %v9307_v48 = vadd.f32 %v1664_v25, %v9294_v23 }
 0x46b   : > { %v1663_v24 = vmul.f32 0.125, %v1638_v15  ;;  %v9320_v19 = vadd.f32 %v1662_v1, %v9304_v10 }
 0x46c   : > { %v1724_v43 = vsel %vm1516_vm5, %v9307_v48, -inf  ;;  %v9317_v2 = vadd.f32 %v1665_v16, %v9299_v45 }
 0x46d   : > { %1725 = vmax.xlane.f32.xlu0 %v1724_v43  ;;  %v9325_v56 = vadd.f32 %v1663_v24, %v9312_v32  ;;  %v1718_v7 = vsel %vm1516_vm5, %v9320_v19, -inf }
 0x46e   : > { %v1727_v46 = vsel %vm1516_vm5, %v9317_v2, -inf }
 0x46f   : > { %1728 = vmax.xlane.f32.xlu1 %v1727_v46  ;;  %v6667_v22 = vpop.f32.mrb[48].mxu0  ;;  %v1721_v9 = vsel %vm1516_vm5, %v9325_v56, -inf }
 0x470   : > { %v2179_v54 = vmul.f32 0.125, %v6667_v22  ;;  %v2114_v49 = vpop.f32.mrb[49].mxu0 }
 0x471   : > { %1719 = vmax.xlane.f32.xlu0 %v1718_v7  ;;  %v2177_v30 = vmul.f32 0.125, %v2114_v49  ;;  %v6668_v37 = vpop.f32.mrb[50].mxu0 }
 0x472   : > { %v2180_v52 = vmul.f32 0.125, %v6668_v37  ;;  %v2117_v28 = vpop.f32.mrb[51].mxu0  ;;  %v9332_v3 = vadd.f32 %v2179_v54, %v9174_v41 }
 0x473   : > { %1722 = vmax.xlane.f32.xlu1 %v1721_v9  ;;  %v2178_v59 = vmul.f32 0.125, %v2117_v28  ;;  %v9340_v17 = vadd.f32 %v2177_v30, %v9179_v18 }
 0x474   : > { %v2215_v55 = vsel %vm1516_vm5, %v9332_v3, -inf  ;;  %v9337_v0 = vadd.f32 %v2180_v52, %v9200_v14 }
 0x475   : > { %2216 = vmax.xlane.f32.xlu0 %v2215_v55  ;;  %v9345_v44 = vadd.f32 %v2178_v59, %v9187_v12  ;;  %v2209_v58 = vsel %vm1516_vm5, %v9340_v17, -inf }
 0x476   : > { %v2218_v50 = vsel %vm1516_vm5, %v9337_v0, -inf }
 0x477   : > { %v6671_v35 = vpop.f32.mrb[52].mxu0  ;;  %2219 = vmax.xlane.f32.xlu1 %v2218_v50  ;;  %v2212_v20 = vsel %vm1516_vm5, %v9345_v44, -inf }
 0x478   : > { %v2183_v41 = vmul.f32 0.125, %v6671_v35  ;;  %v2130_v53 = vpop.f32.mrb[53].mxu0 }
 0x479   : > { %v2181_v33 = vmul.f32 0.125, %v2130_v53  ;;  %2210 = vmax.xlane.f32.xlu0 %v2209_v58  ;;  %v6672_v14 = vpop.f32.mrb[54].mxu0 }
 0x47a   : > { %v2184_v51 = vmul.f32 0.125, %v6672_v14  ;;  %v2133_v18 = vpop.f32.mrb[55].mxu0  ;;  %v9352_v63 = vadd.f32 %v2183_v41, %v9217_v61 }
 0x47b   : > { %v2182_v12 = vmul.f32 0.125, %v2133_v18  ;;  %2213 = vmax.xlane.f32.xlu1 %v2212_v20  ;;  %v9360_v1 = vadd.f32 %v2181_v33, %v9235_v27 }
 0x47c   : > { %v2227_v25 = vsel %vm1516_vm5, %v9352_v63, -inf  ;;  %v9357_v21 = vadd.f32 %v2184_v51, %v9212_v29 }
 0x47d   : > { %2228 = vmax.xlane.f32.xlu0 %v2227_v25  ;;  %v9365_v16 = vadd.f32 %v2182_v12, %v9222_v34  ;;  %v2221_v43 = vsel %vm1516_vm5, %v9360_v1, -inf }
 0x47e   : > { %v2230_v40 = vsel %vm1516_vm5, %v9357_v21, -inf }
 0x47f   : > { %2231 = vmax.xlane.f32.xlu1 %v2230_v40  ;;  %v6675_v61 = vpop.f32.mrb[56].mxu0  ;;  %v2224_v7 = vsel %vm1516_vm5, %v9365_v16, -inf }
 0x480   : > { %v2187_v15 = vmul.f32 0.125, %v6675_v61  ;;  %v2146_v24 = vpop.f32.mrb[57].mxu0 }
 0x481   : > { %v2185_v46 = vmul.f32 0.125, %v2146_v24  ;;  %2222 = vmax.xlane.f32.xlu0 %v2221_v43  ;;  %v6676_v29 = vpop.f32.mrb[58].mxu0 }
 0x482   : > { %v2188_v22 = vmul.f32 0.125, %v6676_v29  ;;  %v2149_v27 = vpop.f32.mrb[59].mxu0  ;;  %v9372_v54 = vadd.f32 %v2187_v15, %v9254_v4  ;;  %v10587_v29 = vld [vmem:[#allocation21_spill] sm:$0xff] }
 0x483   : > { %v2186_v34 = vmul.f32 0.125, %v2149_v27  ;;  %2225 = vmax.xlane.f32.xlu1 %v2224_v7  ;;  %v9380_v37 = vadd.f32 %v2185_v46, %v9264_v39 }
 0x484   : > { %v2239_v49 = vsel %vm1516_vm5, %v9372_v54, -inf  ;;  %v9377_v30 = vadd.f32 %v2188_v22, %v9259_v62 }
 0x485   : > { %2240 = vmax.xlane.f32.xlu0 %v2239_v49  ;;  %v9385_v52 = vadd.f32 %v2186_v34, %v9272_v38  ;;  %v2233_v55 = vsel %vm1516_vm5, %v9380_v37, -inf }
 0x486   : > { %v2242_v9 = vsel %vm1516_vm5, %v9377_v30, -inf }
 0x487   : > { %2243 = vmax.xlane.f32.xlu1 %v2242_v9  ;;  %v6679_v4 = vpop.f32.mrb[60].mxu0  ;;  %v2236_v53 = vsel %vm1516_vm5, %v9385_v52, -inf }
 0x488   : > { %v2191_v28 = vmul.f32 0.125, %v6679_v4  ;;  %v2162_v59 = vpop.f32.mrb[61].mxu0 }
 0x489   : > { %v2189_v50 = vmul.f32 0.125, %v2162_v59  ;;  %2234 = vmax.xlane.f32.xlu0 %v2233_v55  ;;  %v6680_v62 = vpop.f32.mrb[62].mxu0 }
 0x48a   : > { %v9390_v39 = vadd.f32 %v2191_v28, %v9294_v23  ;;  %v2192_v35 = vmul.f32 0.125, %v6680_v62  ;;  %v2165_v41 = vpop.f32.mrb[63].mxu0 }
 0x48b   : > { %v9395_v38 = vadd.f32 %v2189_v50, %v9304_v10  ;;  %v2190_v58 = vmul.f32 0.125, %v2165_v41  ;;  %2237 = vmax.xlane.f32.xlu1 %v2236_v53 }
 0x48c   : > { %v9398_v33 = vadd.f32 %v2192_v35, %v9299_v45  ;;  %v2251_v41 = vsel %vm1516_vm5, %v9390_v39, -inf }
 0x48d   : > { %v9401_v14 = vadd.f32 %v2190_v58, %v9312_v32 }
 0x48e   : > { %v2254_v23 = vsel %vm1516_vm5, %v9398_v33, -inf }
 0x48f   : > { %2255 = vmax.xlane.f32.xlu1 %v2254_v23  ;;  %v1690_v51 = vpop.xlane.xlu0 %1689  ;;  %v2248_v18 = vsel %vm1516_vm5, %v9401_v14, -inf }
 0x492   : > { %v1687_v20 = vpop.xlane.xlu1 %1686 }
 0x493   : > { %2249 = vmax.xlane.f32.xlu1 %v2248_v18  ;;  %v1684_v10 = vpop.xlane.xlu0 %1683  ;;  %v1731_v12 = vsub.f32 %v9195_v60, %v1687_v20 }
 0x494   : > { %v1730_v28 = vsub.f32 %v9192_v5, %v1684_v10  ;;  %v2245_v5 = vsel %vm1516_vm5, %v9395_v38, -inf }
 0x495   : > { %v1748_v61 = vmul.f32 1.442695, %v1731_v12 }
 0x496   : > { %v1746_v55 = vmul.f32 1.442695, %v1730_v28 }
 0x497   : > { %v1693_v25 = vpop.xlane.xlu0 %1692 }
 0x498   : > { %v1733_v45 = vsub.f32 %v9207_v26, %v1693_v25 }
 0x499   : > { %v1705_v40 = vpop.xlane.xlu1 %1704 }
 0x49a   : > { %v1752_v32 = vmul.f32 1.442695, %v1733_v45  ;;  %v1737_v15 = vsub.f32 %v9227_v57, %v1705_v40 }
 0x49b   : > { %v1702_v9 = vpop.xlane.xlu0 %1701 }
 0x49c   : > { %7403 = vpow2.f32 %v1752_v32  ;;  %v1760_v43 = vmul.f32 1.442695, %v1737_v15  ;;  %v1736_v50 = vsub.f32 %v9230_v6, %v1702_v9 }
 0x49d   : > { %v1699_v24 = vpop.xlane.xlu1 %1698  ;;  %7405 = vpow2.f32 %v1748_v61 }
 0x49e   : > { %v1735_v46 = vsub.f32 %v9240_v31, %v1699_v24  ;;  %7407 = vpow2.f32 %v1760_v43  ;;  %v1732_v31 = vsub.f32 %v9182_v13, %v1690_v51  ;;  %v1758_v13 = vmul.f32 1.442695, %v1736_v50 }
 0x49f   : > { %2397 = vrot.lane.b32.xlu0 %v10587_v29, %s8037_s27  ;;  %v1696_v62 = vpop.xlane.xlu0 %1695 }
 0x4a0   : > { %v1756_v22 = vmul.f32 1.442695, %v1735_v46  ;;  %v1750_v4 = vmul.f32 1.442695, %v1732_v31  ;;  %v1734_v35 = vsub.f32 %v9245_v11, %v1696_v62 }
 0x4a2   : > { %7409 = vpow2.f32 %v1756_v22  ;;  %v1754_v53 = vmul.f32 1.442695, %v1734_v35 }
 0x4a3   : > { %7411 = vpow2.f32 %v1750_v4 }
 0x4a4   : > { %7413 = vpow2.f32 %v1746_v55 }
 0x4a5   : > { %7415 = vpow2.f32 %v1758_v13 }
 0x4a6   : > { %v9413_v60 = vpop.eup %7403  ;;  %7417 = vpow2.f32 %v1754_v53 }
 0x4a7   : > { %v1787_v26 = vsel %vm1516_vm5, %v9413_v60, 0.0  ;;  %v9417_v27 = vpop.eup %7405 }
 0x4a8   : > { %1788 = vadd.xlane.f32.xlu1 %v1787_v26  ;;  %v1781_v57 = vsel %vm1516_vm5, %v9417_v27, 0.0  ;;  %v9421_v7 = vpop.eup %7407 }
 0x4a9   : > { %v1799_v34 = vsel %vm1516_vm5, %v9421_v7, 0.0 }
 0x4ac   : > { %1782 = vadd.xlane.f32.xlu1 %v1781_v57  ;;  %v9426_v49 = vpop.eup %7409 }
 0x4ad   : > { %v1793_v59 = vsel %vm1516_vm5, %v9426_v49, 0.0  ;;  %v9437_v58 = vpop.eup %7411 }
 0x4ae   : > { %v1784_v6 = vsel %vm1516_vm5, %v9437_v58, 0.0  ;;  %v9441_v23 = vpop.eup %7413 }
 0x4af   : > { %v1778_v11 = vsel %vm1516_vm5, %v9441_v23, 0.0  ;;  %v9445_v51 = vpop.eup %7415 }
 0x4b0   : > { %1800 = vadd.xlane.f32.xlu1 %v1799_v34  ;;  %v1796_v18 = vsel %vm1516_vm5, %v9445_v51, 0.0  ;;  %v9449_v20 = vpop.eup %7417 }
 0x4b1   : > { %v1790_v10 = vsel %vm1516_vm5, %v9449_v20, 0.0 }
 0x4b4   : > { %1794 = vadd.xlane.f32.xlu1 %v1793_v59 }
 0x4be   : > { %2252 = vmax.xlane.f32.xlu0 %v2251_v41 }
 0x4c2   : > { %2246 = vmax.xlane.f32.xlu0 %v2245_v5 }
 0x4c6   : > { %1785 = vadd.xlane.f32.xlu0 %v1784_v6 }
 0x4ca   : > { %1779 = vadd.xlane.f32.xlu0 %v1778_v11 }
 0x4ce   : > { %1797 = vadd.xlane.f32.xlu0 %v1796_v18 }
 0x4d2   : > { %1791 = vadd.xlane.f32.xlu0 %v1790_v10 }
 0x4ec   : > { %v1714_v12 = vpop.xlane.xlu0 %1713 }
 0x4ed   : > { %v1740_v25 = vsub.f32 %v9267_v47, %v1714_v12 }
 0x4ee   : > { %v1717_v45 = vpop.xlane.xlu1 %1716 }
 0x4ef   : > { %v1766_v40 = vmul.f32 1.442695, %v1740_v25  ;;  %v1741_v61 = vsub.f32 %v9277_v8, %v1717_v45 }
 0x4f0   : > { %v1708_v32 = vpop.xlane.xlu0 %1707 }
 0x4f1   : > { %7419 = vpow2.f32 %v1766_v40  ;;  %v1768_v15 = vmul.f32 1.442695, %v1741_v61  ;;  %v1738_v24 = vsub.f32 %v9280_v36, %v1708_v32 }
 0x4f2   : > { %v1711_v43 = vpop.xlane.xlu1 %1710 }
 0x4f3   : > { %7421 = vpow2.f32 %v1768_v15  ;;  %v1762_v46 = vmul.f32 1.442695, %v1738_v24  ;;  %v1739_v29 = vsub.f32 %v9285_v42, %v1711_v43 }
 0x4f5   : > { %7423 = vpow2.f32 %v1762_v46  ;;  %v1764_v22 = vmul.f32 1.442695, %v1739_v29 }
 0x4f7   : > { %7425 = vpow2.f32 %v1764_v22 }
 0x4fa   : > { %v1726_v26 = vpop.xlane.xlu0 %1725 }
 0x4fb   : > { %v1744_v47 = vsub.f32 %v9307_v48, %v1726_v26  ;;  %v9459_v34 = vpop.eup %7419 }
 0x4fc   : > { %v1729_v57 = vpop.xlane.xlu1 %1728  ;;  %v1808_v42 = vsel %vm1516_vm5, %v9459_v34, 0.0 }
 0x4fd   : > { %v1774_v31 = vmul.f32 1.442695, %v1744_v47  ;;  %v1745_v8 = vsub.f32 %v9317_v2, %v1729_v57  ;;  %v9464_v28 = vpop.eup %7421  ;;  %1809 = vadd.xlane.f32.xlu0 %v1808_v42 }
 0x4fe   : > { %v1720_v9 = vpop.xlane.xlu0 %1719  ;;  %v1811_v2 = vsel %vm1516_vm5, %v9464_v28, 0.0 }
 0x4ff   : > { %7427 = vpow2.f32 %v1774_v31  ;;  %v1776_v36 = vmul.f32 1.442695, %v1745_v8  ;;  %v1742_v4 = vsub.f32 %v9320_v19, %v1720_v9  ;;  %v9469_v50 = vpop.eup %7423  ;;  %1812 = vadd.xlane.f32.xlu1 %v1811_v2 }
 0x500   : > { %v1723_v59 = vpop.xlane.xlu1 %1722  ;;  %v1802_v13 = vsel %vm1516_vm5, %v9469_v50, 0.0 }
 0x501   : > { %7429 = vpow2.f32 %v1776_v36  ;;  %v1770_v48 = vmul.f32 1.442695, %v1742_v4  ;;  %v1743_v55 = vsub.f32 %v9325_v56, %v1723_v59  ;;  %v9473_v35 = vpop.eup %7425  ;;  %1803 = vadd.xlane.f32.xlu0 %v1802_v13 }
 0x502   : > { %v2217_v19 = vpop.xlane.xlu0 %2216  ;;  %v1805_v56 = vsel %vm1516_vm5, %v9473_v35, 0.0 }
 0x503   : > { %7431 = vpow2.f32 %v1770_v48  ;;  %v1772_v62 = vmul.f32 1.442695, %v1743_v55  ;;  %v2259_v41 = vsub.f32 %v9332_v3, %v2217_v19  ;;  %1806 = vadd.xlane.f32.xlu1 %v1805_v56 }
 0x504   : > { %v2220_v53 = vpop.xlane.xlu1 %2219 }
 0x505   : > { %7433 = vpow2.f32 %v1772_v62  ;;  %v2277_v5 = vmul.f32 1.442695, %v2259_v41  ;;  %v2260_v6 = vsub.f32 %v9337_v0, %v2220_v53 }
 0x506   : > { %v2211_v11 = vpop.xlane.xlu0 %2210 }
 0x507   : > { %7435 = vpow2.f32 %v2277_v5  ;;  %v2279_v18 = vmul.f32 1.442695, %v2260_v6  ;;  %v2257_v10 = vsub.f32 %v9340_v17, %v2211_v11 }
 0x508   : > { %v2214_v25 = vpop.xlane.xlu1 %2213 }
 0x509   : > { %v9480_v12 = vpop.eup %7427  ;;  %7437 = vpow2.f32 %v2279_v18  ;;  %v2273_v3 = vmul.f32 1.442695, %v2257_v10  ;;  %v2258_v45 = vsub.f32 %v9345_v44, %v2214_v25 }
 0x50a   : > { %v1820_v40 = vsel %vm1516_vm5, %v9480_v12, 0.0  ;;  %v2229_v32 = vpop.xlane.xlu0 %2228 }
 0x50b   : > { %v9485_v61 = vpop.eup %7429  ;;  %1821 = vadd.xlane.f32.xlu0 %v1820_v40  ;;  %7439 = vpow2.f32 %v2273_v3  ;;  %v2275_v0 = vmul.f32 1.442695, %v2258_v45  ;;  %v2263_v15 = vsub.f32 %v9352_v63, %v2229_v32 }
 0x50c   : > { %v1823_v17 = vsel %vm1516_vm5, %v9485_v61, 0.0  ;;  %v2232_v43 = vpop.xlane.xlu1 %2231 }
 0x50d   : > { %v9490_v24 = vpop.eup %7431  ;;  %1824 = vadd.xlane.f32.xlu1 %v1823_v17  ;;  %7441 = vpow2.f32 %v2275_v0  ;;  %v2285_v44 = vmul.f32 1.442695, %v2263_v15  ;;  %v2264_v46 = vsub.f32 %v9357_v21, %v2232_v43 }
 0x50e   : > { %v1814_v29 = vsel %vm1516_vm5, %v9490_v24, 0.0  ;;  %v2223_v26 = vpop.xlane.xlu0 %2222 }
 0x50f   : > { %v9495_v22 = vpop.eup %7433  ;;  %1815 = vadd.xlane.f32.xlu0 %v1814_v29  ;;  %7443 = vpow2.f32 %v2285_v44  ;;  %v2287_v63 = vmul.f32 1.442695, %v2264_v46  ;;  %v2261_v47 = vsub.f32 %v9360_v1, %v2223_v26 }
 0x510   : > { %v1817_v57 = vsel %vm1516_vm5, %v9495_v22, 0.0  ;;  %v2226_v31 = vpop.xlane.xlu1 %2225 }
 0x511   : > { %1818 = vadd.xlane.f32.xlu1 %v1817_v57  ;;  %v9500_v8 = vpop.eup %7435  ;;  %7445 = vpow2.f32 %v2287_v63  ;;  %v2281_v21 = vmul.f32 1.442695, %v2261_v47  ;;  %v2262_v9 = vsub.f32 %v9365_v16, %v2226_v31  ;;  %v10588_v63 = vld [vmem:[#allocation23_spill] sm:$0xff]  ;;  %v10589_v47 = vld [vmem:[#allocation24_spill] sm:$0xff]  ;;  %v10590_v31 = vld [vmem:[#allocation22_spill] sm:$0xff] }
 0x512   : > { %v2241_v36 = vpop.xlane.xlu0 %2240  ;;  %v2311_v4 = vsel %vm1516_vm5, %v9500_v8, 0.0 }
 0x513   : > { %v9505_v42 = vpop.eup %7437  ;;  %7447 = vpow2.f32 %v2281_v21  ;;  %v2283_v59 = vmul.f32 1.442695, %v2262_v9  ;;  %v2267_v1 = vsub.f32 %v9372_v54, %v2241_v36  ;;  %2312 = vadd.xlane.f32.xlu0 %v2311_v4 }
 0x514   : > { %v2244_v48 = vpop.xlane.xlu1 %2243  ;;  %v2314_v55 = vsel %vm1516_vm5, %v9505_v42, 0.0 }
 0x515   : > { %v9510_v2 = vpop.eup %7439  ;;  %7449 = vpow2.f32 %v2283_v59  ;;  %v2293_v62 = vmul.f32 1.442695, %v2267_v1  ;;  %2315 = vadd.xlane.f32.xlu1 %v2314_v55  ;;  %v2268_v41 = vsub.f32 %v9377_v30, %v2244_v48 }
 0x516   : > { %v2235_v16 = vpop.xlane.xlu0 %2234  ;;  %v2305_v19 = vsel %vm1516_vm5, %v9510_v2, 0.0 }
 0x517   : > { %v9514_v13 = vpop.eup %7441  ;;  %7451 = vpow2.f32 %v2293_v62  ;;  %v2265_v54 = vsub.f32 %v9380_v37, %v2235_v16  ;;  %2306 = vadd.xlane.f32.xlu0 %v2305_v19  ;;  %v2295_v25 = vmul.f32 1.442695, %v2268_v41 }
 0x518   : > { %v2238_v53 = vpop.xlane.xlu1 %2237  ;;  %v2308_v56 = vsel %vm1516_vm5, %v9514_v13, 0.0 }
 0x519   : > { %v9520_v5 = vpop.eup %7443  ;;  %v2289_v6 = vmul.f32 1.442695, %v2265_v54  ;;  %2309 = vadd.xlane.f32.xlu1 %v2308_v56  ;;  %v2266_v30 = vsub.f32 %v9385_v52, %v2238_v53 }
 0x51a   : > { %v9522_v11 = vpop.permute.xlu0 %2397  ;;  %v2323_v18 = vsel %vm1516_vm5, %v9520_v5, 0.0 }
 0x51b   : > { %v9526_v10 = vpop.eup %7445  ;;  %7453 = vpow2.f32 %v2289_v6  ;;  %2324 = vadd.xlane.f32.xlu0 %v2323_v18  ;;  %6681 = vmatprep.subr.bf16.mxu1 %v9522_v11  ;;  %v2291_v32 = vmul.f32 1.442695, %v2266_v30 }
 0x51c   : > { %v2326_v37 = vsel %vm1516_vm5, %v9526_v10, 0.0  ;;  %7455 = vpow2.f32 %v2295_v25  ;;  %v2256_v57 = vpop.xlane.xlu1 %2255 }
 0x51d   : > { %v9532_v3 = vpop.eup %7447  ;;  %2327 = vadd.xlane.f32.xlu1 %v2326_v37  ;;  %7457 = vpow2.f32 %v2291_v32  ;;  %v2272_v16 = vsub.f32 %v9398_v33, %v2256_v57 }
 0x51e   : > { %v2317_v45 = vsel %vm1516_vm5, %v9532_v3, 0.0 }
 0x51f   : > { %v9536_v40 = vpop.eup %7449  ;;  %2318 = vadd.xlane.f32.xlu0 %v2317_v45  ;;  %v2303_v56 = vmul.f32 1.442695, %v2272_v16 }
 0x520   : > { %v2320_v52 = vsel %vm1516_vm5, %v9536_v40, 0.0  ;;  %v2250_v21 = vpop.xlane.xlu1 %2249 }
 0x521   : > { %v9540_v0 = vpop.eup %7451  ;;  %2321 = vadd.xlane.f32.xlu1 %v2320_v52  ;;  %v2270_v36 = vsub.f32 %v9401_v14, %v2250_v21 }
 0x522   : > { %v2335_v15 = vsel %vm1516_vm5, %v9540_v0, 0.0 }
 0x523   : > { %v2299_v59 = vmul.f32 1.442695, %v2270_v36 }
 0x525   : > { %v9544_v17 = vpop.eup %7453  ;;  %2336 = vadd.xlane.f32.xlu1 %v2335_v15  ;;  %7459 = vpow2.f32 %v2299_v59 }
 0x526   : > { %v2329_v43 = vsel %vm1516_vm5, %v9544_v17, 0.0  ;;  %v9548_v44 = vpop.eup %7455 }
 0x527   : > { %v2338_v46 = vsel %vm1516_vm5, %v9548_v44, 0.0  ;;  %v9552_v29 = vpop.eup %7457 }
 0x528   : > { %v2332_v26 = vsel %vm1516_vm5, %v9552_v29, 0.0 }
 0x529   : > { %2330 = vadd.xlane.f32.xlu1 %v2329_v43 }
 0x52d   : > { %2339 = vadd.xlane.f32.xlu1 %v2338_v46 }
 0x52f   : > { %v9566_v18 = vpop.eup %7459 }
 0x530   : > { %v2344_v57 = vsel %vm1516_vm5, %v9566_v18, 0.0 }
 0x531   : > { %2333 = vadd.xlane.f32.xlu1 %v2332_v26 }
 0x535   : > { %2401 = vrot.lane.b32.xlu0 %v10588_v63, %s8037_s27  ;;  %v1789_v9 = vpop.xlane.xlu1 %1788 }
 0x539   : > { %2403 = vrot.lane.b32.xlu0 %v10589_v47, %s8037_s27  ;;  %v1783_v48 = vpop.xlane.xlu1 %1782 }
 0x53a   : > { %7461 = vrcp.f32 %v1783_v48 }
 0x53d   : > { %v1801_v53 = vpop.xlane.xlu1 %1800 }
 0x542   : > { %2399 = vrot.lane.b32.xlu1 %v10590_v31, %s8037_s27 }
 0x54b   : > { %v2253_v4 = vpop.xlane.xlu0 %2252 }
 0x54c   : > { %v2271_v1 = vsub.f32 %v9390_v39, %v2253_v4  ;;  %v1795_v39 = vpop.xlane.xlu1 %1794 }
 0x54e   : > { %v2301_v19 = vmul.f32 1.442695, %v2271_v1 }
 0x54f   : > { %v2247_v55 = vpop.xlane.xlu0 %2246 }
 0x550   : > { %v2269_v62 = vsub.f32 %v9395_v38, %v2247_v55  ;;  %v7462_v38 = vpop.eup %7461 }
 0x551   : > { %v1843_v26 = vmul.f32 %v7462_v38, %v9417_v27 }
 0x552   : > { %v2297_v41 = vmul.f32 1.442695, %v2269_v62 }
 0x553   : > { %v1786_v54 = vpop.xlane.xlu0 %1785 }
 0x554   : > { %7463 = vpow2.f32 %v2297_v41 }
 0x555   : > { %7465 = vrcp.f32 %v1786_v54 }
 0x556   : > { %7467 = vpow2.f32 %v2301_v19 }
 0x557   : > { %7469 = vrcp.f32 %v1789_v9  ;;  %v1780_v14 = vpop.xlane.xlu0 %1779 }
 0x558   : > { %7471 = vrcp.f32 %v1780_v14 }
 0x559   : > { %7473 = vpow2.f32 %v2303_v56 }
 0x55b   : > { %v1798_v6 = vpop.xlane.xlu0 %1797 }
 0x55c   : > { %7475 = vrcp.f32 %v1798_v6 }
 0x55d   : > { %7477 = vrcp.f32 %v1795_v39 }
 0x55e   : > { %v9568_v33 = vpop.eup %7463  ;;  %7479 = vrcp.f32 %v1801_v53 }
 0x55f   : > { %v7466_v25 = vpop.eup %7465  ;;  %v1792_v30 = vpop.xlane.xlu0 %1791  ;;  %v2341_v37 = vsel %vm1516_vm5, %v9568_v33, 0.0 }
 0x560   : > { %v9572_v45 = vpop.eup %7467  ;;  %7481 = vrcp.f32 %v1792_v30  ;;  %2342 = vadd.xlane.f32.xlu0 %v2341_v37  ;;  %v1844_v15 = vmul.f32 %v7466_v25, %v9437_v58 }
 0x561   : > { %v7470_v32 = vpop.eup %7469  ;;  %v2347_v43 = vsel %vm1516_vm5, %v9572_v45, 0.0 }
 0x562   : > { %v7472_v52 = vpop.eup %7471  ;;  %v1845_v47 = vmul.f32 %v7470_v32, %v9413_v60 }
 0x563   : > { %v1842_v46 = vmul.f32 %v7472_v52, %v9441_v23  ;;  %v9579_v63 = vpop.eup %7473 }
 0x564   : > { %2348 = vadd.xlane.f32.xlu0 %v2347_v43  ;;  %v1859_v21 = vpack.c.bf16 %v1845_v47, %v1844_v15  ;;  %v2350_v58 = vsel %vm1516_vm5, %v9579_v63, 0.0 }
 0x565   : > { %v1858_v31 = vpack.c.bf16 %v1843_v26, %v1842_v46 }
 0x566   : > { %2345 = vadd.xlane.f32.xlu1 %v2344_v57  ;;  %v7476_v9 = vpop.eup %7475 }
 0x567   : > { %6641 = vmatprep.mubr.msk.bf16.mxu1 %vm1516_vm5, %v1858_v31  ;;  %v7478_v23 = vpop.eup %7477  ;;  %v1848_v36 = vmul.f32 %v7476_v9, %v9445_v51 }
 0x568   : > { %2351 = vadd.xlane.f32.xlu0 %v2350_v58  ;;  %6642 = vmatmul.mubr.msk.bf16.vlgmr.msra.gmra.mrb[0].mxu1 %vm1516_vm5, %v1859_v21  ;;  %v7480_v27 = vpop.eup %7479  ;;  %v1847_v59 = vmul.f32 %v7478_v23, %v9426_v49 }
 0x569   : > { %6682 = vmatpush3.bf16.msra.mxu1 %v9522_v11  ;;  %v1849_v1 = vmul.f32 %v7480_v27, %v9421_v7 }
 0x56a   : > { %v7482_v60 = vpop.eup %7481 }
 0x56b   : > { %v1846_v4 = vmul.f32 %v7482_v60, %v9449_v20  ;;  %v1861_v55 = vpack.c.bf16 %v1849_v1, %v1848_v36 }
 0x56d   : > { %v1860_v48 = vpack.c.bf16 %v1847_v59, %v1846_v4 }
 0x56f   : > { %6645 = vmatprep.mubr.msk.bf16.mxu1 %vm1516_vm5, %v1860_v48 }
 0x570   : > { %6646 = vmatmul.mubr.msk.bf16.gmra.mrb[4].mxu1 %vm1516_vm5, %v1861_v55 }
 0x58a   : > { %v1810_v62 = vpop.xlane.xlu0 %1809 }
 0x58c   : > { %v1813_v16 = vpop.xlane.xlu1 %1812 }
 0x58d   : > { %7483 = vrcp.f32 %v1813_v16 }
 0x58e   : > { %v1804_v19 = vpop.xlane.xlu0 %1803 }
 0x58f   : > { %7485 = vrcp.f32 %v1804_v19 }
 0x590   : > { %7487 = vrcp.f32 %v1810_v62  ;;  %v1807_v11 = vpop.xlane.xlu1 %1806 }
 0x591   : > { %7489 = vrcp.f32 %v1807_v11 }
 0x597   : > { %v7484_v41 = vpop.eup %7483 }
 0x598   : > { %v1822_v51 = vpop.xlane.xlu0 %1821  ;;  %v1853_v14 = vmul.f32 %v7484_v41, %v9464_v28 }
 0x599   : > { %v7486_v49 = vpop.eup %7485 }
 0x59a   : > { %v1825_v20 = vpop.xlane.xlu1 %1824  ;;  %v7488_v54 = vpop.eup %7487  ;;  %v1850_v39 = vmul.f32 %v7486_v49, %v9469_v50 }
 0x59b   : > { %7491 = vrcp.f32 %v1825_v20  ;;  %v7490_v53 = vpop.eup %7489  ;;  %v1852_v38 = vmul.f32 %v7488_v54, %v9459_v34 }
 0x59c   : > { %v1816_v7 = vpop.xlane.xlu0 %1815  ;;  %v1851_v6 = vmul.f32 %v7490_v53, %v9473_v35 }
 0x59d   : > { %7493 = vrcp.f32 %v1816_v7  ;;  %v1863_v37 = vpack.c.bf16 %v1853_v14, %v1852_v38 }
 0x59e   : > { %7495 = vrcp.f32 %v1822_v51  ;;  %v1819_v56 = vpop.xlane.xlu1 %1818  ;;  %v1862_v30 = vpack.c.bf16 %v1851_v6, %v1850_v39 }
 0x59f   : > { %7497 = vrcp.f32 %v1819_v56 }
 0x5a0   : > { %v2313_v25 = vpop.xlane.xlu0 %2312  ;;  %6649 = vmatprep.mubr.msk.bf16.mxu1 %vm1516_vm5, %v1862_v30 }
 0x5a1   : > { %6650 = vmatmul.mubr.msk.bf16.gmra.mrb[8].mxu1 %vm1516_vm5, %v1863_v37 }
 0x5a2   : > { %v2316_v32 = vpop.xlane.xlu1 %2315 }
 0x5a4   : > { %v2307_v52 = vpop.xlane.xlu0 %2306 }
 0x5a5   : > { %v7492_v15 = vpop.eup %7491  ;;  %7499 = vrcp.f32 %v2307_v52 }
 0x5a6   : > { %v2310_v28 = vpop.xlane.xlu1 %2309  ;;  %v1857_v35 = vmul.f32 %v7492_v15, %v9485_v61 }
 0x5a7   : > { %v7494_v43 = vpop.eup %7493  ;;  %7501 = vrcp.f32 %v2310_v28 }
 0x5a8   : > { %v7496_v46 = vpop.eup %7495  ;;  %v1854_v34 = vmul.f32 %v7494_v43, %v9490_v24  ;;  %v2325_v36 = vpop.xlane.xlu0 %2324  ;;  %7503 = vrcp.f32 %v2316_v32 }
 0x5a9   : > { %v7498_v50 = vpop.eup %7497  ;;  %v1856_v57 = vmul.f32 %v7496_v46, %v9480_v12 }
 0x5aa   : > { %v1855_v26 = vmul.f32 %v7498_v50, %v9495_v22  ;;  %v2328_v47 = vpop.xlane.xlu1 %2327 }
 0x5ab   : > { %v1865_v21 = vpack.c.bf16 %v1857_v35, %v1856_v57 }
 0x5ac   : > { %v1864_v31 = vpack.c.bf16 %v1855_v26, %v1854_v34  ;;  %v2319_v4 = vpop.xlane.xlu0 %2318 }
 0x5ae   : > { %6653 = vmatprep.mubr.msk.bf16.mxu1 %vm1516_vm5, %v1864_v31  ;;  %v2322_v9 = vpop.xlane.xlu1 %2321 }
 0x5af   : > { %6654 = vmatmul.mubr.msk.bf16.gmra.mrb[12].mxu1 %vm1516_vm5, %v1865_v21  ;;  %v7500_v58 = vpop.eup %7499  ;;  %7505 = vrcp.f32 %v2322_v9 }
 0x5b0   : > { %v2369_v60 = vmul.f32 %v7500_v58, %v9510_v2  ;;  %7507 = vrcp.f32 %v2313_v25  ;;  %v2402_v1 = vpop.permute.xlu0 %2401 }
 0x5b1   : > { %v7502_v23 = vpop.eup %7501  ;;  %7509 = vrcp.f32 %v2319_v4  ;;  %v6962_v4 = vld [vmem:[#allocation9 + $0x34] ss:$8 sps:$4 sm:$0xff]  }
 0x5b2   : > { %v2337_v27 = vpop.xlane.xlu1 %2336  ;;  %v2370_v61 = vmul.f32 %v7502_v23, %v9514_v13  ;;  %7511 = vrcp.f32 %v2328_v47  ;;  %v7504_v2 = vpop.eup %7503  ;;  %v6951_v23 = vld [vmem:[#allocation9] ss:$8 sps:$4 sm:$0xff]  }
 0x5b3   : > { %v2372_v19 = vmul.f32 %v7504_v2, %v9505_v42 }
 0x5b4   : > { %v2385_v24 = vpack.c.bf16 %v2370_v61, %v2369_v60  ;;  %v2404_v62 = vpop.permute.xlu0 %2403  ;;  %v6956_v60 = vld [vmem:[#allocation9 + $0x14] ss:$8 sps:$4 sm:$0xff]   ;;  %v6954_v61 = vld [vmem:[#allocation9 + $0x10] ss:$8 sps:$4 sm:$0xff]  }
 0x5b6   : > { %v2331_v22 = vpop.xlane.xlu1 %2330  ;;  %6689 = vmatprep.mubr.msk.bf16.mxu1 %vm1516_vm5, %v2385_v24  ;;  %v6959_v24 = vld [vmem:[#allocation9 + $0x24] ss:$8 sps:$4 sm:$0xff]  }
 0x5b9   : > { %v7506_v13 = vpop.eup %7505 }
 0x5ba   : > { %v2340_v12 = vpop.xlane.xlu1 %2339  ;;  %v7508_v55 = vpop.eup %7507  ;;  %v2374_v11 = vmul.f32 %v7506_v13, %v9536_v40  ;;  %v6960_v13 = vld [vmem:[#allocation9 + $0x30] ss:$8 sps:$4 sm:$0xff]  }
 0x5bb   : > { %v7510_v16 = vpop.eup %7509  ;;  %v2371_v51 = vmul.f32 %v7508_v55, %v9500_v8  ;;  %v6965_v55 = vld [vmem:[#allocation9 + $0x44] ss:$8 sps:$4 sm:$0xff]  }
 0x5bc   : > { %v2373_v20 = vmul.f32 %v7510_v16, %v9532_v3  ;;  %v7512_v49 = vpop.eup %7511  ;;  %v6968_v16 = vld [vmem:[#allocation9 + $0x54] ss:$8 sps:$4 sm:$0xff]  }
 0x5bd   : > { %v2386_v41 = vpack.c.bf16 %v2372_v19, %v2371_v51  ;;  %v2376_v56 = vmul.f32 %v7512_v49, %v9526_v10  ;;  %v6966_v51 = vld [vmem:[#allocation9 + $0x50] ss:$8 sps:$4 sm:$0xff]  }
 0x5be   : > { %v2334_v59 = vpop.xlane.xlu1 %2333  ;;  %v2387_v7 = vpack.c.bf16 %v2374_v11, %v2373_v20 }
 0x5bf   : > { %7513 = vrcp.f32 %v2334_v59 }
 0x5c0   : > { %7515 = vrcp.f32 %v2325_v36 }
 0x5c1   : > { %7517 = vrcp.f32 %v2331_v22  ;;  %v6957_v22 = vld [vmem:[#allocation9 + $0x20] ss:$8 sps:$4 sm:$0xff]  }
 0x5c2   : > { %v2400_v48 = vpop.permute.xlu1 %2399  ;;  %7519 = vrcp.f32 %v2340_v12 }
 0x5c3   : > { %6683 = vmatprep.subr.bf16.mxu1 %v2400_v48  ;;  %7521 = vrcp.f32 %v2337_v27  ;;  %v6953_v27 = vld [vmem:[#allocation9 + $0x4] ss:$8 sps:$4 sm:$0xff]  }
 0x5c4   : > { %6684 = vmatpush3.bf16.msra.mxu1 %v2400_v48  ;;  %2762 = vmatprep.subr.bf16.mxu0 %v6953_v27 }
 0x5c5   : > { %6685 = vmatprep.subr.bf16.mxu1 %v2402_v1  ;;  %2763 = vmatpush1.bf16.msra.mxu0 %v6951_v23 }
 0x5c6   : > { %2764 = vmatprep.subr.bf16.mxu0 %v6956_v60 }
 0x5c8   : > { %6686 = vmatpush3.bf16.msra.mxu1 %v2402_v1 }
 0x5c9   : > { %6687 = vmatprep.subr.bf16.mxu1 %v2404_v62  ;;  %v7514_v54 = vpop.eup %7513  ;;  %2765 = vmatpush1.bf16.msra.mxu0 %v6954_v61 }
 0x5ca   : > { %v7516_v53 = vpop.eup %7515  ;;  %v2378_v40 = vmul.f32 %v7514_v54, %v9552_v29  ;;  %2766 = vmatprep.subr.bf16.mxu0 %v6959_v24 }
 0x5cb   : > { %v7518_v42 = vpop.eup %7517  ;;  %v2375_v8 = vmul.f32 %v7516_v53, %v9520_v5  ;;  %v6969_v53 = vld [vmem:[#allocation9 + $0x60] ss:$8 sps:$4 sm:$0xff]  }
 0x5cc   : > { %6688 = vmatpush3.bf16.msra.mxu1 %v2404_v62  ;;  %v2377_v14 = vmul.f32 %v7518_v42, %v9544_v17  ;;  %v7520_v39 = vpop.eup %7519  ;;  %v6963_v62 = vld [vmem:[#allocation9 + $0x40] ss:$8 sps:$4 sm:$0xff]   ;;  %v6974_v42 = vld [vmem:[#allocation9 + $0x74] ss:$8 sps:$4 sm:$0xff]  }
 0x5cd   : > { %v2388_v3 = vpack.c.bf16 %v2376_v56, %v2375_v8  ;;  %v7522_v38 = vpop.eup %7521  ;;  %v2380_v25 = vmul.f32 %v7520_v39, %v9548_v44  ;;  %2767 = vmatpush1.bf16.msra.mxu0 %v6957_v22  ;;  %v6972_v56 = vld [vmem:[#allocation9 + $0x70] ss:$8 sps:$4 sm:$0xff]   ;;  %v6975_v8 = vld [vmem:[#allocation9 + $0x80] ss:$8 sps:$4 sm:$0xff]   ;;  %v6983_v39 = vld [vmem:[#allocation9 + $0xa4] ss:$8 sps:$4 sm:$0xff]  }
 0x5ce   : > { %v2389_v6 = vpack.c.bf16 %v2378_v40, %v2377_v14  ;;  %v2379_v30 = vmul.f32 %v7522_v38, %v9540_v0  ;;  %2768 = vmatprep.subr.bf16.mxu0 %v6962_v4  ;;  %v6977_v40 = vld [vmem:[#allocation9 + $0x84] ss:$8 sps:$4 sm:$0xff]   ;;  %v6980_v14 = vld [vmem:[#allocation9 + $0x94] ss:$8 sps:$4 sm:$0xff]  }
 0x5cf   : > { %6690 = vmatmul.mubr.msk.bf16.vlgmr.msra.gmra.mrb[16].mxu1 %vm1516_vm5, %v2386_v41  ;;  %v6971_v41 = vld [vmem:[#allocation9 + $0x64] ss:$8 sps:$4 sm:$0xff]   ;;  %v6986_v38 = vld [vmem:[#allocation9 + $0xb4] ss:$8 sps:$4 sm:$0xff]  }
 0x5d0   : > { %6693 = vmatprep.mubr.msk.bf16.mxu1 %vm1516_vm5, %v2387_v7  ;;  %v2390_v37 = vpack.c.bf16 %v2380_v25, %v2379_v30  ;;  %v6984_v25 = vld [vmem:[#allocation9 + $0xb0] ss:$8 sps:$4 sm:$0xff]   ;;  %v6989_v30 = vld [vmem:[#allocation9 + $0xc4] ss:$8 sps:$4 sm:$0xff]  }
 0x5d1   : > { %2769 = vmatpush1.bf16.msra.mxu0 %v6960_v13 }
 0x5d2   : > { %2770 = vmatprep.subr.bf16.mxu0 %v6965_v55 }
 0x5d5   : > { %2771 = vmatpush1.bf16.msra.mxu0 %v6963_v62 }
 0x5d6   : > { %2772 = vmatprep.subr.bf16.mxu0 %v6968_v16 }
 0x5d7   : > { %6694 = vmatmul.mubr.msk.bf16.gmra.mrb[20].mxu1 %vm1516_vm5, %v2388_v3  ;;  %v6978_v3 = vld [vmem:[#allocation9 + $0x90] ss:$8 sps:$4 sm:$0xff]  }
 0x5d8   : > { %6697 = vmatprep.mubr.msk.bf16.mxu1 %vm1516_vm5, %v2389_v6  ;;  %v6981_v6 = vld [vmem:[#allocation9 + $0xa0] ss:$8 sps:$4 sm:$0xff]  }
 0x5d9   : > { %2773 = vmatpush1.bf16.msra.mxu0 %v6966_v51 }
 0x5da   : > { %2774 = vmatprep.subr.bf16.mxu0 %v6971_v41  ;;  %v7001_v41 = vld [vmem:[#allocation11 + $0x4] ss:$44 sps:$4 sm:$0xff]  }
 0x5db   : > { %4055 = vmatprep.subr.bf16.mxu1 %v7001_v41 }
 0x5dd   : > { %2775 = vmatpush1.bf16.msra.mxu0 %v6969_v53  ;;  %v7010_v53 = vld [vmem:[#allocation11 + $0x64] ss:$44 sps:$4 sm:$0xff]  }
 0x5de   : > { %2776 = vmatprep.subr.bf16.mxu0 %v6974_v42  ;;  %v7005_v42 = vld [vmem:[#allocation11 + $0x58] ss:$44 sps:$4 sm:$0xff]  }
 0x5df   : > { %6698 = vmatmul.mubr.msk.bf16.gmra.mrb[24].mxu1 %vm1516_vm5, %v2390_v37  ;;  %v6987_v37 = vld [vmem:[#allocation9 + $0xc0] ss:$8 sps:$4 sm:$0xff]  }
 0x5e1   : > { %2777 = vmatpush1.bf16.msra.mxu0 %v6972_v56  ;;  %v7008_v56 = vld [vmem:[#allocation11 + $0x60] ss:$44 sps:$4 sm:$0xff]  }
 0x5e2   : > { %2778 = vmatprep.subr.bf16.mxu0 %v6977_v40  ;;  %v7013_v40 = vld [vmem:[#allocation11 + $0xb4] ss:$44 sps:$4 sm:$0xff]  }
 0x5e5   : > { %2779 = vmatpush1.bf16.msra.mxu0 %v6975_v8  ;;  %v7016_v8 = vld [vmem:[#allocation11 + $0xbc] ss:$44 sps:$4 sm:$0xff]  }
 0x5e6   : > { %2780 = vmatprep.subr.bf16.mxu0 %v6980_v14  ;;  %v7011_v14 = vld [vmem:[#allocation11 + $0xb0] ss:$44 sps:$4 sm:$0xff]  }
 0x5e9   : > { %2781 = vmatpush1.bf16.msra.mxu0 %v6978_v3  ;;  %v7014_v3 = vld [vmem:[#allocation11 + $0xb8] ss:$44 sps:$4 sm:$0xff]  }
 0x5ea   : > { %2782 = vmatprep.subr.bf16.mxu0 %v6983_v39  ;;  %v7019_v39 = vld [vmem:[#allocation11 + $0x10c] ss:$44 sps:$4 sm:$0xff]  }
 0x5ed   : > { %v2343_v10 = vpop.xlane.xlu0 %2342  ;;  %2783 = vmatpush1.bf16.msra.mxu0 %v6981_v6  ;;  %v7022_v6 = vld [vmem:[#allocation11 + $0x114] ss:$44 sps:$4 sm:$0xff]  }
 0x5ee   : > { %7523 = vrcp.f32 %v2343_v10  ;;  %2784 = vmatprep.subr.bf16.mxu0 %v6986_v38  ;;  %v6992_v10 = vld [vmem:[#allocation9 + $0xd4] ss:$8 sps:$4 sm:$0xff]  }
 0x5ef   : > { %v7017_v38 = vld [vmem:[#allocation11 + $0x108] ss:$44 sps:$4 sm:$0xff]  }
 0x5f1   : > { %v2349_v29 = vpop.xlane.xlu0 %2348  ;;  %2785 = vmatpush1.bf16.msra.mxu0 %v6984_v25  ;;  %v7020_v25 = vld [vmem:[#allocation11 + $0x110] ss:$44 sps:$4 sm:$0xff]  }
 0x5f2   : > { %7525 = vrcp.f32 %v2349_v29  ;;  %2786 = vmatprep.subr.bf16.mxu0 %v6989_v30  ;;  %v7025_v30 = vld [vmem:[#allocation11 + $0x164] ss:$44 sps:$4 sm:$0xff]  }
 0x5f3   : > { %v2346_v5 = vpop.xlane.xlu1 %2345 }
 0x5f4   : > { %7527 = vrcp.f32 %v2346_v5  ;;  %v6990_v5 = vld [vmem:[#allocation9 + $0xd0] ss:$8 sps:$4 sm:$0xff]  }
 0x5f5   : > { %v2352_v17 = vpop.xlane.xlu0 %2351  ;;  %2787 = vmatpush1.bf16.msra.mxu0 %v6987_v37  ;;  %v7028_v37 = vld [vmem:[#allocation11 + $0x16c] ss:$44 sps:$4 sm:$0xff]  }
 0x5f6   : > { %7529 = vrcp.f32 %v2352_v17  ;;  %2788 = vmatprep.subr.bf16.mxu0 %v6992_v10  ;;  %v7023_v10 = vld [vmem:[#allocation11 + $0x160] ss:$44 sps:$4 sm:$0xff]  }
 0x5f8   : > { %v7524_v32 = vpop.eup %7523 }
 0x5f9   : > { %v2381_v43 = vmul.f32 %v7524_v32, %v9568_v33  ;;  %2789 = vmatpush1.bf16.msra.mxu0 %v6990_v5  ;;  %v7031_v5 = vld [vmem:[#allocation11 + $0x1bc] ss:$44 sps:$4 sm:$0xff]  }
 0x5fc   : > { %v7526_v52 = vpop.eup %7525 }
 0x5fd   : > { %v2383_v46 = vmul.f32 %v7526_v52, %v9572_v45 }
 0x5fe   : > { %v7528_v15 = vpop.eup %7527 }
 0x5ff   : > { %v2382_v44 = vmul.f32 %v7528_v15, %v9566_v18 }
 0x600   : > { %v7530_v28 = vpop.eup %7529 }
 0x601   : > { %v2391_v0 = vpack.c.bf16 %v2382_v44, %v2381_v43  ;;  %v2384_v50 = vmul.f32 %v7530_v28, %v9579_v63 }
 0x603   : > { %6701 = vmatprep.mubr.msk.bf16.mxu1 %vm1516_vm5, %v2391_v0  ;;  %v2392_v35 = vpack.c.bf16 %v2384_v50, %v2383_v46  ;;  %v6993_v0 = vld [vmem:[#allocation9 + $0xe0] ss:$8 sps:$4 sm:$0xff]   ;;  %v6995_v46 = vld [vmem:[#allocation9 + $0xe4] ss:$8 sps:$4 sm:$0xff]  }
 0x604   : > { %2790 = vmatprep.subr.bf16.mxu0 %v6995_v46  ;;  %v7046_v46 = vld [vmem:[#allocation11 + $0x274] ss:$44 sps:$4 sm:$0xff]  }
 0x605   : > { %6702 = vmatmul.mubr.msk.bf16.gmra.mrb[28].mxu1 %vm1516_vm5, %v2392_v35  ;;  %2791 = vmatpush1.bf16.msra.mxu0 %v6993_v0  ;;  %v7043_v0 = vld [vmem:[#allocation11 + $0x26c] ss:$44 sps:$4 sm:$0xff]  }
 0x63b   : > { %v6643_v34 = vpop.f32.mrb[0].mxu1 }
 0x63c   : > { %v1924_v26 = vpop.f32.mrb[1].mxu1 }
 0x63d   : > { %v6644_v47 = vpop.f32.mrb[2].mxu1 }
 0x63e   : > { %v1988_v57 = vpack.c.bf16 %v6644_v47, %v6643_v34  ;;  %v1927_v31 = vpop.f32.mrb[3].mxu1  ;;  %v6996_v47 = vld [vmem:[#allocation9 + $0xf0] ss:$8 sps:$4 sm:$0xff]  }
 0x63f   : > { %v1987_v21 = vpack.c.bf16 %v1927_v31, %v1924_v26 }
 0x640   : > { %1992 = vst.msk [vmem:[#allocation2 + $0x10] sm:$0xff] %vm1516_vm5, %v1988_v57  ;;  %v6998_v57 = vld [vmem:[#allocation9 + $0xf4] ss:$8 sps:$4 sm:$0xff]  }
 0x641   : > { %1991 = vst.msk [vmem:[#allocation2] sm:$0xff] %vm1516_vm5, %v1987_v21  ;;  %2792 = vmatprep.subr.bf16.mxu0 %v6998_v57  ;;  %v7050_v57 = vld [vmem:[#allocation11 + $0x2c8] ss:$44 sps:$4 sm:$0xff]  }
 0x642   : > { %2793 = vmatpush1.bf16.msra.mxu0 %v6996_v47  ;;  %v7047_v47 = vld [vmem:[#allocation11 + $0x2c0] ss:$44 sps:$4 sm:$0xff]  }
 0x643   : > { %v6647_v18 = vpop.f32.mrb[4].mxu1 }
 0x644   : > { %v1940_v33 = vpop.f32.mrb[5].mxu1 }
 0x645   : > { %v6648_v45 = vpop.f32.mrb[6].mxu1 }
 0x646   : > { %v1990_v9 = vpack.c.bf16 %v6648_v45, %v6647_v18  ;;  %v1943_v63 = vpop.f32.mrb[7].mxu1 }
 0x647   : > { %v1989_v58 = vpack.c.bf16 %v1943_v63, %v1940_v33 }
 0x648   : > { %1994 = vst.msk [vmem:[#allocation2 + $0x30] sm:$0xff] %vm1516_vm5, %v1990_v9 }
 0x649   : > { %1993 = vst.msk [vmem:[#allocation2 + $0x20] sm:$0xff] %vm1516_vm5, %v1989_v58 }
 0x674   : > { %v9635_v36 = vpop.f32.mrb[8].mxu1 }
 0x675   : > { %v1956_v12 = vpop.f32.mrb[9].mxu1 }
 0x676   : > { %v9637_v59 = vpop.f32.mrb[10].mxu1 }
 0x677   : > { %v1996_v1 = vpack.c.bf16 %v9637_v59, %v9635_v36  ;;  %v1959_v48 = vpop.f32.mrb[11].mxu1 }
 0x678   : > { %v1995_v2 = vpack.c.bf16 %v1959_v48, %v1956_v12 }
 0x67a   : > { %2003 = vrot.lane.b32.xlu1 %v1995_v2, %s8037_s27 }
 0x682   : > { %v9642_v19 = vpop.f32.mrb[12].mxu1 }
 0x683   : > { %v9644_v11 = vpop.f32.mrb[13].mxu1 }
 0x684   : > { %v9646_v20 = vpop.f32.mrb[14].mxu1 }
 0x685   : > { %v1998_v49 = vpack.c.bf16 %v9646_v20, %v9642_v19  ;;  %v9650_v7 = vpop.f32.mrb[15].mxu1  ;;  %v6999_v20 = vld [vmem:[#allocation11] ss:$44 sps:$4 sm:$0xff]  }
 0x686   : > { %v1997_v54 = vpack.c.bf16 %v9650_v7, %v9644_v11  ;;  %v7004_v7 = vld [vmem:[#allocation11 + $0xc] ss:$44 sps:$4 sm:$0xff]   ;;  %4056 = vmatpush1.bf16.msra.mxu1 %v6999_v20 }
 0x687   : > { %4128 = vmatprep.subr.bf16.mxu0 %v7004_v7 }
 0x6a2   : > { %v6691_v29 = vpop.f32.mrb[16].mxu1 }
 0x6a3   : > { %v2467_v17 = vpop.f32.mrb[17].mxu1 }
 0x6a4   : > { %v6692_v32 = vpop.f32.mrb[18].mxu1 }
 0x6a5   : > { %v2531_v52 = vpack.c.bf16 %v6692_v32, %v6691_v29  ;;  %v2470_v15 = vpop.f32.mrb[19].mxu1  ;;  %v7026_v29 = vld [vmem:[#allocation11 + $0x168] ss:$44 sps:$4 sm:$0xff]   ;;  %v7029_v32 = vld [vmem:[#allocation11 + $0x1b8] ss:$44 sps:$4 sm:$0xff]  }
 0x6a6   : > { %v2530_v43 = vpack.c.bf16 %v2470_v15, %v2467_v17  ;;  %v7034_v17 = vld [vmem:[#allocation11 + $0x1c4] ss:$44 sps:$4 sm:$0xff]   ;;  %v7037_v15 = vld [vmem:[#allocation11 + $0x214] ss:$44 sps:$4 sm:$0xff]  }
 0x6a7   : > { %2535 = vst.msk [vmem:[#allocation2 + $0x18] sm:$0xff] %vm1516_vm5, %v2531_v52  ;;  %v7032_v52 = vld [vmem:[#allocation11 + $0x1c0] ss:$44 sps:$4 sm:$0xff]  }
 0x6a8   : > { %2534 = vst.msk [vmem:[#allocation2 + $0x8] sm:$0xff] %vm1516_vm5, %v2530_v43  ;;  %v7040_v43 = vld [vmem:[#allocation11 + $0x21c] ss:$44 sps:$4 sm:$0xff]  }
 0x6aa   : > { %v6695_v44 = vpop.f32.mrb[20].mxu1 }
 0x6ab   : > { %v2483_v28 = vpop.f32.mrb[21].mxu1 }
 0x6ac   : > { %v6696_v50 = vpop.f32.mrb[22].mxu1 }
 0x6ad   : > { %v2533_v35 = vpack.c.bf16 %v6696_v50, %v6695_v44  ;;  %v2486_v34 = vpop.f32.mrb[23].mxu1  ;;  %v7035_v44 = vld [vmem:[#allocation11 + $0x210] ss:$44 sps:$4 sm:$0xff]   ;;  %v7041_v50 = vld [vmem:[#allocation11 + $0x268] ss:$44 sps:$4 sm:$0xff]  }
 0x6ae   : > { %v2532_v26 = vpack.c.bf16 %v2486_v34, %v2483_v28  ;;  %v7038_v28 = vld [vmem:[#allocation11 + $0x218] ss:$44 sps:$4 sm:$0xff]  }
 0x6af   : > { %2537 = vst.msk [vmem:[#allocation2 + $0x38] sm:$0xff] %vm1516_vm5, %v2533_v35  ;;  %v7044_v35 = vld [vmem:[#allocation11 + $0x270] ss:$44 sps:$4 sm:$0xff]  }
 0x6b0   : > { %2536 = vst.msk [vmem:[#allocation2 + $0x28] sm:$0xff] %vm1516_vm5, %v2532_v26  ;;  %v7049_v34 = vld [vmem:[#allocation11 + $0x2c4] ss:$44 sps:$4 sm:$0xff]   ;;  %v7052_v26 = vld [vmem:[#allocation11 + $0x2cc] ss:$44 sps:$4 sm:$0xff]  }
 0x6b2   : > { %v6699_v31 = vpop.f32.mrb[24].mxu1 }
 0x6b3   : > { %v2499_v21 = vpop.f32.mrb[25].mxu1 }
 0x6b4   : > { %v6700_v18 = vpop.f32.mrb[26].mxu1 }
 0x6b5   : > { %v2539_v33 = vpack.c.bf16 %v6700_v18, %v6699_v31  ;;  %v2502_v45 = vpop.f32.mrb[27].mxu1  ;;  %v7055_v31 = vld [vmem:[#allocation11 + $0x31c] ss:$44 sps:$4 sm:$0xff]   ;;  %v7053_v18 = vld [vmem:[#allocation11 + $0x318] ss:$44 sps:$4 sm:$0xff]  }
 0x6b6   : > { %v2538_v9 = vpack.c.bf16 %v2502_v45, %v2499_v21  ;;  %v7058_v21 = vld [vmem:[#allocation11 + $0x324] ss:$44 sps:$4 sm:$0xff]   ;;  %v7061_v45 = vld [vmem:[#allocation11 + $0x374] ss:$44 sps:$4 sm:$0xff]  }
 0x6b7   : > { %2548 = vrot.lane.b32.xlu1 %v2539_v33, %s8037_s27  ;;  %v7056_v33 = vld [vmem:[#allocation11 + $0x320] ss:$44 sps:$4 sm:$0xff]  }
 0x6b8   : > { %2546 = vrot.lane.b32.xlu0 %v2538_v9, %s8037_s27  ;;  %v7064_v9 = vld [vmem:[#allocation11 + $0x37c] ss:$44 sps:$4 sm:$0xff]  }
 0x6bb   : > { %2005 = vrot.lane.b32.xlu1 %v1996_v1, %s8037_s27 }
 0x6bf   : > { %2007 = vrot.lane.b32.xlu1 %v1997_v54, %s8037_s27  ;;  %v7007_v54 = vld [vmem:[#allocation11 + $0x5c] ss:$44 sps:$4 sm:$0xff]  }
 0x6c0   : > { %4057 = vmatprep.subr.bf16.mxu1 %v7007_v54 }
 0x6c1   : > { %4058 = vmatpush1.bf16.msra.mxu1 %v7005_v42  ;;  %v7761_v42 = vld [vmem:[%s8341_s23 + $0x30] sm:$0xff] }
 0x6c2   : > { %4059 = vmatprep.subr.bf16.mxu1 %v7013_v40 }
 0x6c3   : > { %2009 = vrot.lane.b32.xlu1 %v1998_v49, %s8037_s27  ;;  %v7002_v49 = vld [vmem:[#allocation11 + $0x8] ss:$44 sps:$4 sm:$0xff]  }
 0x6c5   : > { %4060 = vmatpush1.bf16.msra.mxu1 %v7011_v14  ;;  %v7762_v14 = vld [vmem:[%s8341_s23 + $0x38] sm:$0xff] }
 0x6c6   : > { %4061 = vmatprep.subr.bf16.mxu1 %v7019_v39 }
 0x6c9   : > { %4062 = vmatpush1.bf16.msra.mxu1 %v7017_v38 }
 0x6ca   : > { %4063 = vmatprep.subr.bf16.mxu1 %v7025_v30  ;;  %v7067_v30 = vld [vmem:[#allocation11 + $0x3cc] ss:$44 sps:$4 sm:$0xff]  }
 0x6cd   : > { %4064 = vmatpush1.bf16.msra.mxu1 %v7023_v10  ;;  %v7065_v10 = vld [vmem:[#allocation11 + $0x3c8] ss:$44 sps:$4 sm:$0xff]  }
 0x6ce   : > { %4065 = vmatprep.subr.bf16.mxu1 %v7031_v5  ;;  %v7073_v5 = vld [vmem:[#allocation11 + $0x424] ss:$44 sps:$4 sm:$0xff]  }
 0x6d1   : > { %4066 = vmatpush1.bf16.msra.mxu1 %v7029_v32 }
 0x6d2   : > { %4067 = vmatprep.subr.bf16.mxu1 %v7037_v15  ;;  %v7074_v15 = vld [vmem:[#allocation11 + $0x428] ss:$44 sps:$4 sm:$0xff]  }
 0x6d5   : > { %4068 = vmatpush1.bf16.msra.mxu1 %v7035_v44 }
 0x6d6   : > { %4069 = vmatprep.subr.bf16.mxu1 %v7043_v0  ;;  %v7764_v0 = vld [vmem:[%s8341_s23 + $0x48] sm:$0xff] }
 0x6d8   : > { %v6703_v63 = vpop.f32.mrb[28].mxu1 }
 0x6d9   : > { %v2515_v58 = vpop.f32.mrb[29].mxu1  ;;  %4070 = vmatpush1.bf16.msra.mxu1 %v7041_v50 }
 0x6da   : > { %v6704_v23 = vpop.f32.mrb[30].mxu1  ;;  %4071 = vmatprep.subr.bf16.mxu1 %v7049_v34  ;;  %v7765_v34 = vld [vmem:[%s8341_s23 + $0x50] sm:$0xff] }
 0x6db   : > { %v2541_v27 = vpack.c.bf16 %v6704_v23, %v6703_v63  ;;  %v2518_v60 = vpop.f32.mrb[31].mxu1  ;;  %v7059_v63 = vld [vmem:[#allocation11 + $0x370] ss:$44 sps:$4 sm:$0xff]  }
 0x6dc   : > { %v2540_v61 = vpack.c.bf16 %v2518_v60, %v2515_v58  ;;  %v7062_v58 = vld [vmem:[#allocation11 + $0x378] ss:$44 sps:$4 sm:$0xff]  }
 0x6dd   : > { %4072 = vmatpush1.bf16.msra.mxu1 %v7047_v47 }
 0x6de   : > { %2550 = vrot.lane.b32.xlu0 %v2540_v61, %s8037_s27  ;;  %4073 = vmatprep.subr.bf16.mxu1 %v7055_v31  ;;  %v7082_v31 = vld [vmem:[#allocation11 + $0x484] ss:$44 sps:$4 sm:$0xff]  }
 0x6e1   : > { %4074 = vmatpush1.bf16.msra.mxu1 %v7053_v18  ;;  %v7766_v18 = vld [vmem:[%s8341_s23 + $0x58] sm:$0xff] }
 0x6e2   : > { %2552 = vrot.lane.b32.xlu0 %v2541_v27, %s8037_s27  ;;  %4075 = vmatprep.subr.bf16.mxu1 %v7061_v45  ;;  %v7755_v27 = vld [vmem:[%s8341_s23] sm:$0xff] }
 0x6e3   : > { %v7077_v45 = vld [vmem:[#allocation11 + $0x478] ss:$44 sps:$4 sm:$0xff]  }
 0x6e5   : > { %4076 = vmatpush1.bf16.msra.mxu1 %v7059_v63 }
 0x6e6   : > { %4077 = vmatprep.subr.bf16.mxu1 %v7067_v30 }
 0x6e9   : > { %4078 = vmatpush1.bf16.msra.mxu1 %v7065_v10 }
 0x6ea   : > { %4079 = vmatprep.subr.bf16.mxu1 %v7073_v5 }
 0x6ec   : > { %v2004_v24 = vpop.permute.xlu1 %2003 }
 0x6ed   : > { %2016 = vst.msk [vmem:[#allocation2] sm:$0xff] %vm2015_vm6, %v2004_v24  ;;  %v7756_v24 = vld [vmem:[%s8341_s23 + $0x8] sm:$0xff] }
 0x6f4   : > { %v2562_v1 = vld [vmem:[#allocation2] sm:$0xff] }
 0x729   : > { %v2549_v36 = vpop.permute.xlu1 %2548 }
 0x72a   : > { %2559 = vst.msk [vmem:[#allocation2 + $0x18] sm:$0xff] %vm2015_vm6, %v2549_v36  ;;  %v2547_v22 = vpop.permute.xlu0 %2546 }
 0x72b   : > { %2558 = vst.msk [vmem:[#allocation2 + $0x8] sm:$0xff] %vm2015_vm6, %v2547_v22 }
 0x72d   : > { %v2006_v12 = vpop.permute.xlu1 %2005 }
 0x72e   : > { %2017 = vst.msk [vmem:[#allocation2 + $0x10] sm:$0xff] %vm2015_vm6, %v2006_v12 }
 0x731   : > { %v2008_v4 = vpop.permute.xlu1 %2007  ;;  %v2565_v48 = vld [vmem:[#allocation2 + $0x18] sm:$0xff] }
 0x732   : > { %2018 = vst.msk [vmem:[#allocation2 + $0x20] sm:$0xff] %vm2015_vm6, %v2008_v4  ;;  %v2563_v59 = vld [vmem:[#allocation2 + $0x8] sm:$0xff]  ;;  %v7757_v4 = vld [vmem:[%s8341_s23 + $0x10] sm:$0xff] }
 0x733   : > { %2794 = vmatprep.mubr.bf16.mxu0 %v2563_v59 }
 0x734   : > { %2795 = vmatmul.mubr.bf16.vlgmr.msra.gmra.mrb[64].mxu0 %v2562_v1 }
 0x735   : > { %v2010_v2 = vpop.permute.xlu1 %2009  ;;  %2804 = vmatprep.mubr.bf16.mxu0 %v2565_v48  ;;  %v2564_v13 = vld [vmem:[#allocation2 + $0x10] sm:$0xff]  ;;  %4129 = vmatpush1.bf16.msra.mxu0 %v7002_v49  ;;  %v7760_v49 = vld [vmem:[%s8341_s23 + $0x28] sm:$0xff] }
 0x736   : > { %2019 = vst.msk [vmem:[#allocation2 + $0x30] sm:$0xff] %vm2015_vm6, %v2010_v2  ;;  %4130 = vmatprep.subr.bf16.mxu0 %v7010_v53  ;;  %v7758_v2 = vld [vmem:[%s8341_s23 + $0x18] sm:$0xff] }
 0x739   : > { %v2566_v19 = vld [vmem:[#allocation2 + $0x20] sm:$0xff]  ;;  %4131 = vmatpush1.bf16.msra.mxu0 %v7008_v56 }
 0x73a   : > { %4132 = vmatprep.subr.bf16.mxu0 %v7016_v8 }
 0x73c   : > { %2805 = vmatmul.mubr.bf16.gmra.mrb[68].mxu0 %v2564_v13 }
 0x73d   : > { %v2568_v51 = vld [vmem:[#allocation2 + $0x30] sm:$0xff]  ;;  %4133 = vmatpush1.bf16.msra.mxu0 %v7014_v3 }
 0x73e   : > { %4134 = vmatprep.subr.bf16.mxu0 %v7022_v6 }
 0x741   : > { %4135 = vmatpush1.bf16.msra.mxu0 %v7020_v25 }
 0x742   : > { %4136 = vmatprep.subr.bf16.mxu0 %v7028_v37  ;;  %v7070_v37 = vld [vmem:[#allocation11 + $0x3d4] ss:$44 sps:$4 sm:$0xff]  }
 0x745   : > { %4137 = vmatpush1.bf16.msra.mxu0 %v7026_v29  ;;  %v7068_v29 = vld [vmem:[#allocation11 + $0x3d0] ss:$44 sps:$4 sm:$0xff]  }
 0x746   : > { %4138 = vmatprep.subr.bf16.mxu0 %v7034_v17  ;;  %v7076_v17 = vld [vmem:[#allocation11 + $0x42c] ss:$44 sps:$4 sm:$0xff]  }
 0x749   : > { %4139 = vmatpush1.bf16.msra.mxu0 %v7032_v52  ;;  %v7071_v52 = vld [vmem:[#allocation11 + $0x420] ss:$44 sps:$4 sm:$0xff]  }
 0x74a   : > { %4140 = vmatprep.subr.bf16.mxu0 %v7040_v43  ;;  %v7763_v43 = vld [vmem:[%s8341_s23 + $0x40] sm:$0xff]  ;;  %4080 = vmatpush1.bf16.msra.mxu1 %v7071_v52 }
 0x74d   : > { %4141 = vmatpush1.bf16.msra.mxu0 %v7038_v28 }
 0x74e   : > { %4142 = vmatprep.subr.bf16.mxu0 %v7046_v46 }
 0x750   : > { %v2551_v55 = vpop.permute.xlu0 %2550 }
 0x751   : > { %2560 = vst.msk [vmem:[#allocation2 + $0x28] sm:$0xff] %vm2015_vm6, %v2551_v55  ;;  %4143 = vmatpush1.bf16.msra.mxu0 %v7044_v35 }
 0x752   : > { %4144 = vmatprep.subr.bf16.mxu0 %v7052_v26 }
 0x754   : > { %v2553_v62 = vpop.permute.xlu0 %2552 }
 0x755   : > { %2561 = vst.msk [vmem:[#allocation2 + $0x38] sm:$0xff] %vm2015_vm6, %v2553_v62  ;;  %4145 = vmatpush1.bf16.msra.mxu0 %v7050_v57  ;;  %v7079_v57 = vld [vmem:[#allocation11 + $0x47c] ss:$44 sps:$4 sm:$0xff]  }
 0x756   : > { %4146 = vmatprep.subr.bf16.mxu0 %v7058_v21  ;;  %4081 = vmatprep.subr.bf16.mxu1 %v7079_v57  ;;  %v10608_v57 = vld [vmem:[#allocation20_spill] sm:$0xff] }
 0x757   : > { %4082 = vmatpush1.bf16.msra.mxu1 %v7077_v45 }
 0x758   : > { %v2567_v16 = vld [vmem:[#allocation2 + $0x28] sm:$0xff] }
 0x759   : > { %2814 = vmatprep.mubr.bf16.mxu0 %v2567_v16  ;;  %4147 = vmatpush1.bf16.msra.mxu0 %v7056_v33 }
 0x75a   : > { %2815 = vmatmul.mubr.bf16.gmra.mrb[72].mxu0 %v2566_v19  ;;  %4148 = vmatprep.subr.bf16.mxu0 %v7064_v9  ;;  %v7080_v9 = vld [vmem:[#allocation11 + $0x480] ss:$44 sps:$4 sm:$0xff]  }
 0x75c   : > { %v2569_v11 = vld [vmem:[#allocation2 + $0x38] sm:$0xff] }
 0x75d   : > { %2824 = vmatprep.mubr.bf16.mxu0 %v2569_v11  ;;  %4149 = vmatpush1.bf16.msra.mxu0 %v7062_v58 }
 0x75e   : > { %4150 = vmatprep.subr.bf16.mxu0 %v7070_v37  ;;  %v7100_v37 = vld [vmem:[#allocation11 + $0x1c] ss:$44 sps:$4 sm:$0xff]  }
 0x761   : > { %4151 = vmatpush1.bf16.msra.mxu0 %v7068_v29 }
 0x762   : > { %2825 = vmatmul.mubr.bf16.gmra.mrb[76].mxu0 %v2568_v51  ;;  %v7759_v51 = vld [vmem:[%s8341_s23 + $0x20] sm:$0xff]  ;;  %4152 = vmatprep.subr.bf16.mxu0 %v7076_v17 }
 0x765   : > { %4153 = vmatpush1.bf16.msra.mxu0 %v7074_v15 }
 0x766   : > { %4154 = vmatprep.subr.bf16.mxu0 %v7082_v31  ;;  %v10609_v31 = vsub.s32 0, %v10608_v57 }
 0x769   : > { %4155 = vmatpush1.bf16.msra.mxu0 %v7080_v9 }
 0x807   : > { %v2796_v23 = vpop.f32.mrb[64].mxu0 }
 0x808   : > { %v9683_v60 = vadd.f32 %v7755_v27, %v2796_v23  ;;  %v2798_v61 = vpop.f32.mrb[65].mxu0  ;;  %v7085_v27 = vld [vmem:[#allocation11 + $0x4d4] ss:$44 sps:$4 sm:$0xff]  }
 0x809   : > { %v9686_v36 = vadd.f32 %v7756_v24, %v2798_v61  ;;  %v2800_v22 = vpop.f32.mrb[66].mxu0  ;;  %v7088_v61 = vld [vmem:[#allocation11 + $0x4dc] ss:$44 sps:$4 sm:$0xff]   ;;  %4083 = vmatprep.subr.bf16.mxu1 %v7085_v27 }
 0x80a   : > { %10591 = vst [vmem:[#allocation30_spill] sm:$0xff] %v9683_v60  ;;  %v2852_v12 = vmul.f32 %v9683_v60, %v9683_v60  ;;  %v9691_v59 = vadd.f32 %v7757_v4, %v2800_v22  ;;  %v2802_v1 = vpop.f32.mrb[67].mxu0  ;;  %v7086_v4 = vld [vmem:[#allocation11 + $0x4d8] ss:$44 sps:$4 sm:$0xff]   ;;  %4156 = vmatprep.subr.bf16.mxu0 %v7088_v61 }
 0x80b   : > { %10592 = vst [vmem:[#allocation29_spill] sm:$0xff] %v9686_v36  ;;  %v2853_v48 = vmul.f32 %v9686_v36, %v9686_v36  ;;  %v9696_v13 = vadd.f32 %v7758_v2, %v2802_v1  ;;  %v7767_v1 = vld [vmem:[%s8341_s23 + $0x60] sm:$0xff]  ;;  %4157 = vmatpush1.bf16.msra.mxu0 %v7086_v4 }
 0x80c   : > { %10593 = vst [vmem:[#allocation32_spill] sm:$0xff] %v9691_v59  ;;  %v2854_v55 = vmul.f32 %v9691_v59, %v9691_v59 }
 0x80d   : > { %10594 = vst [vmem:[#allocation34_spill] sm:$0xff] %v9696_v13  ;;  %v2855_v62 = vmul.f32 %v9696_v13, %v9696_v13  ;;  %v2868_v16 = vadd.f32 %v2853_v48, %v2852_v12  ;;  %v7083_v12 = vld [vmem:[#allocation11 + $0x4d0] ss:$44 sps:$4 sm:$0xff]  }
 0x80e   : > { %4084 = vmatpush1.bf16.msra.mxu1 %v7083_v12 }
 0x80f   : > { %2869 = vadd.xlane.f32.xlu0 %v2868_v16  ;;  %v2806_v19 = vpop.f32.mrb[68].mxu0  ;;  %v2871_v11 = vadd.f32 %v2855_v62, %v2854_v55  ;;  %v7768_v55 = vld [vmem:[%s8341_s23 + $0x68] sm:$0xff] }
 0x810   : > { %v9703_v20 = vadd.f32 %v7759_v51, %v2806_v19  ;;  %v2808_v41 = vpop.f32.mrb[69].mxu0 }
 0x811   : > { %v9706_v7 = vadd.f32 %v7760_v49, %v2808_v41  ;;  %2872 = vadd.xlane.f32.xlu1 %v2871_v11  ;;  %v2810_v54 = vpop.f32.mrb[70].mxu0  ;;  %v7769_v11 = vld [vmem:[%s8341_s23 + $0x70] sm:$0xff]  ;;  %v7091_v49 = vld [vmem:[#allocation11 + $0x52c] ss:$44 sps:$4 sm:$0xff]  }
 0x812   : > { %10595 = vst [vmem:[#allocation35_spill] sm:$0xff] %v9703_v20  ;;  %v2856_v53 = vmul.f32 %v9703_v20, %v9703_v20  ;;  %v9711_v56 = vadd.f32 %v7761_v42, %v2810_v54  ;;  %v2812_v40 = vpop.f32.mrb[71].mxu0  ;;  %v7094_v54 = vld [vmem:[#allocation11 + $0x534] ss:$44 sps:$4 sm:$0xff]   ;;  %v7770_v42 = vld [vmem:[%s8341_s23 + $0x78] sm:$0xff]  ;;  %4085 = vmatprep.subr.bf16.mxu1 %v7091_v49  ;;  %s7945_s23 = sshll.u32 %s8038_s5, 4  ;;  %s7946_s23 = int_to_ptr.vmem [resolvable:$false] %s7945_s23 }
 0x813   : > { %10596 = vst [vmem:[#allocation37_spill] sm:$0xff] %v9706_v7  ;;  %v2857_v8 = vmul.f32 %v9706_v7, %v9706_v7  ;;  %v9716_v3 = vadd.f32 %v7762_v14, %v2812_v40  ;;  %v7092_v14 = vld [vmem:[#allocation11 + $0x530] ss:$44 sps:$4 sm:$0xff]   ;;  %4158 = vmatprep.subr.bf16.mxu0 %v7094_v54  ;;  %v7101_v54 = vld [vmem:[#allocation11 + $0x68] ss:$44 sps:$4 sm:$0xff]   ;;  %s7947_s29 = scalar_lea.vmem %s7946_s23, 4096 }
 0x814   : > { %10597 = vst [vmem:[#allocation27_spill] sm:$0xff] %v9711_v56  ;;  %v2858_v39 = vmul.f32 %v9711_v56, %v9711_v56  ;;  %4159 = vmatpush1.bf16.msra.mxu0 %v7092_v14  ;;  %v7112_v14 = vld [vmem:[#allocation11 + $0xcc] ss:$44 sps:$4 sm:$0xff]  }
 0x815   : > { %10598 = vst [vmem:[#allocation39_spill] sm:$0xff] %v9716_v3  ;;  %v2859_v6 = vmul.f32 %v9716_v3, %v9716_v3  ;;  %v2874_v38 = vadd.f32 %v2857_v8, %v2856_v53  ;;  %v7089_v8 = vld [vmem:[#allocation11 + $0x528] ss:$44 sps:$4 sm:$0xff]   ;;  %4274 = vmatprep.subr.bf16.mxu0 %v7100_v37 }
 0x816   : > { %4086 = vmatpush1.bf16.msra.mxu1 %v7089_v8  ;;  %v7109_v8 = vld [vmem:[#allocation11 + $0xc4] ss:$44 sps:$4 sm:$0xff]  }
 0x817   : > { %2875 = vadd.xlane.f32.xlu0 %v2874_v38  ;;  %v2877_v25 = vadd.f32 %v2859_v6, %v2858_v39 }
 0x81b   : > { %2878 = vadd.xlane.f32.xlu0 %v2877_v25  ;;  %v7097_v25 = vld [vmem:[#allocation11 + $0x14] ss:$44 sps:$4 sm:$0xff]  }
 0x81c   : > { %4201 = vmatprep.subr.bf16.mxu1 %v7097_v25 }
 0x82d   : > { %v2816_v32 = vpop.f32.mrb[72].mxu0 }
 0x82e   : > { %v9723_v44 = vadd.f32 %v7763_v43, %v2816_v32  ;;  %v2818_v28 = vpop.f32.mrb[73].mxu0 }
 0x82f   : > { %v9726_v46 = vadd.f32 %v7764_v0, %v2818_v28  ;;  %v2820_v50 = vpop.f32.mrb[74].mxu0 }
 0x830   : > { %10599 = vst [vmem:[#allocation25_spill] sm:$0xff] %v9723_v44  ;;  %v2860_v35 = vmul.f32 %v9723_v44, %v9723_v44  ;;  %v9731_v26 = vadd.f32 %v7765_v34, %v2820_v50  ;;  %v2822_v47 = vpop.f32.mrb[75].mxu0  ;;  %v2851_v50 = vld [vmem:[%s10607_s18] sm:$0x3] }
 0x831   : > { %10600 = vst [vmem:[#allocation28_spill] sm:$0xff] %v9726_v46  ;;  %v2861_v21 = vmul.f32 %v9726_v46, %v9726_v46  ;;  %v9736_v33 = vadd.f32 %v7766_v18, %v2822_v47  ;;  %v10610_v18 = vsub.s32 1, %v10608_v57  ;;  %v7127_v57 = vld [vmem:[#allocation11 + $0x1cc] ss:$44 sps:$4 sm:$0xff]  }
 0x832   : > { %10601 = vst [vmem:[#allocation36_spill] sm:$0xff] %v9731_v26  ;;  %v2862_v63 = vmul.f32 %v9731_v26, %v9731_v26 }
 0x833   : > { %10602 = vst [vmem:[#allocation38_spill] sm:$0xff] %v9736_v33  ;;  %v2863_v58 = vmul.f32 %v9736_v33, %v9736_v33  ;;  %v2880_v23 = vadd.f32 %v2861_v21, %v2860_v35  ;;  %v9767_v21 = vrot.slane %v2851_v50, %v10609_v31  ;;  %v9771_v45 = vrot.slane %v2851_v50, %v10610_v18  ;;  %v7130_v31 = vld [vmem:[#allocation11 + $0x1d4] ss:$44 sps:$4 sm:$0xff]  }
 0x835   : > { %2881 = vadd.xlane.f32.xlu0 %v2880_v23  ;;  %v2826_v24 = vpop.f32.mrb[76].mxu0  ;;  %v2883_v22 = vadd.f32 %v2863_v58, %v2862_v63 }
 0x836   : > { %v9743_v48 = vadd.f32 %v7767_v1, %v2826_v24  ;;  %v2828_v2 = vpop.f32.mrb[77].mxu0 }
 0x837   : > { %v9746_v62 = vadd.f32 %v7768_v55, %v2828_v2  ;;  %2884 = vadd.xlane.f32.xlu1 %v2883_v22  ;;  %v2830_v16 = vpop.f32.mrb[78].mxu0  ;;  %v7095_v2 = vld [vmem:[#allocation11 + $0x10] ss:$44 sps:$4 sm:$0xff]   ;;  %v7098_v55 = vld [vmem:[#allocation11 + $0x18] ss:$44 sps:$4 sm:$0xff]  }
 0x838   : > { %10603 = vst [vmem:[#allocation31_spill] sm:$0xff] %v9743_v48  ;;  %v2864_v19 = vmul.f32 %v9743_v48, %v9743_v48  ;;  %v9751_v51 = vadd.f32 %v7769_v11, %v2830_v16  ;;  %v2832_v41 = vpop.f32.mrb[79].mxu0  ;;  %v7106_v11 = vld [vmem:[#allocation11 + $0x74] ss:$44 sps:$4 sm:$0xff]  }
 0x839   : > { %10604 = vst [vmem:[#allocation48_spill] sm:$0xff] %v9746_v62  ;;  %v2865_v53 = vmul.f32 %v9746_v62, %v9746_v62  ;;  %v9756_v40 = vadd.f32 %v7770_v42, %v2832_v41 }
 0x83a   : > { %10605 = vst [vmem:[#allocation41_spill] sm:$0xff] %v9751_v51  ;;  %v2866_v39 = vmul.f32 %v9751_v51, %v9751_v51 }
 0x83b   : > { %10606 = vst [vmem:[#allocation49_spill] sm:$0xff] %v9756_v40  ;;  %v2867_v6 = vmul.f32 %v9756_v40, %v9756_v40  ;;  %v2886_v38 = vadd.f32 %v2865_v53, %v2864_v19  ;;  %v7103_v19 = vld [vmem:[#allocation11 + $0x6c] ss:$44 sps:$4 sm:$0xff]   ;;  %v7104_v53 = vld [vmem:[#allocation11 + $0x70] ss:$44 sps:$4 sm:$0xff]  }
 0x83d   : > { %2887 = vadd.xlane.f32.xlu0 %v2886_v38  ;;  %v2889_v30 = vadd.f32 %v2867_v6, %v2866_v39 }
 0x83f   : > { %2890 = vadd.xlane.f32.xlu1 %v2889_v30 }
 0x89c   : > { %v2870_v10 = vpop.xlane.xlu0 %2869 }
 0x89d   : > { %v2892_v29 = vmul.f32 0.00390625, %v2870_v10  ;;  %v7107_v10 = vld [vmem:[#allocation11 + $0xc0] ss:$44 sps:$4 sm:$0xff]  }
 0x89e   : > { %v2873_v5 = vpop.xlane.xlu1 %2872 }
 0x89f   : > { %v2900_v17 = vadd.f32 1e-05, %v2892_v29  ;;  %v2893_v32 = vmul.f32 0.00390625, %v2873_v5  ;;  %v7110_v29 = vld [vmem:[#allocation11 + $0xc8] ss:$44 sps:$4 sm:$0xff]  }
 0x8a1   : > { %7531 = vrsqrt.f32 %v2900_v17  ;;  %v2901_v52 = vadd.f32 1e-05, %v2893_v32  ;;  %v7115_v32 = vld [vmem:[#allocation11 + $0x11c] ss:$44 sps:$4 sm:$0xff]  }
 0x8a3   : > { %7533 = vrsqrt.f32 %v2901_v52  ;;  %v7118_v52 = vld [vmem:[#allocation11 + $0x124] ss:$44 sps:$4 sm:$0xff]  }
 0x8a4   : > { %v2876_v15 = vpop.xlane.xlu0 %2875 }
 0x8a5   : > { %v2894_v43 = vmul.f32 0.00390625, %v2876_v15  ;;  %v7113_v15 = vld [vmem:[#allocation11 + $0x118] ss:$44 sps:$4 sm:$0xff]  }
 0x8a7   : > { %v2902_v28 = vadd.f32 1e-05, %v2894_v43  ;;  %v7116_v43 = vld [vmem:[#allocation11 + $0x120] ss:$44 sps:$4 sm:$0xff]  }
 0x8a8   : > { %v2879_v0 = vpop.xlane.xlu0 %2878 }
 0x8a9   : > { %7535 = vrsqrt.f32 %v2902_v28  ;;  %v2895_v35 = vmul.f32 0.00390625, %v2879_v0  ;;  %v7121_v28 = vld [vmem:[#allocation11 + $0x174] ss:$44 sps:$4 sm:$0xff]   ;;  %v7124_v0 = vld [vmem:[#allocation11 + $0x17c] ss:$44 sps:$4 sm:$0xff]  }
 0x8ab   : > { %v7532_v34 = vpop.eup %7531  ;;  %v2903_v47 = vadd.f32 1e-05, %v2895_v35  ;;  %v7119_v35 = vld [vmem:[#allocation11 + $0x170] ss:$44 sps:$4 sm:$0xff]  }
 0x8ac   : > { %v2916_v9 = vmul.f32 %v7532_v34, %v9683_v60  ;;  %v2917_v63 = vmul.f32 %v7532_v34, %v9686_v36  ;;  %v7122_v34 = vld [vmem:[#allocation11 + $0x178] ss:$44 sps:$4 sm:$0xff]  }
 0x8ad   : > { %v7534_v58 = vpop.eup %7533  ;;  %7537 = vrsqrt.f32 %v2903_v47 }
 0x8ae   : > { %v2918_v23 = vmul.f32 %v7534_v58, %v9691_v59  ;;  %v2919_v27 = vmul.f32 %v7534_v58, %v9696_v13  ;;  %v2943_v61 = vmul.f32 %v9767_v21, %v2916_v9  ;;  %v2944_v24 = vmul.f32 %v9771_v45, %v2917_v63  ;;  %v7125_v58 = vld [vmem:[#allocation11 + $0x1c8] ss:$44 sps:$4 sm:$0xff]  }
 0x8b0   : > { %v2945_v22 = vmul.f32 %v9767_v21, %v2918_v23  ;;  %v2946_v12 = vmul.f32 %v9771_v45, %v2919_v27  ;;  %v7128_v23 = vld [vmem:[#allocation11 + $0x1d0] ss:$44 sps:$4 sm:$0xff]  }
 0x8b2   : > { %v9781_v4 = vpack.c.bf16 %v2945_v22, %v2943_v61  ;;  %v9783_v1 = vpack.c.bf16 %v2946_v12, %v2944_v24  ;;  %v7133_v61 = vld [vmem:[#allocation11 + $0x224] ss:$44 sps:$4 sm:$0xff]   ;;  %v7136_v24 = vld [vmem:[#allocation11 + $0x22c] ss:$44 sps:$4 sm:$0xff]  }
 0x8b3   : > { %v7536_v16 = vpop.eup %7535  ;;  %v7131_v12 = vld [vmem:[#allocation11 + $0x220] ss:$44 sps:$4 sm:$0xff]  }
 0x8b4   : > { %4087 = vmatprep.mubr.bf16.mxu1 %v9783_v1  ;;  %4160 = vmatprep.mubr.bf16.mxu0 %v9783_v1  ;;  %v2920_v41 = vmul.f32 %v7536_v16, %v9703_v20  ;;  %v2921_v49 = vmul.f32 %v7536_v16, %v9706_v7  ;;  %v7139_v16 = vld [vmem:[#allocation11 + $0x27c] ss:$44 sps:$4 sm:$0xff]  }
 0x8b5   : > { %4088 = vmatmul.mubr.bf16.vlgmr.msra.gmra.mrb[32].mxu1 %v9781_v4  ;;  %4161 = vmatmul.mubr.bf16.vlgmr.msra.gmra.mrb[80].mxu0 %v9781_v4 }
 0x8b6   : > { %4202 = vmatpush1.bf16.msra.mxu1 %v7095_v2  ;;  %4275 = vmatpush1.bf16.msra.mxu0 %v7098_v55  ;;  %v2947_v38 = vmul.f32 %v9767_v21, %v2920_v41  ;;  %v2948_v25 = vmul.f32 %v9771_v45, %v2921_v49  ;;  %v7134_v2 = vld [vmem:[#allocation11 + $0x228] ss:$44 sps:$4 sm:$0xff]  }
 0x8b7   : > { %v7538_v42 = vpop.eup %7537  ;;  %4203 = vmatprep.subr.bf16.mxu1 %v7103_v19  ;;  %4276 = vmatprep.subr.bf16.mxu0 %v7106_v11  ;;  %v7142_v19 = vld [vmem:[#allocation11 + $0x284] ss:$44 sps:$4 sm:$0xff]  }
 0x8b8   : > { %v2922_v39 = vmul.f32 %v7538_v42, %v9711_v56  ;;  %v2923_v6 = vmul.f32 %v7538_v42, %v9716_v3 }
 0x8ba   : > { %v2949_v30 = vmul.f32 %v9767_v21, %v2922_v39  ;;  %v2950_v37 = vmul.f32 %v9771_v45, %v2923_v6  ;;  %4204 = vmatpush1.bf16.msra.mxu1 %v7101_v54  ;;  %4277 = vmatpush1.bf16.msra.mxu0 %v7104_v53  ;;  %v7137_v54 = vld [vmem:[#allocation11 + $0x278] ss:$44 sps:$4 sm:$0xff]   ;;  %v7140_v53 = vld [vmem:[#allocation11 + $0x280] ss:$44 sps:$4 sm:$0xff]  }
 0x8bb   : > { %4205 = vmatprep.subr.bf16.mxu1 %v7109_v8  ;;  %4278 = vmatprep.subr.bf16.mxu0 %v7112_v14  ;;  %v7145_v8 = vld [vmem:[#allocation11 + $0x2d4] ss:$44 sps:$4 sm:$0xff]   ;;  %v7148_v14 = vld [vmem:[#allocation11 + $0x2dc] ss:$44 sps:$4 sm:$0xff]  }
 0x8bc   : > { %v9797_v5 = vpack.c.bf16 %v2949_v30, %v2947_v38  ;;  %v9799_v17 = vpack.c.bf16 %v2950_v37, %v2948_v25  ;;  %v7143_v25 = vld [vmem:[#allocation11 + $0x2d0] ss:$44 sps:$4 sm:$0xff]   ;;  %v7146_v30 = vld [vmem:[#allocation11 + $0x2d8] ss:$44 sps:$4 sm:$0xff]  }
 0x8be   : > { %4206 = vmatpush1.bf16.msra.mxu1 %v7107_v10  ;;  %4279 = vmatpush1.bf16.msra.mxu0 %v7110_v29  ;;  %v7151_v10 = vld [vmem:[#allocation11 + $0x32c] ss:$44 sps:$4 sm:$0xff]   ;;  %v7154_v29 = vld [vmem:[#allocation11 + $0x334] ss:$44 sps:$4 sm:$0xff]  }
 0x8bf   : > { %4097 = vmatprep.mubr.bf16.mxu1 %v9799_v17  ;;  %4170 = vmatprep.mubr.bf16.mxu0 %v9799_v17 }
 0x8c0   : > { %4098 = vmatmul.mubr.bf16.gmra.mrb[36].mxu1 %v9797_v5  ;;  %4171 = vmatmul.mubr.bf16.gmra.mrb[84].mxu0 %v9797_v5 }
 0x8c1   : > { %4207 = vmatprep.subr.bf16.mxu1 %v7115_v32  ;;  %4280 = vmatprep.subr.bf16.mxu0 %v7118_v52 }
 0x8c2   : > { %4208 = vmatpush1.bf16.msra.mxu1 %v7113_v15  ;;  %4281 = vmatpush1.bf16.msra.mxu0 %v7116_v43  ;;  %v2882_v50 = vpop.xlane.xlu0 %2881 }
 0x8c3   : > { %v2896_v47 = vmul.f32 0.00390625, %v2882_v50  ;;  %4209 = vmatprep.subr.bf16.mxu1 %v7121_v28  ;;  %4282 = vmatprep.subr.bf16.mxu0 %v7124_v0  ;;  %v7149_v50 = vld [vmem:[#allocation11 + $0x328] ss:$44 sps:$4 sm:$0xff]  }
 0x8c4   : > { %v2885_v18 = vpop.xlane.xlu1 %2884 }
 0x8c5   : > { %v2904_v9 = vadd.f32 1e-05, %v2896_v47  ;;  %v2897_v63 = vmul.f32 0.00390625, %v2885_v18 }
 0x8c6   : > { %4210 = vmatpush1.bf16.msra.mxu1 %v7119_v35  ;;  %4283 = vmatpush1.bf16.msra.mxu0 %v7122_v34  ;;  %v7152_v35 = vld [vmem:[#allocation11 + $0x330] ss:$44 sps:$4 sm:$0xff]  }
 0x8c7   : > { %7539 = vrsqrt.f32 %v2904_v9  ;;  %v2905_v27 = vadd.f32 1e-05, %v2897_v63  ;;  %4211 = vmatprep.subr.bf16.mxu1 %v7127_v57  ;;  %4284 = vmatprep.subr.bf16.mxu0 %v7130_v31  ;;  %v7157_v31 = vld [vmem:[#allocation11 + $0x384] ss:$44 sps:$4 sm:$0xff]   ;;  %v7155_v63 = vld [vmem:[#allocation11 + $0x380] ss:$44 sps:$4 sm:$0xff]  }
 0x8c9   : > { %7541 = vrsqrt.f32 %v2905_v27  ;;  %v7158_v27 = vld [vmem:[#allocation11 + $0x388] ss:$44 sps:$4 sm:$0xff]  }
 0x8ca   : > { %4212 = vmatpush1.bf16.msra.mxu1 %v7125_v58  ;;  %4285 = vmatpush1.bf16.msra.mxu0 %v7128_v23  ;;  %v2888_v22 = vpop.xlane.xlu0 %2887  ;;  %v7160_v58 = vld [vmem:[#allocation11 + $0x38c] ss:$44 sps:$4 sm:$0xff]  }
 0x8cb   : > { %v2898_v55 = vmul.f32 0.00390625, %v2888_v22  ;;  %4213 = vmatprep.subr.bf16.mxu1 %v7133_v61  ;;  %4286 = vmatprep.subr.bf16.mxu0 %v7136_v24  ;;  %v7163_v61 = vld [vmem:[#allocation11 + $0x3dc] ss:$44 sps:$4 sm:$0xff]  }
 0x8cc   : > { %v2891_v11 = vpop.xlane.xlu1 %2890 }
 0x8cd   : > { %v2906_v41 = vadd.f32 1e-05, %v2898_v55  ;;  %v2899_v49 = vmul.f32 0.00390625, %v2891_v11  ;;  %v7161_v11 = vld [vmem:[#allocation11 + $0x3d8] ss:$44 sps:$4 sm:$0xff]  }
 0x8ce   : > { %4214 = vmatpush1.bf16.msra.mxu1 %v7131_v12  ;;  %4287 = vmatpush1.bf16.msra.mxu0 %v7134_v2  ;;  %v7166_v12 = vld [vmem:[#allocation11 + $0x3e4] ss:$44 sps:$4 sm:$0xff]  }
 0x8cf   : > { %7543 = vrsqrt.f32 %v2906_v41  ;;  %v2907_v42 = vadd.f32 1e-05, %v2899_v49  ;;  %4215 = vmatprep.subr.bf16.mxu1 %v7139_v16  ;;  %4288 = vmatprep.subr.bf16.mxu0 %v7142_v19  ;;  %v7164_v41 = vld [vmem:[#allocation11 + $0x3e0] ss:$44 sps:$4 sm:$0xff]  }
 0x8d1   : > { %v7540_v39 = vpop.eup %7539  ;;  %7545 = vrsqrt.f32 %v2907_v42  ;;  %v7172_v42 = vld [vmem:[#allocation11 + $0x43c] ss:$44 sps:$4 sm:$0xff]  }
 0x8d2   : > { %v2924_v6 = vmul.f32 %v7540_v39, %v9723_v44  ;;  %v2925_v38 = vmul.f32 %v7540_v39, %v9726_v46  ;;  %4216 = vmatpush1.bf16.msra.mxu1 %v7137_v54  ;;  %4289 = vmatpush1.bf16.msra.mxu0 %v7140_v53  ;;  %v7169_v53 = vld [vmem:[#allocation11 + $0x434] ss:$44 sps:$4 sm:$0xff]  }
 0x8d3   : > { %v7542_v37 = vpop.eup %7541  ;;  %4217 = vmatprep.subr.bf16.mxu1 %v7145_v8  ;;  %4290 = vmatprep.subr.bf16.mxu0 %v7148_v14  ;;  %v7175_v8 = vld [vmem:[#allocation11 + $0x48c] ss:$44 sps:$4 sm:$0xff]   ;;  %v7178_v14 = vld [vmem:[#allocation11 + $0x494] ss:$44 sps:$4 sm:$0xff]  }
 0x8d4   : > { %v2926_v32 = vmul.f32 %v7542_v37, %v9731_v26  ;;  %v2927_v52 = vmul.f32 %v7542_v37, %v9736_v33  ;;  %v2951_v15 = vmul.f32 %v9767_v21, %v2924_v6  ;;  %v2952_v43 = vmul.f32 %v9771_v45, %v2925_v38  ;;  %v7173_v39 = vld [vmem:[#allocation11 + $0x488] ss:$44 sps:$4 sm:$0xff]   ;;  %v7176_v6 = vld [vmem:[#allocation11 + $0x490] ss:$44 sps:$4 sm:$0xff]  }
 0x8d5   : > { %v7181_v38 = vld [vmem:[#allocation11 + $0x4e4] ss:$44 sps:$4 sm:$0xff]   ;;  %v7182_v37 = vld [vmem:[#allocation11 + $0x4e8] ss:$44 sps:$4 sm:$0xff]  }
 0x8d6   : > { %v2953_v28 = vmul.f32 %v9767_v21, %v2926_v32  ;;  %v2954_v0 = vmul.f32 %v9771_v45, %v2927_v52  ;;  %4218 = vmatpush1.bf16.msra.mxu1 %v7143_v25  ;;  %4291 = vmatpush1.bf16.msra.mxu0 %v7146_v30  ;;  %v7184_v25 = vld [vmem:[#allocation11 + $0x4ec] ss:$44 sps:$4 sm:$0xff]  }
 0x8d7   : > { %4219 = vmatprep.subr.bf16.mxu1 %v7151_v10  ;;  %4292 = vmatprep.subr.bf16.mxu0 %v7154_v29  ;;  %v7179_v30 = vld [vmem:[#allocation11 + $0x4e0] ss:$44 sps:$4 sm:$0xff]   ;;  %v7187_v10 = vld [vmem:[#allocation11 + $0x53c] ss:$44 sps:$4 sm:$0xff]   ;;  %v7190_v29 = vld [vmem:[#allocation11 + $0x544] ss:$44 sps:$4 sm:$0xff]  }
 0x8d8   : > { %v9813_v34 = vpack.c.bf16 %v2953_v28, %v2951_v15  ;;  %v9815_v47 = vpack.c.bf16 %v2954_v0, %v2952_v43  ;;  %v7185_v32 = vld [vmem:[#allocation11 + $0x538] ss:$44 sps:$4 sm:$0xff]   ;;  %v7188_v52 = vld [vmem:[#allocation11 + $0x540] ss:$44 sps:$4 sm:$0xff]   ;;  %v7194_v43 = vld [vmem:[#allocation11 + $0x2e8] ss:$44 sps:$4 sm:$0xff]  }
 0x8d9   : > { %v7544_v57 = vpop.eup %7543  ;;  %v7193_v15 = vld [vmem:[#allocation11 + $0x24] ss:$44 sps:$4 sm:$0xff]   ;;  %v7191_v28 = vld [vmem:[#allocation11 + $0x20] ss:$44 sps:$4 sm:$0xff]   ;;  %v7195_v0 = vld [vmem:[#allocation11 + $0x28] ss:$44 sps:$4 sm:$0xff]  }
 0x8da   : > { %v2928_v18 = vmul.f32 %v7544_v57, %v9743_v48  ;;  %v2929_v9 = vmul.f32 %v7544_v57, %v9746_v62  ;;  %4220 = vmatpush1.bf16.msra.mxu1 %v7149_v50  ;;  %4293 = vmatpush1.bf16.msra.mxu0 %v7152_v35  ;;  %v7198_v50 = vld [vmem:[#allocation11 + $0x7c] ss:$44 sps:$4 sm:$0xff]   ;;  %v7199_v35 = vld [vmem:[#allocation11 + $0x340] ss:$44 sps:$4 sm:$0xff]   ;;  %v7196_v57 = vld [vmem:[#allocation11 + $0x78] ss:$44 sps:$4 sm:$0xff]  }
 0x8db   : > { %v7546_v23 = vpop.eup %7545  ;;  %4107 = vmatprep.mubr.bf16.mxu1 %v9815_v47  ;;  %4180 = vmatprep.mubr.bf16.mxu0 %v9815_v47 }
 0x8dc   : > { %v2930_v24 = vmul.f32 %v7546_v23, %v9751_v51  ;;  %v2931_v22 = vmul.f32 %v7546_v23, %v9756_v40  ;;  %4108 = vmatmul.mubr.bf16.gmra.mrb[40].mxu1 %v9813_v34  ;;  %v2955_v2 = vmul.f32 %v9767_v21, %v2928_v18  ;;  %4181 = vmatmul.mubr.bf16.gmra.mrb[88].mxu0 %v9813_v34  ;;  %v7203_v18 = vld [vmem:[#allocation11 + $0xd4] ss:$44 sps:$4 sm:$0xff]   ;;  %v7208_v23 = vld [vmem:[#allocation11 + $0x12c] ss:$44 sps:$4 sm:$0xff]  }
 0x8dd   : > { %4221 = vmatprep.subr.bf16.mxu1 %v7157_v31  ;;  %v2956_v55 = vmul.f32 %v9771_v45, %v2929_v9  ;;  %4294 = vmatprep.subr.bf16.mxu0 %v7160_v58  ;;  %v7200_v31 = vld [vmem:[#allocation11 + $0x80] ss:$44 sps:$4 sm:$0xff]   ;;  %v7204_v9 = vld [vmem:[#allocation11 + $0x398] ss:$44 sps:$4 sm:$0xff]  }
 0x8de   : > { %v2957_v16 = vmul.f32 %v9767_v21, %v2930_v24  ;;  %v2958_v19 = vmul.f32 %v9771_v45, %v2931_v22  ;;  %4222 = vmatpush1.bf16.msra.mxu1 %v7155_v63  ;;  %4295 = vmatpush1.bf16.msra.mxu0 %v7158_v27  ;;  %v7167_v21 = vld [vmem:[#allocation11 + $0x430] ss:$44 sps:$4 sm:$0xff]   ;;  %v7170_v45 = vld [vmem:[#allocation11 + $0x438] ss:$44 sps:$4 sm:$0xff]  }
 0x8df   : > { %4223 = vmatprep.subr.bf16.mxu1 %v7163_v61  ;;  %4296 = vmatprep.subr.bf16.mxu0 %v7166_v12  ;;  %v7201_v63 = vld [vmem:[#allocation11 + $0xd0] ss:$44 sps:$4 sm:$0xff]   ;;  %v7205_v58 = vld [vmem:[#allocation11 + $0xd8] ss:$44 sps:$4 sm:$0xff]   ;;  %v7206_v61 = vld [vmem:[#allocation11 + $0x128] ss:$44 sps:$4 sm:$0xff]  }
 0x8e0   : > { %v9829_v49 = vpack.c.bf16 %v2957_v16, %v2955_v2  ;;  %v9831_v54 = vpack.c.bf16 %v2958_v19, %v2956_v55  ;;  %v7209_v27 = vld [vmem:[#allocation11 + $0x3f0] ss:$44 sps:$4 sm:$0xff]   ;;  %v7214_v12 = vld [vmem:[#allocation11 + $0x448] ss:$44 sps:$4 sm:$0xff]   ;;  %v7211_v2 = vld [vmem:[#allocation11 + $0x180] ss:$44 sps:$4 sm:$0xff]  }
 0x8e1   : > { %v7210_v24 = vld [vmem:[#allocation11 + $0x130] ss:$44 sps:$4 sm:$0xff]   ;;  %v7215_v55 = vld [vmem:[#allocation11 + $0x188] ss:$44 sps:$4 sm:$0xff]   ;;  %v7219_v19 = vld [vmem:[#allocation11 + $0x4a0] ss:$44 sps:$4 sm:$0xff]  }
 0x8e2   : > { %4224 = vmatpush1.bf16.msra.mxu1 %v7161_v11  ;;  %4117 = vmatprep.mubr.bf16.mxu1 %v9831_v54  ;;  %v7213_v22 = vld [vmem:[#allocation11 + $0x184] ss:$44 sps:$4 sm:$0xff]   ;;  %v7218_v16 = vld [vmem:[#allocation11 + $0x1dc] ss:$44 sps:$4 sm:$0xff]  }
 0x8e3   : > { %4297 = vmatpush1.bf16.msra.mxu0 %v7164_v41  ;;  %4190 = vmatprep.mubr.bf16.mxu0 %v9831_v54  ;;  %v7216_v11 = vld [vmem:[#allocation11 + $0x1d8] ss:$44 sps:$4 sm:$0xff]   ;;  %v7220_v41 = vld [vmem:[#allocation11 + $0x1e0] ss:$44 sps:$4 sm:$0xff]  }
 0x8e4   : > { %4118 = vmatmul.mubr.bf16.gmra.mrb[44].mxu1 %v9829_v49  ;;  %4225 = vmatprep.subr.bf16.mxu1 %v7169_v53  ;;  %v7223_v53 = vld [vmem:[#allocation11 + $0x234] ss:$44 sps:$4 sm:$0xff]  }
 0x8e5   : > { %4191 = vmatmul.mubr.bf16.gmra.mrb[92].mxu0 %v9829_v49  ;;  %4233 = vmatprep.mubr.bf16.mxu1 %v9783_v1 }
 0x8e6   : > { %4298 = vmatprep.subr.bf16.mxu0 %v7172_v42  ;;  %4306 = vmatprep.mubr.bf16.mxu0 %v9783_v1  ;;  %v7224_v42 = vld [vmem:[#allocation11 + $0x4f8] ss:$44 sps:$4 sm:$0xff]  }
 0x8e7   : > { %4226 = vmatpush1.bf16.msra.mxu1 %v7167_v21  ;;  %4299 = vmatpush1.bf16.msra.mxu0 %v7170_v45  ;;  %v7221_v21 = vld [vmem:[#allocation11 + $0x230] ss:$44 sps:$4 sm:$0xff]   ;;  %v7225_v45 = vld [vmem:[#allocation11 + $0x238] ss:$44 sps:$4 sm:$0xff]  }
 0x8e8   : > { %4227 = vmatprep.subr.bf16.mxu1 %v7175_v8  ;;  %4300 = vmatprep.subr.bf16.mxu0 %v7178_v14  ;;  %v7228_v8 = vld [vmem:[#allocation11 + $0x28c] ss:$44 sps:$4 sm:$0xff]   ;;  %v7229_v14 = vld [vmem:[#allocation11 + $0x550] ss:$44 sps:$4 sm:$0xff]  }
 0x8eb   : > { %4228 = vmatpush1.bf16.msra.mxu1 %v7173_v39  ;;  %4301 = vmatpush1.bf16.msra.mxu0 %v7176_v6  ;;  %v7226_v39 = vld [vmem:[#allocation11 + $0x288] ss:$44 sps:$4 sm:$0xff]   ;;  %v7230_v6 = vld [vmem:[#allocation11 + $0x290] ss:$44 sps:$4 sm:$0xff]  }
 0x8ec   : > { %4229 = vmatprep.subr.bf16.mxu1 %v7181_v38  ;;  %4302 = vmatprep.subr.bf16.mxu0 %v7184_v25  ;;  %v7233_v38 = vld [vmem:[#allocation11 + $0x2e4] ss:$44 sps:$4 sm:$0xff]   ;;  %v7231_v25 = vld [vmem:[#allocation11 + $0x2e0] ss:$44 sps:$4 sm:$0xff]  }
 0x8ef   : > { %4230 = vmatpush1.bf16.msra.mxu1 %v7179_v30  ;;  %4303 = vmatpush1.bf16.msra.mxu0 %v7182_v37  ;;  %v7236_v30 = vld [vmem:[#allocation11 + $0x33c] ss:$44 sps:$4 sm:$0xff]   ;;  %v7234_v37 = vld [vmem:[#allocation11 + $0x338] ss:$44 sps:$4 sm:$0xff]  }
 0x8f0   : > { %4231 = vmatprep.subr.bf16.mxu1 %v7187_v10  ;;  %4304 = vmatprep.subr.bf16.mxu0 %v7190_v29  ;;  %v7237_v10 = vld [vmem:[#allocation11 + $0x390] ss:$44 sps:$4 sm:$0xff]   ;;  %v7242_v29 = vld [vmem:[#allocation11 + $0x3ec] ss:$44 sps:$4 sm:$0xff]  }
 0x8f3   : > { %4232 = vmatpush1.bf16.msra.mxu1 %v7185_v32  ;;  %4305 = vmatpush1.bf16.msra.mxu0 %v7188_v52  ;;  %v7240_v32 = vld [vmem:[#allocation11 + $0x3e8] ss:$44 sps:$4 sm:$0xff]   ;;  %v7245_v52 = vld [vmem:[#allocation11 + $0x444] ss:$44 sps:$4 sm:$0xff]  }
 0x8f4   : > { %4347 = vmatprep.subr.bf16.mxu1 %v7193_v15  ;;  %6569 = vmatprep.subr.bf16.mxu0 %v7194_v43  ;;  %v7243_v15 = vld [vmem:[#allocation11 + $0x440] ss:$44 sps:$4 sm:$0xff]   ;;  %v7248_v43 = vld [vmem:[#allocation11 + $0x49c] ss:$44 sps:$4 sm:$0xff]  }
 0x8f6   : > { %4234 = vmatmul.mubr.bf16.vlgmr.msra.gmra.mrb[48].mxu1 %v9781_v4  ;;  %4307 = vmatmul.mubr.bf16.vlgmr.msra.gmra.mrb[96].mxu0 %v9781_v4 }
 0x8f7   : > { %4243 = vmatprep.mubr.bf16.mxu1 %v9799_v17  ;;  %4316 = vmatprep.mubr.bf16.mxu0 %v9799_v17 }
 0x8f8   : > { %4348 = vmatpush1.bf16.msra.mxu1 %v7191_v28  ;;  %6570 = vmatpush3.bf16.msra.mxu0 %v7195_v0  ;;  %v7246_v28 = vld [vmem:[#allocation11 + $0x498] ss:$44 sps:$4 sm:$0xff]   ;;  %v7251_v0 = vld [vmem:[#allocation11 + $0x4f4] ss:$44 sps:$4 sm:$0xff]  }
 0x8f9   : > { %4349 = vmatprep.subr.bf16.mxu1 %v7198_v50  ;;  %6571 = vmatprep.subr.bf16.mxu0 %v7199_v35  ;;  %v7249_v50 = vld [vmem:[#allocation11 + $0x4f0] ss:$44 sps:$4 sm:$0xff]   ;;  %v7254_v35 = vld [vmem:[#allocation11 + $0x54c] ss:$44 sps:$4 sm:$0xff]  }
 0x8fc   : > { %4350 = vmatpush1.bf16.msra.mxu1 %v7196_v57  ;;  %6572 = vmatpush3.bf16.msra.mxu0 %v7200_v31  ;;  %v7252_v57 = vld [vmem:[#allocation11 + $0x548] ss:$44 sps:$4 sm:$0xff]  }
 0x8fd   : > { %4351 = vmatprep.subr.bf16.mxu1 %v7203_v18  ;;  %6573 = vmatprep.subr.bf16.mxu0 %v7204_v9 }
 0x8fe   : > { %4244 = vmatmul.mubr.bf16.gmra.mrb[52].mxu1 %v9797_v5  ;;  %4317 = vmatmul.mubr.bf16.gmra.mrb[100].mxu0 %v9797_v5 }
 0x8ff   : > { %4253 = vmatprep.mubr.bf16.mxu1 %v9815_v47  ;;  %4326 = vmatprep.mubr.bf16.mxu0 %v9815_v47 }
 0x900   : > { %4352 = vmatpush1.bf16.msra.mxu1 %v7201_v63  ;;  %6574 = vmatpush3.bf16.msra.mxu0 %v7205_v58  ;;  %v7260_v58 = vld [vmem:[#allocation12 + $0x14] ss:$8 sps:$4 sm:$0xff]  }
 0x901   : > { %4353 = vmatprep.subr.bf16.mxu1 %v7208_v23  ;;  %6575 = vmatprep.subr.bf16.mxu0 %v7209_v27 }
 0x904   : > { %4354 = vmatpush1.bf16.msra.mxu1 %v7206_v61  ;;  %6576 = vmatpush3.bf16.msra.mxu0 %v7210_v24 }
 0x905   : > { %4355 = vmatprep.subr.bf16.mxu1 %v7213_v22  ;;  %6577 = vmatprep.subr.bf16.mxu0 %v7214_v12 }
 0x906   : > { %4254 = vmatmul.mubr.bf16.gmra.mrb[56].mxu1 %v9813_v34  ;;  %4327 = vmatmul.mubr.bf16.gmra.mrb[104].mxu0 %v9813_v34 }
 0x907   : > { %4263 = vmatprep.mubr.bf16.mxu1 %v9831_v54  ;;  %4336 = vmatprep.mubr.bf16.mxu0 %v9831_v54 }
 0x908   : > { %4356 = vmatpush1.bf16.msra.mxu1 %v7211_v2  ;;  %6578 = vmatpush3.bf16.msra.mxu0 %v7215_v55 }
 0x909   : > { %4357 = vmatprep.subr.bf16.mxu1 %v7218_v16  ;;  %6579 = vmatprep.subr.bf16.mxu0 %v7219_v19  ;;  %v7261_v16 = vld [vmem:[#allocation12 + $0x20] ss:$8 sps:$4 sm:$0xff]   ;;  %v7263_v19 = vld [vmem:[#allocation12 + $0x24] ss:$8 sps:$4 sm:$0xff]  }
 0x90c   : > { %4358 = vmatpush1.bf16.msra.mxu1 %v7216_v11  ;;  %6580 = vmatpush3.bf16.msra.mxu0 %v7220_v41  ;;  %v7266_v11 = vld [vmem:[#allocation12 + $0x34] ss:$8 sps:$4 sm:$0xff]   ;;  %v7264_v41 = vld [vmem:[#allocation12 + $0x30] ss:$8 sps:$4 sm:$0xff]  }
 0x90d   : > { %4359 = vmatprep.subr.bf16.mxu1 %v7223_v53  ;;  %6581 = vmatprep.subr.bf16.mxu0 %v7224_v42  ;;  %v7269_v53 = vld [vmem:[#allocation12 + $0x44] ss:$8 sps:$4 sm:$0xff]   ;;  %v7267_v42 = vld [vmem:[#allocation12 + $0x40] ss:$8 sps:$4 sm:$0xff]  }
 0x90e   : > { %4264 = vmatmul.mubr.bf16.gmra.mrb[60].mxu1 %v9829_v49  ;;  %4337 = vmatmul.mubr.bf16.gmra.mrb[108].mxu0 %v9829_v49 }
 0x90f   : > { %4379 = vmatprep.mubr.bf16.mxu1 %v9783_v1  ;;  %4452 = vmatprep.mubr.bf16.mxu0 %v9783_v1  ;;  %v7239_v1 = vld [vmem:[#allocation11 + $0x394] ss:$44 sps:$4 sm:$0xff]  }
 0x910   : > { %4360 = vmatpush1.bf16.msra.mxu1 %v7221_v21  ;;  %6582 = vmatpush3.bf16.msra.mxu0 %v7225_v45  ;;  %v7272_v21 = vld [vmem:[#allocation12 + $0x54] ss:$8 sps:$4 sm:$0xff]   ;;  %v7270_v45 = vld [vmem:[#allocation12 + $0x50] ss:$8 sps:$4 sm:$0xff]  }
 0x911   : > { %4361 = vmatprep.subr.bf16.mxu1 %v7228_v8  ;;  %6583 = vmatprep.subr.bf16.mxu0 %v7229_v14  ;;  %v7275_v8 = vld [vmem:[#allocation12 + $0x64] ss:$8 sps:$4 sm:$0xff]   ;;  %v7273_v14 = vld [vmem:[#allocation12 + $0x60] ss:$8 sps:$4 sm:$0xff]  }
 0x914   : > { %4362 = vmatpush1.bf16.msra.mxu1 %v7226_v39  ;;  %6584 = vmatpush3.bf16.msra.mxu0 %v7230_v6  ;;  %v7278_v39 = vld [vmem:[#allocation12 + $0x74] ss:$8 sps:$4 sm:$0xff]   ;;  %v7276_v6 = vld [vmem:[#allocation12 + $0x70] ss:$8 sps:$4 sm:$0xff]  }
 0x915   : > { %4363 = vmatprep.subr.bf16.mxu1 %v7233_v38  ;;  %v7281_v38 = vld [vmem:[#allocation12 + $0x84] ss:$8 sps:$4 sm:$0xff]  }
 0x917   : > { %4453 = vmatmul.mubr.bf16.vlgmr.msra.gmra.mrb[112].mxu0 %v9781_v4 }
 0x918   : > { %4364 = vmatpush1.bf16.msra.mxu1 %v7231_v25  ;;  %4460 = vmatprep.mubr.bf16.mxu0 %v9799_v17 }
 0x919   : > { %4365 = vmatprep.subr.bf16.mxu1 %v7236_v30  ;;  %v7279_v30 = vld [vmem:[#allocation12 + $0x80] ss:$8 sps:$4 sm:$0xff]  }
 0x91c   : > { %4366 = vmatpush1.bf16.msra.mxu1 %v7234_v37 }
 0x91d   : > { %4367 = vmatprep.subr.bf16.mxu1 %v7239_v1 }
 0x91f   : > { %4461 = vmatmul.mubr.bf16.gmra.mrb[116].mxu0 %v9797_v5 }
 0x920   : > { %4368 = vmatpush1.bf16.msra.mxu1 %v7237_v10  ;;  %4468 = vmatprep.mubr.bf16.mxu0 %v9815_v47 }
 0x921   : > { %4369 = vmatprep.subr.bf16.mxu1 %v7242_v29 }
 0x924   : > { %4370 = vmatpush1.bf16.msra.mxu1 %v7240_v32 }
 0x925   : > { %4371 = vmatprep.subr.bf16.mxu1 %v7245_v52 }
 0x927   : > { %4469 = vmatmul.mubr.bf16.gmra.mrb[120].mxu0 %v9813_v34 }
 0x928   : > { %4372 = vmatpush1.bf16.msra.mxu1 %v7243_v15  ;;  %4476 = vmatprep.mubr.bf16.mxu0 %v9831_v54 }
 0x929   : > { %4373 = vmatprep.subr.bf16.mxu1 %v7248_v43  ;;  %v7282_v43 = vld [vmem:[#allocation12 + $0x90] ss:$8 sps:$4 sm:$0xff]  }
 0x92c   : > { %4374 = vmatpush1.bf16.msra.mxu1 %v7246_v28  ;;  %v7284_v28 = vld [vmem:[#allocation12 + $0x94] ss:$8 sps:$4 sm:$0xff]  }
 0x92d   : > { %4375 = vmatprep.subr.bf16.mxu1 %v7251_v0  ;;  %v7287_v0 = vld [vmem:[#allocation12 + $0xa4] ss:$8 sps:$4 sm:$0xff]  }
 0x92f   : > { %4477 = vmatmul.mubr.bf16.gmra.mrb[124].mxu0 %v9829_v49 }
 0x930   : > { %4376 = vmatpush1.bf16.msra.mxu1 %v7249_v50 }
 0x931   : > { %4377 = vmatprep.subr.bf16.mxu1 %v7254_v35 }
 0x934   : > { %4378 = vmatpush1.bf16.msra.mxu1 %v7252_v57 }
 0x937   : > { %4380 = vmatmul.mubr.bf16.vlgmr.msra.gmra.mrb[64].mxu1 %v9781_v4 }
 0x938   : > { %4389 = vmatprep.mubr.bf16.mxu1 %v9799_v17 }
 0x93f   : > { %4390 = vmatmul.mubr.bf16.gmra.mrb[68].mxu1 %v9797_v5 }
 0x940   : > { %4399 = vmatprep.mubr.bf16.mxu1 %v9815_v47 }
 0x947   : > { %4400 = vmatmul.mubr.bf16.gmra.mrb[72].mxu1 %v9813_v34  ;;  %v7255_v34 = vld [vmem:[#allocation12] ss:$8 sps:$4 sm:$0xff]  }
 0x948   : > { %4409 = vmatprep.mubr.bf16.mxu1 %v9831_v54  ;;  %v7257_v54 = vld [vmem:[#allocation12 + $0x4] ss:$8 sps:$4 sm:$0xff]  }
 0x949   : > { %5665 = vmatprep.subr.bf16.mxu1 %v7257_v54 }
 0x94a   : > { %5666 = vmatpush1.bf16.msra.mxu1 %v7255_v34  ;;  %v7285_v34 = vld [vmem:[#allocation12 + $0xa0] ss:$8 sps:$4 sm:$0xff]  }
 0x94b   : > { %5667 = vmatprep.subr.bf16.mxu1 %v7260_v58 }
 0x94f   : > { %4410 = vmatmul.mubr.bf16.gmra.mrb[76].mxu1 %v9829_v49  ;;  %v7258_v49 = vld [vmem:[#allocation12 + $0x10] ss:$8 sps:$4 sm:$0xff]  }
 0x950   : > { %5668 = vmatpush1.bf16.msra.mxu1 %v7258_v49 }
 0x951   : > { %5669 = vmatprep.subr.bf16.mxu1 %v7263_v19 }
 0x954   : > { %5670 = vmatpush1.bf16.msra.mxu1 %v7261_v16 }
 0x955   : > { %5671 = vmatprep.subr.bf16.mxu1 %v7266_v11  ;;  %v7288_v11 = vld [vmem:[#allocation12 + $0xb0] ss:$8 sps:$4 sm:$0xff]  }
 0x958   : > { %5672 = vmatpush1.bf16.msra.mxu1 %v7264_v41  ;;  %v7290_v41 = vld [vmem:[#allocation12 + $0xb4] ss:$8 sps:$4 sm:$0xff]  }
 0x959   : > { %5673 = vmatprep.subr.bf16.mxu1 %v7269_v53  ;;  %v7293_v53 = vld [vmem:[#allocation12 + $0xc4] ss:$8 sps:$4 sm:$0xff]  }
 0x95c   : > { %5674 = vmatpush1.bf16.msra.mxu1 %v7267_v42  ;;  %v7291_v42 = vld [vmem:[#allocation12 + $0xc0] ss:$8 sps:$4 sm:$0xff]  }
 0x95d   : > { %5675 = vmatprep.subr.bf16.mxu1 %v7272_v21  ;;  %v7296_v21 = vld [vmem:[#allocation12 + $0xd4] ss:$8 sps:$4 sm:$0xff]  }
 0x960   : > { %5676 = vmatpush1.bf16.msra.mxu1 %v7270_v45  ;;  %v7294_v45 = vld [vmem:[#allocation12 + $0xd0] ss:$8 sps:$4 sm:$0xff]  }
 0x961   : > { %5677 = vmatprep.subr.bf16.mxu1 %v7275_v8  ;;  %v7299_v8 = vld [vmem:[#allocation12 + $0xe4] ss:$8 sps:$4 sm:$0xff]  }
 0x964   : > { %5678 = vmatpush1.bf16.msra.mxu1 %v7273_v14  ;;  %v7297_v14 = vld [vmem:[#allocation12 + $0xe0] ss:$8 sps:$4 sm:$0xff]  }
 0x965   : > { %5679 = vmatprep.subr.bf16.mxu1 %v7278_v39 }
 0x968   : > { %5680 = vmatpush1.bf16.msra.mxu1 %v7276_v6 }
 0x969   : > { %5681 = vmatprep.subr.bf16.mxu1 %v7281_v38 }
 0x96c   : > { %5682 = vmatpush1.bf16.msra.mxu1 %v7279_v30 }
 0x96d   : > { %5683 = vmatprep.subr.bf16.mxu1 %v7284_v28 }
 0x970   : > { %5684 = vmatpush1.bf16.msra.mxu1 %v7282_v43 }
 0x971   : > { %5685 = vmatprep.subr.bf16.mxu1 %v7287_v0 }
 0x974   : > { %5686 = vmatpush1.bf16.msra.mxu1 %v7285_v34 }
 0x975   : > { %5687 = vmatprep.subr.bf16.mxu1 %v7290_v41  ;;  %v7302_v41 = vld [vmem:[#allocation12 + $0xf4] ss:$8 sps:$4 sm:$0xff]  }
 0x978   : > { %5688 = vmatpush1.bf16.msra.mxu1 %v7288_v11  ;;  %v7300_v11 = vld [vmem:[#allocation12 + $0xf0] ss:$8 sps:$4 sm:$0xff]  }
 0x979   : > { %5689 = vmatprep.subr.bf16.mxu1 %v7293_v53  ;;  %v7305_v53 = vld [vmem:[#allocation12 + $0x104] ss:$8 sps:$4 sm:$0xff]  }
 0x97c   : > { %5690 = vmatpush1.bf16.msra.mxu1 %v7291_v42 }
 0x97d   : > { %5691 = vmatprep.subr.bf16.mxu1 %v7296_v21 }
 0x980   : > { %5692 = vmatpush1.bf16.msra.mxu1 %v7294_v45 }
 0x981   : > { %5693 = vmatprep.subr.bf16.mxu1 %v7299_v8 }
 0x984   : > { %5694 = vmatpush1.bf16.msra.mxu1 %v7297_v14 }
 0x985   : > { %5695 = vmatprep.subr.bf16.mxu1 %v7302_v41 }
 0x988   : > { %v9869_v31 = vpop.f32.mrb[32].mxu1  ;;  %v9871_v18 = vpop.f32.mrb[80].mxu0  ;;  %5696 = vmatpush1.bf16.msra.mxu1 %v7300_v11 }
 0x989   : > { %v9873_v9 = vpop.f32.mrb[33].mxu1  ;;  %v9875_v63 = vpop.f32.mrb[81].mxu0  ;;  %5738 = vmatprep.subr.bf16.mxu1 %v7305_v53 }
 0x98a   : > { %v9877_v4 = vpop.f32.mrb[34].mxu1  ;;  %v9879_v17 = vpop.f32.mrb[82].mxu0 }
 0x98b   : > { %v9881_v5 = vpop.f32.mrb[35].mxu1  ;;  %v9883_v47 = vpop.f32.mrb[83].mxu0 }
 0x993   : > { %v9885_v23 = vpop.f32.mrb[36].mxu1  ;;  %v9887_v27 = vpop.f32.mrb[84].mxu0 }
 0x994   : > { %v9889_v61 = vpop.f32.mrb[37].mxu1  ;;  %v9891_v24 = vpop.f32.mrb[85].mxu0 }
 0x995   : > { %v9893_v22 = vpop.f32.mrb[38].mxu1  ;;  %v9895_v12 = vpop.f32.mrb[86].mxu0 }
 0x996   : > { %v9897_v2 = vpop.f32.mrb[39].mxu1  ;;  %v9899_v55 = vpop.f32.mrb[87].mxu0 }
 0x9af   : > { %v9901_v25 = vpop.f32.mrb[40].mxu1  ;;  %v9903_v37 = vpop.f32.mrb[88].mxu0 }
 0x9b0   : > { %v9905_v1 = vpop.f32.mrb[41].mxu1  ;;  %v9907_v10 = vpop.f32.mrb[89].mxu0 }
 0x9b1   : > { %v9909_v29 = vpop.f32.mrb[42].mxu1  ;;  %v9911_v32 = vpop.f32.mrb[90].mxu0 }
 0x9b2   : > { %v9913_v52 = vpop.f32.mrb[43].mxu1  ;;  %v9915_v15 = vpop.f32.mrb[91].mxu0 }
 0x9b7   : > { %v9917_v50 = vpop.f32.mrb[44].mxu1 }
 0x9b8   : > { %v9919_v35 = vpop.f32.mrb[92].mxu0  ;;  %v9921_v57 = vpop.f32.mrb[45].mxu1 }
 0x9b9   : > { %v9923_v54 = vpop.f32.mrb[93].mxu0  ;;  %v9925_v49 = vpop.f32.mrb[46].mxu1 }
 0x9ba   : > { %v9927_v58 = vpop.f32.mrb[94].mxu0  ;;  %v9929_v16 = vpop.f32.mrb[47].mxu1 }
 0x9bb   : > { %v9931_v19 = vpop.f32.mrb[95].mxu0 }
 0x9c9   : > { %v9933_v39 = vpop.f32.mrb[48].mxu1  ;;  %v4308_v6 = vpop.f32.mrb[96].mxu0 }
 0x9ca   : > { %4871 = vrot.lane.b32.xlu0 %v4308_v6, %s8037_s27  ;;  %v9936_v38 = vpop.f32.mrb[49].mxu1  ;;  %v4310_v30 = vpop.f32.mrb[97].mxu0 }
 0x9cb   : > { %4873 = vrot.lane.b32.xlu1 %v4310_v30, %s8037_s27  ;;  %v9939_v43 = vpop.f32.mrb[50].mxu1  ;;  %v4312_v28 = vpop.f32.mrb[98].mxu0 }
 0x9cc   : > { %v9941_v0 = vpop.f32.mrb[51].mxu1  ;;  %v4314_v34 = vpop.f32.mrb[99].mxu0 }
 0x9ce   : > { %4869 = vrot.lane.b32.xlu0 %v9936_v38, %s8037_s27 }
 0x9cf   : > { %4883 = vrot.lane.b32.xlu1 %v4312_v28, %s8037_s27 }
 0x9d1   : > { %v9946_v42 = vpop.f32.mrb[52].mxu1  ;;  %v4318_v21 = vpop.f32.mrb[100].mxu0 }
 0x9d2   : > { %v4320_v45 = vpop.f32.mrb[101].mxu0  ;;  %4895 = vrot.lane.b32.xlu0 %v4318_v21, %s8037_s27  ;;  %v9949_v8 = vpop.f32.mrb[53].mxu1 }
 0x9d3   : > { %4885 = vrot.lane.b32.xlu1 %v4314_v34, %s8037_s27  ;;  %v9952_v14 = vpop.f32.mrb[54].mxu1  ;;  %v4322_v6 = vpop.f32.mrb[102].mxu0 }
 0x9d4   : > { %v9954_v30 = vpop.f32.mrb[55].mxu1  ;;  %v4324_v28 = vpop.f32.mrb[103].mxu0 }
 0x9d5   : > { %10611 = vst [vmem:[#allocation40_spill] sm:$0xff] %v9954_v30 }
 0x9d6   : > { %4893 = vrot.lane.b32.xlu0 %v9949_v8, %s8037_s27 }
 0x9d7   : > { %4881 = vrot.lane.b32.xlu1 %v9941_v0, %s8037_s27 }
 0x9d9   : > { %v9960_v11 = vpop.f32.mrb[56].mxu1  ;;  %v4328_v41 = vpop.f32.mrb[104].mxu0 }
 0x9da   : > { %10612 = vst [vmem:[#allocation47_spill] sm:$0xff] %v9960_v11  ;;  %v4330_v53 = vpop.f32.mrb[105].mxu0  ;;  %4907 = vrot.lane.b32.xlu0 %v4322_v6, %s8037_s27  ;;  %v9963_v21 = vpop.f32.mrb[57].mxu1 }
 0x9db   : > { %10613 = vst [vmem:[#allocation33_spill] sm:$0xff] %v9963_v21  ;;  %v4332_v34 = vpop.f32.mrb[106].mxu0  ;;  %4897 = vrot.lane.b32.xlu1 %v4320_v45, %s8037_s27  ;;  %v9966_v40 = vpop.f32.mrb[58].mxu1 }
 0x9dc   : > { %10614 = vst [vmem:[#allocation42_spill] sm:$0xff] %v9966_v40  ;;  %v9968_v51 = vpop.f32.mrb[59].mxu1  ;;  %v4334_v62 = vpop.f32.mrb[107].mxu0  ;;  %v6411_v40 = vmul.f32 -1.442695, %v9921_v57 }
 0x9dd   : > { %10615 = vst [vmem:[#allocation26_spill] sm:$0xff] %v9968_v51 }
 0x9de   : > { %4919 = vrot.lane.b32.xlu0 %v4328_v41, %s8037_s27 }
 0x9df   : > { %4909 = vrot.lane.b32.xlu1 %v4324_v28, %s8037_s27 }
 0x9e1   : > { %v9972_v48 = vpop.f32.mrb[60].mxu1  ;;  %v4338_v33 = vpop.f32.mrb[108].mxu0 }
 0x9e2   : > { %10616 = vst [vmem:[#allocation44_spill] sm:$0xff] %v9972_v48  ;;  %v4340_v26 = vpop.f32.mrb[109].mxu0  ;;  %4917 = vrot.lane.b32.xlu0 %v9963_v21, %s8037_s27  ;;  %v9976_v6 = vpop.f32.mrb[61].mxu1  ;;  %v6410_v21 = vmul.f32 -1.442695, %v9917_v50 }
 0x9e3   : > { %10617 = vst [vmem:[#allocation46_spill] sm:$0xff] %v9976_v6  ;;  %v4342_v46 = vpop.f32.mrb[110].mxu0  ;;  %4905 = vrot.lane.b32.xlu1 %v9954_v30, %s8037_s27  ;;  %v9980_v45 = vpop.f32.mrb[62].mxu1 }
 0x9e4   : > { %10618 = vst [vmem:[#allocation43_spill] sm:$0xff] %v9980_v45  ;;  %v9982_v44 = vpop.f32.mrb[63].mxu1  ;;  %v4344_v41 = vpop.f32.mrb[111].mxu0 }
 0x9e5   : > { %10619 = vst [vmem:[#allocation45_spill] sm:$0xff] %v9982_v44 }
 0x9e6   : > { %4931 = vrot.lane.b32.xlu0 %v4332_v34, %s8037_s27 }
 0x9e7   : > { %4921 = vrot.lane.b32.xlu1 %v4330_v53, %s8037_s27 }
 0x9ea   : > { %v6585_v28 = vpop.f32.mrb[112].mxu0  ;;  %4943 = vrot.lane.b32.xlu0 %v4338_v33, %s8037_s27 }
 0x9eb   : > { %v6586_v3 = vpop.f32.mrb[113].mxu0  ;;  %4933 = vrot.lane.b32.xlu1 %v4334_v62, %s8037_s27 }
 0x9ec   : > { %v9988_v56 = vadd.f32 %v6586_v3, %v6585_v28  ;;  %v6588_v7 = vpop.f32.mrb[114].mxu0 }
 0x9ed   : > { %v6589_v20 = vpop.f32.mrb[115].mxu0 }
 0x9ee   : > { %v9990_v13 = vadd.f32 %v6589_v20, %v6588_v7  ;;  %4941 = vrot.lane.b32.xlu0 %v9976_v6, %s8037_s27 }
 0x9ef   : > { %4929 = vrot.lane.b32.xlu1 %v9968_v51, %s8037_s27 }
 0x9f2   : > { %v6591_v34 = vpop.f32.mrb[116].mxu0  ;;  %4955 = vrot.lane.b32.xlu0 %v4342_v46, %s8037_s27 }
 0x9f3   : > { %v6592_v53 = vpop.f32.mrb[117].mxu0  ;;  %4945 = vrot.lane.b32.xlu1 %v4340_v26, %s8037_s27 }
 0x9f4   : > { %v6593_v33 = vadd.f32 %v6592_v53, %v6591_v34  ;;  %v6594_v62 = vpop.f32.mrb[118].mxu0 }
 0x9f5   : > { %v6595_v3 = vpop.f32.mrb[119].mxu0 }
 0x9f6   : > { %v6596_v28 = vadd.f32 %v6595_v3, %v6594_v62 }
 0x9f7   : > { %4957 = vrot.lane.b32.xlu1 %v4344_v41, %s8037_s27 }
 0x9fa   : > { %v6597_v20 = vpop.f32.mrb[120].mxu0 }
 0x9fb   : > { %v6598_v7 = vpop.f32.mrb[121].mxu0  ;;  %4953 = vrot.lane.b32.xlu1 %v9982_v44, %s8037_s27 }
 0x9fc   : > { %v6599_v59 = vadd.f32 %v6598_v7, %v6597_v20  ;;  %v6600_v36 = vpop.f32.mrb[122].mxu0 }
 0x9fd   : > { %v6601_v60 = vpop.f32.mrb[123].mxu0 }
 0x9fe   : > { %v6602_v45 = vadd.f32 %v6601_v60, %v6600_v36 }
 0xa02   : > { %v6603_v6 = vpop.f32.mrb[124].mxu0 }
 0xa03   : > { %v6604_v46 = vpop.f32.mrb[125].mxu0 }
 0xa04   : > { %v10001_v48 = vadd.f32 %v6604_v46, %v6603_v6  ;;  %v6606_v26 = vpop.f32.mrb[126].mxu0 }
 0xa05   : > { %v6607_v34 = vpop.f32.mrb[127].mxu0 }
 0xa06   : > { %v10003_v53 = vadd.f32 %v6607_v34, %v6606_v26  ;;  %v6375_v34 = vmul.f32 -1.442695, %v9873_v9 }
 0xa08   : > { %7547 = vpow2.f32 %v6375_v34  ;;  %v6386_v34 = vmul.f32 -1.442695, %v9885_v23 }
 0xa0a   : > { %v4381_v62 = vpop.f32.mrb[64].mxu1 }
 0xa0b   : > { %4875 = vrot.lane.b32.xlu0 %v4381_v62, %s8037_s27  ;;  %v4383_v41 = vpop.f32.mrb[65].mxu1 }
 0xa0c   : > { %4877 = vrot.lane.b32.xlu1 %v4383_v41, %s8037_s27  ;;  %v4385_v3 = vpop.f32.mrb[66].mxu1  ;;  %v6381_v41 = vmul.f32 -1.442695, %v9881_v5 }
 0xa0d   : > { %v4387_v44 = vpop.f32.mrb[67].mxu1 }
 0xa0e   : > { %7549 = vpow2.f32 %v6381_v41  ;;  %v6392_v41 = vmul.f32 -1.442695, %v9893_v22 }
 0xa0f   : > { %4887 = vrot.lane.b32.xlu0 %v4385_v3, %s8037_s27 }
 0xa10   : > { %4889 = vrot.lane.b32.xlu1 %v4387_v44, %s8037_s27 }
 0xa12   : > { %v4391_v60 = vpop.f32.mrb[68].mxu1 }
 0xa13   : > { %4899 = vrot.lane.b32.xlu0 %v4391_v60, %s8037_s27  ;;  %v4393_v36 = vpop.f32.mrb[69].mxu1 }
 0xa14   : > { %4901 = vrot.lane.b32.xlu1 %v4393_v36, %s8037_s27  ;;  %v4395_v6 = vpop.f32.mrb[70].mxu1 }
 0xa15   : > { %v4397_v20 = vpop.f32.mrb[71].mxu1 }
 0xa17   : > { %4911 = vrot.lane.b32.xlu0 %v4395_v6, %s8037_s27  ;;  %v6374_v6 = vmul.f32 -1.442695, %v9869_v31 }
 0xa18   : > { %4913 = vrot.lane.b32.xlu1 %v4397_v20, %s8037_s27  ;;  %v6380_v20 = vmul.f32 -1.442695, %v9877_v4 }
 0xa19   : > { %7551 = vpow2.f32 %v6374_v6 }
 0xa1a   : > { %v4401_v7 = vpop.f32.mrb[72].mxu1  ;;  %7553 = vpow2.f32 %v6380_v20 }
 0xa1b   : > { %4923 = vrot.lane.b32.xlu0 %v4401_v7, %s8037_s27  ;;  %v4403_v46 = vpop.f32.mrb[73].mxu1  ;;  %v6387_v7 = vmul.f32 -1.442695, %v9889_v61 }
 0xa1c   : > { %4925 = vrot.lane.b32.xlu1 %v4403_v46, %s8037_s27  ;;  %v4405_v26 = vpop.f32.mrb[74].mxu1  ;;  %v7548_v46 = vpop.eup %7547 }
 0xa1d   : > { %v4407_v44 = vpop.f32.mrb[75].mxu1  ;;  %7555 = vpow2.f32 %v6387_v7 }
 0xa1f   : > { %4935 = vrot.lane.b32.xlu0 %v4405_v26, %s8037_s27  ;;  %v6393_v26 = vmul.f32 -1.442695, %v9897_v2 }
 0xa20   : > { %4937 = vrot.lane.b32.xlu1 %v4407_v44, %s8037_s27  ;;  %v7550_v44 = vpop.eup %7549 }
 0xa21   : > { %7557 = vpow2.f32 %v6393_v26  ;;  %v6404_v26 = vmul.f32 -1.442695, %v9909_v29 }
 0xa22   : > { %v4411_v62 = vpop.f32.mrb[76].mxu1  ;;  %7559 = vpow2.f32 %v6386_v34 }
 0xa23   : > { %4947 = vrot.lane.b32.xlu0 %v4411_v62, %s8037_s27  ;;  %v4413_v3 = vpop.f32.mrb[77].mxu1  ;;  %v4630_v62 = vadd.f32 1.0, %v7548_v46  ;;  %v6398_v46 = vmul.f32 -1.442695, %v9901_v25 }
 0xa24   : > { %4949 = vrot.lane.b32.xlu1 %v4413_v3, %s8037_s27  ;;  %v4415_v60 = vpop.f32.mrb[78].mxu1  ;;  %v4636_v3 = vadd.f32 1.0, %v7550_v44 }
 0xa25   : > { %v4417_v36 = vpop.f32.mrb[79].mxu1  ;;  %7561 = vrcp.f32 %v4630_v62 }
 0xa26   : > { %7563 = vpow2.f32 %v6392_v41 }
 0xa27   : > { %4959 = vrot.lane.b32.xlu0 %v4415_v60, %s8037_s27  ;;  %7565 = vrcp.f32 %v4636_v3 }
 0xa28   : > { %4961 = vrot.lane.b32.xlu1 %v4417_v36, %s8037_s27  ;;  %v6405_v36 = vmul.f32 -1.442695, %v9913_v52 }
 0xa2b   : > { %4879 = vrot.lane.b32.xlu0 %v9988_v56, %s8037_s27  ;;  %v7552_v56 = vpop.eup %7551 }
 0xa2c   : > { %4891 = vrot.lane.b32.xlu1 %v9990_v13, %s8037_s27  ;;  %v7554_v13 = vpop.eup %7553 }
 0xa2d   : > { %v7556_v60 = vpop.eup %7555 }
 0xa2e   : > { %v7558_v6 = vpop.eup %7557  ;;  %v4642_v20 = vadd.f32 1.0, %v7556_v60 }
 0xa2f   : > { %4903 = vrot.lane.b32.xlu0 %v6593_v33, %s8037_s27  ;;  %v4629_v33 = vadd.f32 1.0, %v7552_v56  ;;  %v4648_v44 = vadd.f32 1.0, %v7558_v6 }
 0xa30   : > { %4915 = vrot.lane.b32.xlu1 %v6596_v28, %s8037_s27  ;;  %v4635_v28 = vadd.f32 1.0, %v7554_v13 }
 0xa31   : > { %7567 = vrcp.f32 %v4629_v33 }
 0xa32   : > { %7569 = vrcp.f32 %v4635_v28 }
 0xa33   : > { %4927 = vrot.lane.b32.xlu0 %v6599_v59, %s8037_s27  ;;  %v6399_v59 = vmul.f32 -1.442695, %v9905_v1 }
 0xa34   : > { %4939 = vrot.lane.b32.xlu1 %v6602_v45, %s8037_s27 }
 0xa35   : > { %7571 = vpow2.f32 %v6399_v59 }
 0xa36   : > { %7573 = vpow2.f32 %v6405_v36 }
 0xa37   : > { %4951 = vrot.lane.b32.xlu0 %v10001_v48, %s8037_s27  ;;  %v7560_v48 = vpop.eup %7559  ;;  %7575 = vrcp.f32 %v4642_v20 }
 0xa38   : > { %4963 = vrot.lane.b32.xlu1 %v10003_v53, %s8037_s27  ;;  %v7562_v53 = vpop.eup %7561  ;;  %7577 = vpow2.f32 %v6398_v46  ;;  %v4641_v3 = vadd.f32 1.0, %v7560_v48  ;;  %v6417_v48 = vmul.f32 -1.442695, %v9929_v16  ;;  %s10328_s27 = scalar_lea.vmem [#allocation14], %s6063_s17  ;;  %s6520_s17 = sshll.u32 %s8117_s19, 11 }
 0xa39   : > { %v7564_v62 = vpop.eup %7563  ;;  %7579 = vpow2.f32 %v6404_v26  ;;  %v4774_v59 = vmul.f32 %v7562_v53, %v9873_v9  ;;  %s5930_s20 = sshll.u32 %s10328_s27, 4  ;;  %s10361_s25 = scalar_lea.hbm %s10652_s10, %s6520_s17  ;;  %s10363_s20 = int_to_ptr.vmem [resolvable:$true] %s5930_s20 }
 0xa3a   : > { %v7566_v56 = vpop.eup %7565  ;;  %v4647_v13 = vadd.f32 1.0, %v7564_v62  ;;  %7581 = vrcp.f32 %v4648_v44  ;;  %s5917_s19 = scalar_lea.sflag [#allocation5], %s8335_s22  ;;  %s7941_s26 = scalar_lea.vmem %s10363_s20, 2048 }
 0xa3b   : > { %v7568_v60 = vpop.eup %7567  ;;  %v4780_v36 = vmul.f32 %v7566_v56, %v9881_v5  ;;  %7583 = vrcp.f32 %v4641_v3  ;;  %v6416_v3 = vmul.f32 -1.442695, %v9925_v49  ;;  %p7942_p2 = scmp.ne.s32.totalorder %s10363_s20, %s7941_s26  ;;  %p7948_p11 = scmp.lt.s32.totalorder %s10363_s20, %s7946_s23 }
 0xa3c   : > { %v4872_v45 = vpop.permute.xlu0 %4871  ;;  %v7570_v20 = vpop.eup %7569  ;;  %7585 = vrcp.f32 %v4647_v13  ;;  %v4773_v5 = vmul.f32 %v7568_v60, %v9869_v31  ;;  %v7303_v60 = vld [vmem:[#allocation12 + $0x100] ss:$8 sps:$4 sm:$0xff]   ;;  %p7949_p12 = scmp.lt.s32.totalorder %s7947_s29, %s7941_s26 }
 0xa3d   : > { %v10043_v7 = vpop.permute.xlu1 %4873  ;;  %v4779_v56 = vmul.f32 %v7570_v20, %v9877_v4  ;;  %7587 = vpow2.f32 %v6411_v40  ;;  %v7308_v40 = vld [vmem:[#allocation12 + $0x114] ss:$8 sps:$4 sm:$0xff]   ;;  %p7943_p10 = pnand %p7942_p2, %p10654_p7 }
 0xa3e   : > { %v4966_v33 = vsel %vm1516_vm5, %v4872_v45, %v10043_v7  ;;  %7589 = vpow2.f32 %v6417_v48  ;;  %p7950_p13 = por %p7949_p12, %p7948_p11 }
 0xa3f   : > { %v5054_v26 = vmul.f32 %v4966_v33, %v4774_v59  ;;  %v7572_v62 = vpop.eup %7571  ;;  %7591 = vpow2.f32 %v6410_v21  ;;  %p7944_p1 = pneg %p7943_p10 }
 0xa40   : > { %v4870_v34 = vpop.permute.xlu0 %4869  ;;  %v7574_v53 = vpop.eup %7573  ;;  %7593 = vpow2.f32 %v6416_v3  ;;  %v6376_v3 = vmul.f32 -1.442695, %v9871_v18 }
 0xa41   : > { %v4884_v41 = vpop.permute.xlu1 %4883  ;;  %v4965_v51 = vsel %vm1516_vm5, %v4870_v34, %v4872_v45  ;;  %v7576_v59 = vpop.eup %7575  ;;  %p7951_p8 = pnand %p7950_p13, %p7944_p1 }
 0xa42   : > { %v5053_v13 = vmul.f32 %v4965_v51, %v4773_v5  ;;  %v7578_v34 = vpop.eup %7577  ;;  %v4786_v48 = vmul.f32 %v7576_v59, %v9889_v61  ;;  %v7311_v5 = vld [vmem:[#allocation12 + $0x124] ss:$8 sps:$4 sm:$0xff]   ;;  %v6382_v61 = vmul.f32 -1.442695, %v9879_v17 }
 0xa43   : > { %v7580_v4 = vpop.eup %7579 }
 0xa44   : > { %v10049_v28 = vpop.permute.xlu0 %4895 }
 0xa45   : > { %v10053_v6 = vpop.permute.xlu1 %4885 }
 0xa46   : > { %10620 = vst [vmem:[#allocation50_spill] sm:$0xff] %v10053_v6  ;;  %v4971_v46 = vsel %vm1516_vm5, %v4884_v41, %v10053_v6 }
 0xa47   : > { %v5060_v44 = vmul.f32 %v4971_v46, %v4780_v36  ;;  %v4654_v36 = vadd.f32 1.0, %v7572_v62  ;;  %v4660_v46 = vadd.f32 1.0, %v7574_v53 }
 0xa48   : > { %v4894_v9 = vpop.permute.xlu0 %4893 }
 0xa49   : > { %v4882_v11 = vpop.permute.xlu1 %4881  ;;  %v5102_v30 = vpack.c.bf16 %v5060_v44, %v5054_v26  ;;  %v7582_v26 = vpop.eup %7581  ;;  %v4653_v44 = vadd.f32 1.0, %v7578_v34  ;;  %7595 = vrcp.f32 %v4654_v36  ;;  %v6377_v36 = vmul.f32 -1.442695, %v9875_v63 }
 0xa4a   : > { %v4970_v33 = vsel %vm1516_vm5, %v4882_v11, %v4884_v41  ;;  %v4659_v11 = vadd.f32 1.0, %v7580_v4  ;;  %7597 = vrcp.f32 %v4660_v46  ;;  %v7306_v41 = vld [vmem:[#allocation12 + $0x110] ss:$8 sps:$4 sm:$0xff]   ;;  %v7584_v21 = vpop.eup %7583  ;;  %v4792_v62 = vmul.f32 %v7582_v26, %v9897_v2  ;;  %v7309_v46 = vld [vmem:[#allocation12 + $0x120] ss:$8 sps:$4 sm:$0xff]  }
 0xa4b   : > { %v5059_v45 = vmul.f32 %v4970_v33, %v4779_v56  ;;  %5697 = vmatprep.mubr.bf16.mxu1 %v5102_v30  ;;  %v7586_v56 = vpop.eup %7585  ;;  %7599 = vrcp.f32 %v4653_v44  ;;  %v4975_v2 = vsel %vm1516_vm5, %v4894_v9, %v10049_v28  ;;  %v6383_v4 = vmul.f32 -1.442695, %v9883_v47 }
 0xa4c   : > { %v4908_v31 = vpop.permute.xlu0 %4907  ;;  %v7588_v34 = vpop.eup %7587  ;;  %7601 = vrcp.f32 %v4659_v11  ;;  %v6388_v11 = vmul.f32 -1.442695, %v9887_v27 }
 0xa4d   : > { %v5101_v20 = vpack.c.bf16 %v5059_v45, %v5053_v13  ;;  %v10065_v6 = vpop.permute.xlu1 %4897  ;;  %7603 = vpow2.f32 %v6376_v3  ;;  %v4666_v9 = vadd.f32 1.0, %v7588_v34 }
 0xa4e   : > { %v4976_v51 = vsel %vm1516_vm5, %v10049_v28, %v10065_v6  ;;  %7605 = vpow2.f32 %v6377_v36 }
 0xa4f   : > { %5698 = vmatmul.mubr.bf16.vlgmr.msra.gmra.mrb[80].mxu1 %v5101_v20  ;;  %v5066_v13 = vmul.f32 %v4976_v51, %v4786_v48  ;;  %v4785_v20 = vmul.f32 %v7584_v21, %v9885_v23  ;;  %v7314_v51 = vld [vmem:[#allocation12 + $0x134] ss:$8 sps:$4 sm:$0xff]   ;;  %7607 = vpow2.f32 %v6382_v61  ;;  %v7312_v21 = vld [vmem:[#allocation12 + $0x130] ss:$8 sps:$4 sm:$0xff]  }
 0xa50   : > { %5739 = vmatpush1.bf16.msra.mxu1 %v7303_v60  ;;  %v10070_v30 = vpop.permute.xlu0 %4919  ;;  %v7590_v60 = vpop.eup %7589  ;;  %7609 = vpow2.f32 %v6383_v4 }
 0xa51   : > { %v10074_v53 = vpop.permute.xlu1 %4909  ;;  %5740 = vmatprep.subr.bf16.mxu1 %v7308_v40  ;;  %v4791_v40 = vmul.f32 %v7586_v56, %v9893_v22  ;;  %v7592_v28 = vpop.eup %7591  ;;  %v4672_v23 = vadd.f32 1.0, %v7590_v60  ;;  %v6389_v56 = vmul.f32 -1.442695, %v9891_v24  ;;  %7611 = vpow2.f32 %v6388_v11 }
 0xa52   : > { %v4981_v33 = vsel %vm1516_vm5, %v4908_v31, %v10074_v53  ;;  %v4665_v34 = vadd.f32 1.0, %v7592_v28  ;;  %7613 = vrcp.f32 %v4666_v9 }
 0xa53   : > { %v5072_v45 = vmul.f32 %v4981_v33, %v4792_v62  ;;  %v7594_v33 = vpop.eup %7593  ;;  %7615 = vrcp.f32 %v4672_v23 }
 0xa54   : > { %5741 = vmatpush1.bf16.msra.mxu1 %v7306_v41  ;;  %v4918_v59 = vpop.permute.xlu0 %4917  ;;  %v5065_v41 = vmul.f32 %v4975_v2, %v4785_v20  ;;  %v4671_v61 = vadd.f32 1.0, %v7594_v33  ;;  %7617 = vpow2.f32 %v6389_v56 }
 0xa55   : > { %v4906_v26 = vpop.permute.xlu1 %4905  ;;  %5742 = vmatprep.subr.bf16.mxu1 %v7311_v5  ;;  %v5108_v44 = vpack.c.bf16 %v5072_v45, %v5066_v13  ;;  %v7596_v5 = vpop.eup %7595  ;;  %v7317_v13 = vld [vmem:[#allocation12 + $0x144] ss:$8 sps:$4 sm:$0xff]   ;;  %v6394_v45 = vmul.f32 -1.442695, %v9895_v12 }
 0xa56   : > { %v4980_v48 = vsel %vm1516_vm5, %v4906_v26, %v4908_v31  ;;  %v7598_v36 = vpop.eup %7597  ;;  %v4798_v4 = vmul.f32 %v7596_v5, %v9905_v1  ;;  %v6400_v1 = vmul.f32 -1.442695, %v9903_v37 }
 0xa57   : > { %v5071_v62 = vmul.f32 %v4980_v48, %v4791_v40  ;;  %5707 = vmatprep.mubr.bf16.mxu1 %v5108_v44  ;;  %v7600_v60 = vpop.eup %7599  ;;  %v4804_v20 = vmul.f32 %v7598_v36, %v9913_v52  ;;  %v7320_v44 = vld [vmem:[#allocation12 + $0x154] ss:$8 sps:$4 sm:$0xff]   ;;  %7619 = vpow2.f32 %v6394_v45  ;;  %v6395_v48 = vmul.f32 -1.442695, %v9899_v55 }
 0xa58   : > { %5743 = vmatpush1.bf16.msra.mxu1 %v7309_v46  ;;  %v4932_v22 = vpop.permute.xlu0 %4931  ;;  %v7315_v46 = vld [vmem:[#allocation12 + $0x140] ss:$8 sps:$4 sm:$0xff]   ;;  %7621 = vrcp.f32 %v4665_v34  ;;  %v4985_v52 = vsel %vm1516_vm5, %v4918_v59, %v10070_v30  ;;  %v4797_v23 = vmul.f32 %v7600_v60, %v9901_v25  ;;  %v6406_v45 = vmul.f32 -1.442695, %v9911_v32 }
 0xa59   : > { %v10089_v3 = vpop.permute.xlu1 %4921  ;;  %5744 = vmatprep.subr.bf16.mxu1 %v7314_v51  ;;  %v5107_v31 = vpack.c.bf16 %v5071_v62, %v5065_v41  ;;  %v7602_v51 = vpop.eup %7601  ;;  %7623 = vrcp.f32 %v4671_v61  ;;  %v7318_v62 = vld [vmem:[#allocation12 + $0x150] ss:$8 sps:$4 sm:$0xff]   ;;  %v7321_v60 = vld [vmem:[#allocation12 + $0x160] ss:$8 sps:$4 sm:$0xff]  }
 0xa5a   : > { %v4986_v2 = vsel %vm1516_vm5, %v10070_v30, %v10089_v3  ;;  %v7604_v41 = vpop.eup %7603  ;;  %v4803_v5 = vmul.f32 %v7602_v51, %v9909_v29  ;;  %7625 = vpow2.f32 %v6395_v48  ;;  %v6407_v30 = vmul.f32 -1.442695, %v9915_v15  ;;  %v7326_v51 = vld [vmem:[#allocation12 + $0x174] ss:$8 sps:$4 sm:$0xff]  }
 0xa5b   : > { %5708 = vmatmul.mubr.bf16.gmra.mrb[84].mxu1 %v5107_v31  ;;  %v5078_v28 = vmul.f32 %v4986_v2, %v4798_v4  ;;  %v7606_v33 = vpop.eup %7605  ;;  %v5077_v59 = vmul.f32 %v4985_v52, %v4797_v23  ;;  %7627 = vpow2.f32 %v6400_v1  ;;  %v6412_v29 = vmul.f32 -1.442695, %v9919_v35 }
 0xa5c   : > { %5745 = vmatpush1.bf16.msra.mxu1 %v7312_v21  ;;  %v10097_v40 = vpop.permute.xlu0 %4943  ;;  %v6401_v21 = vmul.f32 -1.442695, %v9907_v10  ;;  %v7608_v36 = vpop.eup %7607  ;;  %v4632_v1 = vadd.f32 1.0, %v7606_v33 }
 0xa5d   : > { %v10099_v26 = vpop.permute.xlu1 %4933  ;;  %5746 = vmatprep.subr.bf16.mxu1 %v7317_v13  ;;  %v7323_v13 = vld [vmem:[#allocation12 + $0x164] ss:$8 sps:$4 sm:$0xff]   ;;  %v7610_v61 = vpop.eup %7609  ;;  %v4637_v33 = vadd.f32 1.0, %v7608_v36 }
 0xa5e   : > { %v4991_v11 = vsel %vm1516_vm5, %v4932_v22, %v10099_v26  ;;  %7629 = vpow2.f32 %v6401_v21 }
 0xa5f   : > { %v5084_v9 = vmul.f32 %v4991_v11, %v4804_v20  ;;  %v6413_v20 = vmul.f32 -1.442695, %v9923_v54  ;;  %7631 = vpow2.f32 %v6406_v45 }
 0xa60   : > { %5747 = vmatpush1.bf16.msra.mxu1 %v7315_v46  ;;  %v4942_v2 = vpop.permute.xlu0 %4941  ;;  %v7612_v46 = vpop.eup %7611  ;;  %7633 = vpow2.f32 %v6407_v30 }
 0xa61   : > { %v4930_v56 = vpop.permute.xlu1 %4929  ;;  %5748 = vmatprep.subr.bf16.mxu1 %v7320_v44  ;;  %v5114_v31 = vpack.c.bf16 %v5084_v9, %v5078_v28  ;;  %v7614_v4 = vpop.eup %7613  ;;  %v4631_v28 = vadd.f32 1.0, %v7604_v41  ;;  %7635 = vpow2.f32 %v6412_v29  ;;  %v7329_v41 = vld [vmem:[#allocation12 + $0x184] ss:$8 sps:$4 sm:$0xff]  }
 0xa62   : > { %v4990_v34 = vsel %vm1516_vm5, %v4930_v56, %v4932_v22  ;;  %v7616_v11 = vpop.eup %7615  ;;  %v4810_v21 = vmul.f32 %v7614_v4, %v9921_v57  ;;  %7637 = vpow2.f32 %v6413_v20  ;;  %v4995_v57 = vsel %vm1516_vm5, %v4942_v2, %v10097_v40 }
 0xa63   : > { %v5083_v25 = vmul.f32 %v4990_v34, %v4803_v5  ;;  %5717 = vmatprep.mubr.bf16.mxu1 %v5114_v31  ;;  %v7618_v48 = vpop.eup %7617  ;;  %v4816_v5 = vmul.f32 %v7616_v11, %v9929_v16  ;;  %7639 = vrcp.f32 %v4631_v28  ;;  %v4638_v34 = vadd.f32 1.0, %v7610_v61  ;;  %v7327_v16 = vld [vmem:[#allocation12 + $0x180] ss:$8 sps:$4 sm:$0xff]  }
 0xa64   : > { %5749 = vmatpush1.bf16.msra.mxu1 %v7318_v62  ;;  %v7620_v9 = vpop.eup %7619  ;;  %v7324_v62 = vld [vmem:[#allocation12 + $0x170] ss:$8 sps:$4 sm:$0xff]   ;;  %v4956_v56 = vpop.permute.xlu0 %4955  ;;  %7641 = vrcp.f32 %v4632_v1 }
 0xa65   : > { %v10115_v44 = vpop.permute.xlu1 %4945  ;;  %5750 = vmatprep.subr.bf16.mxu1 %v7323_v13  ;;  %v5113_v22 = vpack.c.bf16 %v5083_v25, %v5077_v59  ;;  %v7622_v23 = vpop.eup %7621  ;;  %v4643_v25 = vadd.f32 1.0, %v7612_v46  ;;  %7643 = vrcp.f32 %v4637_v33  ;;  %v4649_v11 = vadd.f32 1.0, %v7620_v9  ;;  %v7335_v9 = vld [vmem:[#allocation12 + $0x1a4] ss:$8 sps:$4 sm:$0xff]   ;;  %v7333_v33 = vld [vmem:[#allocation12 + $0x1a0] ss:$8 sps:$4 sm:$0xff]  }
 0xa66   : > { %v4996_v52 = vsel %vm1516_vm5, %v10097_v40, %v10115_v44  ;;  %v7624_v13 = vpop.eup %7623  ;;  %v4809_v4 = vmul.f32 %v7622_v23, %v9917_v50  ;;  %7645 = vrcp.f32 %v4638_v34  ;;  %v6418_v40 = vmul.f32 -1.442695, %v9927_v58 }
 0xa67   : > { %5718 = vmatmul.mubr.bf16.gmra.mrb[88].mxu1 %v5113_v22  ;;  %v5090_v30 = vmul.f32 %v4996_v52, %v4810_v21  ;;  %v7626_v29 = vpop.eup %7625  ;;  %v4815_v36 = vmul.f32 %v7624_v13, %v9925_v49  ;;  %7647 = vrcp.f32 %v4643_v25  ;;  %v7330_v49 = vld [vmem:[#allocation12 + $0x190] ss:$8 sps:$4 sm:$0xff]  }
 0xa68   : > { %5751 = vmatpush1.bf16.msra.mxu1 %v7321_v60  ;;  %v4644_v60 = vadd.f32 1.0, %v7618_v48  ;;  %v7628_v61 = vpop.eup %7627  ;;  %v5089_v2 = vmul.f32 %v4995_v57, %v4809_v4  ;;  %v4650_v50 = vadd.f32 1.0, %v7626_v29  ;;  %v6419_v57 = vmul.f32 -1.442695, %v9931_v19 }
 0xa69   : > { %v10122_v31 = vpop.permute.xlu1 %4957  ;;  %5752 = vmatprep.subr.bf16.mxu1 %v7326_v51  ;;  %v7332_v51 = vld [vmem:[#allocation12 + $0x194] ss:$8 sps:$4 sm:$0xff]   ;;  %v7630_v28 = vpop.eup %7629  ;;  %v6378_v29 = vmul.f32 -1.442695, %v9933_v39 }
 0xa6a   : > { %v5001_v45 = vsel %vm1516_vm5, %v4956_v56, %v10122_v31  ;;  %v7632_v48 = vpop.eup %7631  ;;  %7649 = vrcp.f32 %v4644_v60  ;;  %v7336_v60 = vld [vmem:[#allocation12 + $0x1b0] ss:$8 sps:$4 sm:$0xff]  }
 0xa6b   : > { %v5096_v59 = vmul.f32 %v5001_v45, %v4816_v5  ;;  %v7634_v52 = vpop.eup %7633  ;;  %7651 = vrcp.f32 %v4649_v11  ;;  %v4656_v5 = vadd.f32 1.0, %v7630_v28  ;;  %v6385_v11 = vmul.f32 -1.442695, %v9941_v0 }
 0xa6c   : > { %5753 = vmatpush1.bf16.msra.mxu1 %v7324_v62  ;;  %v4655_v62 = vadd.f32 1.0, %v7628_v61  ;;  %v7636_v21 = vpop.eup %7635  ;;  %7653 = vpow2.f32 %v6418_v40  ;;  %v4662_v13 = vadd.f32 1.0, %v7634_v52  ;;  %v6390_v28 = vmul.f32 -1.442695, %v9946_v42  ;;  %v7339_v40 = vld [vmem:[#allocation12 + $0x1c0] ss:$8 sps:$4 sm:$0xff]  }
 0xa6d   : > { %v4954_v20 = vpop.permute.xlu1 %4953  ;;  %5754 = vmatprep.subr.bf16.mxu1 %v7329_v41  ;;  %v5120_v22 = vpack.c.bf16 %v5096_v59, %v5090_v30  ;;  %v4661_v41 = vadd.f32 1.0, %v7632_v48  ;;  %7655 = vrcp.f32 %v4650_v50  ;;  %v4667_v34 = vadd.f32 1.0, %v7636_v21  ;;  %v7338_v30 = vld [vmem:[#allocation12 + $0x1b4] ss:$8 sps:$4 sm:$0xff]  }
 0xa6e   : > { %v5000_v46 = vsel %vm1516_vm5, %v4954_v20, %v4956_v56  ;;  %v7638_v56 = vpop.eup %7637  ;;  %7657 = vrcp.f32 %v4655_v62  ;;  %v7341_v20 = vld [vmem:[#allocation12 + $0x1c4] ss:$8 sps:$4 sm:$0xff]   ;;  %v6391_v48 = vmul.f32 -1.442695, %v9949_v8  ;;  %v6396_v62 = vmul.f32 -1.442695, %v9952_v14 }
 0xa6f   : > { %v5095_v1 = vmul.f32 %v5000_v46, %v4815_v36  ;;  %5727 = vmatprep.mubr.bf16.mxu1 %v5120_v22  ;;  %v7640_v45 = vpop.eup %7639  ;;  %7659 = vrcp.f32 %v4656_v5  ;;  %v4668_v25 = vadd.f32 1.0, %v7638_v56  ;;  %v6379_v36 = vmul.f32 -1.442695, %v9936_v38 }
 0xa70   : > { %5755 = vmatpush1.bf16.msra.mxu1 %v7327_v16  ;;  %v7642_v59 = vpop.eup %7641  ;;  %7661 = vrcp.f32 %v4661_v41 }
 0xa71   : > { %5756 = vmatprep.subr.bf16.mxu1 %v7332_v51  ;;  %v5119_v23 = vpack.c.bf16 %v5095_v1, %v5089_v2  ;;  %v7644_v16 = vpop.eup %7643  ;;  %7663 = vrcp.f32 %v4662_v13  ;;  %v6384_v51 = vmul.f32 -1.442695, %v9939_v43  ;;  %v4775_v1 = vmul.f32 %v7640_v45, %v9871_v18  ;;  %v10621_v18 = vld [vmem:[#allocation40_spill] sm:$0xff]  ;;  %v7342_v45 = vld [vmem:[#allocation12 + $0x1d0] ss:$8 sps:$4 sm:$0xff]  }
 0xa72   : > { %v7646_v4 = vpop.eup %7645  ;;  %7665 = vrcp.f32 %v4667_v34  ;;  %v6397_v5 = vmul.f32 -1.442695, %v10621_v18  ;;  %v4776_v13 = vmul.f32 %v7642_v59, %v9875_v63  ;;  %v10623_v59 = vld [vmem:[#allocation33_spill] sm:$0xff] }
 0xa73   : > { %5728 = vmatmul.mubr.bf16.gmra.mrb[92].mxu1 %v5119_v23  ;;  %v7648_v22 = vpop.eup %7647  ;;  %7667 = vrcp.f32 %v4668_v25  ;;  %v4782_v63 = vmul.f32 %v7646_v4, %v9883_v47  ;;  %v10626_v47 = vld [vmem:[#allocation42_spill] sm:$0xff] }
 0xa74   : > { %5757 = vmatpush1.bf16.msra.mxu1 %v7330_v49  ;;  %v10136_v61 = vpop.eup %7649  ;;  %7669 = vpow2.f32 %v6419_v57  ;;  %v7344_v49 = vld [vmem:[#allocation12 + $0x1d4] ss:$8 sps:$4 sm:$0xff]   ;;  %v6408_v4 = vmul.f32 -1.442695, %v10626_v47 }
 0xa75   : > { %5758 = vmatprep.subr.bf16.mxu1 %v7335_v9  ;;  %v10139_v46 = vpop.eup %7651  ;;  %7671 = vpow2.f32 %v6378_v29 }
 0xa76   : > { %v7654_v2 = vpop.eup %7653  ;;  %7673 = vpow2.f32 %v6379_v36 }
 0xa77   : > { %v10144_v52 = vpop.eup %7655  ;;  %7675 = vpow2.f32 %v6384_v51  ;;  %v10624_v51 = vld [vmem:[#allocation50_spill] sm:$0xff] }
 0xa78   : > { %5759 = vmatpush1.bf16.msra.mxu1 %v7333_v33  ;;  %v10151_v21 = vpop.eup %7657  ;;  %7677 = vpow2.f32 %v6385_v11  ;;  %v4673_v33 = vadd.f32 1.0, %v7654_v2 }
 0xa79   : > { %5760 = vmatprep.subr.bf16.mxu1 %v7338_v30  ;;  %v10156_v41 = vpop.eup %7659  ;;  %7679 = vpow2.f32 %v6390_v28  ;;  %v10622_v30 = vld [vmem:[#allocation47_spill] sm:$0xff]  ;;  %v10625_v28 = vld [vmem:[#allocation26_spill] sm:$0xff] }
 0xa7a   : > { %v10159_v34 = vpop.eup %7661  ;;  %7681 = vpow2.f32 %v6391_v48  ;;  %v6402_v25 = vmul.f32 -1.442695, %v10622_v30 }
 0xa7b   : > { %v10165_v36 = vpop.eup %7663  ;;  %7683 = vpow2.f32 %v6396_v62  ;;  %v7345_v62 = vld [vmem:[#allocation12 + $0x1e0] ss:$8 sps:$4 sm:$0xff]  }
 0xa7c   : > { %5761 = vmatpush1.bf16.msra.mxu1 %v7336_v60  ;;  %v7347_v60 = vld [vmem:[#allocation12 + $0x1e4] ss:$8 sps:$4 sm:$0xff]   ;;  %7685 = vpow2.f32 %v6397_v5 }
 0xa7d   : > { %v4876_v50 = vpop.permute.xlu0 %4875  ;;  %5762 = vmatprep.subr.bf16.mxu1 %v7341_v20  ;;  %v6403_v20 = vmul.f32 -1.442695, %v10623_v59  ;;  %7687 = vrcp.f32 %v4673_v33  ;;  %v10627_v5 = vld [vmem:[#allocation44_spill] sm:$0xff]  ;;  %v10628_v33 = vld [vmem:[#allocation46_spill] sm:$0xff] }
 0xa7e   : > { %v4967_v23 = vsel %vm1516_vm5, %v10043_v7, %v4876_v50  ;;  %v10149_v9 = vpop.permute.xlu1 %4877  ;;  %v4781_v7 = vmul.f32 %v7644_v16, %v9879_v17  ;;  %v10173_v16 = vpop.eup %7665  ;;  %7689 = vpow2.f32 %v6402_v25  ;;  %v6415_v47 = vmul.f32 -1.442695, %v10628_v33 }
 0xa7f   : > { %v10154_v56 = vmul.f32 %v4967_v23, %v4775_v1  ;;  %v4968_v57 = vsel %vm1516_vm5, %v4876_v50, %v10149_v9  ;;  %v10180_v48 = vpop.eup %7667  ;;  %7691 = vpow2.f32 %v6403_v20  ;;  %v10630_v20 = vld [vmem:[#allocation43_spill] sm:$0xff] }
 0xa80   : > { %5763 = vmatpush1.bf16.msra.mxu1 %v7339_v40  ;;  %v6409_v40 = vmul.f32 -1.442695, %v10625_v28  ;;  %v5056_v50 = vmul.f32 %v4968_v57, %v4776_v13  ;;  %v7670_v23 = vpop.eup %7669  ;;  %v6414_v28 = vmul.f32 -1.442695, %v10627_v5  ;;  %v7348_v5 = vld [vmem:[#allocation12 + $0x1f0] ss:$8 sps:$4 sm:$0xff]  }
 0xa81   : > { %v4888_v29 = vpop.permute.xlu0 %4887  ;;  %5764 = vmatprep.subr.bf16.mxu1 %v7344_v49  ;;  %v7672_v30 = vpop.eup %7671 }
 0xa82   : > { %v4972_v11 = vsel %vm1516_vm5, %v10624_v51, %v4888_v29  ;;  %v10171_v17 = vpop.permute.xlu1 %4889  ;;  %v4787_v51 = vmul.f32 %v7648_v22, %v9887_v27  ;;  %v7674_v27 = vpop.eup %7673  ;;  %7693 = vpow2.f32 %v6409_v40  ;;  %v10629_v22 = vld [vmem:[#allocation45_spill] sm:$0xff] }
 0xa83   : > { %v10176_v2 = vmul.f32 %v4972_v11, %v4781_v7  ;;  %v4973_v1 = vsel %vm1516_vm5, %v4888_v29, %v10171_v17  ;;  %v7350_v29 = vld [vmem:[#allocation12 + $0x1f4] ss:$8 sps:$4 sm:$0xff]   ;;  %v6421_v25 = vmul.f32 -1.442695, %v10629_v22  ;;  %7695 = vpow2.f32 %v6408_v4 }
 0xa84   : > { %v5062_v49 = vmul.f32 %v4973_v1, %v4782_v63  ;;  %5765 = vmatpush1.bf16.msra.mxu1 %v7342_v45  ;;  %v7676_v1 = vpop.eup %7675  ;;  %v6420_v7 = vmul.f32 -1.442695, %v10630_v20  ;;  %7697 = vpow2.f32 %v6414_v28 }
 0xa85   : > { %v4900_v11 = vpop.permute.xlu0 %4899  ;;  %5766 = vmatprep.subr.bf16.mxu1 %v7347_v60  ;;  %v4788_v60 = vmul.f32 %v10136_v61, %v9891_v24  ;;  %v4794_v24 = vmul.f32 %v10144_v52, %v9899_v55  ;;  %v4633_v61 = vadd.f32 1.0, %v7672_v30  ;;  %7699 = vpow2.f32 %v6415_v47  ;;  %v7351_v52 = vld [vmem:[#allocation12 + $0x200] ss:$8 sps:$4 sm:$0xff]  }
 0xa86   : > { %v4977_v13 = vsel %vm1516_vm5, %v10065_v6, %v4900_v11  ;;  %v10190_v45 = vpop.permute.xlu1 %4901  ;;  %v5104_v57 = vpack.c.bf16 %v5062_v49, %v5056_v50  ;;  %v7678_v6 = vpop.eup %7677  ;;  %v4793_v50 = vmul.f32 %v10139_v46, %v9895_v12  ;;  %v4674_v49 = vadd.f32 1.0, %v7670_v23 }
 0xa87   : > { %v10193_v63 = vmul.f32 %v4977_v13, %v4787_v51  ;;  %v4978_v40 = vsel %vm1516_vm5, %v4900_v11, %v10190_v45  ;;  %v7353_v13 = vld [vmem:[#allocation12 + $0x204] ss:$8 sps:$4 sm:$0xff]   ;;  %v7680_v22 = vpop.eup %7679  ;;  %v4634_v46 = vadd.f32 1.0, %v7674_v27  ;;  %7701 = vpow2.f32 %v6421_v25  ;;  %v7356_v25 = vld [vmem:[#allocation12 + $0x214] ss:$8 sps:$4 sm:$0xff]  }
 0xa88   : > { %5767 = vmatpush1.bf16.msra.mxu1 %v7345_v62  ;;  %5770 = vmatprep.mubr.bf16.mxu1 %v5104_v57  ;;  %v7682_v12 = vpop.eup %7681  ;;  %7703 = vpow2.f32 %v6420_v7  ;;  %v5068_v57 = vmul.f32 %v4978_v40, %v4788_v60  ;;  %v4639_v47 = vadd.f32 1.0, %v7676_v1  ;;  %v4645_v7 = vadd.f32 1.0, %v7680_v22 }
 0xa89   : > { %v4912_v51 = vpop.permute.xlu0 %4911  ;;  %5768 = vmatprep.subr.bf16.mxu1 %v7350_v29  ;;  %v7684_v11 = vpop.eup %7683  ;;  %v4640_v29 = vadd.f32 1.0, %v7678_v6  ;;  %7705 = vrcp.f32 %v4674_v49  ;;  %v10631_v1 = vpack.c.bf16 %v10176_v2, %v10154_v56  ;;  %v4800_v49 = vmul.f32 %v10156_v41, %v9907_v10  ;;  %v7359_v2 = vld [vmem:[#allocation12 + $0x224] ss:$8 sps:$4 sm:$0xff]  }
 0xa8a   : > { %v4982_v4 = vsel %vm1516_vm5, %v10074_v53, %v4912_v51  ;;  %v10206_v62 = vpop.permute.xlu1 %4913  ;;  %v7686_v30 = vpop.eup %7685  ;;  %v4799_v53 = vmul.f32 %v10151_v21, %v9903_v37  ;;  %7707 = vrcp.f32 %v4633_v61  ;;  %v4646_v37 = vadd.f32 1.0, %v7682_v12 }
 0xa8b   : > { %v10208_v28 = vmul.f32 %v4982_v4, %v4793_v50  ;;  %v4983_v23 = vsel %vm1516_vm5, %v4912_v51, %v10206_v62  ;;  %v10216_v51 = vpop.eup %7687  ;;  %7709 = vrcp.f32 %v4634_v46  ;;  %v4652_v22 = vadd.f32 1.0, %v7686_v30 }
 0xa8c   : > { %v5074_v55 = vmul.f32 %v4983_v23, %v4794_v24  ;;  %5769 = vmatpush1.bf16.msra.mxu1 %v7348_v5  ;;  %v7690_v40 = vpop.eup %7689  ;;  %7711 = vrcp.f32 %v4640_v29  ;;  %v4805_v24 = vmul.f32 %v10159_v34, %v9911_v32  ;;  %v4651_v61 = vadd.f32 1.0, %v7684_v11 }
 0xa8d   : > { %v4924_v27 = vpop.permute.xlu0 %4923  ;;  %5811 = vmatprep.subr.bf16.mxu1 %v7353_v13  ;;  %v5109_v50 = vpack.c.bf16 %v10208_v28, %v10193_v63  ;;  %v7692_v63 = vpop.eup %7691  ;;  %7713 = vrcp.f32 %v4639_v47  ;;  %v4806_v10 = vmul.f32 %v10165_v36, %v9915_v15  ;;  %v4657_v41 = vadd.f32 1.0, %v7690_v40  ;;  %v7357_v36 = vld [vmem:[#allocation12 + $0x220] ss:$8 sps:$4 sm:$0xff]  }
 0xa8e   : > { %v4987_v5 = vsel %vm1516_vm5, %v10089_v3, %v4924_v27  ;;  %v10220_v60 = vpop.permute.xlu1 %4925  ;;  %v5110_v6 = vpack.c.bf16 %v5074_v55, %v5068_v57  ;;  %v7354_v3 = vld [vmem:[#allocation12 + $0x210] ss:$8 sps:$4 sm:$0xff]   ;;  %v7694_v13 = vpop.eup %7693  ;;  %7715 = vrcp.f32 %v4645_v7  ;;  %v4658_v34 = vadd.f32 1.0, %v7692_v63 }
 0xa8f   : > { %v10222_v21 = vmul.f32 %v4987_v5, %v4799_v53  ;;  %5771 = vmatmul.mubr.bf16.vlgmr.msra.gmra.mrb[80].mxu1 %v10631_v1  ;;  %v4988_v4 = vsel %vm1516_vm5, %v4924_v27, %v10220_v60  ;;  %v7696_v12 = vpop.eup %7695  ;;  %7717 = vrcp.f32 %v4646_v37  ;;  %v4664_v57 = vadd.f32 1.0, %v7694_v13  ;;  %v7362_v53 = vld [vmem:[#allocation12 + $0x234] ss:$8 sps:$4 sm:$0xff]  }
 0xa90   : > { %5780 = vmatprep.mubr.bf16.mxu1 %v5110_v6  ;;  %5812 = vmatpush1.bf16.msra.mxu1 %v7351_v52  ;;  %v7698_v32 = vpop.eup %7697  ;;  %7719 = vrcp.f32 %v4652_v22  ;;  %v5080_v55 = vmul.f32 %v4988_v4, %v4800_v49  ;;  %v4811_v1 = vmul.f32 %v10173_v16, %v9919_v35  ;;  %v7365_v35 = vld [vmem:[#allocation12 + $0x244] ss:$8 sps:$4 sm:$0xff]  }
 0xa91   : > { %v4936_v56 = vpop.permute.xlu0 %4935  ;;  %5813 = vmatprep.subr.bf16.mxu1 %v7356_v25  ;;  %v7700_v29 = vpop.eup %7699  ;;  %7721 = vrcp.f32 %v4651_v61  ;;  %v4669_v25 = vadd.f32 1.0, %v7698_v32  ;;  %v4812_v61 = vmul.f32 %v10180_v48, %v9923_v54 }
 0xa92   : > { %v4992_v46 = vsel %vm1516_vm5, %v10099_v26, %v4936_v56  ;;  %v10237_v28 = vpop.permute.xlu1 %4937  ;;  %v7702_v52 = vpop.eup %7701  ;;  %v4663_v26 = vadd.f32 1.0, %v7696_v12  ;;  %7723 = vrcp.f32 %v4657_v41  ;;  %v4670_v40 = vadd.f32 1.0, %v7700_v29  ;;  %v7363_v41 = vld [vmem:[#allocation12 + $0x240] ss:$8 sps:$4 sm:$0xff]  }
 0xa93   : > { %v10239_v23 = vmul.f32 %v4992_v46, %v4805_v24  ;;  %v4993_v11 = vsel %vm1516_vm5, %v4936_v56, %v10237_v28  ;;  %v7704_v27 = vpop.eup %7703  ;;  %7725 = vrcp.f32 %v4658_v34  ;;  %v4676_v63 = vadd.f32 1.0, %v7702_v52 }
 0xa94   : > { %v5086_v15 = vmul.f32 %v4993_v11, %v4806_v10  ;;  %5814 = vmatpush1.bf16.msra.mxu1 %v7354_v3  ;;  %v7706_v6 = vpop.eup %7705  ;;  %7727 = vrcp.f32 %v4664_v57  ;;  %v4817_v3 = vmul.f32 %v10216_v51, %v9927_v58  ;;  %v4675_v13 = vadd.f32 1.0, %v7704_v27 }
 0xa95   : > { %v4948_v30 = vpop.permute.xlu0 %4947  ;;  %5815 = vmatprep.subr.bf16.mxu1 %v7359_v2  ;;  %v5115_v47 = vpack.c.bf16 %v10239_v23, %v10222_v21  ;;  %v7708_v37 = vpop.eup %7707  ;;  %v7360_v21 = vld [vmem:[#allocation12 + $0x230] ss:$8 sps:$4 sm:$0xff]   ;;  %7729 = vrcp.f32 %v4663_v26  ;;  %v7368_v23 = vld [vmem:[#allocation12 + $0x254] ss:$8 sps:$4 sm:$0xff]  }
 0xa96   : > { %v10245_v7 = vpop.permute.xlu1 %4949  ;;  %v5116_v5 = vpack.c.bf16 %v5086_v15, %v5080_v55  ;;  %v4997_v49 = vsel %vm1516_vm5, %v10115_v44, %v4948_v30  ;;  %v7710_v22 = vpop.eup %7709  ;;  %v4818_v44 = vmul.f32 %v7706_v6, %v9931_v19  ;;  %7731 = vrcp.f32 %v4669_v25 }
 0xa97   : > { %5781 = vmatmul.mubr.bf16.gmra.mrb[84].mxu1 %v5109_v50  ;;  %v4998_v50 = vsel %vm1516_vm5, %v4948_v30, %v10245_v7  ;;  %v7712_v16 = vpop.eup %7711  ;;  %7733 = vrcp.f32 %v4670_v40  ;;  %v10262_v51 = vmul.f32 %v4997_v49, %v4811_v1  ;;  %v4778_v54 = vmul.f32 %v7710_v22, %v9936_v38 }
 0xa98   : > { %5790 = vmatprep.mubr.bf16.mxu1 %v5116_v5  ;;  %5816 = vmatpush1.bf16.msra.mxu1 %v7357_v36  ;;  %v7714_v58 = vpop.eup %7713  ;;  %7735 = vrcp.f32 %v4676_v63  ;;  %v5092_v19 = vmul.f32 %v4998_v50, %v4812_v61  ;;  %v4777_v46 = vmul.f32 %v7708_v37, %v9933_v39  ;;  %v4784_v32 = vmul.f32 %v7712_v16, %v9941_v0  ;;  %v7371_v37 = vld [vmem:[#allocation12 + $0x264] ss:$8 sps:$4 sm:$0xff]   ;;  %v7369_v50 = vld [vmem:[#allocation12 + $0x260] ss:$8 sps:$4 sm:$0xff]   ;;  %v10633_v16 = vld [vmem:[#allocation26_spill] sm:$0xff] }
 0xa99   : > { %v4960_v24 = vpop.permute.xlu0 %4959  ;;  %5817 = vmatprep.subr.bf16.mxu1 %v7362_v53  ;;  %v7716_v10 = vpop.eup %7715  ;;  %7737 = vrcp.f32 %v4675_v13  ;;  %v4783_v38 = vmul.f32 %v7714_v58, %v9939_v43  ;;  %v7366_v43 = vld [vmem:[#allocation12 + $0x250] ss:$8 sps:$4 sm:$0xff]   ;;  %v7374_v58 = vld [vmem:[#allocation12 + $0x274] ss:$8 sps:$4 sm:$0xff]  }
 0xa9a   : > { %v5002_v4 = vsel %vm1516_vm5, %v10122_v31, %v4960_v24  ;;  %v10260_v56 = vpop.permute.xlu1 %4961  ;;  %v7718_v31 = vpop.eup %7717  ;;  %v4789_v25 = vmul.f32 %v7716_v10, %v9946_v42 }
 0xa9b   : > { %v10264_v2 = vmul.f32 %v5002_v4, %v4817_v3  ;;  %v5003_v12 = vsel %vm1516_vm5, %v4960_v24, %v10260_v56  ;;  %v7720_v29 = vpop.eup %7719  ;;  %v4790_v53 = vmul.f32 %v7718_v31, %v9949_v8 }
 0xa9c   : > { %v5098_v48 = vmul.f32 %v5003_v12, %v4818_v44  ;;  %5818 = vmatpush1.bf16.msra.mxu1 %v7360_v21  ;;  %v7722_v52 = vpop.eup %7721  ;;  %v4796_v5 = vmul.f32 %v7720_v29, %v10621_v18 }
 0xa9d   : > { %v4880_v34 = vpop.permute.xlu0 %4879  ;;  %5819 = vmatprep.subr.bf16.mxu1 %v7365_v35  ;;  %v5121_v11 = vpack.c.bf16 %v10264_v2, %v10262_v51  ;;  %v7724_v30 = vpop.eup %7723  ;;  %v10632_v35 = vld [vmem:[#allocation47_spill] sm:$0xff]  ;;  %v10634_v51 = vld [vmem:[#allocation42_spill] sm:$0xff] }
 0xa9e   : > { %v4969_v57 = vsel %vm1516_vm5, %v10149_v9, %v4880_v34  ;;  %v5058_v55 = vmul.f32 %v4880_v34, %v4778_v54  ;;  %v4892_v15 = vpop.permute.xlu1 %4891  ;;  %v5122_v36 = vpack.c.bf16 %v5098_v48, %v5092_v19  ;;  %v7726_v9 = vpop.eup %7725  ;;  %v7372_v34 = vld [vmem:[#allocation12 + $0x270] ss:$8 sps:$4 sm:$0xff]  }
 0xa9f   : > { %v10276_v39 = vmul.f32 %v4969_v57, %v4777_v46  ;;  %v4974_v0 = vsel %vm1516_vm5, %v10171_v17, %v4892_v15  ;;  %v5064_v26 = vmul.f32 %v4892_v15, %v4784_v32  ;;  %5791 = vmatmul.mubr.bf16.gmra.mrb[88].mxu1 %v5115_v47  ;;  %v7728_v17 = vpop.eup %7727  ;;  %v4795_v47 = vmul.f32 %v7722_v52, %v9952_v14  ;;  %v10636_v57 = vld [vmem:[#allocation45_spill] sm:$0xff] }
 0xaa0   : > { %v10281_v27 = vmul.f32 %v4974_v0, %v4783_v38  ;;  %5800 = vmatprep.mubr.bf16.mxu1 %v5122_v36  ;;  %5820 = vmatpush1.bf16.msra.mxu1 %v7363_v41  ;;  %v7730_v21 = vpop.eup %7729  ;;  %v4802_v14 = vmul.f32 %v7726_v9, %v10623_v59  ;;  %v4808_v61 = vmul.f32 %v7728_v17, %v10633_v16  ;;  %v7377_v15 = vld [vmem:[#allocation12 + $0x284] ss:$8 sps:$4 sm:$0xff]   ;;  %v10637_v17 = vld [vmem:[#allocation30_spill] sm:$0xff] }
 0xaa1   : > { %v5106_v6 = vpack.c.bf16 %v5064_v26, %v5058_v55  ;;  %v4904_v40 = vpop.permute.xlu0 %4903  ;;  %5821 = vmatprep.subr.bf16.mxu1 %v7368_v23  ;;  %v7732_v3 = vpop.eup %7731  ;;  %v4807_v2 = vmul.f32 %v7730_v21, %v10634_v51  ;;  %v10635_v23 = vld [vmem:[#allocation44_spill] sm:$0xff] }
 0xaa2   : > { %v5105_v8 = vpack.c.bf16 %v10281_v27, %v10276_v39  ;;  %v4979_v1 = vsel %vm1516_vm5, %v10190_v45, %v4904_v40  ;;  %v10290_v63 = vmul.f32 %v4904_v40, %v4790_v53  ;;  %v4916_v49 = vpop.permute.xlu1 %4915  ;;  %v7734_v24 = vpop.eup %7733  ;;  %v4801_v45 = vmul.f32 %v7724_v30, %v10632_v35  ;;  %v7386_v40 = vld [vmem:[#allocation12 + $0x2b4] ss:$8 sps:$4 sm:$0xff]   ;;  %v10639_v39 = vld [vmem:[#allocation32_spill] sm:$0xff] }
 0xaa3   : > { %v10292_v42 = vmul.f32 %v4979_v1, %v4789_v25  ;;  %v4984_v18 = vsel %vm1516_vm5, %v10206_v62, %v4916_v49  ;;  %v10296_v22 = vmul.f32 %v4916_v49, %v4796_v5  ;;  %v7736_v62 = vpop.eup %7735  ;;  %v4814_v32 = vmul.f32 %v7734_v24, %v10628_v33  ;;  %v7380_v25 = vld [vmem:[#allocation12 + $0x294] ss:$8 sps:$4 sm:$0xff]  }
 0xaa4   : > { %v5075_v13 = vmul.f32 %v4984_v18, %v4795_v47  ;;  %5822 = vmatpush1.bf16.msra.mxu1 %v7366_v43  ;;  %v7738_v19 = vpop.eup %7737  ;;  %v4820_v55 = vmul.f32 %v7736_v62, %v10636_v57  ;;  %v7375_v43 = vld [vmem:[#allocation12 + $0x280] ss:$8 sps:$4 sm:$0xff]  }
 0xaa5   : > { %v5112_v44 = vpack.c.bf16 %v10296_v22, %v10290_v63  ;;  %v4928_v4 = vpop.permute.xlu0 %4927  ;;  %5823 = vmatprep.subr.bf16.mxu1 %v7371_v37  ;;  %v4819_v36 = vmul.f32 %v7738_v19, %v10630_v20  ;;  %v7378_v20 = vld [vmem:[#allocation12 + $0x290] ss:$8 sps:$4 sm:$0xff]   ;;  %v10638_v63 = vld [vmem:[#allocation29_spill] sm:$0xff] }
 0xaa6   : > { %v4989_v59 = vsel %vm1516_vm5, %v10220_v60, %v4928_v4  ;;  %v5082_v12 = vmul.f32 %v4928_v4, %v4802_v14  ;;  %v4940_v10 = vpop.permute.xlu1 %4939  ;;  %v5111_v54 = vpack.c.bf16 %v5075_v13, %v10292_v42  ;;  %v4813_v60 = vmul.f32 %v7732_v3, %v10635_v23  ;;  %v7384_v37 = vld [vmem:[#allocation12 + $0x2b0] ss:$8 sps:$4 sm:$0xff]   ;;  %v10645_v62 = vld [vmem:[#allocation25_spill] sm:$0xff] }
 0xaa7   : > { %v5081_v48 = vmul.f32 %v4989_v59, %v4801_v45  ;;  %v4994_v41 = vsel %vm1516_vm5, %v10237_v28, %v4940_v10  ;;  %v5088_v31 = vmul.f32 %v4940_v10, %v4808_v61  ;;  %5801 = vmatmul.mubr.bf16.gmra.mrb[92].mxu1 %v5121_v11  ;;  %v10640_v42 = vld [vmem:[#allocation34_spill] sm:$0xff]  ;;  %v10641_v3 = vld [vmem:[#allocation35_spill] sm:$0xff]  ;;  %v10646_v59 = vld [vmem:[#allocation28_spill] sm:$0xff] }
 0xaa8   : > { %v5087_v46 = vmul.f32 %v4994_v41, %v4807_v2  ;;  %5824 = vmatpush1.bf16.msra.mxu1 %v7369_v50  ;;  %6510 = vmatprep.mubr.msk.bf16.mxu1 %vm1516_vm5, %v5106_v6  ;;  %v7383_v6 = vld [vmem:[#allocation12 + $0x2a4] ss:$8 sps:$4 sm:$0xff]   ;;  %v10643_v45 = vld [vmem:[#allocation27_spill] sm:$0xff]  ;;  %v10648_v41 = vld [vmem:[#allocation38_spill] sm:$0xff] }
 0xaa9   : > { %v5118_v29 = vpack.c.bf16 %v5088_v31, %v5082_v12  ;;  %v4952_v38 = vpop.permute.xlu0 %4951  ;;  %5825 = vmatprep.subr.bf16.mxu1 %v7374_v58  ;;  %v10642_v50 = vld [vmem:[#allocation37_spill] sm:$0xff] }
 0xaaa   : > { %v4999_v28 = vsel %vm1516_vm5, %v10245_v7, %v4952_v38  ;;  %v5094_v11 = vmul.f32 %v4952_v38, %v4814_v32  ;;  %v4964_v52 = vpop.permute.xlu1 %4963  ;;  %v5117_v0 = vpack.c.bf16 %v5087_v46, %v5081_v48  ;;  %v7381_v7 = vld [vmem:[#allocation12 + $0x2a0] ss:$8 sps:$4 sm:$0xff]   ;;  %v10649_v32 = vld [vmem:[#allocation31_spill] sm:$0xff] }
 0xaab   : > { %v5093_v26 = vmul.f32 %v4999_v28, %v4813_v60  ;;  %v5004_v33 = vsel %vm1516_vm5, %v10260_v56, %v4964_v52  ;;  %v5100_v30 = vmul.f32 %v4964_v52, %v4820_v55  ;;  %v10650_v60 = vld [vmem:[#allocation48_spill] sm:$0xff]  ;;  %v10651_v57 = vld [vmem:[#allocation41_spill] sm:$0xff] }
 0xaac   : > { %v5099_v53 = vmul.f32 %v5004_v33, %v4819_v36  ;;  %5826 = vmatpush1.bf16.msra.mxu1 %v7372_v34  ;;  %v10653_v36 = vld [vmem:[#allocation49_spill] sm:$0xff] }
 0xaad   : > { %v5124_v9 = vpack.c.bf16 %v5100_v30, %v5094_v11  ;;  %5827 = vmatprep.subr.bf16.mxu1 %v7377_v15 }
 0xaae   : > { %v5123_v5 = vpack.c.bf16 %v5099_v53, %v5093_v26 }
 0xab0   : > { %5828 = vmatpush1.bf16.msra.mxu1 %v7375_v43 }
 0xab1   : > { %5829 = vmatprep.subr.bf16.mxu1 %v7380_v25 }
 0xab4   : > { %5830 = vmatpush1.bf16.msra.mxu1 %v7378_v20 }
 0xab5   : > { %5831 = vmatprep.subr.bf16.mxu1 %v7383_v6 }
 0xab8   : > { %5832 = vmatpush1.bf16.msra.mxu1 %v7381_v7 }
 0xab9   : > { %5833 = vmatprep.subr.bf16.mxu1 %v7386_v40 }
 0xabc   : > { %5834 = vmatpush1.bf16.msra.mxu1 %v7384_v37 }
 0xabf   : > { %5844 = vmatmul.mubr.bf16.vlgmr.msra.gmra.mrb[80].mxu1 %v5105_v8 }
 0xac0   : > { %6511 = vmatprep.mubr.msk.bf16.mxu1 %vm1516_vm5, %v5112_v44  ;;  %v10644_v44 = vld [vmem:[#allocation39_spill] sm:$0xff] }
 0xac7   : > { %5854 = vmatmul.mubr.bf16.gmra.mrb[84].mxu1 %v5111_v54  ;;  %v10647_v54 = vld [vmem:[#allocation36_spill] sm:$0xff] }
 0xac8   : > { %6512 = vmatprep.mubr.msk.bf16.mxu1 %vm1516_vm5, %v5118_v29 }
 0xacf   : > { %5864 = vmatmul.mubr.bf16.gmra.mrb[88].mxu1 %v5117_v0 }
 0xad0   : > { %6513 = vmatprep.mubr.msk.bf16.mxu1 %vm1516_vm5, %v5124_v9 }
 0xad7   : > { %5874 = vmatmul.mubr.bf16.gmra.mrb[92].mxu1 %v5123_v5 }
 0xb92   : > { %v5845_v56 = vpop.f32.mrb[80].mxu1 }
 0xb93   : > { %v5884_v47 = vadd.f32 %v5845_v56, %v10637_v17  ;;  %v5847_v1 = vpop.f32.mrb[81].mxu1 }
 0xb94   : > { %v5885_v49 = vadd.f32 %v5847_v1, %v10638_v63  ;;  %v5849_v21 = vpop.f32.mrb[82].mxu1 }
 0xb95   : > { %5900 = vst [vmem:[%s10328_s27] sm:$0xff] %v5884_v47  ;;  %v5886_v27 = vadd.f32 %v5849_v21, %v10639_v39  ;;  %v5851_v8 = vpop.f32.mrb[83].mxu1 }
 0xb96   : > { %5901 = vst [vmem:[%s10328_s27 + $0x8] sm:$0xff] %v5885_v49  ;;  %v5887_v18 = vadd.f32 %v5851_v8, %v10640_v42 }
 0xb97   : > { %5902 = vst [vmem:[%s10328_s27 + $0x10] sm:$0xff] %v5886_v27 }
 0xb98   : > { %5903 = vst [vmem:[%s10328_s27 + $0x18] sm:$0xff] %v5887_v18 }
 0xb9a   : > { %v5855_v22 = vpop.f32.mrb[84].mxu1 }
 0xb9b   : > { %v5888_v14 = vadd.f32 %v5855_v22, %v10641_v3  ;;  %v5857_v13 = vpop.f32.mrb[85].mxu1 }
 0xb9c   : > { %v5889_v24 = vadd.f32 %v5857_v13, %v10642_v50  ;;  %v5859_v35 = vpop.f32.mrb[86].mxu1 }
 0xb9d   : > { %5904 = vst [vmem:[%s10328_s27 + $0x20] sm:$0xff] %v5888_v14  ;;  %v5890_v16 = vadd.f32 %v5859_v35, %v10643_v45  ;;  %v5861_v61 = vpop.f32.mrb[87].mxu1 }
 0xb9e   : > { %5905 = vst [vmem:[%s10328_s27 + $0x28] sm:$0xff] %v5889_v24  ;;  %v5891_v4 = vadd.f32 %v5861_v61, %v10644_v44 }
 0xb9f   : > { %5906 = vst [vmem:[%s10328_s27 + $0x30] sm:$0xff] %v5890_v16 }
 0xba0   : > { %5907 = vst [vmem:[%s10328_s27 + $0x38] sm:$0xff] %v5891_v4 }
 0xba2   : > { %v5865_v58 = vpop.f32.mrb[88].mxu1 }
 0xba3   : > { %v5892_v51 = vadd.f32 %v5865_v58, %v10645_v62  ;;  %v5867_v2 = vpop.f32.mrb[89].mxu1 }
 0xba4   : > { %v5893_v12 = vadd.f32 %v5867_v2, %v10646_v59  ;;  %v5869_v10 = vpop.f32.mrb[90].mxu1 }
 0xba5   : > { %5908 = vst [vmem:[%s10328_s27 + $0x40] sm:$0xff] %v5892_v51  ;;  %v5894_v19 = vadd.f32 %v5869_v10, %v10647_v54  ;;  %v5871_v48 = vpop.f32.mrb[91].mxu1 }
 0xba6   : > { %5909 = vst [vmem:[%s10328_s27 + $0x48] sm:$0xff] %v5893_v12  ;;  %v5895_v31 = vadd.f32 %v5871_v48, %v10648_v41 }
 0xba7   : > { %5910 = vst [vmem:[%s10328_s27 + $0x50] sm:$0xff] %v5894_v19 }
 0xba8   : > { %5911 = vst [vmem:[%s10328_s27 + $0x58] sm:$0xff] %v5895_v31 }
 0xbaa   : > { %v5875_v46 = vpop.f32.mrb[92].mxu1 }
 0xbab   : > { %v5896_v34 = vadd.f32 %v5875_v46, %v10649_v32  ;;  %v5877_v23 = vpop.f32.mrb[93].mxu1 }
 0xbac   : > { %v5897_v29 = vadd.f32 %v5877_v23, %v10650_v60  ;;  %v5879_v38 = vpop.f32.mrb[94].mxu1 }
 0xbad   : > { %5912 = vst [vmem:[%s10328_s27 + $0x60] sm:$0xff] %v5896_v34  ;;  %v5898_v55 = vadd.f32 %v5879_v38, %v10651_v57  ;;  %v5881_v15 = vpop.f32.mrb[95].mxu1 }
 0xbae   : > { %5913 = vst [vmem:[%s10328_s27 + $0x68] sm:$0xff] %v5897_v29  ;;  %v5899_v28 = vadd.f32 %v5881_v15, %v10653_v36 }
 0xbaf   : > { %5914 = vst [vmem:[%s10328_s27 + $0x70] sm:$0xff] %v5898_v55 }
 0xbb0   : > { %5915 = vst [vmem:[%s10328_s27 + $0x78] sm:$0xff] %v5899_v28 }
 0xbb1   : > { %7954 = shalt.err (!%p7951_p8)
}
 0xbb2   : > { %s7955_s18 = scalar_lea.hbm %s10361_s25, 2048  ;;  %s7959_s12 = scalar_lea.hbm %s10652_s10, 4096 }
 0xbb3   : > { %p7956_p6 = scmp.ne.s32.totalorder %s10361_s25, %s7955_s18  ;;  %p7960_p3 = scmp.lt.u32.totalorder %s10361_s25, %s10652_s10 }
 0xbb4   : > { %p7961_p0 = scmp.lt.u32.totalorder %s7959_s12, %s7955_s18  ;;  %p7963_p2 = scmp.lt.u32.totalorder %s7955_s18, %s10361_s25 }
 0xbb5   : > { %p7957_p9 = pnand %p7956_p6, %p10654_p7 }
 0xbb6   : > { %p7962_p5 = por %p7961_p0, %p7960_p3 }
 0xbb7   : > { %p7958_p4 = pneg %p7957_p9 }
 0xbb8   : > { %p7964_p10 = por %p7963_p2, %p7962_p5 }
 0xbba   : > { %p7965_p1 = pnand %p7964_p10, %p7958_p4 }
 0xbbc   : > { %7968 = shalt.err (!%p7965_p1)
}
 0xbbd   : > { %s8039_s26 = smov 256   ;;  %s8040_s23 = smov 16  }
 0xbbe   : > { %6767 = dma.vmem_to_hbm [thread:$0]  (%p10654_p7), %s10363_s20, 2048, %s10361_s25, %s5917_s19, %s8039_s26, %s8039_s26, %s8040_s23  }
 0xbbf PF: > { %s5945_s29 = sand.u32 1, %s8007_s13   ;;  %p10655_p11 = scmp.ne.s32.totalorder %s10494_s21, 0 }
 0xbc0   : > { %p10656_p12 = scmp.ge.s32.totalorder %s8019_s16, 2  ;;  %s5946_s18 = scalar_lea.sflag [#allocation5], %s5945_s29 }
 0xbc2   : > { %p6790_p13 = pnand %p10656_p12, %p10655_p11 }
 0xbc4   : > { %8002 = dma.done.wait (!%p6790_p13), %s5946_s18, 2048  }
 0xbc5   : > { %8004 = vsyncadd (!%p6790_p13), %s5946_s18, 4294965248  ;;  %p26_p8 = scmp.ge.s32.totalorder %s8259_s11, 4   ;;  %s10657_s13 = smov %s8011_s14 }
 0xbc6   : > { %s10658_s14 = smov %s8015_s15  ;;  %s10659_s15 = smov %s8271_s28 }
 0xbc7   : > { %s10660_s16 = smov %s8259_s11  ;;  %28 = sbr.rel (!%p26_p8) target bundleno = 11 (0xb), region = 125 }
 0xbce   :  { %5951 = vsyncpa [#allocation4], 1 }
 0xbcf   :  { %5953 = vsyncpa [#allocation4 + $0x1], 1 }
 0xbd0   :  { %5954 = vsyncpa [#allocation7], 1 }
 0xbd1   :  { %5955 = vsyncpa [#allocation10], 1 }
 0xbd2   :  { %5956 = vsyncpa [#allocation13], 1 }
 0xbd3   :  { %5957 = vsyncpa [#allocation5], 1 }
 0xbd4   :  { %5959 = vsyncpa [#allocation5 + $0x1], 1 }

// kernel: tpu_custom_call.1
= control target key start
LH: loop header
LB: loop body
LE: loop exit
PB: predicated region body
PF: predicated region fallthrough
CT: control target
= control target key end

     0   :  { %s10411_s0 = inlined_call_operand.hbm [shape: f32[2,64,256], index: 0, kind: input, shape index: {}]   ;;  %s10412_s1 = inlined_call_operand.vmem [shape: f32[64,384], index: 1, kind: input, shape index: {}]   ;;  %s10413_s2 = inlined_call_operand.hbm [shape: f32[64,384], index: 2, kind: input, shape index: {}]   ;;  %s10414_s3 = inlined_call_operand.vmem [shape: f32[128,64], index: 3, kind: input, shape index: {}]   ;;  %s10415_s4 = inlined_call_operand.vmem [shape: f32[1,256], index: 4, kind: input, shape index: {}]   ;;  %s10416_s5 = inlined_call_operand.vmem [shape: f32[1,256], index: 5, kind: input, shape index: {}]   ;;  %s10417_s6 = inlined_call_operand.hbm [shape: bf16[256,512], index: 6, kind: input, shape index: {}]   ;;  %s10418_s7 = inlined_call_operand.hbm [shape: bf16[256,256], index: 7, kind: input, shape index: {}]   ;;  %s10419_s8 = inlined_call_operand.hbm [shape: bf16[256,1408], index: 8, kind: input, shape index: {}]   ;;  %s10420_s9 = inlined_call_operand.hbm [shape: bf16[704,256], index: 9, kind: input, shape index: {}]   ;;  %s10421_s10 = inlined_call_operand.hbm [shape: f32[2,64,256], index: 10, kind: output, shape index: {}]  }
   0x1   :  { %10484 = sst [smem:[#allocation52_spill]] %s10416_s5 }
   0x2   :  { %10485 = sst [smem:[#allocation53_spill]] %s10421_s10 }
   0x3   :  { %15 = vsyncpa [#allocation4], 0 }
   0x4   :  { %17 = vsyncpa [#allocation4 + $0x1], 0 }
   0x5   :  { %18 = vsyncpa [#allocation7], 0 }
   0x6   :  { %19 = vsyncpa [#allocation10], 0 }
   0x7   :  { %20 = vsyncpa [#allocation13], 0 }
   0x8   :  { %21 = vsyncpa [#allocation5], 0 }
   0x9   :  { %23 = vsyncpa [#allocation5 + $0x1], 0  ;;  %s8096_s13 = smov 0   ;;  %s8098_s14 = smov 0  }
   0xa   :  { %s8100_s15 = smov 0   ;;  %s8102_s16 = smov 0  }
   0xb LB: > { %s8021_s17 = smov [#allocation6]   ;;  %s8117_s19 = sadd.s32 4294967295, %s8019_s16   ;;  %s8019_s16 = sphi %s8102_s16, %s10660_s16   ;;  %s8015_s15 = sphi %s8100_s15, %s10659_s15   ;;  %s8011_s14 = sphi %s8098_s14, %s10658_s14   ;;  %s8007_s13 = sphi %s8096_s13, %s10657_s13  }
   0xc   : > { %s290_s18 = sshll.u32 %s8021_s17, 4  ;;  %p6052_p0 = scmp.ge.s32.totalorder %s8019_s16, 1  ;;  %s8122_s18 = int_to_ptr.vmem [resolvable:$true] %s290_s18 }
   0xd   : > { %p10423_p1 = scmp.eq.s32.totalorder %s8117_s19, 0  ;;  %p275_p2 = scmp.lt.s32.totalorder %s8019_s16, 3 }
   0xe   : > { %s8022_s21 = smov [#allocation9]   ;;  %s8023_s24 = smov [#allocation8]  }
   0xf   : > { %p8124_p3 = pnand %p6052_p0, %p275_p2  ;;  %s325_s22 = sshll.u32 %s8022_s21, 4  ;;  %s8137_s22 = int_to_ptr.vmem [resolvable:$true] %s325_s22 }
  0x10   : > { %s8139_s25 = sshll.u32 %s8023_s24, 4  ;;  %s7771_s28 = scalar_lea.hbm %s10413_s2, 3072  ;;  %s313_s25 = int_to_ptr.vmem [resolvable:$true] %s8139_s25 }
  0x11   : > { %s10486_s20 = scalar_select %p8124_p3, 1, 0 }
  0x12   : > { %p6769_p5 = pneg %p8124_p3  ;;  %p7772_p7 = scmp.ne.s32.totalorder %s10413_s2, %s7771_s28 }
  0x13   : > { %p7778_p11 = scmp.lt.u32.totalorder %s7771_s28, %s10413_s2 }
  0x14   : > { %p8133_p6 = pnand %p6769_p5, %p10423_p1 }
  0x16   : > { %p8149_p8 = pneg %p8133_p6 }
  0x18   : > { %p7774_p9 = pnand %p8149_p8, %p7772_p7 }
  0x1a   : > { %p7775_p10 = pneg %p7774_p9 }
  0x1c   : > { %p7780_p12 = pnand %p7778_p11, %p7775_p10 }
  0x1e   : > { %7783 = shalt.err (!%p7780_p12)
}
  0x1f   : > { %s7784_s21 = scalar_lea.vmem %s8122_s18, 3072  ;;  %p7792_p5 = scmp.lt.s32.totalorder %s8122_s18, %s8122_s18 }
  0x20   : > { %p7785_p13 = scmp.ne.s32.totalorder %s8122_s18, %s7784_s21  ;;  %p7793_p4 = scmp.lt.s32.totalorder %s7784_s21, %s7784_s21 }
  0x22   : > { %p7787_p0 = pnand %p7785_p13, %p8149_p8  ;;  %p7794_p7 = por %p7793_p4, %p7792_p5 }
  0x24   : > { %p7788_p2 = pneg %p7787_p0 }
  0x26   : > { %p7795_p9 = pnand %p7794_p7, %p7788_p2 }
  0x28   : > { %7798 = shalt.err (!%p7795_p9)
}
  0x29   : > { %s8024_s24 = smov 384   ;;  %s8025_s26 = smov 24  }
  0x2a   : > { %6772 = dma.hbm_to_vmem [thread:$0]  (!%p8133_p6), %s10413_s2, 3072, %s8122_s18, [#allocation7], %s8024_s24, %s8024_s24, %s8025_s26  }
  0x2b   : > { %s7799_s12 = scalar_lea.hbm %s10418_s7, 4096 }
  0x2c   : > { %p7800_p4 = scmp.ne.s32.totalorder %s10418_s7, %s7799_s12  ;;  %p7806_p12 = scmp.lt.u32.totalorder %s7799_s12, %s10418_s7 }
  0x2e   : > { %p7802_p10 = pnand %p7800_p4, %p8149_p8 }
  0x30   : > { %p7803_p11 = pneg %p7802_p10 }
  0x32   : > { %p7808_p13 = pnand %p7806_p12, %p7803_p11 }
  0x34   : > { %7811 = shalt.err (!%p7808_p13)
}
  0x35   : > { %s7812_s18 = scalar_lea.vmem %s8137_s22, 4096  ;;  %p7820_p7 = scmp.lt.s32.totalorder %s8137_s22, %s8137_s22 }
  0x36   : > { %p7813_p0 = scmp.ne.s32.totalorder %s8137_s22, %s7812_s18  ;;  %p7821_p9 = scmp.lt.s32.totalorder %s7812_s18, %s7812_s18 }
  0x38   : > { %p7815_p2 = pnand %p7813_p0, %p8149_p8  ;;  %p7822_p4 = por %p7821_p9, %p7820_p7 }
  0x3a   : > { %p7816_p5 = pneg %p7815_p2 }
  0x3c   : > { %p7823_p10 = pnand %p7822_p4, %p7816_p5 }
  0x3e   : > { %7826 = shalt.err (!%p7823_p10)
}
  0x3f   : > { %s10425_s10 = smov 128   ;;  %s10426_s5 = smov 8  }
  0x40   : > { %6778 = dma.hbm_to_vmem [thread:$0]  (!%p8133_p6), %s10418_s7, 4096, %s8137_s22, [#allocation10], %s10425_s10, %s10425_s10, %s10426_s5  }
  0x41   : > { %s7827_s29 = scalar_lea.hbm %s10417_s6, 8192 }
  0x42   : > { %p7828_p11 = scmp.ne.s32.totalorder %s10417_s6, %s7827_s29  ;;  %p7834_p0 = scmp.lt.u32.totalorder %s7827_s29, %s10417_s6 }
  0x44   : > { %p7830_p12 = pnand %p7828_p11, %p8149_p8 }
  0x46   : > { %p7831_p13 = pneg %p7830_p12 }
  0x48   : > { %p7836_p2 = pnand %p7834_p0, %p7831_p13 }
  0x4a   : > { %7839 = shalt.err (!%p7836_p2)
}
  0x4b   : > { %s7840_s18 = scalar_lea.vmem %s313_s25, 8192  ;;  %p7848_p4 = scmp.lt.s32.totalorder %s313_s25, %s313_s25 }
  0x4c   : > { %p7841_p5 = scmp.ne.s32.totalorder %s313_s25, %s7840_s18  ;;  %p7849_p10 = scmp.lt.s32.totalorder %s7840_s18, %s7840_s18 }
  0x4e   : > { %p7843_p7 = pnand %p7841_p5, %p8149_p8  ;;  %p7850_p1 = por %p7849_p10, %p7848_p4 }
  0x50   : > { %p7844_p9 = pneg %p7843_p7 }
  0x52   : > { %p7851_p3 = pnand %p7850_p1, %p7844_p9 }
  0x54   : > { %7854 = shalt.err (!%p7851_p3)
}
  0x55   : > { %s10427_s22 = smov 256   ;;  %s10428_s24 = smov 16  }
  0x56   : > { %6775 = dma.hbm_to_vmem [thread:$0]  (!%p8133_p6), %s10417_s6, 8192, %s313_s25, [#allocation7], %s10427_s22, %s10427_s22, %s10428_s24  }
  0x57   : > { %s8030_s28 = smov [#allocation11]   ;;  %s7855_s17 = scalar_lea.hbm %s10419_s8, 22528 }
  0x58   : > { %s338_s29 = sshll.u32 %s8030_s28, 4  ;;  %p7856_p1 = scmp.ne.s32.totalorder %s10419_s8, %s7855_s17  ;;  %s339_s29 = int_to_ptr.vmem [resolvable:$true] %s338_s29 }
  0x59   : > { %p7862_p12 = scmp.lt.u32.totalorder %s7855_s17, %s10419_s8 }
  0x5a   : > { %p7858_p3 = pnand %p7856_p1, %p8149_p8 }
  0x5c   : > { %p7859_p11 = pneg %p7858_p3 }
  0x5e   : > { %p7864_p13 = pnand %p7862_p12, %p7859_p11 }
  0x60   : > { %7867 = shalt.err (!%p7864_p13)
}
  0x61   : > { %s7868_s25 = scalar_lea.vmem %s339_s29, 22528  ;;  %p7876_p7 = scmp.lt.s32.totalorder %s339_s29, %s339_s29 }
  0x62   : > { %p7869_p0 = scmp.ne.s32.totalorder %s339_s29, %s7868_s25  ;;  %p7877_p9 = scmp.lt.s32.totalorder %s7868_s25, %s7868_s25 }
  0x64   : > { %p7871_p2 = pnand %p7869_p0, %p8149_p8  ;;  %p7878_p4 = por %p7877_p9, %p7876_p7 }
  0x66   : > { %p7872_p5 = pneg %p7871_p2 }
  0x68   : > { %p7879_p10 = pnand %p7878_p4, %p7872_p5 }
  0x6a   : > { %7882 = shalt.err (!%p7879_p10)
}
  0x6b   : > { %s8031_s26 = smov 704   ;;  %s8032_s27 = smov 44  }
  0x6c   : > { %6781 = dma.hbm_to_vmem [thread:$0]  (!%p8133_p6), %s10419_s8, 22528, %s339_s29, [#allocation10], %s8031_s26, %s8031_s26, %s8032_s27  }
  0x6d   : > { %s8033_s28 = smov [#allocation12]   ;;  %s7883_s21 = scalar_lea.hbm %s10420_s9, 11264 }
  0x6e   : > { %s351_s30 = sshll.u32 %s8033_s28, 4  ;;  %p7884_p1 = scmp.ne.s32.totalorder %s10420_s9, %s7883_s21  ;;  %s352_s30 = int_to_ptr.vmem [resolvable:$true] %s351_s30 }
  0x6f   : > { %p7890_p12 = scmp.lt.u32.totalorder %s7883_s21, %s10420_s9 }
  0x70   : > { %p7886_p3 = pnand %p7884_p1, %p8149_p8 }
  0x72   : > { %p7887_p11 = pneg %p7886_p3 }
  0x74   : > { %p7892_p13 = pnand %p7890_p12, %p7887_p11 }
  0x76   : > { %7895 = shalt.err (!%p7892_p13)
}
  0x77   : > { %s7896_s29 = scalar_lea.vmem %s352_s30, 11264  ;;  %p7904_p7 = scmp.lt.s32.totalorder %s352_s30, %s352_s30 }
  0x78   : > { %p7897_p0 = scmp.ne.s32.totalorder %s352_s30, %s7896_s29  ;;  %p7905_p9 = scmp.lt.s32.totalorder %s7896_s29, %s7896_s29 }
  0x7a   : > { %p7899_p2 = pnand %p7897_p0, %p8149_p8  ;;  %p7906_p4 = por %p7905_p9, %p7904_p7 }
  0x7c   : > { %p7900_p5 = pneg %p7899_p2 }
  0x7e   : > { %p7907_p10 = pnand %p7906_p4, %p7900_p5 }
  0x80   : > { %7910 = shalt.err (!%p7907_p10)
}
  0x81   : > { %s10489_s26 = smov 8   ;;  %s10490_s27 = smov 128  }
  0x82   : > { %6784 = dma.hbm_to_vmem [thread:$0]  (!%p8133_p6), %s10420_s9, 11264, %s352_s30, [#allocation13], %s10490_s27, %s10490_s27, %s10489_s26  }
  0x83   : > { %s6051_s23 = sadd.s32 4294967294, %s8019_s16   ;;  %s8259_s11 = sadd.s32 1, %s8019_s16  }
  0x84   : > { %s36_s10 = sadd.s32 1, %s8015_s15  ;;  %s33_s5 = ssub.s32 %s8019_s16, %s8259_s11 }
  0x85   : > { %p43_p8 = scmp.ne.s32.totalorder %s8015_s15, %s8011_s14  ;;  %p34_p1 = scmp.eq.s32.totalorder %s33_s5, 0 }
  0x86   : > { %p44_p3 = scmp.eq.s32.totalorder %s8019_s16, 0  ;;  %p49_p11 = scmp.ne.s32.totalorder %s8011_s14, %s8007_s13 }
  0x87   : > { %p262_p12 = scmp.eq.s32.totalorder %s8117_s19, 1  ;;  %p10491_p0 = scmp.eq.s32.totalorder %s8117_s19, 0 }
  0x88   : > { %s8271_s28 = scalar_select %p34_p1, %s8015_s15, %s36_s10  }
  0x89   : > { %p45_p13 = por %p44_p3, %p43_p8  ;;  %p8275_p2 = por %p10491_p0, %p49_p11 }
  0x8a   : > { %p8279_p6 = por %p262_p12, %p43_p8  ;;  %p268_p5 = scmp.eq.s32.totalorder %s6051_s23, 1 }
  0x8b   : > { %p6798_p7 = scmp.lt.s32.totalorder %s8019_s16, 2  ;;  %s365_s17 = sand.u32 1, %s8015_s15  }
  0x8c   : > { %s10493_s30 = scalar_select %p8279_p6, 1, 0 }
  0x8d   : > { %p8285_p9 = por %p268_p5, %p49_p11  ;;  %s6059_s18 = sshll.u32 %s365_s17, 7 }
  0x8e   : > { %s6519_s25 = sshll.u32 %s8019_s16, 11  ;;  %s369_s22 = scalar_lea.vmem [#allocation3], %s6059_s18 }
  0x8f   : > { %s10494_s21 = scalar_select %p8285_p9, 1, 0 }
  0x90   : > { %s8293_s27 = scalar_lea.hbm %s10411_s0, %s6519_s25  ;;  %s376_s24 = sshll.u32 %s369_s22, 4  ;;  %s8299_s24 = int_to_ptr.vmem [resolvable:$true] %s376_s24 }
  0x91   : > { %p8295_p4 = pnand %p6798_p7, %p45_p13  ;;  %s8301_s10 = scalar_lea.sflag [#allocation4], %s365_s17 }
  0x92   : > { %s7911_s5 = scalar_lea.hbm %s8293_s27, 2048  ;;  %s7916_s29 = scalar_lea.hbm %s10411_s0, 4096 }
  0x93   : > { %p7912_p10 = scmp.ne.s32.totalorder %s8293_s27, %s7911_s5  ;;  %p7913_p8 = pneg %p8295_p4 }
  0x94   : > { %p7917_p11 = scmp.lt.u32.totalorder %s8293_s27, %s10411_s0  ;;  %p7918_p12 = scmp.lt.u32.totalorder %s7916_s29, %s7911_s5 }
  0x95   : > { %p7914_p1 = pnand %p7913_p8, %p7912_p10  ;;  %p7920_p0 = scmp.lt.u32.totalorder %s7911_s5, %s8293_s27 }
  0x96   : > { %p7919_p13 = por %p7918_p12, %p7917_p11 }
  0x97   : > { %p7915_p3 = pneg %p7914_p1 }
  0x98   : > { %p7921_p5 = por %p7920_p0, %p7919_p13 }
  0x9a   : > { %p7922_p7 = pnand %p7921_p5, %p7915_p3 }
  0x9c   : > { %7925 = shalt.err (!%p7922_p7)
}
  0x9d   : > { %s7926_s17 = scalar_lea.vmem %s8299_s24, 2048  ;;  %s8034_s18 = smov [#allocation3]  }
  0x9e   : > { %p7927_p10 = scmp.ne.s32.totalorder %s8299_s24, %s7926_s17  ;;  %s7931_s25 = sshll.u32 %s8034_s18, 4  ;;  %s7932_s25 = int_to_ptr.vmem [resolvable:$false] %s7931_s25 }
  0x9f   : > { %s7933_s26 = scalar_lea.vmem %s7932_s25, 4096  ;;  %p7934_p6 = scmp.lt.s32.totalorder %s8299_s24, %s7932_s25 }
  0xa0   : > { %p7929_p1 = pnand %p7927_p10, %p7913_p8  ;;  %p7935_p11 = scmp.lt.s32.totalorder %s7933_s26, %s7926_s17 }
  0xa2   : > { %p7930_p9 = pneg %p7929_p1  ;;  %p7936_p12 = por %p7935_p11, %p7934_p6 }
  0xa4   : > { %p7937_p13 = pnand %p7936_p12, %p7930_p9 }
  0xa6   : > { %7940 = shalt.err (!%p7937_p13)
}
  0xa7   : > { %s10496_s5 = smov 16   ;;  %s10497_s29 = smov 256  }
  0xa8   : > { %6788 = dma.hbm_to_vmem [thread:$0]  (!%p8295_p4), %s8293_s27, 2048, %s8299_s24, %s8301_s10, %s10497_s29, %s10497_s29, %s10496_s5  }
  0xa9   : > { %p10498_p8 = scmp.ne.s32.totalorder %s10486_s20, 0 }
  0xab   : > { %388 = sbr.rel (%p10498_p8) target bundleno = 3007 (0xbbf), region = 60 }
  0xb2   : > { %s8335_s22 = sand.u32 1, %s8011_s14  }
  0xb3   : > { %s6063_s17 = sshll.u32 %s8335_s22, 7  ;;  %s391_s18 = scalar_lea.sflag [#allocation4], %s8335_s22 }
  0xb4   : > { %s8341_s23 = scalar_lea.vmem [#allocation3], %s6063_s17 }
  0xb5   : > { %7986 = dma.done.wait (%p8275_p2), %s391_s18, 2048  }
  0xb6   : > { %7988 = vsyncadd (%p8275_p2), %s391_s18, 4294965248  ;;  %p10499_p6 = scmp.eq.s32.totalorder %s8117_s19, 0 }
  0xb8   : > { %7990 = dma.done.wait (%p10499_p6), [#allocation7], 11264   ;;  %p10500_p9 = pmov %p10499_p6 }
  0xb9   : > { %p10501_p4 = pmov %p10499_p6 }
  0xba   : > { %7992 = vsyncadd (%p10500_p9), [#allocation7], 4294956032 }
  0xbb   : > { %7994 = dma.done.wait (%p10501_p4), [#allocation10], 26624   ;;  %p10502_p3 = pmov %p10501_p4 }
  0xbd   : > { %7996 = vsyncadd (%p10502_p3), [#allocation10], 4294940672  ;;  %p10503_p0 = pmov %p10502_p3 }
  0xbf   : > { %7998 = dma.done.wait (%p10503_p0), [#allocation13], 11264   ;;  %p10504_p5 = pmov %p10503_p0 }
  0xc0   : > { %v452_v0 = vld [vmem:[%s8341_s23] sm:$0xff]  ;;  %v453_v1 = vld [vmem:[%s8341_s23 + $0x8] sm:$0xff]  ;;  %v454_v2 = vld [vmem:[%s8341_s23 + $0x10] sm:$0xff]  ;;  %s8035_s27 = smov 96   ;;  %s8036_s24 = smov 32   ;;  %vm1516_vm5 = vcmask 523264  }
  0xc1   : > { %8000 = vsyncadd (%p10504_p5), [#allocation13], 4294956032  ;;  %v469_v3 = vmul.f32 %v452_v0, %v452_v0  ;;  %v470_v4 = vmul.f32 %v453_v1, %v453_v1  ;;  %v455_v5 = vld [vmem:[%s8341_s23 + $0x18] sm:$0xff]  ;;  %v471_v6 = vmul.f32 %v454_v2, %v454_v2  ;;  %v456_v7 = vld [vmem:[%s8341_s23 + $0x20] sm:$0xff]  ;;  %vm2015_vm6 = vcmask 1048064   ;;  %s10607_s18 = sld [smem:[#allocation52_spill]] }
  0xc2   : > { %v457_v8 = vld [vmem:[%s8341_s23 + $0x28] sm:$0xff]  ;;  %v472_v9 = vmul.f32 %v455_v5, %v455_v5  ;;  %v473_v10 = vmul.f32 %v456_v7, %v456_v7  ;;  %v458_v12 = vld [vmem:[%s8341_s23 + $0x30] sm:$0xff]  ;;  %v459_v13 = vld [vmem:[%s8341_s23 + $0x38] sm:$0xff]  ;;  %s10652_s10 = sld [smem:[#allocation53_spill]]  ;;  %p10654_p7 = scmp.ne.s32.totalorder %s10493_s30, 0 }
  0xc3   : > { %v474_v11 = vmul.f32 %v457_v8, %v457_v8  ;;  %v462_v14 = vld [vmem:[%s8341_s23 + $0x50] sm:$0xff]  ;;  %v485_v15 = vadd.f32 %v470_v4, %v469_v3  ;;  %v475_v16 = vmul.f32 %v458_v12, %v458_v12  ;;  %v476_v17 = vmul.f32 %v459_v13, %v459_v13  ;;  %v463_v18 = vld [vmem:[%s8341_s23 + $0x58] sm:$0xff]  ;;  %v460_v19 = vld [vmem:[%s8341_s23 + $0x40] sm:$0xff]  ;;  %s8038_s5 = smov [#allocation14]  }
  0xc4   : > { %v461_v20 = vld [vmem:[%s8341_s23 + $0x48] sm:$0xff]  ;;  %v464_v22 = vld [vmem:[%s8341_s23 + $0x60] sm:$0xff]  ;;  %v488_v23 = vadd.f32 %v472_v9, %v471_v6  ;;  %v477_v24 = vmul.f32 %v460_v19, %v460_v19  ;;  %v466_v26 = vld [vmem:[%s8341_s23 + $0x70] sm:$0xff]  ;;  %v479_v29 = vmul.f32 %v462_v14, %v462_v14  ;;  %v480_v30 = vmul.f32 %v463_v18, %v463_v18 }
  0xc5   : > { %v491_v21 = vadd.f32 %v474_v11, %v473_v10  ;;  %486 = vadd.xlane.f32.xlu0 %v485_v15  ;;  %v478_v25 = vmul.f32 %v461_v20, %v461_v20  ;;  %v465_v27 = vld [vmem:[%s8341_s23 + $0x68] sm:$0xff]  ;;  %v494_v28 = vadd.f32 %v476_v17, %v475_v16  ;;  %v6855_v31 = vld [vmem:[#allocation8 + $0x4] ss:$16 sps:$4 sm:$0xff]   ;;  %v6857_v32 = vld [vmem:[#allocation8] ss:$16 sps:$4 sm:$0xff]   ;;  %v481_v36 = vmul.f32 %v464_v22, %v464_v22 }
  0xc6   : > { %v467_v33 = vld [vmem:[%s8341_s23 + $0x78] sm:$0xff]  ;;  %v6858_v34 = vld [vmem:[#allocation8 + $0x24] ss:$16 sps:$4 sm:$0xff]   ;;  %969 = vmatprep.subr.bf16.mxu0 %v6855_v31  ;;  %v482_v37 = vmul.f32 %v465_v27, %v465_v27  ;;  %v6860_v38 = vld [vmem:[#allocation8 + $0x20] ss:$16 sps:$4 sm:$0xff]   ;;  %v500_v39 = vadd.f32 %v480_v30, %v479_v29  ;;  %v483_v40 = vmul.f32 %v466_v26, %v466_v26  ;;  %v551_v18 = vlaneseq }
  0xc7   : > { %492 = vadd.xlane.f32.xlu1 %v491_v21  ;;  %v497_v35 = vadd.f32 %v478_v25, %v477_v24  ;;  %970 = vmatpush1.bf16.msra.mxu0 %v6857_v32  ;;  %v484_v41 = vmul.f32 %v467_v33, %v467_v33  ;;  %v6861_v42 = vld [vmem:[#allocation8 + $0x44] ss:$16 sps:$4 sm:$0xff]   ;;  %v6863_v44 = vld [vmem:[#allocation8 + $0x40] ss:$16 sps:$4 sm:$0xff]   ;;  %v6905_v8 = vld [vmem:[#allocation8 + $0xc] ss:$16 sps:$4 sm:$0xff]  }
  0xc8   : > { %971 = vmatprep.subr.bf16.mxu0 %v6858_v34  ;;  %v503_v43 = vadd.f32 %v482_v37, %v481_v36  ;;  %v6864_v46 = vld [vmem:[#allocation8 + $0x64] ss:$16 sps:$4 sm:$0xff]   ;;  %v6866_v47 = vld [vmem:[#allocation8 + $0x60] ss:$16 sps:$4 sm:$0xff]   ;;  %v8376_v25 = vshrl.u32 %v551_v18, 7 }
  0xc9   : > { %489 = vadd.xlane.f32.xlu0 %v488_v23  ;;  %v506_v45 = vadd.f32 %v484_v41, %v483_v40  ;;  %v6867_v48 = vld [vmem:[#allocation8 + $0x84] ss:$16 sps:$4 sm:$0xff]   ;;  %v6869_v49 = vld [vmem:[#allocation8 + $0x80] ss:$16 sps:$4 sm:$0xff]   ;;  %v7739_v41 = vld [vmem:[%s8341_s23 + $0x28] sm:$0xff] }
  0xca   : > { %v6870_v50 = vld [vmem:[#allocation8 + $0xa4] ss:$16 sps:$4 sm:$0xff]   ;;  %v6872_v51 = vld [vmem:[#allocation8 + $0xa0] ss:$16 sps:$4 sm:$0xff]   ;;  %10505 = vst [vmem:[#allocation20_spill] sm:$0xff] %v8376_v25  ;;  %v10431_v30 = vsub.s32 0, %v8376_v25 }
  0xcb   : > { %495 = vadd.xlane.f32.xlu1 %v494_v28  ;;  %972 = vmatpush1.bf16.msra.mxu0 %v6860_v38  ;;  %v6873_v52 = vld [vmem:[#allocation8 + $0xc4] ss:$16 sps:$4 sm:$0xff]   ;;  %v6875_v53 = vld [vmem:[#allocation8 + $0xc0] ss:$16 sps:$4 sm:$0xff]   ;;  %v10430_v34 = vsub.s32 1, %v8376_v25  ;;  %v1359_v25 = vld [vmem:[%s10412_s1 + $0x38] sm:$0xff] }
  0xcc   : > { %973 = vmatprep.subr.bf16.mxu0 %v6861_v42  ;;  %v6876_v54 = vld [vmem:[#allocation8 + $0xe4] ss:$16 sps:$4 sm:$0xff]   ;;  %v6878_v55 = vld [vmem:[#allocation8 + $0xe0] ss:$16 sps:$4 sm:$0xff]  }
  0xcd   : > { %498 = vadd.xlane.f32.xlu0 %v497_v35  ;;  %v6879_v56 = vld [vmem:[#allocation8 + $0x104] ss:$16 sps:$4 sm:$0xff]   ;;  %v6881_v57 = vld [vmem:[#allocation8 + $0x100] ss:$16 sps:$4 sm:$0xff]  }
  0xce   : > { %v6882_v58 = vld [vmem:[#allocation8 + $0x124] ss:$16 sps:$4 sm:$0xff]   ;;  %v6884_v59 = vld [vmem:[#allocation8 + $0x120] ss:$16 sps:$4 sm:$0xff]  }
  0xcf   : > { %501 = vadd.xlane.f32.xlu1 %v500_v39  ;;  %974 = vmatpush1.bf16.msra.mxu0 %v6863_v44  ;;  %v6885_v60 = vld [vmem:[#allocation8 + $0x144] ss:$16 sps:$4 sm:$0xff]   ;;  %v6887_v61 = vld [vmem:[#allocation8 + $0x140] ss:$16 sps:$4 sm:$0xff]  }
  0xd0   : > { %975 = vmatprep.subr.bf16.mxu0 %v6864_v46  ;;  %v6888_v62 = vld [vmem:[#allocation8 + $0x164] ss:$16 sps:$4 sm:$0xff]   ;;  %v6890_v63 = vld [vmem:[#allocation8 + $0x160] ss:$16 sps:$4 sm:$0xff]  }
  0xd1   : > { %504 = vadd.xlane.f32.xlu0 %v503_v43  ;;  %v6891_v0 = vld [vmem:[#allocation8 + $0x184] ss:$16 sps:$4 sm:$0xff]   ;;  %v6893_v1 = vld [vmem:[#allocation8 + $0x180] ss:$16 sps:$4 sm:$0xff]   ;;  %v7740_v43 = vld [vmem:[%s8341_s23 + $0x8] sm:$0xff] }
  0xd2   : > { %v6894_v2 = vld [vmem:[#allocation8 + $0x1a4] ss:$16 sps:$4 sm:$0xff]   ;;  %v6896_v3 = vld [vmem:[#allocation8 + $0x1a0] ss:$16 sps:$4 sm:$0xff]  }
  0xd3   : > { %507 = vadd.xlane.f32.xlu1 %v506_v45  ;;  %976 = vmatpush1.bf16.msra.mxu0 %v6866_v47  ;;  %v6897_v4 = vld [vmem:[#allocation8 + $0x1c4] ss:$16 sps:$4 sm:$0xff]   ;;  %v6899_v5 = vld [vmem:[#allocation8 + $0x1c0] ss:$16 sps:$4 sm:$0xff]  }
  0xd4   : > { %977 = vmatprep.subr.bf16.mxu0 %v6867_v48  ;;  %v6900_v6 = vld [vmem:[#allocation8 + $0x1e4] ss:$16 sps:$4 sm:$0xff]   ;;  %v6902_v7 = vld [vmem:[#allocation8 + $0x1e0] ss:$16 sps:$4 sm:$0xff]  }
  0xd5   : > { %v468_v33 = vld [vmem:[%s10415_s4] sm:$0x3] }
  0xd6   : > { %v8385_v40 = vrot.slane %v468_v33, %v10431_v30  ;;  %v8391_v45 = vrot.slane %v468_v33, %v10430_v34  ;;  %v7741_v46 = vld [vmem:[%s8341_s23] sm:$0xff]  ;;  %v7752_v33 = vld [vmem:[%s8341_s23 + $0x78] sm:$0xff]  ;;  %v1358_v30 = vld [vmem:[%s10412_s1 + $0x30] sm:$0xff] }
  0xd7   : > { %978 = vmatpush1.bf16.msra.mxu0 %v6869_v49 }
  0xd8   : > { %979 = vmatprep.subr.bf16.mxu0 %v6870_v50  ;;  %v7742_v50 = vld [vmem:[%s8341_s23 + $0x18] sm:$0xff] }
  0xdb   : > { %980 = vmatpush1.bf16.msra.mxu0 %v6872_v51 }
  0xdc   : > { %981 = vmatprep.subr.bf16.mxu0 %v6873_v52  ;;  %v7743_v52 = vld [vmem:[%s8341_s23 + $0x10] sm:$0xff] }
  0xdf   : > { %982 = vmatpush1.bf16.msra.mxu0 %v6875_v53 }
  0xe0   : > { %983 = vmatprep.subr.bf16.mxu0 %v6876_v54  ;;  %v7744_v54 = vld [vmem:[%s8341_s23 + $0x38] sm:$0xff] }
  0xe3   : > { %984 = vmatpush1.bf16.msra.mxu0 %v6878_v55 }
  0xe4   : > { %985 = vmatprep.subr.bf16.mxu0 %v6879_v56 }
  0xe7   : > { %986 = vmatpush1.bf16.msra.mxu0 %v6881_v57 }
  0xe8   : > { %987 = vmatprep.subr.bf16.mxu0 %v6882_v58 }
  0xeb   : > { %988 = vmatpush1.bf16.msra.mxu0 %v6884_v59 }
  0xec   : > { %989 = vmatprep.subr.bf16.mxu0 %v6885_v60 }
  0xef   : > { %990 = vmatpush1.bf16.msra.mxu0 %v6887_v61 }
  0xf0   : > { %991 = vmatprep.subr.bf16.mxu0 %v6888_v62 }
  0xf3   : > { %992 = vmatpush1.bf16.msra.mxu0 %v6890_v63  ;;  %v7745_v63 = vld [vmem:[%s8341_s23 + $0x20] sm:$0xff] }
  0xf4   : > { %993 = vmatprep.subr.bf16.mxu0 %v6891_v0 }
  0xf7   : > { %994 = vmatpush1.bf16.msra.mxu0 %v6893_v1  ;;  %v7746_v1 = vld [vmem:[%s8341_s23 + $0x30] sm:$0xff] }
  0xf8   : > { %995 = vmatprep.subr.bf16.mxu0 %v6894_v2 }
  0xfb   : > { %996 = vmatpush1.bf16.msra.mxu0 %v6896_v3 }
  0xfc   : > { %997 = vmatprep.subr.bf16.mxu0 %v6897_v4 }
  0xff   : > { %998 = vmatpush1.bf16.msra.mxu0 %v6899_v5  ;;  %v6903_v5 = vld [vmem:[#allocation8 + $0x8] ss:$16 sps:$4 sm:$0xff]  }
 0x100   : > { %999 = vmatprep.subr.bf16.mxu0 %v6900_v6 }
 0x103   : > { %1000 = vmatpush1.bf16.msra.mxu0 %v6902_v7  ;;  %v7747_v7 = vld [vmem:[%s8341_s23 + $0x48] sm:$0xff] }
 0x104   : > { %1042 = vmatprep.subr.bf16.mxu0 %v6905_v8 }
 0x152   : > { %v487_v9 = vpop.xlane.xlu0 %486 }
 0x153   : > { %v510_v10 = vmul.f32 0.00390625, %v487_v9  ;;  %v6908_v9 = vld [vmem:[#allocation8 + $0x2c] ss:$16 sps:$4 sm:$0xff]  }
 0x154   : > { %v493_v11 = vpop.xlane.xlu1 %492 }
 0x155   : > { %v512_v12 = vmul.f32 0.00390625, %v493_v11  ;;  %v518_v13 = vadd.f32 1e-05, %v510_v10  ;;  %v7748_v11 = vld [vmem:[%s8341_s23 + $0x58] sm:$0xff] }
 0x156   : > { %v490_v14 = vpop.xlane.xlu0 %489 }
 0x157   : > { %v520_v15 = vadd.f32 1e-05, %v512_v12  ;;  %7387 = vrsqrt.f32 %v518_v13  ;;  %v511_v16 = vmul.f32 0.00390625, %v490_v14 }
 0x158   : > { %v496_v17 = vpop.xlane.xlu1 %495 }
 0x159   : > { %7389 = vrsqrt.f32 %v520_v15  ;;  %v513_v19 = vmul.f32 0.00390625, %v496_v17  ;;  %v519_v20 = vadd.f32 1e-05, %v511_v16  ;;  %v6906_v16 = vld [vmem:[#allocation8 + $0x28] ss:$16 sps:$4 sm:$0xff]  }
 0x15a   : > { %v499_v22 = vpop.xlane.xlu0 %498 }
 0x15b   : > { %v521_v21 = vadd.f32 1e-05, %v513_v19  ;;  %7391 = vrsqrt.f32 %v519_v20  ;;  %v514_v24 = vmul.f32 0.00390625, %v499_v22 }
 0x15c   : > { %v502_v23 = vpop.xlane.xlu1 %501 }
 0x15d   : > { %7393 = vrsqrt.f32 %v521_v21  ;;  %v515_v26 = vmul.f32 0.00390625, %v502_v23  ;;  %v522_v27 = vadd.f32 1e-05, %v514_v24  ;;  %v6911_v21 = vld [vmem:[#allocation8 + $0x4c] ss:$16 sps:$4 sm:$0xff]   ;;  %v7749_v23 = vld [vmem:[%s8341_s23 + $0x40] sm:$0xff] }
 0x15e   : > { %v505_v29 = vpop.xlane.xlu0 %504 }
 0x15f   : > { %v523_v28 = vadd.f32 1e-05, %v515_v26  ;;  %7395 = vrsqrt.f32 %v522_v27  ;;  %v516_v32 = vmul.f32 0.00390625, %v505_v29  ;;  %v7750_v26 = vld [vmem:[%s8341_s23 + $0x50] sm:$0xff] }
 0x160   : > { %v508_v31 = vpop.xlane.xlu1 %507 }
 0x161   : > { %7397 = vrsqrt.f32 %v523_v28  ;;  %v517_v35 = vmul.f32 0.00390625, %v508_v31  ;;  %v7388_v36 = vpop.eup %7387  ;;  %v524_v37 = vadd.f32 1e-05, %v516_v32  ;;  %v6909_v28 = vld [vmem:[#allocation8 + $0x48] ss:$16 sps:$4 sm:$0xff]  }
 0x162   : > { %v535_v44 = vmul.f32 %v7740_v43, %v7388_v36  ;;  %v534_v47 = vmul.f32 %v7741_v46, %v7388_v36  ;;  %v7751_v31 = vld [vmem:[%s8341_s23 + $0x68] sm:$0xff]  ;;  %v7753_v46 = vld [vmem:[%s8341_s23 + $0x60] sm:$0xff] }
 0x163   : > { %v7390_v38 = vpop.eup %7389  ;;  %v525_v39 = vadd.f32 1e-05, %v517_v35  ;;  %7399 = vrsqrt.f32 %v524_v37  ;;  %v6914_v36 = vld [vmem:[#allocation8 + $0x6c] ss:$16 sps:$4 sm:$0xff]  }
 0x164   : > { %v539_v42 = vmul.f32 %v7739_v41, %v7390_v38  ;;  %v562_v57 = vmul.f32 %v8391_v45, %v535_v44  ;;  %v561_v59 = vmul.f32 %v8385_v40, %v534_v47  ;;  %v538_v0 = vmul.f32 %v7745_v63, %v7390_v38  ;;  %v6917_v43 = vld [vmem:[#allocation8 + $0x8c] ss:$16 sps:$4 sm:$0xff]  }
 0x165   : > { %v7392_v48 = vpop.eup %7391  ;;  %7401 = vrsqrt.f32 %v525_v39  ;;  %v6912_v39 = vld [vmem:[#allocation8 + $0x68] ss:$16 sps:$4 sm:$0xff]   ;;  %v6935_v63 = vld [vmem:[#allocation8 + $0x14c] ss:$16 sps:$4 sm:$0xff]  }
 0x166   : > { %v537_v51 = vmul.f32 %v7742_v50, %v7392_v48  ;;  %v536_v53 = vmul.f32 %v7743_v52, %v7392_v48  ;;  %v566_v56 = vmul.f32 %v8391_v45, %v539_v42  ;;  %v565_v13 = vmul.f32 %v8385_v40, %v538_v0  ;;  %v7754_v48 = vld [vmem:[%s8341_s23 + $0x70] sm:$0xff]  ;;  %v6915_v50 = vld [vmem:[#allocation8 + $0x88] ss:$16 sps:$4 sm:$0xff]   ;;  %v6920_v52 = vld [vmem:[#allocation8 + $0xac] ss:$16 sps:$4 sm:$0xff]  }
 0x167   : > { %v7394_v49 = vpop.eup %7393  ;;  %v6933_v0 = vld [vmem:[#allocation8 + $0x148] ss:$16 sps:$4 sm:$0xff]  }
 0x168   : > { %v541_v55 = vmul.f32 %v7744_v54, %v7394_v49  ;;  %v564_v58 = vmul.f32 %v8391_v45, %v537_v51  ;;  %v563_v60 = vmul.f32 %v8385_v40, %v536_v53  ;;  %v540_v2 = vmul.f32 %v7746_v1, %v7394_v49  ;;  %v6938_v1 = vld [vmem:[#allocation8 + $0x16c] ss:$16 sps:$4 sm:$0xff]  }
 0x169   : > { %v7396_v61 = vpop.eup %7395 }
 0x16a   : > { %v568_v62 = vmul.f32 %v8391_v45, %v541_v55  ;;  %v8405_v4 = vpack.c.bf16 %v564_v58, %v562_v57  ;;  %v8407_v6 = vpack.c.bf16 %v563_v60, %v561_v59  ;;  %v543_v8 = vmul.f32 %v7747_v7, %v7396_v61  ;;  %v6923_v55 = vld [vmem:[#allocation8 + $0xcc] ss:$16 sps:$4 sm:$0xff]   ;;  %v6921_v57 = vld [vmem:[#allocation8 + $0xc8] ss:$16 sps:$4 sm:$0xff]  }
 0x16b   : > { %v7398_v3 = vpop.eup %7397  ;;  %v567_v14 = vmul.f32 %v8385_v40, %v540_v2  ;;  %v542_v24 = vmul.f32 %v7749_v23, %v7396_v61  ;;  %v6926_v58 = vld [vmem:[#allocation8 + $0xec] ss:$16 sps:$4 sm:$0xff]   ;;  %v6924_v59 = vld [vmem:[#allocation8 + $0xe8] ss:$16 sps:$4 sm:$0xff]  }
 0x16c   : > { %v8410_v10 = vpack.c.bf16 %v568_v62, %v566_v56  ;;  %v545_v12 = vmul.f32 %v7748_v11, %v7398_v3  ;;  %1001 = vmatprep.mubr.bf16.mxu0 %v8405_v4  ;;  %v570_v17 = vmul.f32 %v8391_v45, %v543_v8  ;;  %v544_v27 = vmul.f32 %v7750_v26, %v7398_v3  ;;  %v6929_v60 = vld [vmem:[#allocation8 + $0x10c] ss:$16 sps:$4 sm:$0xff]   ;;  %v6927_v61 = vld [vmem:[#allocation8 + $0x108] ss:$16 sps:$4 sm:$0xff]  }
 0x16d   : > { %1002 = vmatmul.mubr.bf16.vlgmr.msra.gmra.mrb[0].mxu0 %v8407_v6  ;;  %v7400_v15 = vpop.eup %7399  ;;  %v8420_v22 = vpack.c.bf16 %v567_v14, %v565_v13  ;;  %v569_v37 = vmul.f32 %v8385_v40, %v542_v24  ;;  %v6930_v62 = vld [vmem:[#allocation8 + $0x128] ss:$16 sps:$4 sm:$0xff]   ;;  %v6941_v3 = vld [vmem:[#allocation8 + $0x18c] ss:$16 sps:$4 sm:$0xff]  }
 0x16e   : > { %1043 = vmatpush1.bf16.msra.mxu0 %v6903_v5  ;;  %1011 = vmatprep.mubr.bf16.mxu0 %v8410_v10  ;;  %v572_v19 = vmul.f32 %v8391_v45, %v545_v12  ;;  %v547_v32 = vmul.f32 %v7751_v31, %v7400_v15  ;;  %v571_v38 = vmul.f32 %v8385_v40, %v544_v27  ;;  %v6936_v2 = vld [vmem:[#allocation8 + $0x168] ss:$16 sps:$4 sm:$0xff]   ;;  %v6944_v5 = vld [vmem:[#allocation8 + $0x1ac] ss:$16 sps:$4 sm:$0xff]  }
 0x16f   : > { %v7402_v20 = vpop.eup %7401  ;;  %1044 = vmatprep.subr.bf16.mxu0 %v6908_v9  ;;  %v546_v47 = vmul.f32 %v7753_v46, %v7400_v15  ;;  %v6942_v7 = vld [vmem:[#allocation8 + $0x1a8] ss:$16 sps:$4 sm:$0xff]   ;;  %v6947_v8 = vld [vmem:[#allocation8 + $0x1cc] ss:$16 sps:$4 sm:$0xff]  }
 0x170   : > { %v8424_v29 = vpack.c.bf16 %v572_v19, %v570_v17  ;;  %v549_v35 = vmul.f32 %v7752_v33, %v7402_v20  ;;  %v574_v41 = vmul.f32 %v8391_v45, %v547_v32  ;;  %v8434_v44 = vpack.c.bf16 %v571_v38, %v569_v37  ;;  %v6945_v9 = vld [vmem:[#allocation8 + $0x1c8] ss:$16 sps:$4 sm:$0xff]   ;;  %v6950_v11 = vld [vmem:[#allocation8 + $0x1ec] ss:$16 sps:$4 sm:$0xff]  }
 0x171   : > { %v548_v49 = vmul.f32 %v7754_v48, %v7402_v20  ;;  %v573_v53 = vmul.f32 %v8385_v40, %v546_v47  ;;  %v6948_v12 = vld [vmem:[#allocation8 + $0x1e8] ss:$16 sps:$4 sm:$0xff]  }
 0x172   : > { %1045 = vmatpush1.bf16.msra.mxu0 %v6906_v16  ;;  %v576_v42 = vmul.f32 %v8391_v45, %v549_v35  ;;  %v6918_v45 = vld [vmem:[#allocation8 + $0xa8] ss:$16 sps:$4 sm:$0xff]  }
 0x173   : > { %1046 = vmatprep.subr.bf16.mxu0 %v6911_v21  ;;  %v575_v54 = vmul.f32 %v8385_v40, %v548_v49  ;;  %v6932_v40 = vld [vmem:[#allocation8 + $0x12c] ss:$16 sps:$4 sm:$0xff]  }
 0x174   : > { %v584_v51 = vpack.c.bf16 %v576_v42, %v574_v41 }
 0x175   : > { %1012 = vmatmul.mubr.bf16.gmra.mrb[4].mxu0 %v8420_v22  ;;  %v583_v56 = vpack.c.bf16 %v575_v54, %v573_v53 }
 0x176   : > { %1047 = vmatpush1.bf16.msra.mxu0 %v6909_v28  ;;  %1021 = vmatprep.mubr.bf16.mxu0 %v8424_v29 }
 0x177   : > { %1048 = vmatprep.subr.bf16.mxu0 %v6914_v36 }
 0x17a   : > { %1049 = vmatpush1.bf16.msra.mxu0 %v6912_v39 }
 0x17b   : > { %1050 = vmatprep.subr.bf16.mxu0 %v6917_v43 }
 0x17d   : > { %1022 = vmatmul.mubr.bf16.gmra.mrb[8].mxu0 %v8434_v44 }
 0x17e   : > { %1051 = vmatpush1.bf16.msra.mxu0 %v6915_v50  ;;  %1031 = vmatprep.mubr.bf16.mxu0 %v584_v51 }
 0x17f   : > { %1052 = vmatprep.subr.bf16.mxu0 %v6920_v52 }
 0x182   : > { %1053 = vmatpush1.bf16.msra.mxu0 %v6918_v45 }
 0x183   : > { %1054 = vmatprep.subr.bf16.mxu0 %v6923_v55 }
 0x185   : > { %1032 = vmatmul.mubr.bf16.gmra.mrb[12].mxu0 %v583_v56 }
 0x186   : > { %1055 = vmatpush1.bf16.msra.mxu0 %v6921_v57  ;;  %1074 = vmatprep.mubr.bf16.mxu0 %v8405_v4  ;;  %v6939_v4 = vld [vmem:[#allocation8 + $0x188] ss:$16 sps:$4 sm:$0xff]  }
 0x187   : > { %1056 = vmatprep.subr.bf16.mxu0 %v6926_v58 }
 0x18a   : > { %1057 = vmatpush1.bf16.msra.mxu0 %v6924_v59 }
 0x18b   : > { %1058 = vmatprep.subr.bf16.mxu0 %v6929_v60 }
 0x18e   : > { %1059 = vmatpush1.bf16.msra.mxu0 %v6927_v61 }
 0x18f   : > { %1060 = vmatprep.subr.bf16.mxu0 %v6932_v40 }
 0x192   : > { %1061 = vmatpush1.bf16.msra.mxu0 %v6930_v62 }
 0x193   : > { %1062 = vmatprep.subr.bf16.mxu0 %v6935_v63 }
 0x196   : > { %1063 = vmatpush1.bf16.msra.mxu0 %v6933_v0 }
 0x197   : > { %1064 = vmatprep.subr.bf16.mxu0 %v6938_v1 }
 0x19a   : > { %1065 = vmatpush1.bf16.msra.mxu0 %v6936_v2 }
 0x19b   : > { %1066 = vmatprep.subr.bf16.mxu0 %v6941_v3 }
 0x19e   : > { %1067 = vmatpush1.bf16.msra.mxu0 %v6939_v4 }
 0x19f   : > { %1068 = vmatprep.subr.bf16.mxu0 %v6944_v5 }
 0x1a2   : > { %1069 = vmatpush1.bf16.msra.mxu0 %v6942_v7 }
 0x1a3   : > { %1070 = vmatprep.subr.bf16.mxu0 %v6947_v8 }
 0x1a6   : > { %1071 = vmatpush1.bf16.msra.mxu0 %v6945_v9 }
 0x1a7   : > { %1072 = vmatprep.subr.bf16.mxu0 %v6950_v11 }
 0x1aa   : > { %1073 = vmatpush1.bf16.msra.mxu0 %v6948_v12 }
 0x1ad   : > { %1075 = vmatmul.mubr.bf16.vlgmr.msra.gmra.mrb[16].mxu0 %v8407_v6 }
 0x1ae   : > { %1084 = vmatprep.mubr.bf16.mxu0 %v8410_v10 }
 0x1b5   : > { %1085 = vmatmul.mubr.bf16.gmra.mrb[20].mxu0 %v8420_v22 }
 0x1b6   : > { %1094 = vmatprep.mubr.bf16.mxu0 %v8424_v29 }
 0x1bd   : > { %1095 = vmatmul.mubr.bf16.gmra.mrb[24].mxu0 %v8434_v44 }
 0x1be   : > { %1104 = vmatprep.mubr.bf16.mxu0 %v584_v51 }
 0x1c5   : > { %1105 = vmatmul.mubr.bf16.gmra.mrb[28].mxu0 %v583_v56 }
 0x240   : > { %v8447_v13 = vpop.f32.mrb[0].mxu0 }
 0x241   : > { %1231 = vrot.lane.b32.xlu0 %v8447_v13, %s8035_s27  ;;  %v8451_v14 = vpop.f32.mrb[1].mxu0 }
 0x242   : > { %v8453_v15 = vpop.f32.mrb[2].mxu0 }
 0x243   : > { %1233 = vrot.lane.b32.xlu1 %v8453_v15, %s8035_s27  ;;  %v8457_v6 = vpop.f32.mrb[3].mxu0 }
 0x245   : > { %1158 = vrot.lane.b32.xlu0 %v8447_v13, %s8036_s24 }
 0x247   : > { %1160 = vrot.lane.b32.xlu1 %v8453_v15, %s8036_s24 }
 0x248   : > { %v8463_v10 = vpop.f32.mrb[4].mxu0 }
 0x249   : > { %1174 = vrot.lane.b32.xlu0 %v8451_v14, %s8036_s24  ;;  %v8467_v16 = vpop.f32.mrb[5].mxu0 }
 0x24a   : > { %v8469_v17 = vpop.f32.mrb[6].mxu0 }
 0x24b   : > { %1176 = vrot.lane.b32.xlu1 %v8457_v6, %s8036_s24  ;;  %v8473_v19 = vpop.f32.mrb[7].mxu0 }
 0x24d   : > { %1247 = vrot.lane.b32.xlu0 %v8451_v14, %s8035_s27 }
 0x24f   : > { %1249 = vrot.lane.b32.xlu1 %v8457_v6, %s8035_s27 }
 0x250   : > { %v8479_v20 = vpop.f32.mrb[8].mxu0 }
 0x251   : > { %1235 = vrot.lane.b32.xlu0 %v8463_v10, %s8035_s27  ;;  %v8483_v21 = vpop.f32.mrb[9].mxu0 }
 0x252   : > { %v8485_v22 = vpop.f32.mrb[10].mxu0 }
 0x253   : > { %1237 = vrot.lane.b32.xlu1 %v8469_v17, %s8035_s27  ;;  %v8489_v23 = vpop.f32.mrb[11].mxu0 }
 0x255   : > { %1162 = vrot.lane.b32.xlu0 %v8463_v10, %s8036_s24 }
 0x257   : > { %1164 = vrot.lane.b32.xlu1 %v8469_v17, %s8036_s24 }
 0x258   : > { %v8495_v24 = vpop.f32.mrb[12].mxu0 }
 0x259   : > { %1178 = vrot.lane.b32.xlu0 %v8467_v16, %s8036_s24  ;;  %v8499_v26 = vpop.f32.mrb[13].mxu0 }
 0x25a   : > { %v8501_v27 = vpop.f32.mrb[14].mxu0 }
 0x25b   : > { %1180 = vrot.lane.b32.xlu1 %v8473_v19, %s8036_s24  ;;  %v8505_v28 = vpop.f32.mrb[15].mxu0 }
 0x25d   : > { %1251 = vrot.lane.b32.xlu0 %v8467_v16, %s8035_s27 }
 0x25f   : > { %1253 = vrot.lane.b32.xlu1 %v8473_v19, %s8035_s27 }
 0x261   : > { %1239 = vrot.lane.b32.xlu0 %v8479_v20, %s8035_s27 }
 0x263   : > { %1241 = vrot.lane.b32.xlu1 %v8485_v22, %s8035_s27 }
 0x265   : > { %1166 = vrot.lane.b32.xlu0 %v8479_v20, %s8036_s24 }
 0x267   : > { %1168 = vrot.lane.b32.xlu1 %v8485_v22, %s8036_s24 }
 0x269   : > { %1182 = vrot.lane.b32.xlu0 %v8483_v21, %s8036_s24 }
 0x26b   : > { %1184 = vrot.lane.b32.xlu1 %v8489_v23, %s8036_s24 }
 0x26d   : > { %1255 = vrot.lane.b32.xlu0 %v8483_v21, %s8035_s27 }
 0x26f   : > { %1257 = vrot.lane.b32.xlu1 %v8489_v23, %s8035_s27 }
 0x271   : > { %1243 = vrot.lane.b32.xlu0 %v8495_v24, %s8035_s27 }
 0x273   : > { %1245 = vrot.lane.b32.xlu1 %v8501_v27, %s8035_s27 }
 0x275   : > { %1170 = vrot.lane.b32.xlu0 %v8495_v24, %s8036_s24 }
 0x277   : > { %1172 = vrot.lane.b32.xlu1 %v8501_v27, %s8036_s24 }
 0x279   : > { %1259 = vrot.lane.b32.xlu0 %v8499_v26, %s8035_s27 }
 0x27b   : > { %1261 = vrot.lane.b32.xlu1 %v8505_v28, %s8035_s27 }
 0x27d   : > { %1186 = vrot.lane.b32.xlu0 %v8499_v26, %s8036_s24 }
 0x27f   : > { %1188 = vrot.lane.b32.xlu1 %v8505_v28, %s8036_s24 }
 0x280   : > { %v8543_v29 = vpop.f32.mrb[16].mxu0 }
 0x281   : > { %v1078_v31 = vpop.f32.mrb[17].mxu0  ;;  %1190 = vrot.lane.b32.xlu0 %v8543_v29, %s8036_s24 }
 0x282   : > { %v8547_v32 = vpop.f32.mrb[18].mxu0 }
 0x283   : > { %v1082_v33 = vpop.f32.mrb[19].mxu0  ;;  %1263 = vrot.lane.b32.xlu1 %v8543_v29, %s8035_s27 }
 0x284   : > { %v8551_v35 = vpack.c.bf16 %v1082_v33, %v1078_v31 }
 0x286   : > { %10506 = vst [vmem:[#allocation21_spill] sm:$0xff] %v8551_v35  ;;  %6633 = vmatprep.subr.bf16.mxu1 %v8551_v35 }
 0x287   : > { %6634 = vmatpush3.bf16.msra.mxu1 %v8551_v35  ;;  %1265 = vrot.lane.b32.xlu1 %v8547_v32, %s8035_s27  ;;  %v1364_v35 = vld [vmem:[%s10412_s1 + $0x60] sm:$0xff] }
 0x288   : > { %v8557_v36 = vpop.f32.mrb[20].mxu0 }
 0x289   : > { %1267 = vrot.lane.b32.xlu0 %v8557_v36, %s8035_s27  ;;  %v1088_v37 = vpop.f32.mrb[21].mxu0 }
 0x28a   : > { %v8561_v38 = vpop.f32.mrb[22].mxu0 }
 0x28b   : > { %v1092_v39 = vpop.f32.mrb[23].mxu0  ;;  %1192 = vrot.lane.b32.xlu1 %v8547_v32, %s8036_s24 }
 0x28c   : > { %v8565_v41 = vpack.c.bf16 %v1092_v39, %v1088_v37  ;;  %v8660_v37 = vand.u32 127, %v551_v18  ;;  %v1356_v18 = vld [vmem:[%s10412_s1 + $0x20] sm:$0xff] }
 0x28d   : > { %1194 = vrot.lane.b32.xlu0 %v8557_v36, %s8036_s24 }
 0x28e   : > { %10507 = vst [vmem:[#allocation22_spill] sm:$0xff] %v8565_v41  ;;  %6635 = vmatprep.subr.bf16.mxu1 %v8565_v41  ;;  %v1118_v34 = vadd.s32 256, %v8660_v37  ;;  %vm1206_vm0 = vcmp.lt.s32.totalorder %v8660_v37, 32  ;;  %vm1279_vm1 = vcmp.lt.s32.totalorder %v8660_v37, 96 }
 0x28f   : > { %6636 = vmatpush3.bf16.msra.mxu1 %v8565_v41  ;;  %1269 = vrot.lane.b32.xlu1 %v8561_v38, %s8035_s27 }
 0x290   : > { %v8573_v42 = vpop.f32.mrb[24].mxu0 }
 0x291   : > { %1271 = vrot.lane.b32.xlu0 %v8573_v42, %s8035_s27  ;;  %v1098_v43 = vpop.f32.mrb[25].mxu0 }
 0x292   : > { %v8577_v44 = vpop.f32.mrb[26].mxu0 }
 0x293   : > { %v1102_v46 = vpop.f32.mrb[27].mxu0  ;;  %1196 = vrot.lane.b32.xlu1 %v8561_v38, %s8036_s24 }
 0x294   : > { %v8581_v47 = vpack.c.bf16 %v1102_v46, %v1098_v43  ;;  %v1352_v43 = vld [vmem:[%s10412_s1] sm:$0xff]  ;;  %v1353_v46 = vld [vmem:[%s10412_s1 + $0x8] sm:$0xff] }
 0x295   : > { %1198 = vrot.lane.b32.xlu0 %v8573_v42, %s8036_s24 }
 0x296   : > { %10508 = vst [vmem:[#allocation23_spill] sm:$0xff] %v8581_v47  ;;  %6637 = vmatprep.subr.bf16.mxu1 %v8581_v47 }
 0x297   : > { %6638 = vmatpush3.bf16.msra.mxu1 %v8581_v47  ;;  %1273 = vrot.lane.b32.xlu1 %v8577_v44, %s8035_s27  ;;  %v1362_v47 = vld [vmem:[%s10412_s1 + $0x50] sm:$0xff] }
 0x298   : > { %v8589_v48 = vpop.f32.mrb[28].mxu0 }
 0x299   : > { %1275 = vrot.lane.b32.xlu0 %v8589_v48, %s8035_s27  ;;  %v1108_v49 = vpop.f32.mrb[29].mxu0 }
 0x29a   : > { %v8593_v50 = vpop.f32.mrb[30].mxu0 }
 0x29b   : > { %v1112_v51 = vpop.f32.mrb[31].mxu0  ;;  %1200 = vrot.lane.b32.xlu1 %v8577_v44, %s8036_s24 }
 0x29c   : > { %v8597_v52 = vpack.c.bf16 %v1112_v51, %v1108_v49  ;;  %v1355_v49 = vld [vmem:[%s10412_s1 + $0x18] sm:$0xff]  ;;  %v1117_v51 = vadd.s32 128, %v8660_v37 }
 0x29d   : > { %1202 = vrot.lane.b32.xlu0 %v8589_v48, %s8036_s24 }
 0x29e   : > { %10509 = vst [vmem:[#allocation24_spill] sm:$0xff] %v8597_v52  ;;  %6639 = vmatprep.subr.bf16.mxu1 %v8597_v52 }
 0x29f   : > { %6640 = vmatpush3.bf16.msra.mxu1 %v8597_v52  ;;  %1277 = vrot.lane.b32.xlu1 %v8593_v50, %s8035_s27  ;;  %v1361_v52 = vld [vmem:[%s10412_s1 + $0x48] sm:$0xff]  ;;  %s8037_s27 = smov 64  }
 0x2a3   : > { %1204 = vrot.lane.b32.xlu1 %v8593_v50, %s8036_s24 }
 0x2b3   : > { %v8607_v53 = vpop.permute.xlu0 %1231 }
 0x2b5   : > { %v8609_v54 = vpop.permute.xlu1 %1233 }
 0x2b7   : > { %v8611_v45 = vpop.permute.xlu0 %1158 }
 0x2b9   : > { %v8613_v55 = vpop.permute.xlu1 %1160 }
 0x2bb   : > { %v8615_v56 = vpop.permute.xlu0 %1174 }
 0x2bd   : > { %v8617_v57 = vpop.permute.xlu1 %1176 }
 0x2bf   : > { %v8619_v58 = vpop.permute.xlu0 %1247 }
 0x2c1   : > { %v8621_v59 = vpop.permute.xlu1 %1249 }
 0x2c3   : > { %v8623_v60 = vpop.permute.xlu0 %1235 }
 0x2c5   : > { %v8625_v61 = vpop.permute.xlu1 %1237 }
 0x2c7   : > { %v8627_v40 = vpop.permute.xlu0 %1162 }
 0x2c9   : > { %v8629_v62 = vpop.permute.xlu1 %1164 }
 0x2cb   : > { %v8631_v63 = vpop.permute.xlu0 %1178 }
 0x2cd   : > { %v8633_v0 = vpop.permute.xlu1 %1180 }
 0x2cf   : > { %v8635_v1 = vpop.permute.xlu0 %1251 }
 0x2d1   : > { %v8637_v2 = vpop.permute.xlu1 %1253 }
 0x2d3   : > { %v8639_v3 = vpop.permute.xlu0 %1239 }
 0x2d5   : > { %v8641_v4 = vpop.permute.xlu1 %1241 }
 0x2d6   : > { %10510 = vst [vmem:[#allocation25_spill] sm:$0xff] %v8641_v4 }
 0x2d7   : > { %v8643_v5 = vpop.permute.xlu0 %1166 }
 0x2d8   : > { %10511 = vst [vmem:[#allocation26_spill] sm:$0xff] %v8643_v5  ;;  %v1137_v5 = vand.u32 63, %v1118_v34  ;;  %v8745_v34 = vmul.f32 %v1362_v47, %v8473_v19 }
 0x2d9   : > { %v8645_v7 = vpop.permute.xlu1 %1168 }
 0x2da   : > { %10512 = vst [vmem:[#allocation27_spill] sm:$0xff] %v8645_v7  ;;  %v8699_v7 = vmul.f32 %v1353_v46, %v8451_v14  ;;  %v8715_v14 = vmul.f32 %v1355_v49, %v8453_v15  ;;  %v1371_v46 = vld [vmem:[%s10412_s1 + $0x98] sm:$0xff]  ;;  %v8731_v15 = vmul.f32 %v1358_v30, %v8463_v10  ;;  %v8734_v49 = vmul.f32 %v1359_v25, %v8467_v16  ;;  %v1354_v10 = vld [vmem:[%s10412_s1 + $0x10] sm:$0xff]  ;;  %v1357_v16 = vld [vmem:[%s10412_s1 + $0x28] sm:$0xff] }
 0x2db   : > { %v8647_v8 = vpop.permute.xlu0 %1182  ;;  %10524 = vst [vmem:[#allocation39_spill] sm:$0xff] %v8745_v34  ;;  %vm8805_vm4 = vcmp.lt.s32.totalorder %v1137_v5, 32 }
 0x2dc   : > { %10513 = vst [vmem:[#allocation28_spill] sm:$0xff] %v8647_v8  ;;  %10520 = vst [vmem:[#allocation35_spill] sm:$0xff] %v8699_v7  ;;  %v1373_v7 = vld [vmem:[%s10412_s1 + $0xa8] sm:$0xff]  ;;  %v1374_v8 = vld [vmem:[%s10412_s1 + $0xb0] sm:$0xff] }
 0x2dd   : > { %v8649_v9 = vpop.permute.xlu1 %1184  ;;  %10522 = vst [vmem:[#allocation37_spill] sm:$0xff] %v8715_v14  ;;  %v8737_v14 = vmul.f32 %v1361_v52, %v8469_v17  ;;  %v1360_v17 = vld [vmem:[%s10412_s1 + $0x40] sm:$0xff] }
 0x2de   : > { %10514 = vst [vmem:[#allocation29_spill] sm:$0xff] %v8649_v9  ;;  %v1367_v9 = vld [vmem:[%s10412_s1 + $0x78] sm:$0xff] }
 0x2df   : > { %v8651_v11 = vpop.permute.xlu0 %1255  ;;  %v8754_v25 = vmul.f32 %v1367_v9, %v8485_v22  ;;  %v8775_v22 = vmul.f32 %v1373_v7, %v8501_v27  ;;  %v1375_v27 = vld [vmem:[%s10412_s1 + $0xb8] sm:$0xff]  ;;  %v8813_v9 = vmul.f32 %v1357_v16, %v8547_v32  ;;  %v8840_v32 = vsel %vm1279_vm1, %v8623_v60, %v8635_v1 }
 0x2e0   : > { %v1217_v16 = vsel %vm1206_vm0, %v8627_v40, %v8631_v63 }
 0x2e1   : > { %v8653_v12 = vpop.permute.xlu1 %1257  ;;  %10526 = vst [vmem:[#allocation41_spill] sm:$0xff] %v8754_v25  ;;  %10530 = vst [vmem:[#allocation45_spill] sm:$0xff] %v8775_v22  ;;  %v1403_v25 = vld [vmem:[#allocation6 + $0x18] sm:$0xff] }
 0x2e3   : > { %v8655_v31 = vpop.permute.xlu0 %1243 }
 0x2e4   : > { %10515 = vst [vmem:[#allocation30_spill] sm:$0xff] %v8655_v31  ;;  %v1130_v31 = vand.u32 63, %v1117_v51 }
 0x2e5   : > { %v8657_v33 = vpop.permute.xlu1 %1245 }
 0x2e6   : > { %10516 = vst [vmem:[#allocation31_spill] sm:$0xff] %v8657_v33  ;;  %v1368_v33 = vld [vmem:[%s10412_s1 + $0x80] sm:$0xff]  ;;  %vm8801_vm3 = vcmp.lt.s32.totalorder %v1130_v31, 32  ;;  %v1288_v31 = vsel %vm1279_vm1, %v8607_v53, %v8619_v58 }
 0x2e7   : > { %v8662_v39 = vpop.permute.xlu0 %1170  ;;  %v8766_v19 = vmul.f32 %v1368_v33, %v8489_v23  ;;  %v8786_v23 = vmul.f32 %v1374_v8, %v8505_v28  ;;  %v8810_v8 = vmul.f32 %v1354_v10, %v8543_v29  ;;  %v8816_v33 = vmul.f32 %v1360_v17, %v8557_v36 }
 0x2e8   : > { %10517 = vst [vmem:[#allocation32_spill] sm:$0xff] %v8662_v39  ;;  %v8696_v39 = vmul.f32 %v1352_v43, %v8447_v13  ;;  %v1370_v43 = vld [vmem:[%s10412_s1 + $0x90] sm:$0xff]  ;;  %v8834_v29 = vsel %vm1279_vm1, %v8609_v54, %v8621_v59  ;;  %v1304_v10 = vsub.f32 0.0, %v1288_v31  ;;  %v8877_v17 = vsel %vm1206_vm0, %v8629_v62, %v8633_v0  ;;  %v10584_v28 = vld [vmem:[#allocation45_spill] sm:$0xff] }
 0x2e9   : > { %v8684_v41 = vpop.permute.xlu1 %1172  ;;  %10527 = vst [vmem:[#allocation42_spill] sm:$0xff] %v8766_v19  ;;  %10531 = vst [vmem:[#allocation46_spill] sm:$0xff] %v8786_v23  ;;  %v10546_v23 = vld [vmem:[#allocation26_spill] sm:$0xff] }
 0x2ea   : > { %10518 = vst [vmem:[#allocation33_spill] sm:$0xff] %v8684_v41  ;;  %10519 = vst [vmem:[#allocation34_spill] sm:$0xff] %v8696_v39  ;;  %v1365_v41 = vld [vmem:[%s10412_s1 + $0x68] sm:$0xff]  ;;  %v1123_v39 = vand.u32 63, %v8660_v37 }
 0x2eb   : > { %v8712_v13 = vpop.permute.xlu0 %1259  ;;  %v8751_v30 = vmul.f32 %v1365_v41, %v8483_v21  ;;  %v8772_v21 = vmul.f32 %v1371_v46, %v8499_v26  ;;  %v1366_v41 = vld [vmem:[%s10412_s1 + $0x70] sm:$0xff]  ;;  %v1372_v26 = vld [vmem:[%s10412_s1 + $0xa0] sm:$0xff]  ;;  %v1216_v46 = vsel %vm1206_vm0, %v8613_v55, %v8617_v57 }
 0x2ec   : > { %10521 = vst [vmem:[#allocation36_spill] sm:$0xff] %v8712_v13  ;;  %v8728_v13 = vmul.f32 %v1356_v18, %v8457_v6  ;;  %v8748_v6 = vmul.f32 %v1364_v35, %v8479_v20  ;;  %v8769_v20 = vmul.f32 %v1370_v43, %v8495_v24  ;;  %v1363_v35 = vld [vmem:[%s10412_s1 + $0x58] sm:$0xff]  ;;  %v1369_v24 = vld [vmem:[%s10412_s1 + $0x88] sm:$0xff]  ;;  %vm8797_vm2 = vcmp.lt.s32.totalorder %v1123_v39, 32 }
 0x2ed   : > { %v8742_v4 = vpop.permute.xlu1 %1261  ;;  %10525 = vst [vmem:[#allocation40_spill] sm:$0xff] %v8751_v30  ;;  %10529 = vst [vmem:[#allocation44_spill] sm:$0xff] %v8772_v21  ;;  %v8825_v5 = vmul.f32 %v1363_v35, %v8561_v38  ;;  %v8828_v51 = vmul.f32 %v1366_v41, %v8573_v42  ;;  %v8843_v36 = vmul.f32 %v1369_v24, %v8577_v44  ;;  %v10543_v24 = vld [vmem:[#allocation25_spill] sm:$0xff]  ;;  %v1400_v35 = vld [vmem:[#allocation6] sm:$0xff] }
 0x2ee   : > { %10523 = vst [vmem:[#allocation38_spill] sm:$0xff] %v8742_v4  ;;  %10528 = vst [vmem:[#allocation43_spill] sm:$0xff] %v8769_v20  ;;  %v8846_v38 = vmul.f32 %v1372_v26, %v8589_v48  ;;  %v8849_v42 = vmul.f32 %v1375_v27, %v8593_v50  ;;  %v1215_v18 = vsel %vm1206_vm0, %v8611_v45, %v8615_v56  ;;  %v1307_v50 = vsub.f32 0.0, %v8834_v29  ;;  %v10545_v20 = vld [vmem:[#allocation28_spill] sm:$0xff] }
 0x2ef   : > { %v8783_v47 = vpop.permute.xlu0 %1186  ;;  %10539 = vst [vmem:[#allocation48_spill] sm:$0xff] %v8828_v51  ;;  %10540 = vst [vmem:[#allocation49_spill] sm:$0xff] %v8843_v36  ;;  %v8863_v44 = vsel %vm1279_vm1, %v8625_v61, %v8637_v2  ;;  %v8890_v26 = vsel %vm1279_vm1, %v10543_v24, %v8653_v12  ;;  %v8905_v21 = vsel %vm1206_vm0, %v10546_v23, %v10545_v20  ;;  %v1405_v36 = vld [vmem:[#allocation6 + $0x28] sm:$0xff] }
 0x2f0   : > { %10541 = vst [vmem:[#allocation50_spill] sm:$0xff] %v8846_v38  ;;  %10542 = vst [vmem:[#allocation51_spill] sm:$0xff] %v8849_v42 }
 0x2f1   : > { %v8822_v39 = vpop.permute.xlu1 %1188  ;;  %10544 = vst [vmem:[#allocation25_spill] sm:$0xff] %v8890_v26 }
 0x2f2   : > { %10538 = vst [vmem:[#allocation47_spill] sm:$0xff] %v8822_v39 }
 0x2f3   : > { %v1191_v43 = vpop.permute.xlu0 %1190  ;;  %v10547_v19 = vld [vmem:[#allocation36_spill] sm:$0xff] }
 0x2f4   : > { %v1223_v48 = vsel %vm1206_vm0, %v1191_v43, %v8611_v45  ;;  %v8884_v45 = vsel %vm1279_vm1, %v8639_v3, %v8651_v11 }
 0x2f5   : > { %v1264_v41 = vpop.permute.xlu1 %1263  ;;  %v1328_v42 = vsel %vm8797_vm2, %v1304_v10, %v1223_v48  ;;  %v1207_v10 = vsel %vm1206_vm0, %v8615_v56, %v1191_v43  ;;  %v1402_v48 = vld [vmem:[#allocation6 + $0x10] sm:$0xff]  ;;  %v10583_v52 = vld [vmem:[#allocation43_spill] sm:$0xff] }
 0x2f6   : > { %v1280_v27 = vsel %vm1279_vm1, %v8619_v58, %v1264_v41  ;;  %v1296_v31 = vsel %vm1279_vm1, %v1264_v41, %v8607_v53  ;;  %v10548_v58 = vld [vmem:[#allocation30_spill] sm:$0xff]  ;;  %v10550_v53 = vld [vmem:[#allocation31_spill] sm:$0xff] }
 0x2f7   : > { %v1305_v38 = vsub.f32 0.0, %v1280_v27  ;;  %v1306_v22 = vsub.f32 0.0, %v1296_v31  ;;  %v8911_v30 = vsel %vm1279_vm1, %v10548_v58, %v10547_v19  ;;  %v8917_v41 = vsel %vm1279_vm1, %v10550_v53, %v8742_v4  ;;  %v10552_v27 = vld [vmem:[#allocation29_spill] sm:$0xff]  ;;  %v10553_v31 = vld [vmem:[#allocation27_spill] sm:$0xff] }
 0x2f8   : > { %10549 = vst [vmem:[#allocation28_spill] sm:$0xff] %v8911_v30  ;;  %10551 = vst [vmem:[#allocation26_spill] sm:$0xff] %v8917_v41  ;;  %v8926_v29 = vsel %vm1206_vm0, %v10553_v31, %v10552_v27  ;;  %v1424_v4 = vmul.f32 %v1400_v35, %v1328_v42  ;;  %v1401_v31 = vld [vmem:[#allocation6 + $0x8] sm:$0xff]  ;;  %v1404_v35 = vld [vmem:[#allocation6 + $0x20] sm:$0xff] }
 0x2f9   : > { %v1330_v51 = vsel %vm8805_vm4, %v1306_v22, %v1207_v10  ;;  %v1266_v53 = vpop.permute.xlu1 %1265  ;;  %v1329_v34 = vsel %vm8801_vm3, %v1305_v38, %v1215_v18  ;;  %v10554_v38 = vld [vmem:[#allocation32_spill] sm:$0xff]  ;;  %v10557_v30 = vld [vmem:[#allocation34_spill] sm:$0xff] }
 0x2fa   : > { %v1281_v56 = vsel %vm1279_vm1, %v8621_v59, %v1266_v53  ;;  %v1297_v43 = vsel %vm1279_vm1, %v1266_v53, %v8609_v54  ;;  %v1426_v42 = vmul.f32 %v1402_v48, %v1330_v51  ;;  %v8946_v18 = vsel %vm1206_vm0, %v10554_v38, %v8783_v47  ;;  %v10556_v59 = vld [vmem:[#allocation33_spill] sm:$0xff] }
 0x2fb   : > { %v1308_v26 = vsub.f32 0.0, %v1281_v56  ;;  %v1268_v22 = vpop.permute.xlu0 %1267  ;;  %10555 = vst [vmem:[#allocation36_spill] sm:$0xff] %v8946_v18  ;;  %v8952_v54 = vsel %vm1206_vm0, %v10556_v59, %v8822_v39  ;;  %v1309_v10 = vsub.f32 0.0, %v1297_v43  ;;  %v1425_v18 = vmul.f32 %v1401_v31, %v1329_v34 }
 0x2fc   : > { %v1282_v53 = vsel %vm1279_vm1, %v8635_v1, %v1268_v22  ;;  %v1298_v51 = vsel %vm1279_vm1, %v1268_v22, %v8623_v60  ;;  %v1448_v59 = vadd.f32 %v1424_v4, %v10557_v30  ;;  %v1408_v22 = vld [vmem:[#allocation6 + $0x40] sm:$0xff]  ;;  %v1450_v4 = vadd.f32 %v1426_v42, %v8810_v8  ;;  %v1407_v8 = vld [vmem:[#allocation6 + $0x38] sm:$0xff] }
 0x2fd   : > { %v1332_v48 = vsel %vm8801_vm3, %v1308_v26, %v1216_v46  ;;  %v1311_v56 = vsub.f32 0.0, %v1282_v53  ;;  %v1193_v41 = vpop.permute.xlu1 %1192  ;;  %v1312_v43 = vsub.f32 0.0, %v1298_v51  ;;  %v1406_v51 = vld [vmem:[#allocation6 + $0x30] sm:$0xff] }
 0x2fe   : > { %v1208_v39 = vsel %vm1206_vm0, %v8617_v57, %v1193_v41  ;;  %v1224_v1 = vsel %vm1206_vm0, %v1193_v41, %v8613_v55  ;;  %v1428_v60 = vmul.f32 %v1404_v35, %v1332_v48  ;;  %v10558_v35 = vld [vmem:[#allocation35_spill] sm:$0xff] }
 0x2ff   : > { %v1331_v46 = vsel %vm8797_vm2, %v1307_v50, %v1224_v1  ;;  %v1333_v26 = vsel %vm8805_vm4, %v1309_v10, %v1208_v39  ;;  %v1195_v34 = vpop.permute.xlu0 %1194  ;;  %v1335_v50 = vsel %vm8801_vm3, %v1311_v56, %v1217_v16  ;;  %v1449_v53 = vadd.f32 %v1425_v18, %v10558_v35 }
 0x300   : > { %v1427_v30 = vmul.f32 %v1403_v25, %v1331_v46  ;;  %v1429_v31 = vmul.f32 %v1405_v36, %v1333_v26  ;;  %v1209_v57 = vsel %vm1206_vm0, %v8631_v63, %v1195_v34  ;;  %v1225_v55 = vsel %vm1206_vm0, %v1195_v34, %v8627_v40  ;;  %v10559_v36 = vld [vmem:[#allocation37_spill] sm:$0xff]  ;;  %v1411_v34 = vld [vmem:[#allocation6 + $0x58] sm:$0xff] }
 0x301   : > { %v1336_v39 = vsel %vm8805_vm4, %v1312_v43, %v1209_v57  ;;  %v1270_v41 = vpop.permute.xlu1 %1269  ;;  %v1452_v25 = vadd.f32 %v1428_v60, %v8728_v13  ;;  %v10560_v63 = vsub.f32 0.0, %v8840_v32 }
 0x302   : > { %v1451_v42 = vadd.f32 %v1427_v30, %v10559_v36  ;;  %v1432_v10 = vmul.f32 %v1408_v22, %v1336_v39  ;;  %v1283_v16 = vsel %vm1279_vm1, %v8637_v2, %v1270_v41  ;;  %v1299_v18 = vsel %vm1279_vm1, %v1270_v41, %v8625_v61  ;;  %v1409_v61 = vld [vmem:[#allocation6 + $0x48] sm:$0xff]  ;;  %v1410_v39 = vld [vmem:[#allocation6 + $0x50] sm:$0xff] }
 0x303   : > { %v1334_v40 = vsel %vm8797_vm2, %v10560_v63, %v1225_v55  ;;  %v1314_v48 = vsub.f32 0.0, %v1283_v16  ;;  %v1272_v13 = vpop.permute.xlu0 %1271  ;;  %v1453_v56 = vadd.f32 %v1429_v31, %v8813_v9  ;;  %v8998_v1 = vpack.c.bf16 %v1452_v25, %v1449_v53 }
 0x304   : > { %v1284_v32 = vsel %vm1279_vm1, %v8651_v11, %v1272_v13  ;;  %v1300_v60 = vsel %vm1279_vm1, %v1272_v13, %v8639_v3  ;;  %v1472_v43 = vpack.c.bf16 %v1451_v42, %v1448_v59  ;;  %v1431_v2 = vmul.f32 %v1407_v8, %v1335_v50  ;;  %v1414_v8 = vld [vmem:[#allocation6 + $0x70] sm:$0xff] }
 0x305   : > { %v1430_v46 = vmul.f32 %v1406_v51, %v1334_v40  ;;  %v1315_v26 = vsub.f32 0.0, %v1299_v18  ;;  %v1317_v22 = vsub.f32 0.0, %v1284_v32  ;;  %v1197_v30 = vpop.permute.xlu1 %1196  ;;  %v1474_v57 = vpack.c.bf16 %v1453_v56, %v1450_v4 }
 0x306   : > { %v1338_v9 = vsel %vm8801_vm3, %v1314_v48, %v8877_v17  ;;  %v1318_v31 = vsub.f32 0.0, %v1300_v60  ;;  %v1210_v11 = vsel %vm1206_vm0, %v8633_v0, %v1197_v30  ;;  %v1226_v3 = vsel %vm1206_vm0, %v1197_v30, %v8629_v62  ;;  %6617 = vmatprep.mubr.msk.bf16.mxu0 %vm1516_vm5, %v1472_v43  ;;  %v1412_v0 = vld [vmem:[#allocation6 + $0x60] sm:$0xff]  ;;  %v1417_v60 = vld [vmem:[#allocation6 + $0x88] sm:$0xff] }
 0x307   : > { %v10561_v59 = vsub.f32 0.0, %v8863_v44  ;;  %v1339_v55 = vsel %vm8805_vm4, %v1315_v26, %v1210_v11  ;;  %2036 = vrot.lane.b32.xlu0 %v1474_v57, %s8037_s27  ;;  %6737 = vmatprep.subr.msk.bf16.mxu0 %vm1516_vm5, %v1474_v57  ;;  %v1199_v17 = vpop.permute.xlu0 %1198  ;;  %v1542_v50 = vsel %vm1516_vm5, %v1474_v57, 0  ;;  %v1456_v62 = vadd.f32 %v1432_v10, %v8816_v33  ;;  %v10564_v26 = vld [vmem:[#allocation39_spill] sm:$0xff] }
 0x308   : > { %v1435_v44 = vmul.f32 %v1411_v34, %v1339_v55  ;;  %v1211_v35 = vsel %vm1206_vm0, %v10545_v20, %v1199_v17  ;;  %v1227_v53 = vsel %vm1206_vm0, %v1199_v17, %v10546_v23  ;;  %6610 = vmatpush3.bf16.xpose.msra.mxu0 %v1542_v50  ;;  %v1341_v25 = vsel %vm8801_vm3, %v1317_v22, %v8905_v21  ;;  %v10565_v34 = vld [vmem:[#allocation25_spill] sm:$0xff]  ;;  %v1420_v55 = vld [vmem:[#allocation6 + $0xa0] sm:$0xff] }
 0x309   : > { %v1337_v4 = vsel %vm8797_vm2, %v10561_v59, %v1226_v3  ;;  %v10562_v36 = vsub.f32 0.0, %v8884_v45  ;;  %v1342_v42 = vsel %vm8805_vm4, %v1318_v31, %v1211_v35  ;;  %v1274_v51 = vpop.permute.xlu1 %1273  ;;  %v1454_v20 = vadd.f32 %v1430_v46, %v8731_v15  ;;  %v1418_v3 = vld [vmem:[#allocation6 + $0x90] sm:$0xff] }
 0x30a   : > { %v1433_v41 = vmul.f32 %v1409_v61, %v1337_v4  ;;  %v1285_v23 = vsel %vm1279_vm1, %v8653_v12, %v1274_v51  ;;  %v1301_v21 = vsel %vm1279_vm1, %v1274_v51, %v10543_v24  ;;  %v1434_v40 = vmul.f32 %v1410_v39, %v1338_v9 }
 0x30b   : > { %v1340_v33 = vsel %vm8797_vm2, %v10562_v36, %v1227_v53  ;;  %v1320_v45 = vsub.f32 0.0, %v1285_v23  ;;  %1508 = vrot.lane.b32.xlu0 %v1472_v43, %s8037_s27  ;;  %v1276_v10 = vpop.permute.xlu0 %1275  ;;  %v1459_v16 = vadd.f32 %v1435_v44, %v8825_v5  ;;  %v1455_v15 = vadd.f32 %v1431_v2, %v8734_v49  ;;  %v1415_v5 = vld [vmem:[#allocation6 + $0x78] sm:$0xff]  ;;  %v1416_v44 = vld [vmem:[#allocation6 + $0x80] sm:$0xff] }
 0x30c   : > { %v1436_v63 = vmul.f32 %v1412_v0, %v1340_v33  ;;  %v1457_v18 = vadd.f32 %v1433_v41, %v8737_v14  ;;  %v1438_v48 = vmul.f32 %v1414_v8, %v1342_v42  ;;  %v1321_v13 = vsub.f32 0.0, %v1301_v21  ;;  %v10567_v0 = vld [vmem:[#allocation28_spill] sm:$0xff]  ;;  %v10571_v36 = vld [vmem:[#allocation31_spill] sm:$0xff] }
 0x30d   : > { %v1286_v12 = vsel %vm1279_vm1, %v10547_v19, %v1276_v10  ;;  %v1302_v24 = vsel %vm1279_vm1, %v1276_v10, %v10548_v58  ;;  %v1344_v56 = vsel %vm8801_vm3, %v1320_v45, %v8926_v29  ;;  %v1201_v14 = vpop.permute.xlu1 %1200  ;;  %v1477_v43 = vpack.c.bf16 %v1459_v16, %v1456_v62  ;;  %v10563_v19 = vld [vmem:[#allocation27_spill] sm:$0xff]  ;;  %v1413_v29 = vld [vmem:[#allocation6 + $0x68] sm:$0xff]  ;;  %v10572_v42 = vld [vmem:[#allocation48_spill] sm:$0xff] }
 0x30e   : > { %v1323_v32 = vsub.f32 0.0, %v1286_v12  ;;  %v1460_v49 = vadd.f32 %v1436_v63, %v8748_v6  ;;  %v1212_v2 = vsel %vm1206_vm0, %v10552_v27, %v1201_v14  ;;  %v1228_v46 = vsel %vm1206_vm0, %v1201_v14, %v10563_v19  ;;  %v1422_v10 = vld [vmem:[#allocation6 + $0xb0] sm:$0xff] }
 0x30f   : > { %v9068_v58 = vpack.c.bf16 %v1457_v18, %v1454_v20  ;;  %v1458_v22 = vadd.f32 %v1434_v40, %v10564_v26  ;;  %v1324_v61 = vsub.f32 0.0, %v1302_v24  ;;  %v10566_v30 = vsub.f32 0.0, %v10565_v34  ;;  %2038 = vrot.lane.b32.xlu1 %v1477_v43, %s8037_s27  ;;  %6738 = vmatprep.subr.msk.bf16.mxu0 %vm1516_vm5, %v1477_v43  ;;  %v1203_v27 = vpop.permute.xlu0 %1202  ;;  %v1419_v20 = vld [vmem:[#allocation6 + $0x98] sm:$0xff]  ;;  %v10574_v40 = vld [vmem:[#allocation49_spill] sm:$0xff]  ;;  %v10578_v26 = vld [vmem:[#allocation42_spill] sm:$0xff] }
 0x310   : > { %v1345_v6 = vsel %vm8805_vm4, %v1321_v13, %v1212_v2  ;;  %v1545_v9 = vsel %vm1516_vm5, %v1477_v43, 0  ;;  %v1213_v59 = vsel %vm1206_vm0, %v8783_v47, %v1203_v27  ;;  %v1229_v4 = vsel %vm1206_vm0, %v1203_v27, %v10554_v38  ;;  %v10569_v47 = vld [vmem:[#allocation36_spill] sm:$0xff]  ;;  %v10570_v38 = vld [vmem:[#allocation38_spill] sm:$0xff]  ;;  %v1421_v24 = vld [vmem:[#allocation6 + $0xa8] sm:$0xff] }
 0x311   : > { %v1343_v57 = vsel %vm8797_vm2, %v10566_v30, %v1228_v46  ;;  %v1441_v11 = vmul.f32 %v1417_v60, %v1345_v6  ;;  %6612 = vmatpush3.bf16.xpose.msra.mxu0 %v1545_v9  ;;  %v10568_v17 = vsub.f32 0.0, %v10567_v0  ;;  %v1348_v62 = vsel %vm8805_vm4, %v1324_v61, %v1213_v59  ;;  %v1278_v39 = vpop.permute.xlu1 %1277  ;;  %v10575_v13 = vld [vmem:[#allocation40_spill] sm:$0xff]  ;;  %v10576_v2 = vld [vmem:[#allocation47_spill] sm:$0xff]  ;;  %v10577_v46 = vld [vmem:[#allocation33_spill] sm:$0xff] }
 0x312   : > { %v1439_v31 = vmul.f32 %v1415_v5, %v1343_v57  ;;  %v9092_v41 = vpack.c.bf16 %v1458_v22, %v1455_v15  ;;  %v1437_v35 = vmul.f32 %v1413_v29, %v1341_v25  ;;  %v1347_v53 = vsel %vm8801_vm3, %v1323_v32, %v10569_v47  ;;  %v10573_v25 = vld [vmem:[#allocation41_spill] sm:$0xff]  ;;  %v1423_v32 = vld [vmem:[#allocation6 + $0xb8] sm:$0xff]  ;;  %v10579_v61 = vld [vmem:[#allocation26_spill] sm:$0xff] }
 0x313   : > { %v1346_v50 = vsel %vm8797_vm2, %v10568_v17, %v1229_v4  ;;  %v1287_v8 = vsel %vm1279_vm1, %v10570_v38, %v1278_v39  ;;  %v1303_v33 = vsel %vm1279_vm1, %v1278_v39, %v10571_v36  ;;  %v1462_v51 = vadd.f32 %v1438_v48, %v10572_v42  ;;  %1510 = vrot.lane.b32.xlu1 %v9068_v58, %s8037_s27  ;;  %v10581_v30 = vld [vmem:[#allocation44_spill] sm:$0xff]  ;;  %v10582_v9 = vld [vmem:[#allocation46_spill] sm:$0xff] }
 0x314   : > { %v1442_v63 = vmul.f32 %v1418_v3, %v1346_v50  ;;  %v1326_v23 = vsub.f32 0.0, %v1287_v8  ;;  %v1463_v21 = vadd.f32 %v1439_v31, %v10573_v25  ;;  %v1465_v45 = vadd.f32 %v1441_v11, %v10574_v40  ;;  %v10585_v59 = vld [vmem:[#allocation50_spill] sm:$0xff] }
 0x315   : > { %v1444_v16 = vmul.f32 %v1420_v55, %v1348_v62  ;;  %v1327_v18 = vsub.f32 0.0, %v1303_v33  ;;  %v1440_v15 = vmul.f32 %v1416_v44, %v1344_v56  ;;  %v1461_v12 = vadd.f32 %v1437_v35, %v10575_v13  ;;  %v1205_v5 = vpop.permute.xlu1 %1204  ;;  %v10586_v55 = vld [vmem:[#allocation51_spill] sm:$0xff] }
 0x316   : > { %v1350_v48 = vsel %vm8801_vm3, %v1326_v23, %v8952_v54  ;;  %v1478_v60 = vpack.c.bf16 %v1463_v21, %v1460_v49  ;;  %v1480_v14 = vpack.c.bf16 %v1465_v45, %v1462_v51  ;;  %v1443_v43 = vmul.f32 %v1419_v20, %v1347_v53 }
 0x317   : > { %v1214_v19 = vsel %vm1206_vm0, %v10576_v2, %v1205_v5  ;;  %v1230_v56 = vsel %vm1206_vm0, %v1205_v5, %v10577_v46  ;;  %v1464_v22 = vadd.f32 %v1440_v15, %v10578_v26  ;;  %v1446_v29 = vmul.f32 %v1422_v10, %v1350_v48 }
 0x318   : > { %v10580_v7 = vsub.f32 0.0, %v10579_v61  ;;  %v1351_v49 = vsel %vm8805_vm4, %v1327_v18, %v1214_v19  ;;  %1512 = vrot.lane.b32.xlu1 %v1478_v60, %s8037_s27  ;;  %2040 = vrot.lane.b32.xlu0 %v1480_v14, %s8037_s27  ;;  %v1548_v34 = vsel %vm1516_vm5, %v1480_v14, 0  ;;  %v1467_v37 = vadd.f32 %v1443_v43, %v10581_v30  ;;  %v9179_v18 = vld [vmem:[%s10414_s3] sm:$0xff]  ;;  %v9217_v61 = vld [vmem:[%s10414_s3 + $0x30] sm:$0xff] }
 0x319   : > { %v1447_v6 = vmul.f32 %v1423_v32, %v1351_v49  ;;  %6739 = vmatprep.subr.msk.bf16.mxu0 %vm1516_vm5, %v1480_v14  ;;  %v1479_v27 = vpack.c.bf16 %v1464_v22, %v1461_v12  ;;  %v1470_v31 = vadd.f32 %v1446_v29, %v10582_v9  ;;  %v1466_v11 = vadd.f32 %v1442_v63, %v10583_v52  ;;  %v9187_v12 = vld [vmem:[%s10414_s3 + $0x8] sm:$0xff]  ;;  %v9200_v14 = vld [vmem:[%s10414_s3 + $0x18] sm:$0xff] }
 0x31a   : > { %v1349_v54 = vsel %vm8797_vm2, %v10580_v7, %v1230_v56  ;;  %6614 = vmatpush3.bf16.xpose.msra.mxu0 %v1548_v34  ;;  %v1468_v4 = vadd.f32 %v1444_v16, %v10585_v59  ;;  %v9212_v29 = vld [vmem:[%s10414_s3 + $0x38] sm:$0xff]  ;;  %v9222_v34 = vld [vmem:[%s10414_s3 + $0x28] sm:$0xff] }
 0x31b   : > { %v1445_v57 = vmul.f32 %v1421_v24, %v1349_v54  ;;  %v1471_v0 = vadd.f32 %v1447_v6, %v10586_v55  ;;  %v1482_v17 = vpack.c.bf16 %v1470_v31, %v1467_v37 }
 0x31d   : > { %v1469_v3 = vadd.f32 %v1445_v57, %v10584_v28  ;;  %v1483_v62 = vpack.c.bf16 %v1471_v0, %v1468_v4  ;;  %v9254_v4 = vld [vmem:[%s10414_s3 + $0x50] sm:$0xff] }
 0x31f   : > { %v1481_v50 = vpack.c.bf16 %v1469_v3, %v1466_v11  ;;  %2042 = vrot.lane.b32.xlu1 %v1483_v62, %s8037_s27  ;;  %v1551_v39 = vsel %vm1516_vm5, %v1483_v62, 0  ;;  %6740 = vmatprep.subr.msk.bf16.mxu0 %vm1516_vm5, %v1483_v62  ;;  %v9259_v62 = vld [vmem:[%s10414_s3 + $0x58] sm:$0xff] }
 0x321   : > { %1514 = vrot.lane.b32.xlu0 %v1481_v50, %s8037_s27 }
 0x322   : > { %6616 = vmatpush3.bf16.xpose.msra.mxu0 %v1551_v39  ;;  %v9264_v39 = vld [vmem:[%s10414_s3 + $0x40] sm:$0xff] }
 0x323   : > { %2026 = vrot.lane.b32.xlu1 %v9092_v41, %s8037_s27 }
 0x325   : > { %2024 = vrot.lane.b32.xlu0 %v8998_v1, %s8037_s27 }
 0x327   : > { %2030 = vrot.lane.b32.xlu1 %v1482_v17, %s8037_s27 }
 0x329   : > { %2028 = vrot.lane.b32.xlu0 %v1479_v27, %s8037_s27  ;;  %6618 = vmatmul.mubr.msk.bf16.vlgmr.msra.gmra.mrb[32].mxu0 %vm1516_vm5, %v9068_v58 }
 0x32a   : > { %6621 = vmatprep.mubr.msk.bf16.mxu0 %vm1516_vm5, %v1478_v60 }
 0x331   : > { %6622 = vmatmul.mubr.msk.bf16.gmra.mrb[36].mxu0 %vm1516_vm5, %v1481_v50 }
 0x379   : > { %v2037_v44 = vpop.permute.xlu0 %2036 }
 0x37a   : > { %6741 = vmatprep.subr.msk.bf16.mxu0 %vm1516_vm5, %v2037_v44  ;;  %v2069_v35 = vsel %vm1516_vm5, %v2037_v44, 0 }
 0x37b   : > { %6658 = vmatpush3.bf16.xpose.msra.mxu0 %v2069_v35 }
 0x37d   : > { %v1509_v47 = vpop.permute.xlu0 %1508 }
 0x37e   : > { %6625 = vmatprep.mubr.msk.bf16.mxu0 %vm1516_vm5, %v1509_v47 }
 0x381   : > { %v2039_v53 = vpop.permute.xlu1 %2038 }
 0x382   : > { %6742 = vmatprep.subr.msk.bf16.mxu0 %vm1516_vm5, %v2039_v53  ;;  %v2072_v38 = vsel %vm1516_vm5, %v2039_v53, 0 }
 0x383   : > { %6660 = vmatpush3.bf16.xpose.msra.mxu0 %v2072_v38  ;;  %v9272_v38 = vld [vmem:[%s10414_s3 + $0x48] sm:$0xff] }
 0x385   : > { %v1511_v58 = vpop.permute.xlu1 %1510 }
 0x386   : > { %6626 = vmatmul.mubr.msk.bf16.gmra.mrb[40].mxu0 %vm1516_vm5, %v1511_v58 }
 0x38a   : > { %v1513_v8 = vpop.permute.xlu1 %1512  ;;  %v2041_v36 = vpop.permute.xlu0 %2040 }
 0x38b   : > { %6629 = vmatprep.mubr.msk.bf16.mxu0 %vm1516_vm5, %v1513_v8  ;;  %6743 = vmatprep.subr.msk.bf16.mxu0 %vm1516_vm5, %v2041_v36  ;;  %v2075_v33 = vsel %vm1516_vm5, %v2041_v36, 0 }
 0x38c   : > { %6662 = vmatpush3.bf16.xpose.msra.mxu0 %v2075_v33 }
 0x391   : > { %v2043_v42 = vpop.permute.xlu1 %2042 }
 0x392   : > { %6744 = vmatprep.subr.msk.bf16.mxu0 %vm1516_vm5, %v2043_v42  ;;  %v2078_v20 = vsel %vm1516_vm5, %v2043_v42, 0 }
 0x393   : > { %v1515_v51 = vpop.permute.xlu0 %1514 }
 0x394   : > { %6630 = vmatmul.mubr.msk.bf16.gmra.mrb[44].mxu0 %vm1516_vm5, %v1515_v51 }
 0x395   : > { %6665 = vmatprep.mubr.msk.bf16.mxu0 %vm1516_vm5, %v8998_v1  ;;  %6664 = vmatpush3.bf16.xpose.msra.mxu0 %v2078_v20  ;;  %v2027_v23 = vpop.permute.xlu1 %2026 }
 0x397   : > { %v2025_v63 = vpop.permute.xlu0 %2024 }
 0x399   : > { %v2031_v21 = vpop.permute.xlu1 %2030 }
 0x39b   : > { %v2029_v25 = vpop.permute.xlu0 %2028 }
 0x39c   : > { %6666 = vmatmul.mubr.msk.bf16.vlgmr.msra.gmra.mrb[48].mxu0 %vm1516_vm5, %v9092_v41  ;;  %v9174_v41 = vld [vmem:[%s10414_s3 + $0x10] sm:$0xff] }
 0x39d   : > { %6669 = vmatprep.mubr.msk.bf16.mxu0 %vm1516_vm5, %v1479_v27  ;;  %v9235_v27 = vld [vmem:[%s10414_s3 + $0x20] sm:$0xff] }
 0x3a4   : > { %6670 = vmatmul.mubr.msk.bf16.gmra.mrb[52].mxu0 %vm1516_vm5, %v1482_v17 }
 0x3a5   : > { %6673 = vmatprep.mubr.msk.bf16.mxu0 %vm1516_vm5, %v2025_v63 }
 0x3ac   : > { %6674 = vmatmul.mubr.msk.bf16.gmra.mrb[56].mxu0 %vm1516_vm5, %v2027_v23  ;;  %v9294_v23 = vld [vmem:[%s10414_s3 + $0x70] sm:$0xff] }
 0x3ad   : > { %6677 = vmatprep.mubr.msk.bf16.mxu0 %vm1516_vm5, %v2029_v25 }
 0x3b4   : > { %6678 = vmatmul.mubr.msk.bf16.gmra.mrb[60].mxu0 %vm1516_vm5, %v2031_v21 }
 0x3fc   : > { %v6619_v1 = vpop.f32.mrb[32].mxu0 }
 0x3fd   : > { %v1652_v40 = vmul.f32 0.125, %v6619_v1  ;;  %v1587_v45 = vpop.f32.mrb[33].mxu0 }
 0x3fe   : > { %v1650_v10 = vmul.f32 0.125, %v1587_v45  ;;  %v6620_v16 = vpop.f32.mrb[34].mxu0  ;;  %v9299_v45 = vld [vmem:[%s10414_s3 + $0x78] sm:$0xff] }
 0x3ff   : > { %v1590_v15 = vpop.f32.mrb[35].mxu0  ;;  %v9182_v13 = vadd.f32 %v1652_v40, %v9174_v41  ;;  %v1653_v24 = vmul.f32 0.125, %v6620_v16 }
 0x400   : > { %v1651_v48 = vmul.f32 0.125, %v1590_v15  ;;  %v9192_v5 = vadd.f32 %v1650_v10, %v9179_v18  ;;  %v9304_v10 = vld [vmem:[%s10414_s3 + $0x60] sm:$0xff] }
 0x401   : > { %v1688_v32 = vsel %vm1516_vm5, %v9182_v13, -inf  ;;  %v9207_v26 = vadd.f32 %v1653_v24, %v9200_v14 }
 0x402   : > { %1689 = vmax.xlane.f32.xlu0 %v1688_v32  ;;  %v9195_v60 = vadd.f32 %v1651_v48, %v9187_v12  ;;  %v1682_v56 = vsel %vm1516_vm5, %v9192_v5, -inf  ;;  %v9312_v32 = vld [vmem:[%s10414_s3 + $0x68] sm:$0xff] }
 0x403   : > { %v1691_v37 = vsel %vm1516_vm5, %v9207_v26, -inf }
 0x404   : > { %v6623_v43 = vpop.f32.mrb[36].mxu0  ;;  %v1685_v2 = vsel %vm1516_vm5, %v9195_v60, -inf }
 0x405   : > { %v1656_v19 = vmul.f32 0.125, %v6623_v43  ;;  %1686 = vmax.xlane.f32.xlu1 %v1685_v2  ;;  %v1603_v46 = vpop.f32.mrb[37].mxu0 }
 0x406   : > { %1683 = vmax.xlane.f32.xlu0 %v1682_v56  ;;  %v6624_v22 = vpop.f32.mrb[38].mxu0  ;;  %v1654_v30 = vmul.f32 0.125, %v1603_v46 }
 0x407   : > { %v1657_v7 = vmul.f32 0.125, %v6624_v22  ;;  %v1606_v54 = vpop.f32.mrb[39].mxu0  ;;  %v9230_v6 = vadd.f32 %v1656_v19, %v9217_v61 }
 0x408   : > { %v1655_v49 = vmul.f32 0.125, %v1606_v54  ;;  %v9245_v11 = vadd.f32 %v1654_v30, %v9235_v27 }
 0x409   : > { %v9227_v57 = vadd.f32 %v1657_v7, %v9212_v29  ;;  %v1700_v52 = vsel %vm1516_vm5, %v9230_v6, -inf }
 0x40a   : > { %1692 = vmax.xlane.f32.xlu0 %v1691_v37  ;;  %v9240_v31 = vadd.f32 %v1655_v49, %v9222_v34  ;;  %v1694_v3 = vsel %vm1516_vm5, %v9245_v11, -inf }
 0x40b   : > { %v1703_v9 = vsel %vm1516_vm5, %v9227_v57, -inf }
 0x40c   : > { %1704 = vmax.xlane.f32.xlu1 %v1703_v9  ;;  %v1697_v28 = vsel %vm1516_vm5, %v9240_v31, -inf }
 0x40e   : > { %1701 = vmax.xlane.f32.xlu0 %v1700_v52 }
 0x410   : > { %1698 = vmax.xlane.f32.xlu1 %v1697_v28 }
 0x412   : > { %1695 = vmax.xlane.f32.xlu0 %v1694_v3 }
 0x459   : > { %v6627_v59 = vpop.f32.mrb[40].mxu0 }
 0x45a   : > { %v1660_v55 = vmul.f32 0.125, %v6627_v59  ;;  %v1619_v0 = vpop.f32.mrb[41].mxu0 }
 0x45b   : > { %v1658_v17 = vmul.f32 0.125, %v1619_v0  ;;  %v6628_v50 = vpop.f32.mrb[42].mxu0 }
 0x45c   : > { %v1661_v44 = vmul.f32 0.125, %v6628_v50  ;;  %v1622_v35 = vpop.f32.mrb[43].mxu0  ;;  %v9267_v47 = vadd.f32 %v1660_v55, %v9254_v4 }
 0x45d   : > { %v1659_v53 = vmul.f32 0.125, %v1622_v35  ;;  %v9280_v36 = vadd.f32 %v1658_v17, %v9264_v39 }
 0x45e   : > { %v1712_v58 = vsel %vm1516_vm5, %v9267_v47, -inf  ;;  %v9277_v8 = vadd.f32 %v1661_v44, %v9259_v62 }
 0x45f   : > { %1713 = vmax.xlane.f32.xlu0 %v1712_v58  ;;  %v9285_v42 = vadd.f32 %v1659_v53, %v9272_v38  ;;  %v1706_v51 = vsel %vm1516_vm5, %v9280_v36, -inf }
 0x460   : > { %v1715_v33 = vsel %vm1516_vm5, %v9277_v8, -inf }
 0x461   : > { %1716 = vmax.xlane.f32.xlu1 %v1715_v33  ;;  %v1709_v20 = vsel %vm1516_vm5, %v9285_v42, -inf }
 0x463   : > { %1707 = vmax.xlane.f32.xlu0 %v1706_v51 }
 0x465   : > { %1710 = vmax.xlane.f32.xlu1 %v1709_v20 }
 0x467   : > { %v6631_v63 = vpop.f32.mrb[44].mxu0 }
 0x468   : > { %v1664_v25 = vmul.f32 0.125, %v6631_v63  ;;  %v1635_v21 = vpop.f32.mrb[45].mxu0 }
 0x469   : > { %v1662_v1 = vmul.f32 0.125, %v1635_v21  ;;  %v6632_v40 = vpop.f32.mrb[46].mxu0 }
 0x46a   : > { %v1665_v16 = vmul.f32 0.125, %v6632_v40  ;;  %v1638_v15 = vpop.f32.mrb[47].mxu0  ;;  %v9307_v48 = vadd.f32 %v1664_v25, %v9294_v23 }
 0x46b   : > { %v1663_v24 = vmul.f32 0.125, %v1638_v15  ;;  %v9320_v19 = vadd.f32 %v1662_v1, %v9304_v10 }
 0x46c   : > { %v1724_v43 = vsel %vm1516_vm5, %v9307_v48, -inf  ;;  %v9317_v2 = vadd.f32 %v1665_v16, %v9299_v45 }
 0x46d   : > { %1725 = vmax.xlane.f32.xlu0 %v1724_v43  ;;  %v9325_v56 = vadd.f32 %v1663_v24, %v9312_v32  ;;  %v1718_v7 = vsel %vm1516_vm5, %v9320_v19, -inf }
 0x46e   : > { %v1727_v46 = vsel %vm1516_vm5, %v9317_v2, -inf }
 0x46f   : > { %1728 = vmax.xlane.f32.xlu1 %v1727_v46  ;;  %v6667_v22 = vpop.f32.mrb[48].mxu0  ;;  %v1721_v9 = vsel %vm1516_vm5, %v9325_v56, -inf }
 0x470   : > { %v2179_v54 = vmul.f32 0.125, %v6667_v22  ;;  %v2114_v49 = vpop.f32.mrb[49].mxu0 }
 0x471   : > { %1719 = vmax.xlane.f32.xlu0 %v1718_v7  ;;  %v2177_v30 = vmul.f32 0.125, %v2114_v49  ;;  %v6668_v37 = vpop.f32.mrb[50].mxu0 }
 0x472   : > { %v2180_v52 = vmul.f32 0.125, %v6668_v37  ;;  %v2117_v28 = vpop.f32.mrb[51].mxu0  ;;  %v9332_v3 = vadd.f32 %v2179_v54, %v9174_v41 }
 0x473   : > { %1722 = vmax.xlane.f32.xlu1 %v1721_v9  ;;  %v2178_v59 = vmul.f32 0.125, %v2117_v28  ;;  %v9340_v17 = vadd.f32 %v2177_v30, %v9179_v18 }
 0x474   : > { %v2215_v55 = vsel %vm1516_vm5, %v9332_v3, -inf  ;;  %v9337_v0 = vadd.f32 %v2180_v52, %v9200_v14 }
 0x475   : > { %2216 = vmax.xlane.f32.xlu0 %v2215_v55  ;;  %v9345_v44 = vadd.f32 %v2178_v59, %v9187_v12  ;;  %v2209_v58 = vsel %vm1516_vm5, %v9340_v17, -inf }
 0x476   : > { %v2218_v50 = vsel %vm1516_vm5, %v9337_v0, -inf }
 0x477   : > { %v6671_v35 = vpop.f32.mrb[52].mxu0  ;;  %2219 = vmax.xlane.f32.xlu1 %v2218_v50  ;;  %v2212_v20 = vsel %vm1516_vm5, %v9345_v44, -inf }
 0x478   : > { %v2183_v41 = vmul.f32 0.125, %v6671_v35  ;;  %v2130_v53 = vpop.f32.mrb[53].mxu0 }
 0x479   : > { %v2181_v33 = vmul.f32 0.125, %v2130_v53  ;;  %2210 = vmax.xlane.f32.xlu0 %v2209_v58  ;;  %v6672_v14 = vpop.f32.mrb[54].mxu0 }
 0x47a   : > { %v2184_v51 = vmul.f32 0.125, %v6672_v14  ;;  %v2133_v18 = vpop.f32.mrb[55].mxu0  ;;  %v9352_v63 = vadd.f32 %v2183_v41, %v9217_v61 }
 0x47b   : > { %v2182_v12 = vmul.f32 0.125, %v2133_v18  ;;  %2213 = vmax.xlane.f32.xlu1 %v2212_v20  ;;  %v9360_v1 = vadd.f32 %v2181_v33, %v9235_v27 }
 0x47c   : > { %v2227_v25 = vsel %vm1516_vm5, %v9352_v63, -inf  ;;  %v9357_v21 = vadd.f32 %v2184_v51, %v9212_v29 }
 0x47d   : > { %2228 = vmax.xlane.f32.xlu0 %v2227_v25  ;;  %v9365_v16 = vadd.f32 %v2182_v12, %v9222_v34  ;;  %v2221_v43 = vsel %vm1516_vm5, %v9360_v1, -inf }
 0x47e   : > { %v2230_v40 = vsel %vm1516_vm5, %v9357_v21, -inf }
 0x47f   : > { %2231 = vmax.xlane.f32.xlu1 %v2230_v40  ;;  %v6675_v61 = vpop.f32.mrb[56].mxu0  ;;  %v2224_v7 = vsel %vm1516_vm5, %v9365_v16, -inf }
 0x480   : > { %v2187_v15 = vmul.f32 0.125, %v6675_v61  ;;  %v2146_v24 = vpop.f32.mrb[57].mxu0 }
 0x481   : > { %v2185_v46 = vmul.f32 0.125, %v2146_v24  ;;  %2222 = vmax.xlane.f32.xlu0 %v2221_v43  ;;  %v6676_v29 = vpop.f32.mrb[58].mxu0 }
 0x482   : > { %v2188_v22 = vmul.f32 0.125, %v6676_v29  ;;  %v2149_v27 = vpop.f32.mrb[59].mxu0  ;;  %v9372_v54 = vadd.f32 %v2187_v15, %v9254_v4  ;;  %v10587_v29 = vld [vmem:[#allocation21_spill] sm:$0xff] }
 0x483   : > { %v2186_v34 = vmul.f32 0.125, %v2149_v27  ;;  %2225 = vmax.xlane.f32.xlu1 %v2224_v7  ;;  %v9380_v37 = vadd.f32 %v2185_v46, %v9264_v39 }
 0x484   : > { %v2239_v49 = vsel %vm1516_vm5, %v9372_v54, -inf  ;;  %v9377_v30 = vadd.f32 %v2188_v22, %v9259_v62 }
 0x485   : > { %2240 = vmax.xlane.f32.xlu0 %v2239_v49  ;;  %v9385_v52 = vadd.f32 %v2186_v34, %v9272_v38  ;;  %v2233_v55 = vsel %vm1516_vm5, %v9380_v37, -inf }
 0x486   : > { %v2242_v9 = vsel %vm1516_vm5, %v9377_v30, -inf }
 0x487   : > { %2243 = vmax.xlane.f32.xlu1 %v2242_v9  ;;  %v6679_v4 = vpop.f32.mrb[60].mxu0  ;;  %v2236_v53 = vsel %vm1516_vm5, %v9385_v52, -inf }
 0x488   : > { %v2191_v28 = vmul.f32 0.125, %v6679_v4  ;;  %v2162_v59 = vpop.f32.mrb[61].mxu0 }
 0x489   : > { %v2189_v50 = vmul.f32 0.125, %v2162_v59  ;;  %2234 = vmax.xlane.f32.xlu0 %v2233_v55  ;;  %v6680_v62 = vpop.f32.mrb[62].mxu0 }
 0x48a   : > { %v9390_v39 = vadd.f32 %v2191_v28, %v9294_v23  ;;  %v2192_v35 = vmul.f32 0.125, %v6680_v62  ;;  %v2165_v41 = vpop.f32.mrb[63].mxu0 }
 0x48b   : > { %v9395_v38 = vadd.f32 %v2189_v50, %v9304_v10  ;;  %v2190_v58 = vmul.f32 0.125, %v2165_v41  ;;  %2237 = vmax.xlane.f32.xlu1 %v2236_v53 }
 0x48c   : > { %v9398_v33 = vadd.f32 %v2192_v35, %v9299_v45  ;;  %v2251_v41 = vsel %vm1516_vm5, %v9390_v39, -inf }
 0x48d   : > { %v9401_v14 = vadd.f32 %v2190_v58, %v9312_v32 }
 0x48e   : > { %v2254_v23 = vsel %vm1516_vm5, %v9398_v33, -inf }
 0x48f   : > { %2255 = vmax.xlane.f32.xlu1 %v2254_v23  ;;  %v1690_v51 = vpop.xlane.xlu0 %1689  ;;  %v2248_v18 = vsel %vm1516_vm5, %v9401_v14, -inf }
 0x492   : > { %v1687_v20 = vpop.xlane.xlu1 %1686 }
 0x493   : > { %2249 = vmax.xlane.f32.xlu1 %v2248_v18  ;;  %v1684_v10 = vpop.xlane.xlu0 %1683  ;;  %v1731_v12 = vsub.f32 %v9195_v60, %v1687_v20 }
 0x494   : > { %v1730_v28 = vsub.f32 %v9192_v5, %v1684_v10  ;;  %v2245_v5 = vsel %vm1516_vm5, %v9395_v38, -inf }
 0x495   : > { %v1748_v61 = vmul.f32 1.442695, %v1731_v12 }
 0x496   : > { %v1746_v55 = vmul.f32 1.442695, %v1730_v28 }
 0x497   : > { %v1693_v25 = vpop.xlane.xlu0 %1692 }
 0x498   : > { %v1733_v45 = vsub.f32 %v9207_v26, %v1693_v25 }
 0x499   : > { %v1705_v40 = vpop.xlane.xlu1 %1704 }
 0x49a   : > { %v1752_v32 = vmul.f32 1.442695, %v1733_v45  ;;  %v1737_v15 = vsub.f32 %v9227_v57, %v1705_v40 }
 0x49b   : > { %v1702_v9 = vpop.xlane.xlu0 %1701 }
 0x49c   : > { %7403 = vpow2.f32 %v1752_v32  ;;  %v1760_v43 = vmul.f32 1.442695, %v1737_v15  ;;  %v1736_v50 = vsub.f32 %v9230_v6, %v1702_v9 }
 0x49d   : > { %v1699_v24 = vpop.xlane.xlu1 %1698  ;;  %7405 = vpow2.f32 %v1748_v61 }
 0x49e   : > { %v1735_v46 = vsub.f32 %v9240_v31, %v1699_v24  ;;  %7407 = vpow2.f32 %v1760_v43  ;;  %v1732_v31 = vsub.f32 %v9182_v13, %v1690_v51  ;;  %v1758_v13 = vmul.f32 1.442695, %v1736_v50 }
 0x49f   : > { %2397 = vrot.lane.b32.xlu0 %v10587_v29, %s8037_s27  ;;  %v1696_v62 = vpop.xlane.xlu0 %1695 }
 0x4a0   : > { %v1756_v22 = vmul.f32 1.442695, %v1735_v46  ;;  %v1750_v4 = vmul.f32 1.442695, %v1732_v31  ;;  %v1734_v35 = vsub.f32 %v9245_v11, %v1696_v62 }
 0x4a2   : > { %7409 = vpow2.f32 %v1756_v22  ;;  %v1754_v53 = vmul.f32 1.442695, %v1734_v35 }
 0x4a3   : > { %7411 = vpow2.f32 %v1750_v4 }
 0x4a4   : > { %7413 = vpow2.f32 %v1746_v55 }
 0x4a5   : > { %7415 = vpow2.f32 %v1758_v13 }
 0x4a6   : > { %v9413_v60 = vpop.eup %7403  ;;  %7417 = vpow2.f32 %v1754_v53 }
 0x4a7   : > { %v1787_v26 = vsel %vm1516_vm5, %v9413_v60, 0.0  ;;  %v9417_v27 = vpop.eup %7405 }
 0x4a8   : > { %1788 = vadd.xlane.f32.xlu1 %v1787_v26  ;;  %v1781_v57 = vsel %vm1516_vm5, %v9417_v27, 0.0  ;;  %v9421_v7 = vpop.eup %7407 }
 0x4a9   : > { %v1799_v34 = vsel %vm1516_vm5, %v9421_v7, 0.0 }
 0x4ac   : > { %1782 = vadd.xlane.f32.xlu1 %v1781_v57  ;;  %v9426_v49 = vpop.eup %7409 }
 0x4ad   : > { %v1793_v59 = vsel %vm1516_vm5, %v9426_v49, 0.0  ;;  %v9437_v58 = vpop.eup %7411 }
 0x4ae   : > { %v1784_v6 = vsel %vm1516_vm5, %v9437_v58, 0.0  ;;  %v9441_v23 = vpop.eup %7413 }
 0x4af   : > { %v1778_v11 = vsel %vm1516_vm5, %v9441_v23, 0.0  ;;  %v9445_v51 = vpop.eup %7415 }
 0x4b0   : > { %1800 = vadd.xlane.f32.xlu1 %v1799_v34  ;;  %v1796_v18 = vsel %vm1516_vm5, %v9445_v51, 0.0  ;;  %v9449_v20 = vpop.eup %7417 }
 0x4b1   : > { %v1790_v10 = vsel %vm1516_vm5, %v9449_v20, 0.0 }
 0x4b4   : > { %1794 = vadd.xlane.f32.xlu1 %v1793_v59 }
 0x4be   : > { %2252 = vmax.xlane.f32.xlu0 %v2251_v41 }
 0x4c2   : > { %2246 = vmax.xlane.f32.xlu0 %v2245_v5 }
 0x4c6   : > { %1785 = vadd.xlane.f32.xlu0 %v1784_v6 }
 0x4ca   : > { %1779 = vadd.xlane.f32.xlu0 %v1778_v11 }
 0x4ce   : > { %1797 = vadd.xlane.f32.xlu0 %v1796_v18 }
 0x4d2   : > { %1791 = vadd.xlane.f32.xlu0 %v1790_v10 }
 0x4ec   : > { %v1714_v12 = vpop.xlane.xlu0 %1713 }
 0x4ed   : > { %v1740_v25 = vsub.f32 %v9267_v47, %v1714_v12 }
 0x4ee   : > { %v1717_v45 = vpop.xlane.xlu1 %1716 }
 0x4ef   : > { %v1766_v40 = vmul.f32 1.442695, %v1740_v25  ;;  %v1741_v61 = vsub.f32 %v9277_v8, %v1717_v45 }
 0x4f0   : > { %v1708_v32 = vpop.xlane.xlu0 %1707 }
 0x4f1   : > { %7419 = vpow2.f32 %v1766_v40  ;;  %v1768_v15 = vmul.f32 1.442695, %v1741_v61  ;;  %v1738_v24 = vsub.f32 %v9280_v36, %v1708_v32 }
 0x4f2   : > { %v1711_v43 = vpop.xlane.xlu1 %1710 }
 0x4f3   : > { %7421 = vpow2.f32 %v1768_v15  ;;  %v1762_v46 = vmul.f32 1.442695, %v1738_v24  ;;  %v1739_v29 = vsub.f32 %v9285_v42, %v1711_v43 }
 0x4f5   : > { %7423 = vpow2.f32 %v1762_v46  ;;  %v1764_v22 = vmul.f32 1.442695, %v1739_v29 }
 0x4f7   : > { %7425 = vpow2.f32 %v1764_v22 }
 0x4fa   : > { %v1726_v26 = vpop.xlane.xlu0 %1725 }
 0x4fb   : > { %v1744_v47 = vsub.f32 %v9307_v48, %v1726_v26  ;;  %v9459_v34 = vpop.eup %7419 }
 0x4fc   : > { %v1729_v57 = vpop.xlane.xlu1 %1728  ;;  %v1808_v42 = vsel %vm1516_vm5, %v9459_v34, 0.0 }
 0x4fd   : > { %v1774_v31 = vmul.f32 1.442695, %v1744_v47  ;;  %v1745_v8 = vsub.f32 %v9317_v2, %v1729_v57  ;;  %v9464_v28 = vpop.eup %7421  ;;  %1809 = vadd.xlane.f32.xlu0 %v1808_v42 }
 0x4fe   : > { %v1720_v9 = vpop.xlane.xlu0 %1719  ;;  %v1811_v2 = vsel %vm1516_vm5, %v9464_v28, 0.0 }
 0x4ff   : > { %7427 = vpow2.f32 %v1774_v31  ;;  %v1776_v36 = vmul.f32 1.442695, %v1745_v8  ;;  %v1742_v4 = vsub.f32 %v9320_v19, %v1720_v9  ;;  %v9469_v50 = vpop.eup %7423  ;;  %1812 = vadd.xlane.f32.xlu1 %v1811_v2 }
 0x500   : > { %v1723_v59 = vpop.xlane.xlu1 %1722  ;;  %v1802_v13 = vsel %vm1516_vm5, %v9469_v50, 0.0 }
 0x501   : > { %7429 = vpow2.f32 %v1776_v36  ;;  %v1770_v48 = vmul.f32 1.442695, %v1742_v4  ;;  %v1743_v55 = vsub.f32 %v9325_v56, %v1723_v59  ;;  %v9473_v35 = vpop.eup %7425  ;;  %1803 = vadd.xlane.f32.xlu0 %v1802_v13 }
 0x502   : > { %v2217_v19 = vpop.xlane.xlu0 %2216  ;;  %v1805_v56 = vsel %vm1516_vm5, %v9473_v35, 0.0 }
 0x503   : > { %7431 = vpow2.f32 %v1770_v48  ;;  %v1772_v62 = vmul.f32 1.442695, %v1743_v55  ;;  %v2259_v41 = vsub.f32 %v9332_v3, %v2217_v19  ;;  %1806 = vadd.xlane.f32.xlu1 %v1805_v56 }
 0x504   : > { %v2220_v53 = vpop.xlane.xlu1 %2219 }
 0x505   : > { %7433 = vpow2.f32 %v1772_v62  ;;  %v2277_v5 = vmul.f32 1.442695, %v2259_v41  ;;  %v2260_v6 = vsub.f32 %v9337_v0, %v2220_v53 }
 0x506   : > { %v2211_v11 = vpop.xlane.xlu0 %2210 }
 0x507   : > { %7435 = vpow2.f32 %v2277_v5  ;;  %v2279_v18 = vmul.f32 1.442695, %v2260_v6  ;;  %v2257_v10 = vsub.f32 %v9340_v17, %v2211_v11 }
 0x508   : > { %v2214_v25 = vpop.xlane.xlu1 %2213 }
 0x509   : > { %v9480_v12 = vpop.eup %7427  ;;  %7437 = vpow2.f32 %v2279_v18  ;;  %v2273_v3 = vmul.f32 1.442695, %v2257_v10  ;;  %v2258_v45 = vsub.f32 %v9345_v44, %v2214_v25 }
 0x50a   : > { %v1820_v40 = vsel %vm1516_vm5, %v9480_v12, 0.0  ;;  %v2229_v32 = vpop.xlane.xlu0 %2228 }
 0x50b   : > { %v9485_v61 = vpop.eup %7429  ;;  %1821 = vadd.xlane.f32.xlu0 %v1820_v40  ;;  %7439 = vpow2.f32 %v2273_v3  ;;  %v2275_v0 = vmul.f32 1.442695, %v2258_v45  ;;  %v2263_v15 = vsub.f32 %v9352_v63, %v2229_v32 }
 0x50c   : > { %v1823_v17 = vsel %vm1516_vm5, %v9485_v61, 0.0  ;;  %v2232_v43 = vpop.xlane.xlu1 %2231 }
 0x50d   : > { %v9490_v24 = vpop.eup %7431  ;;  %1824 = vadd.xlane.f32.xlu1 %v1823_v17  ;;  %7441 = vpow2.f32 %v2275_v0  ;;  %v2285_v44 = vmul.f32 1.442695, %v2263_v15  ;;  %v2264_v46 = vsub.f32 %v9357_v21, %v2232_v43 }
 0x50e   : > { %v1814_v29 = vsel %vm1516_vm5, %v9490_v24, 0.0  ;;  %v2223_v26 = vpop.xlane.xlu0 %2222 }
 0x50f   : > { %v9495_v22 = vpop.eup %7433  ;;  %1815 = vadd.xlane.f32.xlu0 %v1814_v29  ;;  %7443 = vpow2.f32 %v2285_v44  ;;  %v2287_v63 = vmul.f32 1.442695, %v2264_v46  ;;  %v2261_v47 = vsub.f32 %v9360_v1, %v2223_v26 }
 0x510   : > { %v1817_v57 = vsel %vm1516_vm5, %v9495_v22, 0.0  ;;  %v2226_v31 = vpop.xlane.xlu1 %2225 }
 0x511   : > { %1818 = vadd.xlane.f32.xlu1 %v1817_v57  ;;  %v9500_v8 = vpop.eup %7435  ;;  %7445 = vpow2.f32 %v2287_v63  ;;  %v2281_v21 = vmul.f32 1.442695, %v2261_v47  ;;  %v2262_v9 = vsub.f32 %v9365_v16, %v2226_v31  ;;  %v10588_v63 = vld [vmem:[#allocation23_spill] sm:$0xff]  ;;  %v10589_v47 = vld [vmem:[#allocation24_spill] sm:$0xff]  ;;  %v10590_v31 = vld [vmem:[#allocation22_spill] sm:$0xff] }
 0x512   : > { %v2241_v36 = vpop.xlane.xlu0 %2240  ;;  %v2311_v4 = vsel %vm1516_vm5, %v9500_v8, 0.0 }
 0x513   : > { %v9505_v42 = vpop.eup %7437  ;;  %7447 = vpow2.f32 %v2281_v21  ;;  %v2283_v59 = vmul.f32 1.442695, %v2262_v9  ;;  %v2267_v1 = vsub.f32 %v9372_v54, %v2241_v36  ;;  %2312 = vadd.xlane.f32.xlu0 %v2311_v4 }
 0x514   : > { %v2244_v48 = vpop.xlane.xlu1 %2243  ;;  %v2314_v55 = vsel %vm1516_vm5, %v9505_v42, 0.0 }
 0x515   : > { %v9510_v2 = vpop.eup %7439  ;;  %7449 = vpow2.f32 %v2283_v59  ;;  %v2293_v62 = vmul.f32 1.442695, %v2267_v1  ;;  %2315 = vadd.xlane.f32.xlu1 %v2314_v55  ;;  %v2268_v41 = vsub.f32 %v9377_v30, %v2244_v48 }
 0x516   : > { %v2235_v16 = vpop.xlane.xlu0 %2234  ;;  %v2305_v19 = vsel %vm1516_vm5, %v9510_v2, 0.0 }
 0x517   : > { %v9514_v13 = vpop.eup %7441  ;;  %7451 = vpow2.f32 %v2293_v62  ;;  %v2265_v54 = vsub.f32 %v9380_v37, %v2235_v16  ;;  %2306 = vadd.xlane.f32.xlu0 %v2305_v19  ;;  %v2295_v25 = vmul.f32 1.442695, %v2268_v41 }
 0x518   : > { %v2238_v53 = vpop.xlane.xlu1 %2237  ;;  %v2308_v56 = vsel %vm1516_vm5, %v9514_v13, 0.0 }
 0x519   : > { %v9520_v5 = vpop.eup %7443  ;;  %v2289_v6 = vmul.f32 1.442695, %v2265_v54  ;;  %2309 = vadd.xlane.f32.xlu1 %v2308_v56  ;;  %v2266_v30 = vsub.f32 %v9385_v52, %v2238_v53 }
 0x51a   : > { %v9522_v11 = vpop.permute.xlu0 %2397  ;;  %v2323_v18 = vsel %vm1516_vm5, %v9520_v5, 0.0 }
 0x51b   : > { %v9526_v10 = vpop.eup %7445  ;;  %7453 = vpow2.f32 %v2289_v6  ;;  %2324 = vadd.xlane.f32.xlu0 %v2323_v18  ;;  %6681 = vmatprep.subr.bf16.mxu1 %v9522_v11  ;;  %v2291_v32 = vmul.f32 1.442695, %v2266_v30 }
 0x51c   : > { %v2326_v37 = vsel %vm1516_vm5, %v9526_v10, 0.0  ;;  %7455 = vpow2.f32 %v2295_v25  ;;  %v2256_v57 = vpop.xlane.xlu1 %2255 }
 0x51d   : > { %v9532_v3 = vpop.eup %7447  ;;  %2327 = vadd.xlane.f32.xlu1 %v2326_v37  ;;  %7457 = vpow2.f32 %v2291_v32  ;;  %v2272_v16 = vsub.f32 %v9398_v33, %v2256_v57 }
 0x51e   : > { %v2317_v45 = vsel %vm1516_vm5, %v9532_v3, 0.0 }
 0x51f   : > { %v9536_v40 = vpop.eup %7449  ;;  %2318 = vadd.xlane.f32.xlu0 %v2317_v45  ;;  %v2303_v56 = vmul.f32 1.442695, %v2272_v16 }
 0x520   : > { %v2320_v52 = vsel %vm1516_vm5, %v9536_v40, 0.0  ;;  %v2250_v21 = vpop.xlane.xlu1 %2249 }
 0x521   : > { %v9540_v0 = vpop.eup %7451  ;;  %2321 = vadd.xlane.f32.xlu1 %v2320_v52  ;;  %v2270_v36 = vsub.f32 %v9401_v14, %v2250_v21 }
 0x522   : > { %v2335_v15 = vsel %vm1516_vm5, %v9540_v0, 0.0 }
 0x523   : > { %v2299_v59 = vmul.f32 1.442695, %v2270_v36 }
 0x525   : > { %v9544_v17 = vpop.eup %7453  ;;  %2336 = vadd.xlane.f32.xlu1 %v2335_v15  ;;  %7459 = vpow2.f32 %v2299_v59 }
 0x526   : > { %v2329_v43 = vsel %vm1516_vm5, %v9544_v17, 0.0  ;;  %v9548_v44 = vpop.eup %7455 }
 0x527   : > { %v2338_v46 = vsel %vm1516_vm5, %v9548_v44, 0.0  ;;  %v9552_v29 = vpop.eup %7457 }
 0x528   : > { %v2332_v26 = vsel %vm1516_vm5, %v9552_v29, 0.0 }
 0x529   : > { %2330 = vadd.xlane.f32.xlu1 %v2329_v43 }
 0x52d   : > { %2339 = vadd.xlane.f32.xlu1 %v2338_v46 }
 0x52f   : > { %v9566_v18 = vpop.eup %7459 }
 0x530   : > { %v2344_v57 = vsel %vm1516_vm5, %v9566_v18, 0.0 }
 0x531   : > { %2333 = vadd.xlane.f32.xlu1 %v2332_v26 }
 0x535   : > { %2401 = vrot.lane.b32.xlu0 %v10588_v63, %s8037_s27  ;;  %v1789_v9 = vpop.xlane.xlu1 %1788 }
 0x539   : > { %2403 = vrot.lane.b32.xlu0 %v10589_v47, %s8037_s27  ;;  %v1783_v48 = vpop.xlane.xlu1 %1782 }
 0x53a   : > { %7461 = vrcp.f32 %v1783_v48 }
 0x53d   : > { %v1801_v53 = vpop.xlane.xlu1 %1800 }
 0x542   : > { %2399 = vrot.lane.b32.xlu1 %v10590_v31, %s8037_s27 }
 0x54b   : > { %v2253_v4 = vpop.xlane.xlu0 %2252 }
 0x54c   : > { %v2271_v1 = vsub.f32 %v9390_v39, %v2253_v4  ;;  %v1795_v39 = vpop.xlane.xlu1 %1794 }
 0x54e   : > { %v2301_v19 = vmul.f32 1.442695, %v2271_v1 }
 0x54f   : > { %v2247_v55 = vpop.xlane.xlu0 %2246 }
 0x550   : > { %v2269_v62 = vsub.f32 %v9395_v38, %v2247_v55  ;;  %v7462_v38 = vpop.eup %7461 }
 0x551   : > { %v1843_v26 = vmul.f32 %v7462_v38, %v9417_v27 }
 0x552   : > { %v2297_v41 = vmul.f32 1.442695, %v2269_v62 }
 0x553   : > { %v1786_v54 = vpop.xlane.xlu0 %1785 }
 0x554   : > { %7463 = vpow2.f32 %v2297_v41 }
 0x555   : > { %7465 = vrcp.f32 %v1786_v54 }
 0x556   : > { %7467 = vpow2.f32 %v2301_v19 }
 0x557   : > { %7469 = vrcp.f32 %v1789_v9  ;;  %v1780_v14 = vpop.xlane.xlu0 %1779 }
 0x558   : > { %7471 = vrcp.f32 %v1780_v14 }
 0x559   : > { %7473 = vpow2.f32 %v2303_v56 }
 0x55b   : > { %v1798_v6 = vpop.xlane.xlu0 %1797 }
 0x55c   : > { %7475 = vrcp.f32 %v1798_v6 }
 0x55d   : > { %7477 = vrcp.f32 %v1795_v39 }
 0x55e   : > { %v9568_v33 = vpop.eup %7463  ;;  %7479 = vrcp.f32 %v1801_v53 }
 0x55f   : > { %v7466_v25 = vpop.eup %7465  ;;  %v1792_v30 = vpop.xlane.xlu0 %1791  ;;  %v2341_v37 = vsel %vm1516_vm5, %v9568_v33, 0.0 }
 0x560   : > { %v9572_v45 = vpop.eup %7467  ;;  %7481 = vrcp.f32 %v1792_v30  ;;  %2342 = vadd.xlane.f32.xlu0 %v2341_v37  ;;  %v1844_v15 = vmul.f32 %v7466_v25, %v9437_v58 }
 0x561   : > { %v7470_v32 = vpop.eup %7469  ;;  %v2347_v43 = vsel %vm1516_vm5, %v9572_v45, 0.0 }
 0x562   : > { %v7472_v52 = vpop.eup %7471  ;;  %v1845_v47 = vmul.f32 %v7470_v32, %v9413_v60 }
 0x563   : > { %v1842_v46 = vmul.f32 %v7472_v52, %v9441_v23  ;;  %v9579_v63 = vpop.eup %7473 }
 0x564   : > { %2348 = vadd.xlane.f32.xlu0 %v2347_v43  ;;  %v1859_v21 = vpack.c.bf16 %v1845_v47, %v1844_v15  ;;  %v2350_v58 = vsel %vm1516_vm5, %v9579_v63, 0.0 }
 0x565   : > { %v1858_v31 = vpack.c.bf16 %v1843_v26, %v1842_v46 }
 0x566   : > { %2345 = vadd.xlane.f32.xlu1 %v2344_v57  ;;  %v7476_v9 = vpop.eup %7475 }
 0x567   : > { %6641 = vmatprep.mubr.msk.bf16.mxu1 %vm1516_vm5, %v1858_v31  ;;  %v7478_v23 = vpop.eup %7477  ;;  %v1848_v36 = vmul.f32 %v7476_v9, %v9445_v51 }
 0x568   : > { %2351 = vadd.xlane.f32.xlu0 %v2350_v58  ;;  %6642 = vmatmul.mubr.msk.bf16.vlgmr.msra.gmra.mrb[0].mxu1 %vm1516_vm5, %v1859_v21  ;;  %v7480_v27 = vpop.eup %7479  ;;  %v1847_v59 = vmul.f32 %v7478_v23, %v9426_v49 }
 0x569   : > { %6682 = vmatpush3.bf16.msra.mxu1 %v9522_v11  ;;  %v1849_v1 = vmul.f32 %v7480_v27, %v9421_v7 }
 0x56a   : > { %v7482_v60 = vpop.eup %7481 }
 0x56b   : > { %v1846_v4 = vmul.f32 %v7482_v60, %v9449_v20  ;;  %v1861_v55 = vpack.c.bf16 %v1849_v1, %v1848_v36 }
 0x56d   : > { %v1860_v48 = vpack.c.bf16 %v1847_v59, %v1846_v4 }
 0x56f   : > { %6645 = vmatprep.mubr.msk.bf16.mxu1 %vm1516_vm5, %v1860_v48 }
 0x570   : > { %6646 = vmatmul.mubr.msk.bf16.gmra.mrb[4].mxu1 %vm1516_vm5, %v1861_v55 }
 0x58a   : > { %v1810_v62 = vpop.xlane.xlu0 %1809 }
 0x58c   : > { %v1813_v16 = vpop.xlane.xlu1 %1812 }
 0x58d   : > { %7483 = vrcp.f32 %v1813_v16 }
 0x58e   : > { %v1804_v19 = vpop.xlane.xlu0 %1803 }
 0x58f   : > { %7485 = vrcp.f32 %v1804_v19 }
 0x590   : > { %7487 = vrcp.f32 %v1810_v62  ;;  %v1807_v11 = vpop.xlane.xlu1 %1806 }
 0x591   : > { %7489 = vrcp.f32 %v1807_v11 }
 0x597   : > { %v7484_v41 = vpop.eup %7483 }
 0x598   : > { %v1822_v51 = vpop.xlane.xlu0 %1821  ;;  %v1853_v14 = vmul.f32 %v7484_v41, %v9464_v28 }
 0x599   : > { %v7486_v49 = vpop.eup %7485 }
 0x59a   : > { %v1825_v20 = vpop.xlane.xlu1 %1824  ;;  %v7488_v54 = vpop.eup %7487  ;;  %v1850_v39 = vmul.f32 %v7486_v49, %v9469_v50 }
 0x59b   : > { %7491 = vrcp.f32 %v1825_v20  ;;  %v7490_v53 = vpop.eup %7489  ;;  %v1852_v38 = vmul.f32 %v7488_v54, %v9459_v34 }
 0x59c   : > { %v1816_v7 = vpop.xlane.xlu0 %1815  ;;  %v1851_v6 = vmul.f32 %v7490_v53, %v9473_v35 }
 0x59d   : > { %7493 = vrcp.f32 %v1816_v7  ;;  %v1863_v37 = vpack.c.bf16 %v1853_v14, %v1852_v38 }
 0x59e   : > { %7495 = vrcp.f32 %v1822_v51  ;;  %v1819_v56 = vpop.xlane.xlu1 %1818  ;;  %v1862_v30 = vpack.c.bf16 %v1851_v6, %v1850_v39 }
 0x59f   : > { %7497 = vrcp.f32 %v1819_v56 }
 0x5a0   : > { %v2313_v25 = vpop.xlane.xlu0 %2312  ;;  %6649 = vmatprep.mubr.msk.bf16.mxu1 %vm1516_vm5, %v1862_v30 }
 0x5a1   : > { %6650 = vmatmul.mubr.msk.bf16.gmra.mrb[8].mxu1 %vm1516_vm5, %v1863_v37 }
 0x5a2   : > { %v2316_v32 = vpop.xlane.xlu1 %2315 }
 0x5a4   : > { %v2307_v52 = vpop.xlane.xlu0 %2306 }
 0x5a5   : > { %v7492_v15 = vpop.eup %7491  ;;  %7499 = vrcp.f32 %v2307_v52 }
 0x5a6   : > { %v2310_v28 = vpop.xlane.xlu1 %2309  ;;  %v1857_v35 = vmul.f32 %v7492_v15, %v9485_v61 }
 0x5a7   : > { %v7494_v43 = vpop.eup %7493  ;;  %7501 = vrcp.f32 %v2310_v28 }
 0x5a8   : > { %v7496_v46 = vpop.eup %7495  ;;  %v1854_v34 = vmul.f32 %v7494_v43, %v9490_v24  ;;  %v2325_v36 = vpop.xlane.xlu0 %2324  ;;  %7503 = vrcp.f32 %v2316_v32 }
 0x5a9   : > { %v7498_v50 = vpop.eup %7497  ;;  %v1856_v57 = vmul.f32 %v7496_v46, %v9480_v12 }
 0x5aa   : > { %v1855_v26 = vmul.f32 %v7498_v50, %v9495_v22  ;;  %v2328_v47 = vpop.xlane.xlu1 %2327 }
 0x5ab   : > { %v1865_v21 = vpack.c.bf16 %v1857_v35, %v1856_v57 }
 0x5ac   : > { %v1864_v31 = vpack.c.bf16 %v1855_v26, %v1854_v34  ;;  %v2319_v4 = vpop.xlane.xlu0 %2318 }
 0x5ae   : > { %6653 = vmatprep.mubr.msk.bf16.mxu1 %vm1516_vm5, %v1864_v31  ;;  %v2322_v9 = vpop.xlane.xlu1 %2321 }
 0x5af   : > { %6654 = vmatmul.mubr.msk.bf16.gmra.mrb[12].mxu1 %vm1516_vm5, %v1865_v21  ;;  %v7500_v58 = vpop.eup %7499  ;;  %7505 = vrcp.f32 %v2322_v9 }
 0x5b0   : > { %v2369_v60 = vmul.f32 %v7500_v58, %v9510_v2  ;;  %7507 = vrcp.f32 %v2313_v25  ;;  %v2402_v1 = vpop.permute.xlu0 %2401 }
 0x5b1   : > { %v7502_v23 = vpop.eup %7501  ;;  %7509 = vrcp.f32 %v2319_v4  ;;  %v6962_v4 = vld [vmem:[#allocation9 + $0x34] ss:$8 sps:$4 sm:$0xff]  }
 0x5b2   : > { %v2337_v27 = vpop.xlane.xlu1 %2336  ;;  %v2370_v61 = vmul.f32 %v7502_v23, %v9514_v13  ;;  %7511 = vrcp.f32 %v2328_v47  ;;  %v7504_v2 = vpop.eup %7503  ;;  %v6951_v23 = vld [vmem:[#allocation9] ss:$8 sps:$4 sm:$0xff]  }
 0x5b3   : > { %v2372_v19 = vmul.f32 %v7504_v2, %v9505_v42 }
 0x5b4   : > { %v2385_v24 = vpack.c.bf16 %v2370_v61, %v2369_v60  ;;  %v2404_v62 = vpop.permute.xlu0 %2403  ;;  %v6956_v60 = vld [vmem:[#allocation9 + $0x14] ss:$8 sps:$4 sm:$0xff]   ;;  %v6954_v61 = vld [vmem:[#allocation9 + $0x10] ss:$8 sps:$4 sm:$0xff]  }
 0x5b6   : > { %v2331_v22 = vpop.xlane.xlu1 %2330  ;;  %6689 = vmatprep.mubr.msk.bf16.mxu1 %vm1516_vm5, %v2385_v24  ;;  %v6959_v24 = vld [vmem:[#allocation9 + $0x24] ss:$8 sps:$4 sm:$0xff]  }
 0x5b9   : > { %v7506_v13 = vpop.eup %7505 }
 0x5ba   : > { %v2340_v12 = vpop.xlane.xlu1 %2339  ;;  %v7508_v55 = vpop.eup %7507  ;;  %v2374_v11 = vmul.f32 %v7506_v13, %v9536_v40  ;;  %v6960_v13 = vld [vmem:[#allocation9 + $0x30] ss:$8 sps:$4 sm:$0xff]  }
 0x5bb   : > { %v7510_v16 = vpop.eup %7509  ;;  %v2371_v51 = vmul.f32 %v7508_v55, %v9500_v8  ;;  %v6965_v55 = vld [vmem:[#allocation9 + $0x44] ss:$8 sps:$4 sm:$0xff]  }
 0x5bc   : > { %v2373_v20 = vmul.f32 %v7510_v16, %v9532_v3  ;;  %v7512_v49 = vpop.eup %7511  ;;  %v6968_v16 = vld [vmem:[#allocation9 + $0x54] ss:$8 sps:$4 sm:$0xff]  }
 0x5bd   : > { %v2386_v41 = vpack.c.bf16 %v2372_v19, %v2371_v51  ;;  %v2376_v56 = vmul.f32 %v7512_v49, %v9526_v10  ;;  %v6966_v51 = vld [vmem:[#allocation9 + $0x50] ss:$8 sps:$4 sm:$0xff]  }
 0x5be   : > { %v2334_v59 = vpop.xlane.xlu1 %2333  ;;  %v2387_v7 = vpack.c.bf16 %v2374_v11, %v2373_v20 }
 0x5bf   : > { %7513 = vrcp.f32 %v2334_v59 }
 0x5c0   : > { %7515 = vrcp.f32 %v2325_v36 }
 0x5c1   : > { %7517 = vrcp.f32 %v2331_v22  ;;  %v6957_v22 = vld [vmem:[#allocation9 + $0x20] ss:$8 sps:$4 sm:$0xff]  }
 0x5c2   : > { %v2400_v48 = vpop.permute.xlu1 %2399  ;;  %7519 = vrcp.f32 %v2340_v12 }
 0x5c3   : > { %6683 = vmatprep.subr.bf16.mxu1 %v2400_v48  ;;  %7521 = vrcp.f32 %v2337_v27  ;;  %v6953_v27 = vld [vmem:[#allocation9 + $0x4] ss:$8 sps:$4 sm:$0xff]  }
 0x5c4   : > { %6684 = vmatpush3.bf16.msra.mxu1 %v2400_v48  ;;  %2762 = vmatprep.subr.bf16.mxu0 %v6953_v27 }
 0x5c5   : > { %6685 = vmatprep.subr.bf16.mxu1 %v2402_v1  ;;  %2763 = vmatpush1.bf16.msra.mxu0 %v6951_v23 }
 0x5c6   : > { %2764 = vmatprep.subr.bf16.mxu0 %v6956_v60 }
 0x5c8   : > { %6686 = vmatpush3.bf16.msra.mxu1 %v2402_v1 }
 0x5c9   : > { %6687 = vmatprep.subr.bf16.mxu1 %v2404_v62  ;;  %v7514_v54 = vpop.eup %7513  ;;  %2765 = vmatpush1.bf16.msra.mxu0 %v6954_v61 }
 0x5ca   : > { %v7516_v53 = vpop.eup %7515  ;;  %v2378_v40 = vmul.f32 %v7514_v54, %v9552_v29  ;;  %2766 = vmatprep.subr.bf16.mxu0 %v6959_v24 }
 0x5cb   : > { %v7518_v42 = vpop.eup %7517  ;;  %v2375_v8 = vmul.f32 %v7516_v53, %v9520_v5  ;;  %v6969_v53 = vld [vmem:[#allocation9 + $0x60] ss:$8 sps:$4 sm:$0xff]  }
 0x5cc   : > { %6688 = vmatpush3.bf16.msra.mxu1 %v2404_v62  ;;  %v2377_v14 = vmul.f32 %v7518_v42, %v9544_v17  ;;  %v7520_v39 = vpop.eup %7519  ;;  %v6963_v62 = vld [vmem:[#allocation9 + $0x40] ss:$8 sps:$4 sm:$0xff]   ;;  %v6974_v42 = vld [vmem:[#allocation9 + $0x74] ss:$8 sps:$4 sm:$0xff]  }
 0x5cd   : > { %v2388_v3 = vpack.c.bf16 %v2376_v56, %v2375_v8  ;;  %v7522_v38 = vpop.eup %7521  ;;  %v2380_v25 = vmul.f32 %v7520_v39, %v9548_v44  ;;  %2767 = vmatpush1.bf16.msra.mxu0 %v6957_v22  ;;  %v6972_v56 = vld [vmem:[#allocation9 + $0x70] ss:$8 sps:$4 sm:$0xff]   ;;  %v6975_v8 = vld [vmem:[#allocation9 + $0x80] ss:$8 sps:$4 sm:$0xff]   ;;  %v6983_v39 = vld [vmem:[#allocation9 + $0xa4] ss:$8 sps:$4 sm:$0xff]  }
 0x5ce   : > { %v2389_v6 = vpack.c.bf16 %v2378_v40, %v2377_v14  ;;  %v2379_v30 = vmul.f32 %v7522_v38, %v9540_v0  ;;  %2768 = vmatprep.subr.bf16.mxu0 %v6962_v4  ;;  %v6977_v40 = vld [vmem:[#allocation9 + $0x84] ss:$8 sps:$4 sm:$0xff]   ;;  %v6980_v14 = vld [vmem:[#allocation9 + $0x94] ss:$8 sps:$4 sm:$0xff]  }
 0x5cf   : > { %6690 = vmatmul.mubr.msk.bf16.vlgmr.msra.gmra.mrb[16].mxu1 %vm1516_vm5, %v2386_v41  ;;  %v6971_v41 = vld [vmem:[#allocation9 + $0x64] ss:$8 sps:$4 sm:$0xff]   ;;  %v6986_v38 = vld [vmem:[#allocation9 + $0xb4] ss:$8 sps:$4 sm:$0xff]  }
 0x5d0   : > { %6693 = vmatprep.mubr.msk.bf16.mxu1 %vm1516_vm5, %v2387_v7  ;;  %v2390_v37 = vpack.c.bf16 %v2380_v25, %v2379_v30  ;;  %v6984_v25 = vld [vmem:[#allocation9 + $0xb0] ss:$8 sps:$4 sm:$0xff]   ;;  %v6989_v30 = vld [vmem:[#allocation9 + $0xc4] ss:$8 sps:$4 sm:$0xff]  }
 0x5d1   : > { %2769 = vmatpush1.bf16.msra.mxu0 %v6960_v13 }
 0x5d2   : > { %2770 = vmatprep.subr.bf16.mxu0 %v6965_v55 }
 0x5d5   : > { %2771 = vmatpush1.bf16.msra.mxu0 %v6963_v62 }
 0x5d6   : > { %2772 = vmatprep.subr.bf16.mxu0 %v6968_v16 }
 0x5d7   : > { %6694 = vmatmul.mubr.msk.bf16.gmra.mrb[20].mxu1 %vm1516_vm5, %v2388_v3  ;;  %v6978_v3 = vld [vmem:[#allocation9 + $0x90] ss:$8 sps:$4 sm:$0xff]  }
 0x5d8   : > { %6697 = vmatprep.mubr.msk.bf16.mxu1 %vm1516_vm5, %v2389_v6  ;;  %v6981_v6 = vld [vmem:[#allocation9 + $0xa0] ss:$8 sps:$4 sm:$0xff]  }
 0x5d9   : > { %2773 = vmatpush1.bf16.msra.mxu0 %v6966_v51 }
 0x5da   : > { %2774 = vmatprep.subr.bf16.mxu0 %v6971_v41  ;;  %v7001_v41 = vld [vmem:[#allocation11 + $0x4] ss:$44 sps:$4 sm:$0xff]  }
 0x5db   : > { %4055 = vmatprep.subr.bf16.mxu1 %v7001_v41 }
 0x5dd   : > { %2775 = vmatpush1.bf16.msra.mxu0 %v6969_v53  ;;  %v7010_v53 = vld [vmem:[#allocation11 + $0x64] ss:$44 sps:$4 sm:$0xff]  }
 0x5de   : > { %2776 = vmatprep.subr.bf16.mxu0 %v6974_v42  ;;  %v7005_v42 = vld [vmem:[#allocation11 + $0x58] ss:$44 sps:$4 sm:$0xff]  }
 0x5df   : > { %6698 = vmatmul.mubr.msk.bf16.gmra.mrb[24].mxu1 %vm1516_vm5, %v2390_v37  ;;  %v6987_v37 = vld [vmem:[#allocation9 + $0xc0] ss:$8 sps:$4 sm:$0xff]  }
 0x5e1   : > { %2777 = vmatpush1.bf16.msra.mxu0 %v6972_v56  ;;  %v7008_v56 = vld [vmem:[#allocation11 + $0x60] ss:$44 sps:$4 sm:$0xff]  }
 0x5e2   : > { %2778 = vmatprep.subr.bf16.mxu0 %v6977_v40  ;;  %v7013_v40 = vld [vmem:[#allocation11 + $0xb4] ss:$44 sps:$4 sm:$0xff]  }
 0x5e5   : > { %2779 = vmatpush1.bf16.msra.mxu0 %v6975_v8  ;;  %v7016_v8 = vld [vmem:[#allocation11 + $0xbc] ss:$44 sps:$4 sm:$0xff]  }
 0x5e6   : > { %2780 = vmatprep.subr.bf16.mxu0 %v6980_v14  ;;  %v7011_v14 = vld [vmem:[#allocation11 + $0xb0] ss:$44 sps:$4 sm:$0xff]  }
 0x5e9   : > { %2781 = vmatpush1.bf16.msra.mxu0 %v6978_v3  ;;  %v7014_v3 = vld [vmem:[#allocation11 + $0xb8] ss:$44 sps:$4 sm:$0xff]  }
 0x5ea   : > { %2782 = vmatprep.subr.bf16.mxu0 %v6983_v39  ;;  %v7019_v39 = vld [vmem:[#allocation11 + $0x10c] ss:$44 sps:$4 sm:$0xff]  }
 0x5ed   : > { %v2343_v10 = vpop.xlane.xlu0 %2342  ;;  %2783 = vmatpush1.bf16.msra.mxu0 %v6981_v6  ;;  %v7022_v6 = vld [vmem:[#allocation11 + $0x114] ss:$44 sps:$4 sm:$0xff]  }
 0x5ee   : > { %7523 = vrcp.f32 %v2343_v10  ;;  %2784 = vmatprep.subr.bf16.mxu0 %v6986_v38  ;;  %v6992_v10 = vld [vmem:[#allocation9 + $0xd4] ss:$8 sps:$4 sm:$0xff]  }
 0x5ef   : > { %v7017_v38 = vld [vmem:[#allocation11 + $0x108] ss:$44 sps:$4 sm:$0xff]  }
 0x5f1   : > { %v2349_v29 = vpop.xlane.xlu0 %2348  ;;  %2785 = vmatpush1.bf16.msra.mxu0 %v6984_v25  ;;  %v7020_v25 = vld [vmem:[#allocation11 + $0x110] ss:$44 sps:$4 sm:$0xff]  }
 0x5f2   : > { %7525 = vrcp.f32 %v2349_v29  ;;  %2786 = vmatprep.subr.bf16.mxu0 %v6989_v30  ;;  %v7025_v30 = vld [vmem:[#allocation11 + $0x164] ss:$44 sps:$4 sm:$0xff]  }
 0x5f3   : > { %v2346_v5 = vpop.xlane.xlu1 %2345 }
 0x5f4   : > { %7527 = vrcp.f32 %v2346_v5  ;;  %v6990_v5 = vld [vmem:[#allocation9 + $0xd0] ss:$8 sps:$4 sm:$0xff]  }
 0x5f5   : > { %v2352_v17 = vpop.xlane.xlu0 %2351  ;;  %2787 = vmatpush1.bf16.msra.mxu0 %v6987_v37  ;;  %v7028_v37 = vld [vmem:[#allocation11 + $0x16c] ss:$44 sps:$4 sm:$0xff]  }
 0x5f6   : > { %7529 = vrcp.f32 %v2352_v17  ;;  %2788 = vmatprep.subr.bf16.mxu0 %v6992_v10  ;;  %v7023_v10 = vld [vmem:[#allocation11 + $0x160] ss:$44 sps:$4 sm:$0xff]  }
 0x5f8   : > { %v7524_v32 = vpop.eup %7523 }
 0x5f9   : > { %v2381_v43 = vmul.f32 %v7524_v32, %v9568_v33  ;;  %2789 = vmatpush1.bf16.msra.mxu0 %v6990_v5  ;;  %v7031_v5 = vld [vmem:[#allocation11 + $0x1bc] ss:$44 sps:$4 sm:$0xff]  }
 0x5fc   : > { %v7526_v52 = vpop.eup %7525 }
 0x5fd   : > { %v2383_v46 = vmul.f32 %v7526_v52, %v9572_v45 }
 0x5fe   : > { %v7528_v15 = vpop.eup %7527 }
 0x5ff   : > { %v2382_v44 = vmul.f32 %v7528_v15, %v9566_v18 }
 0x600   : > { %v7530_v28 = vpop.eup %7529 }
 0x601   : > { %v2391_v0 = vpack.c.bf16 %v2382_v44, %v2381_v43  ;;  %v2384_v50 = vmul.f32 %v7530_v28, %v9579_v63 }
 0x603   : > { %6701 = vmatprep.mubr.msk.bf16.mxu1 %vm1516_vm5, %v2391_v0  ;;  %v2392_v35 = vpack.c.bf16 %v2384_v50, %v2383_v46  ;;  %v6993_v0 = vld [vmem:[#allocation9 + $0xe0] ss:$8 sps:$4 sm:$0xff]   ;;  %v6995_v46 = vld [vmem:[#allocation9 + $0xe4] ss:$8 sps:$4 sm:$0xff]  }
 0x604   : > { %2790 = vmatprep.subr.bf16.mxu0 %v6995_v46  ;;  %v7046_v46 = vld [vmem:[#allocation11 + $0x274] ss:$44 sps:$4 sm:$0xff]  }
 0x605   : > { %6702 = vmatmul.mubr.msk.bf16.gmra.mrb[28].mxu1 %vm1516_vm5, %v2392_v35  ;;  %2791 = vmatpush1.bf16.msra.mxu0 %v6993_v0  ;;  %v7043_v0 = vld [vmem:[#allocation11 + $0x26c] ss:$44 sps:$4 sm:$0xff]  }
 0x63b   : > { %v6643_v34 = vpop.f32.mrb[0].mxu1 }
 0x63c   : > { %v1924_v26 = vpop.f32.mrb[1].mxu1 }
 0x63d   : > { %v6644_v47 = vpop.f32.mrb[2].mxu1 }
 0x63e   : > { %v1988_v57 = vpack.c.bf16 %v6644_v47, %v6643_v34  ;;  %v1927_v31 = vpop.f32.mrb[3].mxu1  ;;  %v6996_v47 = vld [vmem:[#allocation9 + $0xf0] ss:$8 sps:$4 sm:$0xff]  }
 0x63f   : > { %v1987_v21 = vpack.c.bf16 %v1927_v31, %v1924_v26 }
 0x640   : > { %1992 = vst.msk [vmem:[#allocation2 + $0x10] sm:$0xff] %vm1516_vm5, %v1988_v57  ;;  %v6998_v57 = vld [vmem:[#allocation9 + $0xf4] ss:$8 sps:$4 sm:$0xff]  }
 0x641   : > { %1991 = vst.msk [vmem:[#allocation2] sm:$0xff] %vm1516_vm5, %v1987_v21  ;;  %2792 = vmatprep.subr.bf16.mxu0 %v6998_v57  ;;  %v7050_v57 = vld [vmem:[#allocation11 + $0x2c8] ss:$44 sps:$4 sm:$0xff]  }
 0x642   : > { %2793 = vmatpush1.bf16.msra.mxu0 %v6996_v47  ;;  %v7047_v47 = vld [vmem:[#allocation11 + $0x2c0] ss:$44 sps:$4 sm:$0xff]  }
 0x643   : > { %v6647_v18 = vpop.f32.mrb[4].mxu1 }
 0x644   : > { %v1940_v33 = vpop.f32.mrb[5].mxu1 }
 0x645   : > { %v6648_v45 = vpop.f32.mrb[6].mxu1 }
 0x646   : > { %v1990_v9 = vpack.c.bf16 %v6648_v45, %v6647_v18  ;;  %v1943_v63 = vpop.f32.mrb[7].mxu1 }
 0x647   : > { %v1989_v58 = vpack.c.bf16 %v1943_v63, %v1940_v33 }
 0x648   : > { %1994 = vst.msk [vmem:[#allocation2 + $0x30] sm:$0xff] %vm1516_vm5, %v1990_v9 }
 0x649   : > { %1993 = vst.msk [vmem:[#allocation2 + $0x20] sm:$0xff] %vm1516_vm5, %v1989_v58 }
 0x674   : > { %v9635_v36 = vpop.f32.mrb[8].mxu1 }
 0x675   : > { %v1956_v12 = vpop.f32.mrb[9].mxu1 }
 0x676   : > { %v9637_v59 = vpop.f32.mrb[10].mxu1 }
 0x677   : > { %v1996_v1 = vpack.c.bf16 %v9637_v59, %v9635_v36  ;;  %v1959_v48 = vpop.f32.mrb[11].mxu1 }
 0x678   : > { %v1995_v2 = vpack.c.bf16 %v1959_v48, %v1956_v12 }
 0x67a   : > { %2003 = vrot.lane.b32.xlu1 %v1995_v2, %s8037_s27 }
 0x682   : > { %v9642_v19 = vpop.f32.mrb[12].mxu1 }
 0x683   : > { %v9644_v11 = vpop.f32.mrb[13].mxu1 }
 0x684   : > { %v9646_v20 = vpop.f32.mrb[14].mxu1 }
 0x685   : > { %v1998_v49 = vpack.c.bf16 %v9646_v20, %v9642_v19  ;;  %v9650_v7 = vpop.f32.mrb[15].mxu1  ;;  %v6999_v20 = vld [vmem:[#allocation11] ss:$44 sps:$4 sm:$0xff]  }
 0x686   : > { %v1997_v54 = vpack.c.bf16 %v9650_v7, %v9644_v11  ;;  %v7004_v7 = vld [vmem:[#allocation11 + $0xc] ss:$44 sps:$4 sm:$0xff]   ;;  %4056 = vmatpush1.bf16.msra.mxu1 %v6999_v20 }
 0x687   : > { %4128 = vmatprep.subr.bf16.mxu0 %v7004_v7 }
 0x6a2   : > { %v6691_v29 = vpop.f32.mrb[16].mxu1 }
 0x6a3   : > { %v2467_v17 = vpop.f32.mrb[17].mxu1 }
 0x6a4   : > { %v6692_v32 = vpop.f32.mrb[18].mxu1 }
 0x6a5   : > { %v2531_v52 = vpack.c.bf16 %v6692_v32, %v6691_v29  ;;  %v2470_v15 = vpop.f32.mrb[19].mxu1  ;;  %v7026_v29 = vld [vmem:[#allocation11 + $0x168] ss:$44 sps:$4 sm:$0xff]   ;;  %v7029_v32 = vld [vmem:[#allocation11 + $0x1b8] ss:$44 sps:$4 sm:$0xff]  }
 0x6a6   : > { %v2530_v43 = vpack.c.bf16 %v2470_v15, %v2467_v17  ;;  %v7034_v17 = vld [vmem:[#allocation11 + $0x1c4] ss:$44 sps:$4 sm:$0xff]   ;;  %v7037_v15 = vld [vmem:[#allocation11 + $0x214] ss:$44 sps:$4 sm:$0xff]  }
 0x6a7   : > { %2535 = vst.msk [vmem:[#allocation2 + $0x18] sm:$0xff] %vm1516_vm5, %v2531_v52  ;;  %v7032_v52 = vld [vmem:[#allocation11 + $0x1c0] ss:$44 sps:$4 sm:$0xff]  }
 0x6a8   : > { %2534 = vst.msk [vmem:[#allocation2 + $0x8] sm:$0xff] %vm1516_vm5, %v2530_v43  ;;  %v7040_v43 = vld [vmem:[#allocation11 + $0x21c] ss:$44 sps:$4 sm:$0xff]  }
 0x6aa   : > { %v6695_v44 = vpop.f32.mrb[20].mxu1 }
 0x6ab   : > { %v2483_v28 = vpop.f32.mrb[21].mxu1 }
 0x6ac   : > { %v6696_v50 = vpop.f32.mrb[22].mxu1 }
 0x6ad   : > { %v2533_v35 = vpack.c.bf16 %v6696_v50, %v6695_v44  ;;  %v2486_v34 = vpop.f32.mrb[23].mxu1  ;;  %v7035_v44 = vld [vmem:[#allocation11 + $0x210] ss:$44 sps:$4 sm:$0xff]   ;;  %v7041_v50 = vld [vmem:[#allocation11 + $0x268] ss:$44 sps:$4 sm:$0xff]  }
 0x6ae   : > { %v2532_v26 = vpack.c.bf16 %v2486_v34, %v2483_v28  ;;  %v7038_v28 = vld [vmem:[#allocation11 + $0x218] ss:$44 sps:$4 sm:$0xff]  }
 0x6af   : > { %2537 = vst.msk [vmem:[#allocation2 + $0x38] sm:$0xff] %vm1516_vm5, %v2533_v35  ;;  %v7044_v35 = vld [vmem:[#allocation11 + $0x270] ss:$44 sps:$4 sm:$0xff]  }
 0x6b0   : > { %2536 = vst.msk [vmem:[#allocation2 + $0x28] sm:$0xff] %vm1516_vm5, %v2532_v26  ;;  %v7049_v34 = vld [vmem:[#allocation11 + $0x2c4] ss:$44 sps:$4 sm:$0xff]   ;;  %v7052_v26 = vld [vmem:[#allocation11 + $0x2cc] ss:$44 sps:$4 sm:$0xff]  }
 0x6b2   : > { %v6699_v31 = vpop.f32.mrb[24].mxu1 }
 0x6b3   : > { %v2499_v21 = vpop.f32.mrb[25].mxu1 }
 0x6b4   : > { %v6700_v18 = vpop.f32.mrb[26].mxu1 }
 0x6b5   : > { %v2539_v33 = vpack.c.bf16 %v6700_v18, %v6699_v31  ;;  %v2502_v45 = vpop.f32.mrb[27].mxu1  ;;  %v7055_v31 = vld [vmem:[#allocation11 + $0x31c] ss:$44 sps:$4 sm:$0xff]   ;;  %v7053_v18 = vld [vmem:[#allocation11 + $0x318] ss:$44 sps:$4 sm:$0xff]  }
 0x6b6   : > { %v2538_v9 = vpack.c.bf16 %v2502_v45, %v2499_v21  ;;  %v7058_v21 = vld [vmem:[#allocation11 + $0x324] ss:$44 sps:$4 sm:$0xff]   ;;  %v7061_v45 = vld [vmem:[#allocation11 + $0x374] ss:$44 sps:$4 sm:$0xff]  }
 0x6b7   : > { %2548 = vrot.lane.b32.xlu1 %v2539_v33, %s8037_s27  ;;  %v7056_v33 = vld [vmem:[#allocation11 + $0x320] ss:$44 sps:$4 sm:$0xff]  }
 0x6b8   : > { %2546 = vrot.lane.b32.xlu0 %v2538_v9, %s8037_s27  ;;  %v7064_v9 = vld [vmem:[#allocation11 + $0x37c] ss:$44 sps:$4 sm:$0xff]  }
 0x6bb   : > { %2005 = vrot.lane.b32.xlu1 %v1996_v1, %s8037_s27 }
 0x6bf   : > { %2007 = vrot.lane.b32.xlu1 %v1997_v54, %s8037_s27  ;;  %v7007_v54 = vld [vmem:[#allocation11 + $0x5c] ss:$44 sps:$4 sm:$0xff]  }
 0x6c0   : > { %4057 = vmatprep.subr.bf16.mxu1 %v7007_v54 }
 0x6c1   : > { %4058 = vmatpush1.bf16.msra.mxu1 %v7005_v42  ;;  %v7761_v42 = vld [vmem:[%s8341_s23 + $0x30] sm:$0xff] }
 0x6c2   : > { %4059 = vmatprep.subr.bf16.mxu1 %v7013_v40 }
 0x6c3   : > { %2009 = vrot.lane.b32.xlu1 %v1998_v49, %s8037_s27  ;;  %v7002_v49 = vld [vmem:[#allocation11 + $0x8] ss:$44 sps:$4 sm:$0xff]  }
 0x6c5   : > { %4060 = vmatpush1.bf16.msra.mxu1 %v7011_v14  ;;  %v7762_v14 = vld [vmem:[%s8341_s23 + $0x38] sm:$0xff] }
 0x6c6   : > { %4061 = vmatprep.subr.bf16.mxu1 %v7019_v39 }
 0x6c9   : > { %4062 = vmatpush1.bf16.msra.mxu1 %v7017_v38 }
 0x6ca   : > { %4063 = vmatprep.subr.bf16.mxu1 %v7025_v30  ;;  %v7067_v30 = vld [vmem:[#allocation11 + $0x3cc] ss:$44 sps:$4 sm:$0xff]  }
 0x6cd   : > { %4064 = vmatpush1.bf16.msra.mxu1 %v7023_v10  ;;  %v7065_v10 = vld [vmem:[#allocation11 + $0x3c8] ss:$44 sps:$4 sm:$0xff]  }
 0x6ce   : > { %4065 = vmatprep.subr.bf16.mxu1 %v7031_v5  ;;  %v7073_v5 = vld [vmem:[#allocation11 + $0x424] ss:$44 sps:$4 sm:$0xff]  }
 0x6d1   : > { %4066 = vmatpush1.bf16.msra.mxu1 %v7029_v32 }
 0x6d2   : > { %4067 = vmatprep.subr.bf16.mxu1 %v7037_v15  ;;  %v7074_v15 = vld [vmem:[#allocation11 + $0x428] ss:$44 sps:$4 sm:$0xff]  }
 0x6d5   : > { %4068 = vmatpush1.bf16.msra.mxu1 %v7035_v44 }
 0x6d6   : > { %4069 = vmatprep.subr.bf16.mxu1 %v7043_v0  ;;  %v7764_v0 = vld [vmem:[%s8341_s23 + $0x48] sm:$0xff] }
 0x6d8   : > { %v6703_v63 = vpop.f32.mrb[28].mxu1 }
 0x6d9   : > { %v2515_v58 = vpop.f32.mrb[29].mxu1  ;;  %4070 = vmatpush1.bf16.msra.mxu1 %v7041_v50 }
 0x6da   : > { %v6704_v23 = vpop.f32.mrb[30].mxu1  ;;  %4071 = vmatprep.subr.bf16.mxu1 %v7049_v34  ;;  %v7765_v34 = vld [vmem:[%s8341_s23 + $0x50] sm:$0xff] }
 0x6db   : > { %v2541_v27 = vpack.c.bf16 %v6704_v23, %v6703_v63  ;;  %v2518_v60 = vpop.f32.mrb[31].mxu1  ;;  %v7059_v63 = vld [vmem:[#allocation11 + $0x370] ss:$44 sps:$4 sm:$0xff]  }
 0x6dc   : > { %v2540_v61 = vpack.c.bf16 %v2518_v60, %v2515_v58  ;;  %v7062_v58 = vld [vmem:[#allocation11 + $0x378] ss:$44 sps:$4 sm:$0xff]  }
 0x6dd   : > { %4072 = vmatpush1.bf16.msra.mxu1 %v7047_v47 }
 0x6de   : > { %2550 = vrot.lane.b32.xlu0 %v2540_v61, %s8037_s27  ;;  %4073 = vmatprep.subr.bf16.mxu1 %v7055_v31  ;;  %v7082_v31 = vld [vmem:[#allocation11 + $0x484] ss:$44 sps:$4 sm:$0xff]  }
 0x6e1   : > { %4074 = vmatpush1.bf16.msra.mxu1 %v7053_v18  ;;  %v7766_v18 = vld [vmem:[%s8341_s23 + $0x58] sm:$0xff] }
 0x6e2   : > { %2552 = vrot.lane.b32.xlu0 %v2541_v27, %s8037_s27  ;;  %4075 = vmatprep.subr.bf16.mxu1 %v7061_v45  ;;  %v7755_v27 = vld [vmem:[%s8341_s23] sm:$0xff] }
 0x6e3   : > { %v7077_v45 = vld [vmem:[#allocation11 + $0x478] ss:$44 sps:$4 sm:$0xff]  }
 0x6e5   : > { %4076 = vmatpush1.bf16.msra.mxu1 %v7059_v63 }
 0x6e6   : > { %4077 = vmatprep.subr.bf16.mxu1 %v7067_v30 }
 0x6e9   : > { %4078 = vmatpush1.bf16.msra.mxu1 %v7065_v10 }
 0x6ea   : > { %4079 = vmatprep.subr.bf16.mxu1 %v7073_v5 }
 0x6ec   : > { %v2004_v24 = vpop.permute.xlu1 %2003 }
 0x6ed   : > { %2016 = vst.msk [vmem:[#allocation2] sm:$0xff] %vm2015_vm6, %v2004_v24  ;;  %v7756_v24 = vld [vmem:[%s8341_s23 + $0x8] sm:$0xff] }
 0x6f4   : > { %v2562_v1 = vld [vmem:[#allocation2] sm:$0xff] }
 0x729   : > { %v2549_v36 = vpop.permute.xlu1 %2548 }
 0x72a   : > { %2559 = vst.msk [vmem:[#allocation2 + $0x18] sm:$0xff] %vm2015_vm6, %v2549_v36  ;;  %v2547_v22 = vpop.permute.xlu0 %2546 }
 0x72b   : > { %2558 = vst.msk [vmem:[#allocation2 + $0x8] sm:$0xff] %vm2015_vm6, %v2547_v22 }
 0x72d   : > { %v2006_v12 = vpop.permute.xlu1 %2005 }
 0x72e   : > { %2017 = vst.msk [vmem:[#allocation2 + $0x10] sm:$0xff] %vm2015_vm6, %v2006_v12 }
 0x731   : > { %v2008_v4 = vpop.permute.xlu1 %2007  ;;  %v2565_v48 = vld [vmem:[#allocation2 + $0x18] sm:$0xff] }
 0x732   : > { %2018 = vst.msk [vmem:[#allocation2 + $0x20] sm:$0xff] %vm2015_vm6, %v2008_v4  ;;  %v2563_v59 = vld [vmem:[#allocation2 + $0x8] sm:$0xff]  ;;  %v7757_v4 = vld [vmem:[%s8341_s23 + $0x10] sm:$0xff] }
 0x733   : > { %2794 = vmatprep.mubr.bf16.mxu0 %v2563_v59 }
 0x734   : > { %2795 = vmatmul.mubr.bf16.vlgmr.msra.gmra.mrb[64].mxu0 %v2562_v1 }
 0x735   : > { %v2010_v2 = vpop.permute.xlu1 %2009  ;;  %2804 = vmatprep.mubr.bf16.mxu0 %v2565_v48  ;;  %v2564_v13 = vld [vmem:[#allocation2 + $0x10] sm:$0xff]  ;;  %4129 = vmatpush1.bf16.msra.mxu0 %v7002_v49  ;;  %v7760_v49 = vld [vmem:[%s8341_s23 + $0x28] sm:$0xff] }
 0x736   : > { %2019 = vst.msk [vmem:[#allocation2 + $0x30] sm:$0xff] %vm2015_vm6, %v2010_v2  ;;  %4130 = vmatprep.subr.bf16.mxu0 %v7010_v53  ;;  %v7758_v2 = vld [vmem:[%s8341_s23 + $0x18] sm:$0xff] }
 0x739   : > { %v2566_v19 = vld [vmem:[#allocation2 + $0x20] sm:$0xff]  ;;  %4131 = vmatpush1.bf16.msra.mxu0 %v7008_v56 }
 0x73a   : > { %4132 = vmatprep.subr.bf16.mxu0 %v7016_v8 }
 0x73c   : > { %2805 = vmatmul.mubr.bf16.gmra.mrb[68].mxu0 %v2564_v13 }
 0x73d   : > { %v2568_v51 = vld [vmem:[#allocation2 + $0x30] sm:$0xff]  ;;  %4133 = vmatpush1.bf16.msra.mxu0 %v7014_v3 }
 0x73e   : > { %4134 = vmatprep.subr.bf16.mxu0 %v7022_v6 }
 0x741   : > { %4135 = vmatpush1.bf16.msra.mxu0 %v7020_v25 }
 0x742   : > { %4136 = vmatprep.subr.bf16.mxu0 %v7028_v37  ;;  %v7070_v37 = vld [vmem:[#allocation11 + $0x3d4] ss:$44 sps:$4 sm:$0xff]  }
 0x745   : > { %4137 = vmatpush1.bf16.msra.mxu0 %v7026_v29  ;;  %v7068_v29 = vld [vmem:[#allocation11 + $0x3d0] ss:$44 sps:$4 sm:$0xff]  }
 0x746   : > { %4138 = vmatprep.subr.bf16.mxu0 %v7034_v17  ;;  %v7076_v17 = vld [vmem:[#allocation11 + $0x42c] ss:$44 sps:$4 sm:$0xff]  }
 0x749   : > { %4139 = vmatpush1.bf16.msra.mxu0 %v7032_v52  ;;  %v7071_v52 = vld [vmem:[#allocation11 + $0x420] ss:$44 sps:$4 sm:$0xff]  }
 0x74a   : > { %4140 = vmatprep.subr.bf16.mxu0 %v7040_v43  ;;  %v7763_v43 = vld [vmem:[%s8341_s23 + $0x40] sm:$0xff]  ;;  %4080 = vmatpush1.bf16.msra.mxu1 %v7071_v52 }
 0x74d   : > { %4141 = vmatpush1.bf16.msra.mxu0 %v7038_v28 }
 0x74e   : > { %4142 = vmatprep.subr.bf16.mxu0 %v7046_v46 }
 0x750   : > { %v2551_v55 = vpop.permute.xlu0 %2550 }
 0x751   : > { %2560 = vst.msk [vmem:[#allocation2 + $0x28] sm:$0xff] %vm2015_vm6, %v2551_v55  ;;  %4143 = vmatpush1.bf16.msra.mxu0 %v7044_v35 }
 0x752   : > { %4144 = vmatprep.subr.bf16.mxu0 %v7052_v26 }
 0x754   : > { %v2553_v62 = vpop.permute.xlu0 %2552 }
 0x755   : > { %2561 = vst.msk [vmem:[#allocation2 + $0x38] sm:$0xff] %vm2015_vm6, %v2553_v62  ;;  %4145 = vmatpush1.bf16.msra.mxu0 %v7050_v57  ;;  %v7079_v57 = vld [vmem:[#allocation11 + $0x47c] ss:$44 sps:$4 sm:$0xff]  }
 0x756   : > { %4146 = vmatprep.subr.bf16.mxu0 %v7058_v21  ;;  %4081 = vmatprep.subr.bf16.mxu1 %v7079_v57  ;;  %v10608_v57 = vld [vmem:[#allocation20_spill] sm:$0xff] }
 0x757   : > { %4082 = vmatpush1.bf16.msra.mxu1 %v7077_v45 }
 0x758   : > { %v2567_v16 = vld [vmem:[#allocation2 + $0x28] sm:$0xff] }
 0x759   : > { %2814 = vmatprep.mubr.bf16.mxu0 %v2567_v16  ;;  %4147 = vmatpush1.bf16.msra.mxu0 %v7056_v33 }
 0x75a   : > { %2815 = vmatmul.mubr.bf16.gmra.mrb[72].mxu0 %v2566_v19  ;;  %4148 = vmatprep.subr.bf16.mxu0 %v7064_v9  ;;  %v7080_v9 = vld [vmem:[#allocation11 + $0x480] ss:$44 sps:$4 sm:$0xff]  }
 0x75c   : > { %v2569_v11 = vld [vmem:[#allocation2 + $0x38] sm:$0xff] }
 0x75d   : > { %2824 = vmatprep.mubr.bf16.mxu0 %v2569_v11  ;;  %4149 = vmatpush1.bf16.msra.mxu0 %v7062_v58 }
 0x75e   : > { %4150 = vmatprep.subr.bf16.mxu0 %v7070_v37  ;;  %v7100_v37 = vld [vmem:[#allocation11 + $0x1c] ss:$44 sps:$4 sm:$0xff]  }
 0x761   : > { %4151 = vmatpush1.bf16.msra.mxu0 %v7068_v29 }
 0x762   : > { %2825 = vmatmul.mubr.bf16.gmra.mrb[76].mxu0 %v2568_v51  ;;  %v7759_v51 = vld [vmem:[%s8341_s23 + $0x20] sm:$0xff]  ;;  %4152 = vmatprep.subr.bf16.mxu0 %v7076_v17 }
 0x765   : > { %4153 = vmatpush1.bf16.msra.mxu0 %v7074_v15 }
 0x766   : > { %4154 = vmatprep.subr.bf16.mxu0 %v7082_v31  ;;  %v10609_v31 = vsub.s32 0, %v10608_v57 }
 0x769   : > { %4155 = vmatpush1.bf16.msra.mxu0 %v7080_v9 }
 0x807   : > { %v2796_v23 = vpop.f32.mrb[64].mxu0 }
 0x808   : > { %v9683_v60 = vadd.f32 %v7755_v27, %v2796_v23  ;;  %v2798_v61 = vpop.f32.mrb[65].mxu0  ;;  %v7085_v27 = vld [vmem:[#allocation11 + $0x4d4] ss:$44 sps:$4 sm:$0xff]  }
 0x809   : > { %v9686_v36 = vadd.f32 %v7756_v24, %v2798_v61  ;;  %v2800_v22 = vpop.f32.mrb[66].mxu0  ;;  %v7088_v61 = vld [vmem:[#allocation11 + $0x4dc] ss:$44 sps:$4 sm:$0xff]   ;;  %4083 = vmatprep.subr.bf16.mxu1 %v7085_v27 }
 0x80a   : > { %10591 = vst [vmem:[#allocation30_spill] sm:$0xff] %v9683_v60  ;;  %v2852_v12 = vmul.f32 %v9683_v60, %v9683_v60  ;;  %v9691_v59 = vadd.f32 %v7757_v4, %v2800_v22  ;;  %v2802_v1 = vpop.f32.mrb[67].mxu0  ;;  %v7086_v4 = vld [vmem:[#allocation11 + $0x4d8] ss:$44 sps:$4 sm:$0xff]   ;;  %4156 = vmatprep.subr.bf16.mxu0 %v7088_v61 }
 0x80b   : > { %10592 = vst [vmem:[#allocation29_spill] sm:$0xff] %v9686_v36  ;;  %v2853_v48 = vmul.f32 %v9686_v36, %v9686_v36  ;;  %v9696_v13 = vadd.f32 %v7758_v2, %v2802_v1  ;;  %v7767_v1 = vld [vmem:[%s8341_s23 + $0x60] sm:$0xff]  ;;  %4157 = vmatpush1.bf16.msra.mxu0 %v7086_v4 }
 0x80c   : > { %10593 = vst [vmem:[#allocation32_spill] sm:$0xff] %v9691_v59  ;;  %v2854_v55 = vmul.f32 %v9691_v59, %v9691_v59 }
 0x80d   : > { %10594 = vst [vmem:[#allocation34_spill] sm:$0xff] %v9696_v13  ;;  %v2855_v62 = vmul.f32 %v9696_v13, %v9696_v13  ;;  %v2868_v16 = vadd.f32 %v2853_v48, %v2852_v12  ;;  %v7083_v12 = vld [vmem:[#allocation11 + $0x4d0] ss:$44 sps:$4 sm:$0xff]  }
 0x80e   : > { %4084 = vmatpush1.bf16.msra.mxu1 %v7083_v12 }
 0x80f   : > { %2869 = vadd.xlane.f32.xlu0 %v2868_v16  ;;  %v2806_v19 = vpop.f32.mrb[68].mxu0  ;;  %v2871_v11 = vadd.f32 %v2855_v62, %v2854_v55  ;;  %v7768_v55 = vld [vmem:[%s8341_s23 + $0x68] sm:$0xff] }
 0x810   : > { %v9703_v20 = vadd.f32 %v7759_v51, %v2806_v19  ;;  %v2808_v41 = vpop.f32.mrb[69].mxu0 }
 0x811   : > { %v9706_v7 = vadd.f32 %v7760_v49, %v2808_v41  ;;  %2872 = vadd.xlane.f32.xlu1 %v2871_v11  ;;  %v2810_v54 = vpop.f32.mrb[70].mxu0  ;;  %v7769_v11 = vld [vmem:[%s8341_s23 + $0x70] sm:$0xff]  ;;  %v7091_v49 = vld [vmem:[#allocation11 + $0x52c] ss:$44 sps:$4 sm:$0xff]  }
 0x812   : > { %10595 = vst [vmem:[#allocation35_spill] sm:$0xff] %v9703_v20  ;;  %v2856_v53 = vmul.f32 %v9703_v20, %v9703_v20  ;;  %v9711_v56 = vadd.f32 %v7761_v42, %v2810_v54  ;;  %v2812_v40 = vpop.f32.mrb[71].mxu0  ;;  %v7094_v54 = vld [vmem:[#allocation11 + $0x534] ss:$44 sps:$4 sm:$0xff]   ;;  %v7770_v42 = vld [vmem:[%s8341_s23 + $0x78] sm:$0xff]  ;;  %4085 = vmatprep.subr.bf16.mxu1 %v7091_v49  ;;  %s7945_s23 = sshll.u32 %s8038_s5, 4  ;;  %s7946_s23 = int_to_ptr.vmem [resolvable:$false] %s7945_s23 }
 0x813   : > { %10596 = vst [vmem:[#allocation37_spill] sm:$0xff] %v9706_v7  ;;  %v2857_v8 = vmul.f32 %v9706_v7, %v9706_v7  ;;  %v9716_v3 = vadd.f32 %v7762_v14, %v2812_v40  ;;  %v7092_v14 = vld [vmem:[#allocation11 + $0x530] ss:$44 sps:$4 sm:$0xff]   ;;  %4158 = vmatprep.subr.bf16.mxu0 %v7094_v54  ;;  %v7101_v54 = vld [vmem:[#allocation11 + $0x68] ss:$44 sps:$4 sm:$0xff]   ;;  %s7947_s29 = scalar_lea.vmem %s7946_s23, 4096 }
 0x814   : > { %10597 = vst [vmem:[#allocation27_spill] sm:$0xff] %v9711_v56  ;;  %v2858_v39 = vmul.f32 %v9711_v56, %v9711_v56  ;;  %4159 = vmatpush1.bf16.msra.mxu0 %v7092_v14  ;;  %v7112_v14 = vld [vmem:[#allocation11 + $0xcc] ss:$44 sps:$4 sm:$0xff]  }
 0x815   : > { %10598 = vst [vmem:[#allocation39_spill] sm:$0xff] %v9716_v3  ;;  %v2859_v6 = vmul.f32 %v9716_v3, %v9716_v3  ;;  %v2874_v38 = vadd.f32 %v2857_v8, %v2856_v53  ;;  %v7089_v8 = vld [vmem:[#allocation11 + $0x528] ss:$44 sps:$4 sm:$0xff]   ;;  %4274 = vmatprep.subr.bf16.mxu0 %v7100_v37 }
 0x816   : > { %4086 = vmatpush1.bf16.msra.mxu1 %v7089_v8  ;;  %v7109_v8 = vld [vmem:[#allocation11 + $0xc4] ss:$44 sps:$4 sm:$0xff]  }
 0x817   : > { %2875 = vadd.xlane.f32.xlu0 %v2874_v38  ;;  %v2877_v25 = vadd.f32 %v2859_v6, %v2858_v39 }
 0x81b   : > { %2878 = vadd.xlane.f32.xlu0 %v2877_v25  ;;  %v7097_v25 = vld [vmem:[#allocation11 + $0x14] ss:$44 sps:$4 sm:$0xff]  }
 0x81c   : > { %4201 = vmatprep.subr.bf16.mxu1 %v7097_v25 }
 0x82d   : > { %v2816_v32 = vpop.f32.mrb[72].mxu0 }
 0x82e   : > { %v9723_v44 = vadd.f32 %v7763_v43, %v2816_v32  ;;  %v2818_v28 = vpop.f32.mrb[73].mxu0 }
 0x82f   : > { %v9726_v46 = vadd.f32 %v7764_v0, %v2818_v28  ;;  %v2820_v50 = vpop.f32.mrb[74].mxu0 }
 0x830   : > { %10599 = vst [vmem:[#allocation25_spill] sm:$0xff] %v9723_v44  ;;  %v2860_v35 = vmul.f32 %v9723_v44, %v9723_v44  ;;  %v9731_v26 = vadd.f32 %v7765_v34, %v2820_v50  ;;  %v2822_v47 = vpop.f32.mrb[75].mxu0  ;;  %v2851_v50 = vld [vmem:[%s10607_s18] sm:$0x3] }
 0x831   : > { %10600 = vst [vmem:[#allocation28_spill] sm:$0xff] %v9726_v46  ;;  %v2861_v21 = vmul.f32 %v9726_v46, %v9726_v46  ;;  %v9736_v33 = vadd.f32 %v7766_v18, %v2822_v47  ;;  %v10610_v18 = vsub.s32 1, %v10608_v57  ;;  %v7127_v57 = vld [vmem:[#allocation11 + $0x1cc] ss:$44 sps:$4 sm:$0xff]  }
 0x832   : > { %10601 = vst [vmem:[#allocation36_spill] sm:$0xff] %v9731_v26  ;;  %v2862_v63 = vmul.f32 %v9731_v26, %v9731_v26 }
 0x833   : > { %10602 = vst [vmem:[#allocation38_spill] sm:$0xff] %v9736_v33  ;;  %v2863_v58 = vmul.f32 %v9736_v33, %v9736_v33  ;;  %v2880_v23 = vadd.f32 %v2861_v21, %v2860_v35  ;;  %v9767_v21 = vrot.slane %v2851_v50, %v10609_v31  ;;  %v9771_v45 = vrot.slane %v2851_v50, %v10610_v18  ;;  %v7130_v31 = vld [vmem:[#allocation11 + $0x1d4] ss:$44 sps:$4 sm:$0xff]  }
 0x835   : > { %2881 = vadd.xlane.f32.xlu0 %v2880_v23  ;;  %v2826_v24 = vpop.f32.mrb[76].mxu0  ;;  %v2883_v22 = vadd.f32 %v2863_v58, %v2862_v63 }
 0x836   : > { %v9743_v48 = vadd.f32 %v7767_v1, %v2826_v24  ;;  %v2828_v2 = vpop.f32.mrb[77].mxu0 }
 0x837   : > { %v9746_v62 = vadd.f32 %v7768_v55, %v2828_v2  ;;  %2884 = vadd.xlane.f32.xlu1 %v2883_v22  ;;  %v2830_v16 = vpop.f32.mrb[78].mxu0  ;;  %v7095_v2 = vld [vmem:[#allocation11 + $0x10] ss:$44 sps:$4 sm:$0xff]   ;;  %v7098_v55 = vld [vmem:[#allocation11 + $0x18] ss:$44 sps:$4 sm:$0xff]  }
 0x838   : > { %10603 = vst [vmem:[#allocation31_spill] sm:$0xff] %v9743_v48  ;;  %v2864_v19 = vmul.f32 %v9743_v48, %v9743_v48  ;;  %v9751_v51 = vadd.f32 %v7769_v11, %v2830_v16  ;;  %v2832_v41 = vpop.f32.mrb[79].mxu0  ;;  %v7106_v11 = vld [vmem:[#allocation11 + $0x74] ss:$44 sps:$4 sm:$0xff]  }
 0x839   : > { %10604 = vst [vmem:[#allocation48_spill] sm:$0xff] %v9746_v62  ;;  %v2865_v53 = vmul.f32 %v9746_v62, %v9746_v62  ;;  %v9756_v40 = vadd.f32 %v7770_v42, %v2832_v41 }
 0x83a   : > { %10605 = vst [vmem:[#allocation41_spill] sm:$0xff] %v9751_v51  ;;  %v2866_v39 = vmul.f32 %v9751_v51, %v9751_v51 }
 0x83b   : > { %10606 = vst [vmem:[#allocation49_spill] sm:$0xff] %v9756_v40  ;;  %v2867_v6 = vmul.f32 %v9756_v40, %v9756_v40  ;;  %v2886_v38 = vadd.f32 %v2865_v53, %v2864_v19  ;;  %v7103_v19 = vld [vmem:[#allocation11 + $0x6c] ss:$44 sps:$4 sm:$0xff]   ;;  %v7104_v53 = vld [vmem:[#allocation11 + $0x70] ss:$44 sps:$4 sm:$0xff]  }
 0x83d   : > { %2887 = vadd.xlane.f32.xlu0 %v2886_v38  ;;  %v2889_v30 = vadd.f32 %v2867_v6, %v2866_v39 }
 0x83f   : > { %2890 = vadd.xlane.f32.xlu1 %v2889_v30 }
 0x89c   : > { %v2870_v10 = vpop.xlane.xlu0 %2869 }
 0x89d   : > { %v2892_v29 = vmul.f32 0.00390625, %v2870_v10  ;;  %v7107_v10 = vld [vmem:[#allocation11 + $0xc0] ss:$44 sps:$4 sm:$0xff]  }
 0x89e   : > { %v2873_v5 = vpop.xlane.xlu1 %2872 }
 0x89f   : > { %v2900_v17 = vadd.f32 1e-05, %v2892_v29  ;;  %v2893_v32 = vmul.f32 0.00390625, %v2873_v5  ;;  %v7110_v29 = vld [vmem:[#allocation11 + $0xc8] ss:$44 sps:$4 sm:$0xff]  }
 0x8a1   : > { %7531 = vrsqrt.f32 %v2900_v17  ;;  %v2901_v52 = vadd.f32 1e-05, %v2893_v32  ;;  %v7115_v32 = vld [vmem:[#allocation11 + $0x11c] ss:$44 sps:$4 sm:$0xff]  }
 0x8a3   : > { %7533 = vrsqrt.f32 %v2901_v52  ;;  %v7118_v52 = vld [vmem:[#allocation11 + $0x124] ss:$44 sps:$4 sm:$0xff]  }
 0x8a4   : > { %v2876_v15 = vpop.xlane.xlu0 %2875 }
 0x8a5   : > { %v2894_v43 = vmul.f32 0.00390625, %v2876_v15  ;;  %v7113_v15 = vld [vmem:[#allocation11 + $0x118] ss:$44 sps:$4 sm:$0xff]  }
 0x8a7   : > { %v2902_v28 = vadd.f32 1e-05, %v2894_v43  ;;  %v7116_v43 = vld [vmem:[#allocation11 + $0x120] ss:$44 sps:$4 sm:$0xff]  }
 0x8a8   : > { %v2879_v0 = vpop.xlane.xlu0 %2878 }
 0x8a9   : > { %7535 = vrsqrt.f32 %v2902_v28  ;;  %v2895_v35 = vmul.f32 0.00390625, %v2879_v0  ;;  %v7121_v28 = vld [vmem:[#allocation11 + $0x174] ss:$44 sps:$4 sm:$0xff]   ;;  %v7124_v0 = vld [vmem:[#allocation11 + $0x17c] ss:$44 sps:$4 sm:$0xff]  }
 0x8ab   : > { %v7532_v34 = vpop.eup %7531  ;;  %v2903_v47 = vadd.f32 1e-05, %v2895_v35  ;;  %v7119_v35 = vld [vmem:[#allocation11 + $0x170] ss:$44 sps:$4 sm:$0xff]  }
 0x8ac   : > { %v2916_v9 = vmul.f32 %v7532_v34, %v9683_v60  ;;  %v2917_v63 = vmul.f32 %v7532_v34, %v9686_v36  ;;  %v7122_v34 = vld [vmem:[#allocation11 + $0x178] ss:$44 sps:$4 sm:$0xff]  }
 0x8ad   : > { %v7534_v58 = vpop.eup %7533  ;;  %7537 = vrsqrt.f32 %v2903_v47 }
 0x8ae   : > { %v2918_v23 = vmul.f32 %v7534_v58, %v9691_v59  ;;  %v2919_v27 = vmul.f32 %v7534_v58, %v9696_v13  ;;  %v2943_v61 = vmul.f32 %v9767_v21, %v2916_v9  ;;  %v2944_v24 = vmul.f32 %v9771_v45, %v2917_v63  ;;  %v7125_v58 = vld [vmem:[#allocation11 + $0x1c8] ss:$44 sps:$4 sm:$0xff]  }
 0x8b0   : > { %v2945_v22 = vmul.f32 %v9767_v21, %v2918_v23  ;;  %v2946_v12 = vmul.f32 %v9771_v45, %v2919_v27  ;;  %v7128_v23 = vld [vmem:[#allocation11 + $0x1d0] ss:$44 sps:$4 sm:$0xff]  }
 0x8b2   : > { %v9781_v4 = vpack.c.bf16 %v2945_v22, %v2943_v61  ;;  %v9783_v1 = vpack.c.bf16 %v2946_v12, %v2944_v24  ;;  %v7133_v61 = vld [vmem:[#allocation11 + $0x224] ss:$44 sps:$4 sm:$0xff]   ;;  %v7136_v24 = vld [vmem:[#allocation11 + $0x22c] ss:$44 sps:$4 sm:$0xff]  }
 0x8b3   : > { %v7536_v16 = vpop.eup %7535  ;;  %v7131_v12 = vld [vmem:[#allocation11 + $0x220] ss:$44 sps:$4 sm:$0xff]  }
 0x8b4   : > { %4087 = vmatprep.mubr.bf16.mxu1 %v9783_v1  ;;  %4160 = vmatprep.mubr.bf16.mxu0 %v9783_v1  ;;  %v2920_v41 = vmul.f32 %v7536_v16, %v9703_v20  ;;  %v2921_v49 = vmul.f32 %v7536_v16, %v9706_v7  ;;  %v7139_v16 = vld [vmem:[#allocation11 + $0x27c] ss:$44 sps:$4 sm:$0xff]  }
 0x8b5   : > { %4088 = vmatmul.mubr.bf16.vlgmr.msra.gmra.mrb[32].mxu1 %v9781_v4  ;;  %4161 = vmatmul.mubr.bf16.vlgmr.msra.gmra.mrb[80].mxu0 %v9781_v4 }
 0x8b6   : > { %4202 = vmatpush1.bf16.msra.mxu1 %v7095_v2  ;;  %4275 = vmatpush1.bf16.msra.mxu0 %v7098_v55  ;;  %v2947_v38 = vmul.f32 %v9767_v21, %v2920_v41  ;;  %v2948_v25 = vmul.f32 %v9771_v45, %v2921_v49  ;;  %v7134_v2 = vld [vmem:[#allocation11 + $0x228] ss:$44 sps:$4 sm:$0xff]  }
 0x8b7   : > { %v7538_v42 = vpop.eup %7537  ;;  %4203 = vmatprep.subr.bf16.mxu1 %v7103_v19  ;;  %4276 = vmatprep.subr.bf16.mxu0 %v7106_v11  ;;  %v7142_v19 = vld [vmem:[#allocation11 + $0x284] ss:$44 sps:$4 sm:$0xff]  }
 0x8b8   : > { %v2922_v39 = vmul.f32 %v7538_v42, %v9711_v56  ;;  %v2923_v6 = vmul.f32 %v7538_v42, %v9716_v3 }
 0x8ba   : > { %v2949_v30 = vmul.f32 %v9767_v21, %v2922_v39  ;;  %v2950_v37 = vmul.f32 %v9771_v45, %v2923_v6  ;;  %4204 = vmatpush1.bf16.msra.mxu1 %v7101_v54  ;;  %4277 = vmatpush1.bf16.msra.mxu0 %v7104_v53  ;;  %v7137_v54 = vld [vmem:[#allocation11 + $0x278] ss:$44 sps:$4 sm:$0xff]   ;;  %v7140_v53 = vld [vmem:[#allocation11 + $0x280] ss:$44 sps:$4 sm:$0xff]  }
 0x8bb   : > { %4205 = vmatprep.subr.bf16.mxu1 %v7109_v8  ;;  %4278 = vmatprep.subr.bf16.mxu0 %v7112_v14  ;;  %v7145_v8 = vld [vmem:[#allocation11 + $0x2d4] ss:$44 sps:$4 sm:$0xff]   ;;  %v7148_v14 = vld [vmem:[#allocation11 + $0x2dc] ss:$44 sps:$4 sm:$0xff]  }
 0x8bc   : > { %v9797_v5 = vpack.c.bf16 %v2949_v30, %v2947_v38  ;;  %v9799_v17 = vpack.c.bf16 %v2950_v37, %v2948_v25  ;;  %v7143_v25 = vld [vmem:[#allocation11 + $0x2d0] ss:$44 sps:$4 sm:$0xff]   ;;  %v7146_v30 = vld [vmem:[#allocation11 + $0x2d8] ss:$44 sps:$4 sm:$0xff]  }
 0x8be   : > { %4206 = vmatpush1.bf16.msra.mxu1 %v7107_v10  ;;  %4279 = vmatpush1.bf16.msra.mxu0 %v7110_v29  ;;  %v7151_v10 = vld [vmem:[#allocation11 + $0x32c] ss:$44 sps:$4 sm:$0xff]   ;;  %v7154_v29 = vld [vmem:[#allocation11 + $0x334] ss:$44 sps:$4 sm:$0xff]  }
 0x8bf   : > { %4097 = vmatprep.mubr.bf16.mxu1 %v9799_v17  ;;  %4170 = vmatprep.mubr.bf16.mxu0 %v9799_v17 }
 0x8c0   : > { %4098 = vmatmul.mubr.bf16.gmra.mrb[36].mxu1 %v9797_v5  ;;  %4171 = vmatmul.mubr.bf16.gmra.mrb[84].mxu0 %v9797_v5 }
 0x8c1   : > { %4207 = vmatprep.subr.bf16.mxu1 %v7115_v32  ;;  %4280 = vmatprep.subr.bf16.mxu0 %v7118_v52 }
 0x8c2   : > { %4208 = vmatpush1.bf16.msra.mxu1 %v7113_v15  ;;  %4281 = vmatpush1.bf16.msra.mxu0 %v7116_v43  ;;  %v2882_v50 = vpop.xlane.xlu0 %2881 }
 0x8c3   : > { %v2896_v47 = vmul.f32 0.00390625, %v2882_v50  ;;  %4209 = vmatprep.subr.bf16.mxu1 %v7121_v28  ;;  %4282 = vmatprep.subr.bf16.mxu0 %v7124_v0  ;;  %v7149_v50 = vld [vmem:[#allocation11 + $0x328] ss:$44 sps:$4 sm:$0xff]  }
 0x8c4   : > { %v2885_v18 = vpop.xlane.xlu1 %2884 }
 0x8c5   : > { %v2904_v9 = vadd.f32 1e-05, %v2896_v47  ;;  %v2897_v63 = vmul.f32 0.00390625, %v2885_v18 }
 0x8c6   : > { %4210 = vmatpush1.bf16.msra.mxu1 %v7119_v35  ;;  %4283 = vmatpush1.bf16.msra.mxu0 %v7122_v34  ;;  %v7152_v35 = vld [vmem:[#allocation11 + $0x330] ss:$44 sps:$4 sm:$0xff]  }
 0x8c7   : > { %7539 = vrsqrt.f32 %v2904_v9  ;;  %v2905_v27 = vadd.f32 1e-05, %v2897_v63  ;;  %4211 = vmatprep.subr.bf16.mxu1 %v7127_v57  ;;  %4284 = vmatprep.subr.bf16.mxu0 %v7130_v31  ;;  %v7157_v31 = vld [vmem:[#allocation11 + $0x384] ss:$44 sps:$4 sm:$0xff]   ;;  %v7155_v63 = vld [vmem:[#allocation11 + $0x380] ss:$44 sps:$4 sm:$0xff]  }
 0x8c9   : > { %7541 = vrsqrt.f32 %v2905_v27  ;;  %v7158_v27 = vld [vmem:[#allocation11 + $0x388] ss:$44 sps:$4 sm:$0xff]  }
 0x8ca   : > { %4212 = vmatpush1.bf16.msra.mxu1 %v7125_v58  ;;  %4285 = vmatpush1.bf16.msra.mxu0 %v7128_v23  ;;  %v2888_v22 = vpop.xlane.xlu0 %2887  ;;  %v7160_v58 = vld [vmem:[#allocation11 + $0x38c] ss:$44 sps:$4 sm:$0xff]  }
 0x8cb   : > { %v2898_v55 = vmul.f32 0.00390625, %v2888_v22  ;;  %4213 = vmatprep.subr.bf16.mxu1 %v7133_v61  ;;  %4286 = vmatprep.subr.bf16.mxu0 %v7136_v24  ;;  %v7163_v61 = vld [vmem:[#allocation11 + $0x3dc] ss:$44 sps:$4 sm:$0xff]  }
 0x8cc   : > { %v2891_v11 = vpop.xlane.xlu1 %2890 }
 0x8cd   : > { %v2906_v41 = vadd.f32 1e-05, %v2898_v55  ;;  %v2899_v49 = vmul.f32 0.00390625, %v2891_v11  ;;  %v7161_v11 = vld [vmem:[#allocation11 + $0x3d8] ss:$44 sps:$4 sm:$0xff]  }
 0x8ce   : > { %4214 = vmatpush1.bf16.msra.mxu1 %v7131_v12  ;;  %4287 = vmatpush1.bf16.msra.mxu0 %v7134_v2  ;;  %v7166_v12 = vld [vmem:[#allocation11 + $0x3e4] ss:$44 sps:$4 sm:$0xff]  }
 0x8cf   : > { %7543 = vrsqrt.f32 %v2906_v41  ;;  %v2907_v42 = vadd.f32 1e-05, %v2899_v49  ;;  %4215 = vmatprep.subr.bf16.mxu1 %v7139_v16  ;;  %4288 = vmatprep.subr.bf16.mxu0 %v7142_v19  ;;  %v7164_v41 = vld [vmem:[#allocation11 + $0x3e0] ss:$44 sps:$4 sm:$0xff]  }
 0x8d1   : > { %v7540_v39 = vpop.eup %7539  ;;  %7545 = vrsqrt.f32 %v2907_v42  ;;  %v7172_v42 = vld [vmem:[#allocation11 + $0x43c] ss:$44 sps:$4 sm:$0xff]  }
 0x8d2   : > { %v2924_v6 = vmul.f32 %v7540_v39, %v9723_v44  ;;  %v2925_v38 = vmul.f32 %v7540_v39, %v9726_v46  ;;  %4216 = vmatpush1.bf16.msra.mxu1 %v7137_v54  ;;  %4289 = vmatpush1.bf16.msra.mxu0 %v7140_v53  ;;  %v7169_v53 = vld [vmem:[#allocation11 + $0x434] ss:$44 sps:$4 sm:$0xff]  }
 0x8d3   : > { %v7542_v37 = vpop.eup %7541  ;;  %4217 = vmatprep.subr.bf16.mxu1 %v7145_v8  ;;  %4290 = vmatprep.subr.bf16.mxu0 %v7148_v14  ;;  %v7175_v8 = vld [vmem:[#allocation11 + $0x48c] ss:$44 sps:$4 sm:$0xff]   ;;  %v7178_v14 = vld [vmem:[#allocation11 + $0x494] ss:$44 sps:$4 sm:$0xff]  }
 0x8d4   : > { %v2926_v32 = vmul.f32 %v7542_v37, %v9731_v26  ;;  %v2927_v52 = vmul.f32 %v7542_v37, %v9736_v33  ;;  %v2951_v15 = vmul.f32 %v9767_v21, %v2924_v6  ;;  %v2952_v43 = vmul.f32 %v9771_v45, %v2925_v38  ;;  %v7173_v39 = vld [vmem:[#allocation11 + $0x488] ss:$44 sps:$4 sm:$0xff]   ;;  %v7176_v6 = vld [vmem:[#allocation11 + $0x490] ss:$44 sps:$4 sm:$0xff]  }
 0x8d5   : > { %v7181_v38 = vld [vmem:[#allocation11 + $0x4e4] ss:$44 sps:$4 sm:$0xff]   ;;  %v7182_v37 = vld [vmem:[#allocation11 + $0x4e8] ss:$44 sps:$4 sm:$0xff]  }
 0x8d6   : > { %v2953_v28 = vmul.f32 %v9767_v21, %v2926_v32  ;;  %v2954_v0 = vmul.f32 %v9771_v45, %v2927_v52  ;;  %4218 = vmatpush1.bf16.msra.mxu1 %v7143_v25  ;;  %4291 = vmatpush1.bf16.msra.mxu0 %v7146_v30  ;;  %v7184_v25 = vld [vmem:[#allocation11 + $0x4ec] ss:$44 sps:$4 sm:$0xff]  }
 0x8d7   : > { %4219 = vmatprep.subr.bf16.mxu1 %v7151_v10  ;;  %4292 = vmatprep.subr.bf16.mxu0 %v7154_v29  ;;  %v7179_v30 = vld [vmem:[#allocation11 + $0x4e0] ss:$44 sps:$4 sm:$0xff]   ;;  %v7187_v10 = vld [vmem:[#allocation11 + $0x53c] ss:$44 sps:$4 sm:$0xff]   ;;  %v7190_v29 = vld [vmem:[#allocation11 + $0x544] ss:$44 sps:$4 sm:$0xff]  }
 0x8d8   : > { %v9813_v34 = vpack.c.bf16 %v2953_v28, %v2951_v15  ;;  %v9815_v47 = vpack.c.bf16 %v2954_v0, %v2952_v43  ;;  %v7185_v32 = vld [vmem:[#allocation11 + $0x538] ss:$44 sps:$4 sm:$0xff]   ;;  %v7188_v52 = vld [vmem:[#allocation11 + $0x540] ss:$44 sps:$4 sm:$0xff]   ;;  %v7194_v43 = vld [vmem:[#allocation11 + $0x2e8] ss:$44 sps:$4 sm:$0xff]  }
 0x8d9   : > { %v7544_v57 = vpop.eup %7543  ;;  %v7193_v15 = vld [vmem:[#allocation11 + $0x24] ss:$44 sps:$4 sm:$0xff]   ;;  %v7191_v28 = vld [vmem:[#allocation11 + $0x20] ss:$44 sps:$4 sm:$0xff]   ;;  %v7195_v0 = vld [vmem:[#allocation11 + $0x28] ss:$44 sps:$4 sm:$0xff]  }
 0x8da   : > { %v2928_v18 = vmul.f32 %v7544_v57, %v9743_v48  ;;  %v2929_v9 = vmul.f32 %v7544_v57, %v9746_v62  ;;  %4220 = vmatpush1.bf16.msra.mxu1 %v7149_v50  ;;  %4293 = vmatpush1.bf16.msra.mxu0 %v7152_v35  ;;  %v7198_v50 = vld [vmem:[#allocation11 + $0x7c] ss:$44 sps:$4 sm:$0xff]   ;;  %v7199_v35 = vld [vmem:[#allocation11 + $0x340] ss:$44 sps:$4 sm:$0xff]   ;;  %v7196_v57 = vld [vmem:[#allocation11 + $0x78] ss:$44 sps:$4 sm:$0xff]  }
 0x8db   : > { %v7546_v23 = vpop.eup %7545  ;;  %4107 = vmatprep.mubr.bf16.mxu1 %v9815_v47  ;;  %4180 = vmatprep.mubr.bf16.mxu0 %v9815_v47 }
 0x8dc   : > { %v2930_v24 = vmul.f32 %v7546_v23, %v9751_v51  ;;  %v2931_v22 = vmul.f32 %v7546_v23, %v9756_v40  ;;  %4108 = vmatmul.mubr.bf16.gmra.mrb[40].mxu1 %v9813_v34  ;;  %v2955_v2 = vmul.f32 %v9767_v21, %v2928_v18  ;;  %4181 = vmatmul.mubr.bf16.gmra.mrb[88].mxu0 %v9813_v34  ;;  %v7203_v18 = vld [vmem:[#allocation11 + $0xd4] ss:$44 sps:$4 sm:$0xff]   ;;  %v7208_v23 = vld [vmem:[#allocation11 + $0x12c] ss:$44 sps:$4 sm:$0xff]  }
 0x8dd   : > { %4221 = vmatprep.subr.bf16.mxu1 %v7157_v31  ;;  %v2956_v55 = vmul.f32 %v9771_v45, %v2929_v9  ;;  %4294 = vmatprep.subr.bf16.mxu0 %v7160_v58  ;;  %v7200_v31 = vld [vmem:[#allocation11 + $0x80] ss:$44 sps:$4 sm:$0xff]   ;;  %v7204_v9 = vld [vmem:[#allocation11 + $0x398] ss:$44 sps:$4 sm:$0xff]  }
 0x8de   : > { %v2957_v16 = vmul.f32 %v9767_v21, %v2930_v24  ;;  %v2958_v19 = vmul.f32 %v9771_v45, %v2931_v22  ;;  %4222 = vmatpush1.bf16.msra.mxu1 %v7155_v63  ;;  %4295 = vmatpush1.bf16.msra.mxu0 %v7158_v27  ;;  %v7167_v21 = vld [vmem:[#allocation11 + $0x430] ss:$44 sps:$4 sm:$0xff]   ;;  %v7170_v45 = vld [vmem:[#allocation11 + $0x438] ss:$44 sps:$4 sm:$0xff]  }
 0x8df   : > { %4223 = vmatprep.subr.bf16.mxu1 %v7163_v61  ;;  %4296 = vmatprep.subr.bf16.mxu0 %v7166_v12  ;;  %v7201_v63 = vld [vmem:[#allocation11 + $0xd0] ss:$44 sps:$4 sm:$0xff]   ;;  %v7205_v58 = vld [vmem:[#allocation11 + $0xd8] ss:$44 sps:$4 sm:$0xff]   ;;  %v7206_v61 = vld [vmem:[#allocation11 + $0x128] ss:$44 sps:$4 sm:$0xff]  }
 0x8e0   : > { %v9829_v49 = vpack.c.bf16 %v2957_v16, %v2955_v2  ;;  %v9831_v54 = vpack.c.bf16 %v2958_v19, %v2956_v55  ;;  %v7209_v27 = vld [vmem:[#allocation11 + $0x3f0] ss:$44 sps:$4 sm:$0xff]   ;;  %v7214_v12 = vld [vmem:[#allocation11 + $0x448] ss:$44 sps:$4 sm:$0xff]   ;;  %v7211_v2 = vld [vmem:[#allocation11 + $0x180] ss:$44 sps:$4 sm:$0xff]  }
 0x8e1   : > { %v7210_v24 = vld [vmem:[#allocation11 + $0x130] ss:$44 sps:$4 sm:$0xff]   ;;  %v7215_v55 = vld [vmem:[#allocation11 + $0x188] ss:$44 sps:$4 sm:$0xff]   ;;  %v7219_v19 = vld [vmem:[#allocation11 + $0x4a0] ss:$44 sps:$4 sm:$0xff]  }
 0x8e2   : > { %4224 = vmatpush1.bf16.msra.mxu1 %v7161_v11  ;;  %4117 = vmatprep.mubr.bf16.mxu1 %v9831_v54  ;;  %v7213_v22 = vld [vmem:[#allocation11 + $0x184] ss:$44 sps:$4 sm:$0xff]   ;;  %v7218_v16 = vld [vmem:[#allocation11 + $0x1dc] ss:$44 sps:$4 sm:$0xff]  }
 0x8e3   : > { %4297 = vmatpush1.bf16.msra.mxu0 %v7164_v41  ;;  %4190 = vmatprep.mubr.bf16.mxu0 %v9831_v54  ;;  %v7216_v11 = vld [vmem:[#allocation11 + $0x1d8] ss:$44 sps:$4 sm:$0xff]   ;;  %v7220_v41 = vld [vmem:[#allocation11 + $0x1e0] ss:$44 sps:$4 sm:$0xff]  }
 0x8e4   : > { %4118 = vmatmul.mubr.bf16.gmra.mrb[44].mxu1 %v9829_v49  ;;  %4225 = vmatprep.subr.bf16.mxu1 %v7169_v53  ;;  %v7223_v53 = vld [vmem:[#allocation11 + $0x234] ss:$44 sps:$4 sm:$0xff]  }
 0x8e5   : > { %4191 = vmatmul.mubr.bf16.gmra.mrb[92].mxu0 %v9829_v49  ;;  %4233 = vmatprep.mubr.bf16.mxu1 %v9783_v1 }
 0x8e6   : > { %4298 = vmatprep.subr.bf16.mxu0 %v7172_v42  ;;  %4306 = vmatprep.mubr.bf16.mxu0 %v9783_v1  ;;  %v7224_v42 = vld [vmem:[#allocation11 + $0x4f8] ss:$44 sps:$4 sm:$0xff]  }
 0x8e7   : > { %4226 = vmatpush1.bf16.msra.mxu1 %v7167_v21  ;;  %4299 = vmatpush1.bf16.msra.mxu0 %v7170_v45  ;;  %v7221_v21 = vld [vmem:[#allocation11 + $0x230] ss:$44 sps:$4 sm:$0xff]   ;;  %v7225_v45 = vld [vmem:[#allocation11 + $0x238] ss:$44 sps:$4 sm:$0xff]  }
 0x8e8   : > { %4227 = vmatprep.subr.bf16.mxu1 %v7175_v8  ;;  %4300 = vmatprep.subr.bf16.mxu0 %v7178_v14  ;;  %v7228_v8 = vld [vmem:[#allocation11 + $0x28c] ss:$44 sps:$4 sm:$0xff]   ;;  %v7229_v14 = vld [vmem:[#allocation11 + $0x550] ss:$44 sps:$4 sm:$0xff]  }
 0x8eb   : > { %4228 = vmatpush1.bf16.msra.mxu1 %v7173_v39  ;;  %4301 = vmatpush1.bf16.msra.mxu0 %v7176_v6  ;;  %v7226_v39 = vld [vmem:[#allocation11 + $0x288] ss:$44 sps:$4 sm:$0xff]   ;;  %v7230_v6 = vld [vmem:[#allocation11 + $0x290] ss:$44 sps:$4 sm:$0xff]  }
 0x8ec   : > { %4229 = vmatprep.subr.bf16.mxu1 %v7181_v38  ;;  %4302 = vmatprep.subr.bf16.mxu0 %v7184_v25  ;;  %v7233_v38 = vld [vmem:[#allocation11 + $0x2e4] ss:$44 sps:$4 sm:$0xff]   ;;  %v7231_v25 = vld [vmem:[#allocation11 + $0x2e0] ss:$44 sps:$4 sm:$0xff]  }
 0x8ef   : > { %4230 = vmatpush1.bf16.msra.mxu1 %v7179_v30  ;;  %4303 = vmatpush1.bf16.msra.mxu0 %v7182_v37  ;;  %v7236_v30 = vld [vmem:[#allocation11 + $0x33c] ss:$44 sps:$4 sm:$0xff]   ;;  %v7234_v37 = vld [vmem:[#allocation11 + $0x338] ss:$44 sps:$4 sm:$0xff]  }
 0x8f0   : > { %4231 = vmatprep.subr.bf16.mxu1 %v7187_v10  ;;  %4304 = vmatprep.subr.bf16.mxu0 %v7190_v29  ;;  %v7237_v10 = vld [vmem:[#allocation11 + $0x390] ss:$44 sps:$4 sm:$0xff]   ;;  %v7242_v29 = vld [vmem:[#allocation11 + $0x3ec] ss:$44 sps:$4 sm:$0xff]  }
 0x8f3   : > { %4232 = vmatpush1.bf16.msra.mxu1 %v7185_v32  ;;  %4305 = vmatpush1.bf16.msra.mxu0 %v7188_v52  ;;  %v7240_v32 = vld [vmem:[#allocation11 + $0x3e8] ss:$44 sps:$4 sm:$0xff]   ;;  %v7245_v52 = vld [vmem:[#allocation11 + $0x444] ss:$44 sps:$4 sm:$0xff]  }
 0x8f4   : > { %4347 = vmatprep.subr.bf16.mxu1 %v7193_v15  ;;  %6569 = vmatprep.subr.bf16.mxu0 %v7194_v43  ;;  %v7243_v15 = vld [vmem:[#allocation11 + $0x440] ss:$44 sps:$4 sm:$0xff]   ;;  %v7248_v43 = vld [vmem:[#allocation11 + $0x49c] ss:$44 sps:$4 sm:$0xff]  }
 0x8f6   : > { %4234 = vmatmul.mubr.bf16.vlgmr.msra.gmra.mrb[48].mxu1 %v9781_v4  ;;  %4307 = vmatmul.mubr.bf16.vlgmr.msra.gmra.mrb[96].mxu0 %v9781_v4 }
 0x8f7   : > { %4243 = vmatprep.mubr.bf16.mxu1 %v9799_v17  ;;  %4316 = vmatprep.mubr.bf16.mxu0 %v9799_v17 }
 0x8f8   : > { %4348 = vmatpush1.bf16.msra.mxu1 %v7191_v28  ;;  %6570 = vmatpush3.bf16.msra.mxu0 %v7195_v0  ;;  %v7246_v28 = vld [vmem:[#allocation11 + $0x498] ss:$44 sps:$4 sm:$0xff]   ;;  %v7251_v0 = vld [vmem:[#allocation11 + $0x4f4] ss:$44 sps:$4 sm:$0xff]  }
 0x8f9   : > { %4349 = vmatprep.subr.bf16.mxu1 %v7198_v50  ;;  %6571 = vmatprep.subr.bf16.mxu0 %v7199_v35  ;;  %v7249_v50 = vld [vmem:[#allocation11 + $0x4f0] ss:$44 sps:$4 sm:$0xff]   ;;  %v7254_v35 = vld [vmem:[#allocation11 + $0x54c] ss:$44 sps:$4 sm:$0xff]  }
 0x8fc   : > { %4350 = vmatpush1.bf16.msra.mxu1 %v7196_v57  ;;  %6572 = vmatpush3.bf16.msra.mxu0 %v7200_v31  ;;  %v7252_v57 = vld [vmem:[#allocation11 + $0x548] ss:$44 sps:$4 sm:$0xff]  }
 0x8fd   : > { %4351 = vmatprep.subr.bf16.mxu1 %v7203_v18  ;;  %6573 = vmatprep.subr.bf16.mxu0 %v7204_v9 }
 0x8fe   : > { %4244 = vmatmul.mubr.bf16.gmra.mrb[52].mxu1 %v9797_v5  ;;  %4317 = vmatmul.mubr.bf16.gmra.mrb[100].mxu0 %v9797_v5 }
 0x8ff   : > { %4253 = vmatprep.mubr.bf16.mxu1 %v9815_v47  ;;  %4326 = vmatprep.mubr.bf16.mxu0 %v9815_v47 }
 0x900   : > { %4352 = vmatpush1.bf16.msra.mxu1 %v7201_v63  ;;  %6574 = vmatpush3.bf16.msra.mxu0 %v7205_v58  ;;  %v7260_v58 = vld [vmem:[#allocation12 + $0x14] ss:$8 sps:$4 sm:$0xff]  }
 0x901   : > { %4353 = vmatprep.subr.bf16.mxu1 %v7208_v23  ;;  %6575 = vmatprep.subr.bf16.mxu0 %v7209_v27 }
 0x904   : > { %4354 = vmatpush1.bf16.msra.mxu1 %v7206_v61  ;;  %6576 = vmatpush3.bf16.msra.mxu0 %v7210_v24 }
 0x905   : > { %4355 = vmatprep.subr.bf16.mxu1 %v7213_v22  ;;  %6577 = vmatprep.subr.bf16.mxu0 %v7214_v12 }
 0x906   : > { %4254 = vmatmul.mubr.bf16.gmra.mrb[56].mxu1 %v9813_v34  ;;  %4327 = vmatmul.mubr.bf16.gmra.mrb[104].mxu0 %v9813_v34 }
 0x907   : > { %4263 = vmatprep.mubr.bf16.mxu1 %v9831_v54  ;;  %4336 = vmatprep.mubr.bf16.mxu0 %v9831_v54 }
 0x908   : > { %4356 = vmatpush1.bf16.msra.mxu1 %v7211_v2  ;;  %6578 = vmatpush3.bf16.msra.mxu0 %v7215_v55 }
 0x909   : > { %4357 = vmatprep.subr.bf16.mxu1 %v7218_v16  ;;  %6579 = vmatprep.subr.bf16.mxu0 %v7219_v19  ;;  %v7261_v16 = vld [vmem:[#allocation12 + $0x20] ss:$8 sps:$4 sm:$0xff]   ;;  %v7263_v19 = vld [vmem:[#allocation12 + $0x24] ss:$8 sps:$4 sm:$0xff]  }
 0x90c   : > { %4358 = vmatpush1.bf16.msra.mxu1 %v7216_v11  ;;  %6580 = vmatpush3.bf16.msra.mxu0 %v7220_v41  ;;  %v7266_v11 = vld [vmem:[#allocation12 + $0x34] ss:$8 sps:$4 sm:$0xff]   ;;  %v7264_v41 = vld [vmem:[#allocation12 + $0x30] ss:$8 sps:$4 sm:$0xff]  }
 0x90d   : > { %4359 = vmatprep.subr.bf16.mxu1 %v7223_v53  ;;  %6581 = vmatprep.subr.bf16.mxu0 %v7224_v42  ;;  %v7269_v53 = vld [vmem:[#allocation12 + $0x44] ss:$8 sps:$4 sm:$0xff]   ;;  %v7267_v42 = vld [vmem:[#allocation12 + $0x40] ss:$8 sps:$4 sm:$0xff]  }
 0x90e   : > { %4264 = vmatmul.mubr.bf16.gmra.mrb[60].mxu1 %v9829_v49  ;;  %4337 = vmatmul.mubr.bf16.gmra.mrb[108].mxu0 %v9829_v49 }
 0x90f   : > { %4379 = vmatprep.mubr.bf16.mxu1 %v9783_v1  ;;  %4452 = vmatprep.mubr.bf16.mxu0 %v9783_v1  ;;  %v7239_v1 = vld [vmem:[#allocation11 + $0x394] ss:$44 sps:$4 sm:$0xff]  }
 0x910   : > { %4360 = vmatpush1.bf16.msra.mxu1 %v7221_v21  ;;  %6582 = vmatpush3.bf16.msra.mxu0 %v7225_v45  ;;  %v7272_v21 = vld [vmem:[#allocation12 + $0x54] ss:$8 sps:$4 sm:$0xff]   ;;  %v7270_v45 = vld [vmem:[#allocation12 + $0x50] ss:$8 sps:$4 sm:$0xff]  }
 0x911   : > { %4361 = vmatprep.subr.bf16.mxu1 %v7228_v8  ;;  %6583 = vmatprep.subr.bf16.mxu0 %v7229_v14  ;;  %v7275_v8 = vld [vmem:[#allocation12 + $0x64] ss:$8 sps:$4 sm:$0xff]   ;;  %v7273_v14 = vld [vmem:[#allocation12 + $0x60] ss:$8 sps:$4 sm:$0xff]  }
 0x914   : > { %4362 = vmatpush1.bf16.msra.mxu1 %v7226_v39  ;;  %6584 = vmatpush3.bf16.msra.mxu0 %v7230_v6  ;;  %v7278_v39 = vld [vmem:[#allocation12 + $0x74] ss:$8 sps:$4 sm:$0xff]   ;;  %v7276_v6 = vld [vmem:[#allocation12 + $0x70] ss:$8 sps:$4 sm:$0xff]  }
 0x915   : > { %4363 = vmatprep.subr.bf16.mxu1 %v7233_v38  ;;  %v7281_v38 = vld [vmem:[#allocation12 + $0x84] ss:$8 sps:$4 sm:$0xff]  }
 0x917   : > { %4453 = vmatmul.mubr.bf16.vlgmr.msra.gmra.mrb[112].mxu0 %v9781_v4 }
 0x918   : > { %4364 = vmatpush1.bf16.msra.mxu1 %v7231_v25  ;;  %4460 = vmatprep.mubr.bf16.mxu0 %v9799_v17 }
 0x919   : > { %4365 = vmatprep.subr.bf16.mxu1 %v7236_v30  ;;  %v7279_v30 = vld [vmem:[#allocation12 + $0x80] ss:$8 sps:$4 sm:$0xff]  }
 0x91c   : > { %4366 = vmatpush1.bf16.msra.mxu1 %v7234_v37 }
 0x91d   : > { %4367 = vmatprep.subr.bf16.mxu1 %v7239_v1 }
 0x91f   : > { %4461 = vmatmul.mubr.bf16.gmra.mrb[116].mxu0 %v9797_v5 }
 0x920   : > { %4368 = vmatpush1.bf16.msra.mxu1 %v7237_v10  ;;  %4468 = vmatprep.mubr.bf16.mxu0 %v9815_v47 }
 0x921   : > { %4369 = vmatprep.subr.bf16.mxu1 %v7242_v29 }
 0x924   : > { %4370 = vmatpush1.bf16.msra.mxu1 %v7240_v32 }
 0x925   : > { %4371 = vmatprep.subr.bf16.mxu1 %v7245_v52 }
 0x927   : > { %4469 = vmatmul.mubr.bf16.gmra.mrb[120].mxu0 %v9813_v34 }
 0x928   : > { %4372 = vmatpush1.bf16.msra.mxu1 %v7243_v15  ;;  %4476 = vmatprep.mubr.bf16.mxu0 %v9831_v54 }
 0x929   : > { %4373 = vmatprep.subr.bf16.mxu1 %v7248_v43  ;;  %v7282_v43 = vld [vmem:[#allocation12 + $0x90] ss:$8 sps:$4 sm:$0xff]  }
 0x92c   : > { %4374 = vmatpush1.bf16.msra.mxu1 %v7246_v28  ;;  %v7284_v28 = vld [vmem:[#allocation12 + $0x94] ss:$8 sps:$4 sm:$0xff]  }
 0x92d   : > { %4375 = vmatprep.subr.bf16.mxu1 %v7251_v0  ;;  %v7287_v0 = vld [vmem:[#allocation12 + $0xa4] ss:$8 sps:$4 sm:$0xff]  }
 0x92f   : > { %4477 = vmatmul.mubr.bf16.gmra.mrb[124].mxu0 %v9829_v49 }
 0x930   : > { %4376 = vmatpush1.bf16.msra.mxu1 %v7249_v50 }
 0x931   : > { %4377 = vmatprep.subr.bf16.mxu1 %v7254_v35 }
 0x934   : > { %4378 = vmatpush1.bf16.msra.mxu1 %v7252_v57 }
 0x937   : > { %4380 = vmatmul.mubr.bf16.vlgmr.msra.gmra.mrb[64].mxu1 %v9781_v4 }
 0x938   : > { %4389 = vmatprep.mubr.bf16.mxu1 %v9799_v17 }
 0x93f   : > { %4390 = vmatmul.mubr.bf16.gmra.mrb[68].mxu1 %v9797_v5 }
 0x940   : > { %4399 = vmatprep.mubr.bf16.mxu1 %v9815_v47 }
 0x947   : > { %4400 = vmatmul.mubr.bf16.gmra.mrb[72].mxu1 %v9813_v34  ;;  %v7255_v34 = vld [vmem:[#allocation12] ss:$8 sps:$4 sm:$0xff]  }
 0x948   : > { %4409 = vmatprep.mubr.bf16.mxu1 %v9831_v54  ;;  %v7257_v54 = vld [vmem:[#allocation12 + $0x4] ss:$8 sps:$4 sm:$0xff]  }
 0x949   : > { %5665 = vmatprep.subr.bf16.mxu1 %v7257_v54 }
 0x94a   : > { %5666 = vmatpush1.bf16.msra.mxu1 %v7255_v34  ;;  %v7285_v34 = vld [vmem:[#allocation12 + $0xa0] ss:$8 sps:$4 sm:$0xff]  }
 0x94b   : > { %5667 = vmatprep.subr.bf16.mxu1 %v7260_v58 }
 0x94f   : > { %4410 = vmatmul.mubr.bf16.gmra.mrb[76].mxu1 %v9829_v49  ;;  %v7258_v49 = vld [vmem:[#allocation12 + $0x10] ss:$8 sps:$4 sm:$0xff]  }
 0x950   : > { %5668 = vmatpush1.bf16.msra.mxu1 %v7258_v49 }
 0x951   : > { %5669 = vmatprep.subr.bf16.mxu1 %v7263_v19 }
 0x954   : > { %5670 = vmatpush1.bf16.msra.mxu1 %v7261_v16 }
 0x955   : > { %5671 = vmatprep.subr.bf16.mxu1 %v7266_v11  ;;  %v7288_v11 = vld [vmem:[#allocation12 + $0xb0] ss:$8 sps:$4 sm:$0xff]  }
 0x958   : > { %5672 = vmatpush1.bf16.msra.mxu1 %v7264_v41  ;;  %v7290_v41 = vld [vmem:[#allocation12 + $0xb4] ss:$8 sps:$4 sm:$0xff]  }
 0x959   : > { %5673 = vmatprep.subr.bf16.mxu1 %v7269_v53  ;;  %v7293_v53 = vld [vmem:[#allocation12 + $0xc4] ss:$8 sps:$4 sm:$0xff]  }
 0x95c   : > { %5674 = vmatpush1.bf16.msra.mxu1 %v7267_v42  ;;  %v7291_v42 = vld [vmem:[#allocation12 + $0xc0] ss:$8 sps:$4 sm:$0xff]  }
 0x95d   : > { %5675 = vmatprep.subr.bf16.mxu1 %v7272_v21  ;;  %v7296_v21 = vld [vmem:[#allocation12 + $0xd4] ss:$8 sps:$4 sm:$0xff]  }
 0x960   : > { %5676 = vmatpush1.bf16.msra.mxu1 %v7270_v45  ;;  %v7294_v45 = vld [vmem:[#allocation12 + $0xd0] ss:$8 sps:$4 sm:$0xff]  }
 0x961   : > { %5677 = vmatprep.subr.bf16.mxu1 %v7275_v8  ;;  %v7299_v8 = vld [vmem:[#allocation12 + $0xe4] ss:$8 sps:$4 sm:$0xff]  }
 0x964   : > { %5678 = vmatpush1.bf16.msra.mxu1 %v7273_v14  ;;  %v7297_v14 = vld [vmem:[#allocation12 + $0xe0] ss:$8 sps:$4 sm:$0xff]  }
 0x965   : > { %5679 = vmatprep.subr.bf16.mxu1 %v7278_v39 }
 0x968   : > { %5680 = vmatpush1.bf16.msra.mxu1 %v7276_v6 }
 0x969   : > { %5681 = vmatprep.subr.bf16.mxu1 %v7281_v38 }
 0x96c   : > { %5682 = vmatpush1.bf16.msra.mxu1 %v7279_v30 }
 0x96d   : > { %5683 = vmatprep.subr.bf16.mxu1 %v7284_v28 }
 0x970   : > { %5684 = vmatpush1.bf16.msra.mxu1 %v7282_v43 }
 0x971   : > { %5685 = vmatprep.subr.bf16.mxu1 %v7287_v0 }
 0x974   : > { %5686 = vmatpush1.bf16.msra.mxu1 %v7285_v34 }
 0x975   : > { %5687 = vmatprep.subr.bf16.mxu1 %v7290_v41  ;;  %v7302_v41 = vld [vmem:[#allocation12 + $0xf4] ss:$8 sps:$4 sm:$0xff]  }
 0x978   : > { %5688 = vmatpush1.bf16.msra.mxu1 %v7288_v11  ;;  %v7300_v11 = vld [vmem:[#allocation12 + $0xf0] ss:$8 sps:$4 sm:$0xff]  }
 0x979   : > { %5689 = vmatprep.subr.bf16.mxu1 %v7293_v53  ;;  %v7305_v53 = vld [vmem:[#allocation12 + $0x104] ss:$8 sps:$4 sm:$0xff]  }
 0x97c   : > { %5690 = vmatpush1.bf16.msra.mxu1 %v7291_v42 }
 0x97d   : > { %5691 = vmatprep.subr.bf16.mxu1 %v7296_v21 }
 0x980   : > { %5692 = vmatpush1.bf16.msra.mxu1 %v7294_v45 }
 0x981   : > { %5693 = vmatprep.subr.bf16.mxu1 %v7299_v8 }
 0x984   : > { %5694 = vmatpush1.bf16.msra.mxu1 %v7297_v14 }
 0x985   : > { %5695 = vmatprep.subr.bf16.mxu1 %v7302_v41 }
 0x988   : > { %v9869_v31 = vpop.f32.mrb[32].mxu1  ;;  %v9871_v18 = vpop.f32.mrb[80].mxu0  ;;  %5696 = vmatpush1.bf16.msra.mxu1 %v7300_v11 }
 0x989   : > { %v9873_v9 = vpop.f32.mrb[33].mxu1  ;;  %v9875_v63 = vpop.f32.mrb[81].mxu0  ;;  %5738 = vmatprep.subr.bf16.mxu1 %v7305_v53 }
 0x98a   : > { %v9877_v4 = vpop.f32.mrb[34].mxu1  ;;  %v9879_v17 = vpop.f32.mrb[82].mxu0 }
 0x98b   : > { %v9881_v5 = vpop.f32.mrb[35].mxu1  ;;  %v9883_v47 = vpop.f32.mrb[83].mxu0 }
 0x993   : > { %v9885_v23 = vpop.f32.mrb[36].mxu1  ;;  %v9887_v27 = vpop.f32.mrb[84].mxu0 }
 0x994   : > { %v9889_v61 = vpop.f32.mrb[37].mxu1  ;;  %v9891_v24 = vpop.f32.mrb[85].mxu0 }
 0x995   : > { %v9893_v22 = vpop.f32.mrb[38].mxu1  ;;  %v9895_v12 = vpop.f32.mrb[86].mxu0 }
 0x996   : > { %v9897_v2 = vpop.f32.mrb[39].mxu1  ;;  %v9899_v55 = vpop.f32.mrb[87].mxu0 }
 0x9af   : > { %v9901_v25 = vpop.f32.mrb[40].mxu1  ;;  %v9903_v37 = vpop.f32.mrb[88].mxu0 }
 0x9b0   : > { %v9905_v1 = vpop.f32.mrb[41].mxu1  ;;  %v9907_v10 = vpop.f32.mrb[89].mxu0 }
 0x9b1   : > { %v9909_v29 = vpop.f32.mrb[42].mxu1  ;;  %v9911_v32 = vpop.f32.mrb[90].mxu0 }
 0x9b2   : > { %v9913_v52 = vpop.f32.mrb[43].mxu1  ;;  %v9915_v15 = vpop.f32.mrb[91].mxu0 }
 0x9b7   : > { %v9917_v50 = vpop.f32.mrb[44].mxu1 }
 0x9b8   : > { %v9919_v35 = vpop.f32.mrb[92].mxu0  ;;  %v9921_v57 = vpop.f32.mrb[45].mxu1 }
 0x9b9   : > { %v9923_v54 = vpop.f32.mrb[93].mxu0  ;;  %v9925_v49 = vpop.f32.mrb[46].mxu1 }
 0x9ba   : > { %v9927_v58 = vpop.f32.mrb[94].mxu0  ;;  %v9929_v16 = vpop.f32.mrb[47].mxu1 }
 0x9bb   : > { %v9931_v19 = vpop.f32.mrb[95].mxu0 }
 0x9c9   : > { %v9933_v39 = vpop.f32.mrb[48].mxu1  ;;  %v4308_v6 = vpop.f32.mrb[96].mxu0 }
 0x9ca   : > { %4871 = vrot.lane.b32.xlu0 %v4308_v6, %s8037_s27  ;;  %v9936_v38 = vpop.f32.mrb[49].mxu1  ;;  %v4310_v30 = vpop.f32.mrb[97].mxu0 }
 0x9cb   : > { %4873 = vrot.lane.b32.xlu1 %v4310_v30, %s8037_s27  ;;  %v9939_v43 = vpop.f32.mrb[50].mxu1  ;;  %v4312_v28 = vpop.f32.mrb[98].mxu0 }
 0x9cc   : > { %v9941_v0 = vpop.f32.mrb[51].mxu1  ;;  %v4314_v34 = vpop.f32.mrb[99].mxu0 }
 0x9ce   : > { %4869 = vrot.lane.b32.xlu0 %v9936_v38, %s8037_s27 }
 0x9cf   : > { %4883 = vrot.lane.b32.xlu1 %v4312_v28, %s8037_s27 }
 0x9d1   : > { %v9946_v42 = vpop.f32.mrb[52].mxu1  ;;  %v4318_v21 = vpop.f32.mrb[100].mxu0 }
 0x9d2   : > { %v4320_v45 = vpop.f32.mrb[101].mxu0  ;;  %4895 = vrot.lane.b32.xlu0 %v4318_v21, %s8037_s27  ;;  %v9949_v8 = vpop.f32.mrb[53].mxu1 }
 0x9d3   : > { %4885 = vrot.lane.b32.xlu1 %v4314_v34, %s8037_s27  ;;  %v9952_v14 = vpop.f32.mrb[54].mxu1  ;;  %v4322_v6 = vpop.f32.mrb[102].mxu0 }
 0x9d4   : > { %v9954_v30 = vpop.f32.mrb[55].mxu1  ;;  %v4324_v28 = vpop.f32.mrb[103].mxu0 }
 0x9d5   : > { %10611 = vst [vmem:[#allocation40_spill] sm:$0xff] %v9954_v30 }
 0x9d6   : > { %4893 = vrot.lane.b32.xlu0 %v9949_v8, %s8037_s27 }
 0x9d7   : > { %4881 = vrot.lane.b32.xlu1 %v9941_v0, %s8037_s27 }
 0x9d9   : > { %v9960_v11 = vpop.f32.mrb[56].mxu1  ;;  %v4328_v41 = vpop.f32.mrb[104].mxu0 }
 0x9da   : > { %10612 = vst [vmem:[#allocation47_spill] sm:$0xff] %v9960_v11  ;;  %v4330_v53 = vpop.f32.mrb[105].mxu0  ;;  %4907 = vrot.lane.b32.xlu0 %v4322_v6, %s8037_s27  ;;  %v9963_v21 = vpop.f32.mrb[57].mxu1 }
 0x9db   : > { %10613 = vst [vmem:[#allocation33_spill] sm:$0xff] %v9963_v21  ;;  %v4332_v34 = vpop.f32.mrb[106].mxu0  ;;  %4897 = vrot.lane.b32.xlu1 %v4320_v45, %s8037_s27  ;;  %v9966_v40 = vpop.f32.mrb[58].mxu1 }
 0x9dc   : > { %10614 = vst [vmem:[#allocation42_spill] sm:$0xff] %v9966_v40  ;;  %v9968_v51 = vpop.f32.mrb[59].mxu1  ;;  %v4334_v62 = vpop.f32.mrb[107].mxu0  ;;  %v6411_v40 = vmul.f32 -1.442695, %v9921_v57 }
 0x9dd   : > { %10615 = vst [vmem:[#allocation26_spill] sm:$0xff] %v9968_v51 }
 0x9de   : > { %4919 = vrot.lane.b32.xlu0 %v4328_v41, %s8037_s27 }
 0x9df   : > { %4909 = vrot.lane.b32.xlu1 %v4324_v28, %s8037_s27 }
 0x9e1   : > { %v9972_v48 = vpop.f32.mrb[60].mxu1  ;;  %v4338_v33 = vpop.f32.mrb[108].mxu0 }
 0x9e2   : > { %10616 = vst [vmem:[#allocation44_spill] sm:$0xff] %v9972_v48  ;;  %v4340_v26 = vpop.f32.mrb[109].mxu0  ;;  %4917 = vrot.lane.b32.xlu0 %v9963_v21, %s8037_s27  ;;  %v9976_v6 = vpop.f32.mrb[61].mxu1  ;;  %v6410_v21 = vmul.f32 -1.442695, %v9917_v50 }
 0x9e3   : > { %10617 = vst [vmem:[#allocation46_spill] sm:$0xff] %v9976_v6  ;;  %v4342_v46 = vpop.f32.mrb[110].mxu0  ;;  %4905 = vrot.lane.b32.xlu1 %v9954_v30, %s8037_s27  ;;  %v9980_v45 = vpop.f32.mrb[62].mxu1 }
 0x9e4   : > { %10618 = vst [vmem:[#allocation43_spill] sm:$0xff] %v9980_v45  ;;  %v9982_v44 = vpop.f32.mrb[63].mxu1  ;;  %v4344_v41 = vpop.f32.mrb[111].mxu0 }
 0x9e5   : > { %10619 = vst [vmem:[#allocation45_spill] sm:$0xff] %v9982_v44 }
 0x9e6   : > { %4931 = vrot.lane.b32.xlu0 %v4332_v34, %s8037_s27 }
 0x9e7   : > { %4921 = vrot.lane.b32.xlu1 %v4330_v53, %s8037_s27 }
 0x9ea   : > { %v6585_v28 = vpop.f32.mrb[112].mxu0  ;;  %4943 = vrot.lane.b32.xlu0 %v4338_v33, %s8037_s27 }
 0x9eb   : > { %v6586_v3 = vpop.f32.mrb[113].mxu0  ;;  %4933 = vrot.lane.b32.xlu1 %v4334_v62, %s8037_s27 }
 0x9ec   : > { %v9988_v56 = vadd.f32 %v6586_v3, %v6585_v28  ;;  %v6588_v7 = vpop.f32.mrb[114].mxu0 }
 0x9ed   : > { %v6589_v20 = vpop.f32.mrb[115].mxu0 }
 0x9ee   : > { %v9990_v13 = vadd.f32 %v6589_v20, %v6588_v7  ;;  %4941 = vrot.lane.b32.xlu0 %v9976_v6, %s8037_s27 }
 0x9ef   : > { %4929 = vrot.lane.b32.xlu1 %v9968_v51, %s8037_s27 }
 0x9f2   : > { %v6591_v34 = vpop.f32.mrb[116].mxu0  ;;  %4955 = vrot.lane.b32.xlu0 %v4342_v46, %s8037_s27 }
 0x9f3   : > { %v6592_v53 = vpop.f32.mrb[117].mxu0  ;;  %4945 = vrot.lane.b32.xlu1 %v4340_v26, %s8037_s27 }
 0x9f4   : > { %v6593_v33 = vadd.f32 %v6592_v53, %v6591_v34  ;;  %v6594_v62 = vpop.f32.mrb[118].mxu0 }
 0x9f5   : > { %v6595_v3 = vpop.f32.mrb[119].mxu0 }
 0x9f6   : > { %v6596_v28 = vadd.f32 %v6595_v3, %v6594_v62 }
 0x9f7   : > { %4957 = vrot.lane.b32.xlu1 %v4344_v41, %s8037_s27 }
 0x9fa   : > { %v6597_v20 = vpop.f32.mrb[120].mxu0 }
 0x9fb   : > { %v6598_v7 = vpop.f32.mrb[121].mxu0  ;;  %4953 = vrot.lane.b32.xlu1 %v9982_v44, %s8037_s27 }
 0x9fc   : > { %v6599_v59 = vadd.f32 %v6598_v7, %v6597_v20  ;;  %v6600_v36 = vpop.f32.mrb[122].mxu0 }
 0x9fd   : > { %v6601_v60 = vpop.f32.mrb[123].mxu0 }
 0x9fe   : > { %v6602_v45 = vadd.f32 %v6601_v60, %v6600_v36 }
 0xa02   : > { %v6603_v6 = vpop.f32.mrb[124].mxu0 }
 0xa03   : > { %v6604_v46 = vpop.f32.mrb[125].mxu0 }
 0xa04   : > { %v10001_v48 = vadd.f32 %v6604_v46, %v6603_v6  ;;  %v6606_v26 = vpop.f32.mrb[126].mxu0 }
 0xa05   : > { %v6607_v34 = vpop.f32.mrb[127].mxu0 }
 0xa06   : > { %v10003_v53 = vadd.f32 %v6607_v34, %v6606_v26  ;;  %v6375_v34 = vmul.f32 -1.442695, %v9873_v9 }
 0xa08   : > { %7547 = vpow2.f32 %v6375_v34  ;;  %v6386_v34 = vmul.f32 -1.442695, %v9885_v23 }
 0xa0a   : > { %v4381_v62 = vpop.f32.mrb[64].mxu1 }
 0xa0b   : > { %4875 = vrot.lane.b32.xlu0 %v4381_v62, %s8037_s27  ;;  %v4383_v41 = vpop.f32.mrb[65].mxu1 }
 0xa0c   : > { %4877 = vrot.lane.b32.xlu1 %v4383_v41, %s8037_s27  ;;  %v4385_v3 = vpop.f32.mrb[66].mxu1  ;;  %v6381_v41 = vmul.f32 -1.442695, %v9881_v5 }
 0xa0d   : > { %v4387_v44 = vpop.f32.mrb[67].mxu1 }
 0xa0e   : > { %7549 = vpow2.f32 %v6381_v41  ;;  %v6392_v41 = vmul.f32 -1.442695, %v9893_v22 }
 0xa0f   : > { %4887 = vrot.lane.b32.xlu0 %v4385_v3, %s8037_s27 }
 0xa10   : > { %4889 = vrot.lane.b32.xlu1 %v4387_v44, %s8037_s27 }
 0xa12   : > { %v4391_v60 = vpop.f32.mrb[68].mxu1 }
 0xa13   : > { %4899 = vrot.lane.b32.xlu0 %v4391_v60, %s8037_s27  ;;  %v4393_v36 = vpop.f32.mrb[69].mxu1 }
 0xa14   : > { %4901 = vrot.lane.b32.xlu1 %v4393_v36, %s8037_s27  ;;  %v4395_v6 = vpop.f32.mrb[70].mxu1 }
 0xa15   : > { %v4397_v20 = vpop.f32.mrb[71].mxu1 }
 0xa17   : > { %4911 = vrot.lane.b32.xlu0 %v4395_v6, %s8037_s27  ;;  %v6374_v6 = vmul.f32 -1.442695, %v9869_v31 }
 0xa18   : > { %4913 = vrot.lane.b32.xlu1 %v4397_v20, %s8037_s27  ;;  %v6380_v20 = vmul.f32 -1.442695, %v9877_v4 }
 0xa19   : > { %7551 = vpow2.f32 %v6374_v6 }
 0xa1a   : > { %v4401_v7 = vpop.f32.mrb[72].mxu1  ;;  %7553 = vpow2.f32 %v6380_v20 }
 0xa1b   : > { %4923 = vrot.lane.b32.xlu0 %v4401_v7, %s8037_s27  ;;  %v4403_v46 = vpop.f32.mrb[73].mxu1  ;;  %v6387_v7 = vmul.f32 -1.442695, %v9889_v61 }
 0xa1c   : > { %4925 = vrot.lane.b32.xlu1 %v4403_v46, %s8037_s27  ;;  %v4405_v26 = vpop.f32.mrb[74].mxu1  ;;  %v7548_v46 = vpop.eup %7547 }
 0xa1d   : > { %v4407_v44 = vpop.f32.mrb[75].mxu1  ;;  %7555 = vpow2.f32 %v6387_v7 }
 0xa1f   : > { %4935 = vrot.lane.b32.xlu0 %v4405_v26, %s8037_s27  ;;  %v6393_v26 = vmul.f32 -1.442695, %v9897_v2 }
 0xa20   : > { %4937 = vrot.lane.b32.xlu1 %v4407_v44, %s8037_s27  ;;  %v7550_v44 = vpop.eup %7549 }
 0xa21   : > { %7557 = vpow2.f32 %v6393_v26  ;;  %v6404_v26 = vmul.f32 -1.442695, %v9909_v29 }
 0xa22   : > { %v4411_v62 = vpop.f32.mrb[76].mxu1  ;;  %7559 = vpow2.f32 %v6386_v34 }
 0xa23   : > { %4947 = vrot.lane.b32.xlu0 %v4411_v62, %s8037_s27  ;;  %v4413_v3 = vpop.f32.mrb[77].mxu1  ;;  %v4630_v62 = vadd.f32 1.0, %v7548_v46  ;;  %v6398_v46 = vmul.f32 -1.442695, %v9901_v25 }
 0xa24   : > { %4949 = vrot.lane.b32.xlu1 %v4413_v3, %s8037_s27  ;;  %v4415_v60 = vpop.f32.mrb[78].mxu1  ;;  %v4636_v3 = vadd.f32 1.0, %v7550_v44 }
 0xa25   : > { %v4417_v36 = vpop.f32.mrb[79].mxu1  ;;  %7561 = vrcp.f32 %v4630_v62 }
 0xa26   : > { %7563 = vpow2.f32 %v6392_v41 }
 0xa27   : > { %4959 = vrot.lane.b32.xlu0 %v4415_v60, %s8037_s27  ;;  %7565 = vrcp.f32 %v4636_v3 }
 0xa28   : > { %4961 = vrot.lane.b32.xlu1 %v4417_v36, %s8037_s27  ;;  %v6405_v36 = vmul.f32 -1.442695, %v9913_v52 }
 0xa2b   : > { %4879 = vrot.lane.b32.xlu0 %v9988_v56, %s8037_s27  ;;  %v7552_v56 = vpop.eup %7551 }
 0xa2c   : > { %4891 = vrot.lane.b32.xlu1 %v9990_v13, %s8037_s27  ;;  %v7554_v13 = vpop.eup %7553 }
 0xa2d   : > { %v7556_v60 = vpop.eup %7555 }
 0xa2e   : > { %v7558_v6 = vpop.eup %7557  ;;  %v4642_v20 = vadd.f32 1.0, %v7556_v60 }
 0xa2f   : > { %4903 = vrot.lane.b32.xlu0 %v6593_v33, %s8037_s27  ;;  %v4629_v33 = vadd.f32 1.0, %v7552_v56  ;;  %v4648_v44 = vadd.f32 1.0, %v7558_v6 }
 0xa30   : > { %4915 = vrot.lane.b32.xlu1 %v6596_v28, %s8037_s27  ;;  %v4635_v28 = vadd.f32 1.0, %v7554_v13 }
 0xa31   : > { %7567 = vrcp.f32 %v4629_v33 }
 0xa32   : > { %7569 = vrcp.f32 %v4635_v28 }
 0xa33   : > { %4927 = vrot.lane.b32.xlu0 %v6599_v59, %s8037_s27  ;;  %v6399_v59 = vmul.f32 -1.442695, %v9905_v1 }
 0xa34   : > { %4939 = vrot.lane.b32.xlu1 %v6602_v45, %s8037_s27 }
 0xa35   : > { %7571 = vpow2.f32 %v6399_v59 }
 0xa36   : > { %7573 = vpow2.f32 %v6405_v36 }
 0xa37   : > { %4951 = vrot.lane.b32.xlu0 %v10001_v48, %s8037_s27  ;;  %v7560_v48 = vpop.eup %7559  ;;  %7575 = vrcp.f32 %v4642_v20 }
 0xa38   : > { %4963 = vrot.lane.b32.xlu1 %v10003_v53, %s8037_s27  ;;  %v7562_v53 = vpop.eup %7561  ;;  %7577 = vpow2.f32 %v6398_v46  ;;  %v4641_v3 = vadd.f32 1.0, %v7560_v48  ;;  %v6417_v48 = vmul.f32 -1.442695, %v9929_v16  ;;  %s10328_s27 = scalar_lea.vmem [#allocation14], %s6063_s17  ;;  %s6520_s17 = sshll.u32 %s8117_s19, 11 }
 0xa39   : > { %v7564_v62 = vpop.eup %7563  ;;  %7579 = vpow2.f32 %v6404_v26  ;;  %v4774_v59 = vmul.f32 %v7562_v53, %v9873_v9  ;;  %s5930_s20 = sshll.u32 %s10328_s27, 4  ;;  %s10361_s25 = scalar_lea.hbm %s10652_s10, %s6520_s17  ;;  %s10363_s20 = int_to_ptr.vmem [resolvable:$true] %s5930_s20 }
 0xa3a   : > { %v7566_v56 = vpop.eup %7565  ;;  %v4647_v13 = vadd.f32 1.0, %v7564_v62  ;;  %7581 = vrcp.f32 %v4648_v44  ;;  %s5917_s19 = scalar_lea.sflag [#allocation5], %s8335_s22  ;;  %s7941_s26 = scalar_lea.vmem %s10363_s20, 2048 }
 0xa3b   : > { %v7568_v60 = vpop.eup %7567  ;;  %v4780_v36 = vmul.f32 %v7566_v56, %v9881_v5  ;;  %7583 = vrcp.f32 %v4641_v3  ;;  %v6416_v3 = vmul.f32 -1.442695, %v9925_v49  ;;  %p7942_p2 = scmp.ne.s32.totalorder %s10363_s20, %s7941_s26  ;;  %p7948_p11 = scmp.lt.s32.totalorder %s10363_s20, %s7946_s23 }
 0xa3c   : > { %v4872_v45 = vpop.permute.xlu0 %4871  ;;  %v7570_v20 = vpop.eup %7569  ;;  %7585 = vrcp.f32 %v4647_v13  ;;  %v4773_v5 = vmul.f32 %v7568_v60, %v9869_v31  ;;  %v7303_v60 = vld [vmem:[#allocation12 + $0x100] ss:$8 sps:$4 sm:$0xff]   ;;  %p7949_p12 = scmp.lt.s32.totalorder %s7947_s29, %s7941_s26 }
 0xa3d   : > { %v10043_v7 = vpop.permute.xlu1 %4873  ;;  %v4779_v56 = vmul.f32 %v7570_v20, %v9877_v4  ;;  %7587 = vpow2.f32 %v6411_v40  ;;  %v7308_v40 = vld [vmem:[#allocation12 + $0x114] ss:$8 sps:$4 sm:$0xff]   ;;  %p7943_p10 = pnand %p7942_p2, %p10654_p7 }
 0xa3e   : > { %v4966_v33 = vsel %vm1516_vm5, %v4872_v45, %v10043_v7  ;;  %7589 = vpow2.f32 %v6417_v48  ;;  %p7950_p13 = por %p7949_p12, %p7948_p11 }
 0xa3f   : > { %v5054_v26 = vmul.f32 %v4966_v33, %v4774_v59  ;;  %v7572_v62 = vpop.eup %7571  ;;  %7591 = vpow2.f32 %v6410_v21  ;;  %p7944_p1 = pneg %p7943_p10 }
 0xa40   : > { %v4870_v34 = vpop.permute.xlu0 %4869  ;;  %v7574_v53 = vpop.eup %7573  ;;  %7593 = vpow2.f32 %v6416_v3  ;;  %v6376_v3 = vmul.f32 -1.442695, %v9871_v18 }
 0xa41   : > { %v4884_v41 = vpop.permute.xlu1 %4883  ;;  %v4965_v51 = vsel %vm1516_vm5, %v4870_v34, %v4872_v45  ;;  %v7576_v59 = vpop.eup %7575  ;;  %p7951_p8 = pnand %p7950_p13, %p7944_p1 }
 0xa42   : > { %v5053_v13 = vmul.f32 %v4965_v51, %v4773_v5  ;;  %v7578_v34 = vpop.eup %7577  ;;  %v4786_v48 = vmul.f32 %v7576_v59, %v9889_v61  ;;  %v7311_v5 = vld [vmem:[#allocation12 + $0x124] ss:$8 sps:$4 sm:$0xff]   ;;  %v6382_v61 = vmul.f32 -1.442695, %v9879_v17 }
 0xa43   : > { %v7580_v4 = vpop.eup %7579 }
 0xa44   : > { %v10049_v28 = vpop.permute.xlu0 %4895 }
 0xa45   : > { %v10053_v6 = vpop.permute.xlu1 %4885 }
 0xa46   : > { %10620 = vst [vmem:[#allocation50_spill] sm:$0xff] %v10053_v6  ;;  %v4971_v46 = vsel %vm1516_vm5, %v4884_v41, %v10053_v6 }
 0xa47   : > { %v5060_v44 = vmul.f32 %v4971_v46, %v4780_v36  ;;  %v4654_v36 = vadd.f32 1.0, %v7572_v62  ;;  %v4660_v46 = vadd.f32 1.0, %v7574_v53 }
 0xa48   : > { %v4894_v9 = vpop.permute.xlu0 %4893 }
 0xa49   : > { %v4882_v11 = vpop.permute.xlu1 %4881  ;;  %v5102_v30 = vpack.c.bf16 %v5060_v44, %v5054_v26  ;;  %v7582_v26 = vpop.eup %7581  ;;  %v4653_v44 = vadd.f32 1.0, %v7578_v34  ;;  %7595 = vrcp.f32 %v4654_v36  ;;  %v6377_v36 = vmul.f32 -1.442695, %v9875_v63 }
 0xa4a   : > { %v4970_v33 = vsel %vm1516_vm5, %v4882_v11, %v4884_v41  ;;  %v4659_v11 = vadd.f32 1.0, %v7580_v4  ;;  %7597 = vrcp.f32 %v4660_v46  ;;  %v7306_v41 = vld [vmem:[#allocation12 + $0x110] ss:$8 sps:$4 sm:$0xff]   ;;  %v7584_v21 = vpop.eup %7583  ;;  %v4792_v62 = vmul.f32 %v7582_v26, %v9897_v2  ;;  %v7309_v46 = vld [vmem:[#allocation12 + $0x120] ss:$8 sps:$4 sm:$0xff]  }
 0xa4b   : > { %v5059_v45 = vmul.f32 %v4970_v33, %v4779_v56  ;;  %5697 = vmatprep.mubr.bf16.mxu1 %v5102_v30  ;;  %v7586_v56 = vpop.eup %7585  ;;  %7599 = vrcp.f32 %v4653_v44  ;;  %v4975_v2 = vsel %vm1516_vm5, %v4894_v9, %v10049_v28  ;;  %v6383_v4 = vmul.f32 -1.442695, %v9883_v47 }
 0xa4c   : > { %v4908_v31 = vpop.permute.xlu0 %4907  ;;  %v7588_v34 = vpop.eup %7587  ;;  %7601 = vrcp.f32 %v4659_v11  ;;  %v6388_v11 = vmul.f32 -1.442695, %v9887_v27 }
 0xa4d   : > { %v5101_v20 = vpack.c.bf16 %v5059_v45, %v5053_v13  ;;  %v10065_v6 = vpop.permute.xlu1 %4897  ;;  %7603 = vpow2.f32 %v6376_v3  ;;  %v4666_v9 = vadd.f32 1.0, %v7588_v34 }
 0xa4e   : > { %v4976_v51 = vsel %vm1516_vm5, %v10049_v28, %v10065_v6  ;;  %7605 = vpow2.f32 %v6377_v36 }
 0xa4f   : > { %5698 = vmatmul.mubr.bf16.vlgmr.msra.gmra.mrb[80].mxu1 %v5101_v20  ;;  %v5066_v13 = vmul.f32 %v4976_v51, %v4786_v48  ;;  %v4785_v20 = vmul.f32 %v7584_v21, %v9885_v23  ;;  %v7314_v51 = vld [vmem:[#allocation12 + $0x134] ss:$8 sps:$4 sm:$0xff]   ;;  %7607 = vpow2.f32 %v6382_v61  ;;  %v7312_v21 = vld [vmem:[#allocation12 + $0x130] ss:$8 sps:$4 sm:$0xff]  }
 0xa50   : > { %5739 = vmatpush1.bf16.msra.mxu1 %v7303_v60  ;;  %v10070_v30 = vpop.permute.xlu0 %4919  ;;  %v7590_v60 = vpop.eup %7589  ;;  %7609 = vpow2.f32 %v6383_v4 }
 0xa51   : > { %v10074_v53 = vpop.permute.xlu1 %4909  ;;  %5740 = vmatprep.subr.bf16.mxu1 %v7308_v40  ;;  %v4791_v40 = vmul.f32 %v7586_v56, %v9893_v22  ;;  %v7592_v28 = vpop.eup %7591  ;;  %v4672_v23 = vadd.f32 1.0, %v7590_v60  ;;  %v6389_v56 = vmul.f32 -1.442695, %v9891_v24  ;;  %7611 = vpow2.f32 %v6388_v11 }
 0xa52   : > { %v4981_v33 = vsel %vm1516_vm5, %v4908_v31, %v10074_v53  ;;  %v4665_v34 = vadd.f32 1.0, %v7592_v28  ;;  %7613 = vrcp.f32 %v4666_v9 }
 0xa53   : > { %v5072_v45 = vmul.f32 %v4981_v33, %v4792_v62  ;;  %v7594_v33 = vpop.eup %7593  ;;  %7615 = vrcp.f32 %v4672_v23 }
 0xa54   : > { %5741 = vmatpush1.bf16.msra.mxu1 %v7306_v41  ;;  %v4918_v59 = vpop.permute.xlu0 %4917  ;;  %v5065_v41 = vmul.f32 %v4975_v2, %v4785_v20  ;;  %v4671_v61 = vadd.f32 1.0, %v7594_v33  ;;  %7617 = vpow2.f32 %v6389_v56 }
 0xa55   : > { %v4906_v26 = vpop.permute.xlu1 %4905  ;;  %5742 = vmatprep.subr.bf16.mxu1 %v7311_v5  ;;  %v5108_v44 = vpack.c.bf16 %v5072_v45, %v5066_v13  ;;  %v7596_v5 = vpop.eup %7595  ;;  %v7317_v13 = vld [vmem:[#allocation12 + $0x144] ss:$8 sps:$4 sm:$0xff]   ;;  %v6394_v45 = vmul.f32 -1.442695, %v9895_v12 }
 0xa56   : > { %v4980_v48 = vsel %vm1516_vm5, %v4906_v26, %v4908_v31  ;;  %v7598_v36 = vpop.eup %7597  ;;  %v4798_v4 = vmul.f32 %v7596_v5, %v9905_v1  ;;  %v6400_v1 = vmul.f32 -1.442695, %v9903_v37 }
 0xa57   : > { %v5071_v62 = vmul.f32 %v4980_v48, %v4791_v40  ;;  %5707 = vmatprep.mubr.bf16.mxu1 %v5108_v44  ;;  %v7600_v60 = vpop.eup %7599  ;;  %v4804_v20 = vmul.f32 %v7598_v36, %v9913_v52  ;;  %v7320_v44 = vld [vmem:[#allocation12 + $0x154] ss:$8 sps:$4 sm:$0xff]   ;;  %7619 = vpow2.f32 %v6394_v45  ;;  %v6395_v48 = vmul.f32 -1.442695, %v9899_v55 }
 0xa58   : > { %5743 = vmatpush1.bf16.msra.mxu1 %v7309_v46  ;;  %v4932_v22 = vpop.permute.xlu0 %4931  ;;  %v7315_v46 = vld [vmem:[#allocation12 + $0x140] ss:$8 sps:$4 sm:$0xff]   ;;  %7621 = vrcp.f32 %v4665_v34  ;;  %v4985_v52 = vsel %vm1516_vm5, %v4918_v59, %v10070_v30  ;;  %v4797_v23 = vmul.f32 %v7600_v60, %v9901_v25  ;;  %v6406_v45 = vmul.f32 -1.442695, %v9911_v32 }
 0xa59   : > { %v10089_v3 = vpop.permute.xlu1 %4921  ;;  %5744 = vmatprep.subr.bf16.mxu1 %v7314_v51  ;;  %v5107_v31 = vpack.c.bf16 %v5071_v62, %v5065_v41  ;;  %v7602_v51 = vpop.eup %7601  ;;  %7623 = vrcp.f32 %v4671_v61  ;;  %v7318_v62 = vld [vmem:[#allocation12 + $0x150] ss:$8 sps:$4 sm:$0xff]   ;;  %v7321_v60 = vld [vmem:[#allocation12 + $0x160] ss:$8 sps:$4 sm:$0xff]  }
 0xa5a   : > { %v4986_v2 = vsel %vm1516_vm5, %v10070_v30, %v10089_v3  ;;  %v7604_v41 = vpop.eup %7603  ;;  %v4803_v5 = vmul.f32 %v7602_v51, %v9909_v29  ;;  %7625 = vpow2.f32 %v6395_v48  ;;  %v6407_v30 = vmul.f32 -1.442695, %v9915_v15  ;;  %v7326_v51 = vld [vmem:[#allocation12 + $0x174] ss:$8 sps:$4 sm:$0xff]  }
 0xa5b   : > { %5708 = vmatmul.mubr.bf16.gmra.mrb[84].mxu1 %v5107_v31  ;;  %v5078_v28 = vmul.f32 %v4986_v2, %v4798_v4  ;;  %v7606_v33 = vpop.eup %7605  ;;  %v5077_v59 = vmul.f32 %v4985_v52, %v4797_v23  ;;  %7627 = vpow2.f32 %v6400_v1  ;;  %v6412_v29 = vmul.f32 -1.442695, %v9919_v35 }
 0xa5c   : > { %5745 = vmatpush1.bf16.msra.mxu1 %v7312_v21  ;;  %v10097_v40 = vpop.permute.xlu0 %4943  ;;  %v6401_v21 = vmul.f32 -1.442695, %v9907_v10  ;;  %v7608_v36 = vpop.eup %7607  ;;  %v4632_v1 = vadd.f32 1.0, %v7606_v33 }
 0xa5d   : > { %v10099_v26 = vpop.permute.xlu1 %4933  ;;  %5746 = vmatprep.subr.bf16.mxu1 %v7317_v13  ;;  %v7323_v13 = vld [vmem:[#allocation12 + $0x164] ss:$8 sps:$4 sm:$0xff]   ;;  %v7610_v61 = vpop.eup %7609  ;;  %v4637_v33 = vadd.f32 1.0, %v7608_v36 }
 0xa5e   : > { %v4991_v11 = vsel %vm1516_vm5, %v4932_v22, %v10099_v26  ;;  %7629 = vpow2.f32 %v6401_v21 }
 0xa5f   : > { %v5084_v9 = vmul.f32 %v4991_v11, %v4804_v20  ;;  %v6413_v20 = vmul.f32 -1.442695, %v9923_v54  ;;  %7631 = vpow2.f32 %v6406_v45 }
 0xa60   : > { %5747 = vmatpush1.bf16.msra.mxu1 %v7315_v46  ;;  %v4942_v2 = vpop.permute.xlu0 %4941  ;;  %v7612_v46 = vpop.eup %7611  ;;  %7633 = vpow2.f32 %v6407_v30 }
 0xa61   : > { %v4930_v56 = vpop.permute.xlu1 %4929  ;;  %5748 = vmatprep.subr.bf16.mxu1 %v7320_v44  ;;  %v5114_v31 = vpack.c.bf16 %v5084_v9, %v5078_v28  ;;  %v7614_v4 = vpop.eup %7613  ;;  %v4631_v28 = vadd.f32 1.0, %v7604_v41  ;;  %7635 = vpow2.f32 %v6412_v29  ;;  %v7329_v41 = vld [vmem:[#allocation12 + $0x184] ss:$8 sps:$4 sm:$0xff]  }
 0xa62   : > { %v4990_v34 = vsel %vm1516_vm5, %v4930_v56, %v4932_v22  ;;  %v7616_v11 = vpop.eup %7615  ;;  %v4810_v21 = vmul.f32 %v7614_v4, %v9921_v57  ;;  %7637 = vpow2.f32 %v6413_v20  ;;  %v4995_v57 = vsel %vm1516_vm5, %v4942_v2, %v10097_v40 }
 0xa63   : > { %v5083_v25 = vmul.f32 %v4990_v34, %v4803_v5  ;;  %5717 = vmatprep.mubr.bf16.mxu1 %v5114_v31  ;;  %v7618_v48 = vpop.eup %7617  ;;  %v4816_v5 = vmul.f32 %v7616_v11, %v9929_v16  ;;  %7639 = vrcp.f32 %v4631_v28  ;;  %v4638_v34 = vadd.f32 1.0, %v7610_v61  ;;  %v7327_v16 = vld [vmem:[#allocation12 + $0x180] ss:$8 sps:$4 sm:$0xff]  }
 0xa64   : > { %5749 = vmatpush1.bf16.msra.mxu1 %v7318_v62  ;;  %v7620_v9 = vpop.eup %7619  ;;  %v7324_v62 = vld [vmem:[#allocation12 + $0x170] ss:$8 sps:$4 sm:$0xff]   ;;  %v4956_v56 = vpop.permute.xlu0 %4955  ;;  %7641 = vrcp.f32 %v4632_v1 }
 0xa65   : > { %v10115_v44 = vpop.permute.xlu1 %4945  ;;  %5750 = vmatprep.subr.bf16.mxu1 %v7323_v13  ;;  %v5113_v22 = vpack.c.bf16 %v5083_v25, %v5077_v59  ;;  %v7622_v23 = vpop.eup %7621  ;;  %v4643_v25 = vadd.f32 1.0, %v7612_v46  ;;  %7643 = vrcp.f32 %v4637_v33  ;;  %v4649_v11 = vadd.f32 1.0, %v7620_v9  ;;  %v7335_v9 = vld [vmem:[#allocation12 + $0x1a4] ss:$8 sps:$4 sm:$0xff]   ;;  %v7333_v33 = vld [vmem:[#allocation12 + $0x1a0] ss:$8 sps:$4 sm:$0xff]  }
 0xa66   : > { %v4996_v52 = vsel %vm1516_vm5, %v10097_v40, %v10115_v44  ;;  %v7624_v13 = vpop.eup %7623  ;;  %v4809_v4 = vmul.f32 %v7622_v23, %v9917_v50  ;;  %7645 = vrcp.f32 %v4638_v34  ;;  %v6418_v40 = vmul.f32 -1.442695, %v9927_v58 }
 0xa67   : > { %5718 = vmatmul.mubr.bf16.gmra.mrb[88].mxu1 %v5113_v22  ;;  %v5090_v30 = vmul.f32 %v4996_v52, %v4810_v21  ;;  %v7626_v29 = vpop.eup %7625  ;;  %v4815_v36 = vmul.f32 %v7624_v13, %v9925_v49  ;;  %7647 = vrcp.f32 %v4643_v25  ;;  %v7330_v49 = vld [vmem:[#allocation12 + $0x190] ss:$8 sps:$4 sm:$0xff]  }
 0xa68   : > { %5751 = vmatpush1.bf16.msra.mxu1 %v7321_v60  ;;  %v4644_v60 = vadd.f32 1.0, %v7618_v48  ;;  %v7628_v61 = vpop.eup %7627  ;;  %v5089_v2 = vmul.f32 %v4995_v57, %v4809_v4  ;;  %v4650_v50 = vadd.f32 1.0, %v7626_v29  ;;  %v6419_v57 = vmul.f32 -1.442695, %v9931_v19 }
 0xa69   : > { %v10122_v31 = vpop.permute.xlu1 %4957  ;;  %5752 = vmatprep.subr.bf16.mxu1 %v7326_v51  ;;  %v7332_v51 = vld [vmem:[#allocation12 + $0x194] ss:$8 sps:$4 sm:$0xff]   ;;  %v7630_v28 = vpop.eup %7629  ;;  %v6378_v29 = vmul.f32 -1.442695, %v9933_v39 }
 0xa6a   : > { %v5001_v45 = vsel %vm1516_vm5, %v4956_v56, %v10122_v31  ;;  %v7632_v48 = vpop.eup %7631  ;;  %7649 = vrcp.f32 %v4644_v60  ;;  %v7336_v60 = vld [vmem:[#allocation12 + $0x1b0] ss:$8 sps:$4 sm:$0xff]  }
 0xa6b   : > { %v5096_v59 = vmul.f32 %v5001_v45, %v4816_v5  ;;  %v7634_v52 = vpop.eup %7633  ;;  %7651 = vrcp.f32 %v4649_v11  ;;  %v4656_v5 = vadd.f32 1.0, %v7630_v28  ;;  %v6385_v11 = vmul.f32 -1.442695, %v9941_v0 }
 0xa6c   : > { %5753 = vmatpush1.bf16.msra.mxu1 %v7324_v62  ;;  %v4655_v62 = vadd.f32 1.0, %v7628_v61  ;;  %v7636_v21 = vpop.eup %7635  ;;  %7653 = vpow2.f32 %v6418_v40  ;;  %v4662_v13 = vadd.f32 1.0, %v7634_v52  ;;  %v6390_v28 = vmul.f32 -1.442695, %v9946_v42  ;;  %v7339_v40 = vld [vmem:[#allocation12 + $0x1c0] ss:$8 sps:$4 sm:$0xff]  }
 0xa6d   : > { %v4954_v20 = vpop.permute.xlu1 %4953  ;;  %5754 = vmatprep.subr.bf16.mxu1 %v7329_v41  ;;  %v5120_v22 = vpack.c.bf16 %v5096_v59, %v5090_v30  ;;  %v4661_v41 = vadd.f32 1.0, %v7632_v48  ;;  %7655 = vrcp.f32 %v4650_v50  ;;  %v4667_v34 = vadd.f32 1.0, %v7636_v21  ;;  %v7338_v30 = vld [vmem:[#allocation12 + $0x1b4] ss:$8 sps:$4 sm:$0xff]  }
 0xa6e   : > { %v5000_v46 = vsel %vm1516_vm5, %v4954_v20, %v4956_v56  ;;  %v7638_v56 = vpop.eup %7637  ;;  %7657 = vrcp.f32 %v4655_v62  ;;  %v7341_v20 = vld [vmem:[#allocation12 + $0x1c4] ss:$8 sps:$4 sm:$0xff]   ;;  %v6391_v48 = vmul.f32 -1.442695, %v9949_v8  ;;  %v6396_v62 = vmul.f32 -1.442695, %v9952_v14 }
 0xa6f   : > { %v5095_v1 = vmul.f32 %v5000_v46, %v4815_v36  ;;  %5727 = vmatprep.mubr.bf16.mxu1 %v5120_v22  ;;  %v7640_v45 = vpop.eup %7639  ;;  %7659 = vrcp.f32 %v4656_v5  ;;  %v4668_v25 = vadd.f32 1.0, %v7638_v56  ;;  %v6379_v36 = vmul.f32 -1.442695, %v9936_v38 }
 0xa70   : > { %5755 = vmatpush1.bf16.msra.mxu1 %v7327_v16  ;;  %v7642_v59 = vpop.eup %7641  ;;  %7661 = vrcp.f32 %v4661_v41 }
 0xa71   : > { %5756 = vmatprep.subr.bf16.mxu1 %v7332_v51  ;;  %v5119_v23 = vpack.c.bf16 %v5095_v1, %v5089_v2  ;;  %v7644_v16 = vpop.eup %7643  ;;  %7663 = vrcp.f32 %v4662_v13  ;;  %v6384_v51 = vmul.f32 -1.442695, %v9939_v43  ;;  %v4775_v1 = vmul.f32 %v7640_v45, %v9871_v18  ;;  %v10621_v18 = vld [vmem:[#allocation40_spill] sm:$0xff]  ;;  %v7342_v45 = vld [vmem:[#allocation12 + $0x1d0] ss:$8 sps:$4 sm:$0xff]  }
 0xa72   : > { %v7646_v4 = vpop.eup %7645  ;;  %7665 = vrcp.f32 %v4667_v34  ;;  %v6397_v5 = vmul.f32 -1.442695, %v10621_v18  ;;  %v4776_v13 = vmul.f32 %v7642_v59, %v9875_v63  ;;  %v10623_v59 = vld [vmem:[#allocation33_spill] sm:$0xff] }
 0xa73   : > { %5728 = vmatmul.mubr.bf16.gmra.mrb[92].mxu1 %v5119_v23  ;;  %v7648_v22 = vpop.eup %7647  ;;  %7667 = vrcp.f32 %v4668_v25  ;;  %v4782_v63 = vmul.f32 %v7646_v4, %v9883_v47  ;;  %v10626_v47 = vld [vmem:[#allocation42_spill] sm:$0xff] }
 0xa74   : > { %5757 = vmatpush1.bf16.msra.mxu1 %v7330_v49  ;;  %v10136_v61 = vpop.eup %7649  ;;  %7669 = vpow2.f32 %v6419_v57  ;;  %v7344_v49 = vld [vmem:[#allocation12 + $0x1d4] ss:$8 sps:$4 sm:$0xff]   ;;  %v6408_v4 = vmul.f32 -1.442695, %v10626_v47 }
 0xa75   : > { %5758 = vmatprep.subr.bf16.mxu1 %v7335_v9  ;;  %v10139_v46 = vpop.eup %7651  ;;  %7671 = vpow2.f32 %v6378_v29 }
 0xa76   : > { %v7654_v2 = vpop.eup %7653  ;;  %7673 = vpow2.f32 %v6379_v36 }
 0xa77   : > { %v10144_v52 = vpop.eup %7655  ;;  %7675 = vpow2.f32 %v6384_v51  ;;  %v10624_v51 = vld [vmem:[#allocation50_spill] sm:$0xff] }
 0xa78   : > { %5759 = vmatpush1.bf16.msra.mxu1 %v7333_v33  ;;  %v10151_v21 = vpop.eup %7657  ;;  %7677 = vpow2.f32 %v6385_v11  ;;  %v4673_v33 = vadd.f32 1.0, %v7654_v2 }
 0xa79   : > { %5760 = vmatprep.subr.bf16.mxu1 %v7338_v30  ;;  %v10156_v41 = vpop.eup %7659  ;;  %7679 = vpow2.f32 %v6390_v28  ;;  %v10622_v30 = vld [vmem:[#allocation47_spill] sm:$0xff]  ;;  %v10625_v28 = vld [vmem:[#allocation26_spill] sm:$0xff] }
 0xa7a   : > { %v10159_v34 = vpop.eup %7661  ;;  %7681 = vpow2.f32 %v6391_v48  ;;  %v6402_v25 = vmul.f32 -1.442695, %v10622_v30 }
 0xa7b   : > { %v10165_v36 = vpop.eup %7663  ;;  %7683 = vpow2.f32 %v6396_v62  ;;  %v7345_v62 = vld [vmem:[#allocation12 + $0x1e0] ss:$8 sps:$4 sm:$0xff]  }
 0xa7c   : > { %5761 = vmatpush1.bf16.msra.mxu1 %v7336_v60  ;;  %v7347_v60 = vld [vmem:[#allocation12 + $0x1e4] ss:$8 sps:$4 sm:$0xff]   ;;  %7685 = vpow2.f32 %v6397_v5 }
 0xa7d   : > { %v4876_v50 = vpop.permute.xlu0 %4875  ;;  %5762 = vmatprep.subr.bf16.mxu1 %v7341_v20  ;;  %v6403_v20 = vmul.f32 -1.442695, %v10623_v59  ;;  %7687 = vrcp.f32 %v4673_v33  ;;  %v10627_v5 = vld [vmem:[#allocation44_spill] sm:$0xff]  ;;  %v10628_v33 = vld [vmem:[#allocation46_spill] sm:$0xff] }
 0xa7e   : > { %v4967_v23 = vsel %vm1516_vm5, %v10043_v7, %v4876_v50  ;;  %v10149_v9 = vpop.permute.xlu1 %4877  ;;  %v4781_v7 = vmul.f32 %v7644_v16, %v9879_v17  ;;  %v10173_v16 = vpop.eup %7665  ;;  %7689 = vpow2.f32 %v6402_v25  ;;  %v6415_v47 = vmul.f32 -1.442695, %v10628_v33 }
 0xa7f   : > { %v10154_v56 = vmul.f32 %v4967_v23, %v4775_v1  ;;  %v4968_v57 = vsel %vm1516_vm5, %v4876_v50, %v10149_v9  ;;  %v10180_v48 = vpop.eup %7667  ;;  %7691 = vpow2.f32 %v6403_v20  ;;  %v10630_v20 = vld [vmem:[#allocation43_spill] sm:$0xff] }
 0xa80   : > { %5763 = vmatpush1.bf16.msra.mxu1 %v7339_v40  ;;  %v6409_v40 = vmul.f32 -1.442695, %v10625_v28  ;;  %v5056_v50 = vmul.f32 %v4968_v57, %v4776_v13  ;;  %v7670_v23 = vpop.eup %7669  ;;  %v6414_v28 = vmul.f32 -1.442695, %v10627_v5  ;;  %v7348_v5 = vld [vmem:[#allocation12 + $0x1f0] ss:$8 sps:$4 sm:$0xff]  }
 0xa81   : > { %v4888_v29 = vpop.permute.xlu0 %4887  ;;  %5764 = vmatprep.subr.bf16.mxu1 %v7344_v49  ;;  %v7672_v30 = vpop.eup %7671 }
 0xa82   : > { %v4972_v11 = vsel %vm1516_vm5, %v10624_v51, %v4888_v29  ;;  %v10171_v17 = vpop.permute.xlu1 %4889  ;;  %v4787_v51 = vmul.f32 %v7648_v22, %v9887_v27  ;;  %v7674_v27 = vpop.eup %7673  ;;  %7693 = vpow2.f32 %v6409_v40  ;;  %v10629_v22 = vld [vmem:[#allocation45_spill] sm:$0xff] }
 0xa83   : > { %v10176_v2 = vmul.f32 %v4972_v11, %v4781_v7  ;;  %v4973_v1 = vsel %vm1516_vm5, %v4888_v29, %v10171_v17  ;;  %v7350_v29 = vld [vmem:[#allocation12 + $0x1f4] ss:$8 sps:$4 sm:$0xff]   ;;  %v6421_v25 = vmul.f32 -1.442695, %v10629_v22  ;;  %7695 = vpow2.f32 %v6408_v4 }
 0xa84   : > { %v5062_v49 = vmul.f32 %v4973_v1, %v4782_v63  ;;  %5765 = vmatpush1.bf16.msra.mxu1 %v7342_v45  ;;  %v7676_v1 = vpop.eup %7675  ;;  %v6420_v7 = vmul.f32 -1.442695, %v10630_v20  ;;  %7697 = vpow2.f32 %v6414_v28 }
 0xa85   : > { %v4900_v11 = vpop.permute.xlu0 %4899  ;;  %5766 = vmatprep.subr.bf16.mxu1 %v7347_v60  ;;  %v4788_v60 = vmul.f32 %v10136_v61, %v9891_v24  ;;  %v4794_v24 = vmul.f32 %v10144_v52, %v9899_v55  ;;  %v4633_v61 = vadd.f32 1.0, %v7672_v30  ;;  %7699 = vpow2.f32 %v6415_v47  ;;  %v7351_v52 = vld [vmem:[#allocation12 + $0x200] ss:$8 sps:$4 sm:$0xff]  }
 0xa86   : > { %v4977_v13 = vsel %vm1516_vm5, %v10065_v6, %v4900_v11  ;;  %v10190_v45 = vpop.permute.xlu1 %4901  ;;  %v5104_v57 = vpack.c.bf16 %v5062_v49, %v5056_v50  ;;  %v7678_v6 = vpop.eup %7677  ;;  %v4793_v50 = vmul.f32 %v10139_v46, %v9895_v12  ;;  %v4674_v49 = vadd.f32 1.0, %v7670_v23 }
 0xa87   : > { %v10193_v63 = vmul.f32 %v4977_v13, %v4787_v51  ;;  %v4978_v40 = vsel %vm1516_vm5, %v4900_v11, %v10190_v45  ;;  %v7353_v13 = vld [vmem:[#allocation12 + $0x204] ss:$8 sps:$4 sm:$0xff]   ;;  %v7680_v22 = vpop.eup %7679  ;;  %v4634_v46 = vadd.f32 1.0, %v7674_v27  ;;  %7701 = vpow2.f32 %v6421_v25  ;;  %v7356_v25 = vld [vmem:[#allocation12 + $0x214] ss:$8 sps:$4 sm:$0xff]  }
 0xa88   : > { %5767 = vmatpush1.bf16.msra.mxu1 %v7345_v62  ;;  %5770 = vmatprep.mubr.bf16.mxu1 %v5104_v57  ;;  %v7682_v12 = vpop.eup %7681  ;;  %7703 = vpow2.f32 %v6420_v7  ;;  %v5068_v57 = vmul.f32 %v4978_v40, %v4788_v60  ;;  %v4639_v47 = vadd.f32 1.0, %v7676_v1  ;;  %v4645_v7 = vadd.f32 1.0, %v7680_v22 }
 0xa89   : > { %v4912_v51 = vpop.permute.xlu0 %4911  ;;  %5768 = vmatprep.subr.bf16.mxu1 %v7350_v29  ;;  %v7684_v11 = vpop.eup %7683  ;;  %v4640_v29 = vadd.f32 1.0, %v7678_v6  ;;  %7705 = vrcp.f32 %v4674_v49  ;;  %v10631_v1 = vpack.c.bf16 %v10176_v2, %v10154_v56  ;;  %v4800_v49 = vmul.f32 %v10156_v41, %v9907_v10  ;;  %v7359_v2 = vld [vmem:[#allocation12 + $0x224] ss:$8 sps:$4 sm:$0xff]  }
 0xa8a   : > { %v4982_v4 = vsel %vm1516_vm5, %v10074_v53, %v4912_v51  ;;  %v10206_v62 = vpop.permute.xlu1 %4913  ;;  %v7686_v30 = vpop.eup %7685  ;;  %v4799_v53 = vmul.f32 %v10151_v21, %v9903_v37  ;;  %7707 = vrcp.f32 %v4633_v61  ;;  %v4646_v37 = vadd.f32 1.0, %v7682_v12 }
 0xa8b   : > { %v10208_v28 = vmul.f32 %v4982_v4, %v4793_v50  ;;  %v4983_v23 = vsel %vm1516_vm5, %v4912_v51, %v10206_v62  ;;  %v10216_v51 = vpop.eup %7687  ;;  %7709 = vrcp.f32 %v4634_v46  ;;  %v4652_v22 = vadd.f32 1.0, %v7686_v30 }
 0xa8c   : > { %v5074_v55 = vmul.f32 %v4983_v23, %v4794_v24  ;;  %5769 = vmatpush1.bf16.msra.mxu1 %v7348_v5  ;;  %v7690_v40 = vpop.eup %7689  ;;  %7711 = vrcp.f32 %v4640_v29  ;;  %v4805_v24 = vmul.f32 %v10159_v34, %v9911_v32  ;;  %v4651_v61 = vadd.f32 1.0, %v7684_v11 }
 0xa8d   : > { %v4924_v27 = vpop.permute.xlu0 %4923  ;;  %5811 = vmatprep.subr.bf16.mxu1 %v7353_v13  ;;  %v5109_v50 = vpack.c.bf16 %v10208_v28, %v10193_v63  ;;  %v7692_v63 = vpop.eup %7691  ;;  %7713 = vrcp.f32 %v4639_v47  ;;  %v4806_v10 = vmul.f32 %v10165_v36, %v9915_v15  ;;  %v4657_v41 = vadd.f32 1.0, %v7690_v40  ;;  %v7357_v36 = vld [vmem:[#allocation12 + $0x220] ss:$8 sps:$4 sm:$0xff]  }
 0xa8e   : > { %v4987_v5 = vsel %vm1516_vm5, %v10089_v3, %v4924_v27  ;;  %v10220_v60 = vpop.permute.xlu1 %4925  ;;  %v5110_v6 = vpack.c.bf16 %v5074_v55, %v5068_v57  ;;  %v7354_v3 = vld [vmem:[#allocation12 + $0x210] ss:$8 sps:$4 sm:$0xff]   ;;  %v7694_v13 = vpop.eup %7693  ;;  %7715 = vrcp.f32 %v4645_v7  ;;  %v4658_v34 = vadd.f32 1.0, %v7692_v63 }
 0xa8f   : > { %v10222_v21 = vmul.f32 %v4987_v5, %v4799_v53  ;;  %5771 = vmatmul.mubr.bf16.vlgmr.msra.gmra.mrb[80].mxu1 %v10631_v1  ;;  %v4988_v4 = vsel %vm1516_vm5, %v4924_v27, %v10220_v60  ;;  %v7696_v12 = vpop.eup %7695  ;;  %7717 = vrcp.f32 %v4646_v37  ;;  %v4664_v57 = vadd.f32 1.0, %v7694_v13  ;;  %v7362_v53 = vld [vmem:[#allocation12 + $0x234] ss:$8 sps:$4 sm:$0xff]  }
 0xa90   : > { %5780 = vmatprep.mubr.bf16.mxu1 %v5110_v6  ;;  %5812 = vmatpush1.bf16.msra.mxu1 %v7351_v52  ;;  %v7698_v32 = vpop.eup %7697  ;;  %7719 = vrcp.f32 %v4652_v22  ;;  %v5080_v55 = vmul.f32 %v4988_v4, %v4800_v49  ;;  %v4811_v1 = vmul.f32 %v10173_v16, %v9919_v35  ;;  %v7365_v35 = vld [vmem:[#allocation12 + $0x244] ss:$8 sps:$4 sm:$0xff]  }
 0xa91   : > { %v4936_v56 = vpop.permute.xlu0 %4935  ;;  %5813 = vmatprep.subr.bf16.mxu1 %v7356_v25  ;;  %v7700_v29 = vpop.eup %7699  ;;  %7721 = vrcp.f32 %v4651_v61  ;;  %v4669_v25 = vadd.f32 1.0, %v7698_v32  ;;  %v4812_v61 = vmul.f32 %v10180_v48, %v9923_v54 }
 0xa92   : > { %v4992_v46 = vsel %vm1516_vm5, %v10099_v26, %v4936_v56  ;;  %v10237_v28 = vpop.permute.xlu1 %4937  ;;  %v7702_v52 = vpop.eup %7701  ;;  %v4663_v26 = vadd.f32 1.0, %v7696_v12  ;;  %7723 = vrcp.f32 %v4657_v41  ;;  %v4670_v40 = vadd.f32 1.0, %v7700_v29  ;;  %v7363_v41 = vld [vmem:[#allocation12 + $0x240] ss:$8 sps:$4 sm:$0xff]  }
 0xa93   : > { %v10239_v23 = vmul.f32 %v4992_v46, %v4805_v24  ;;  %v4993_v11 = vsel %vm1516_vm5, %v4936_v56, %v10237_v28  ;;  %v7704_v27 = vpop.eup %7703  ;;  %7725 = vrcp.f32 %v4658_v34  ;;  %v4676_v63 = vadd.f32 1.0, %v7702_v52 }
 0xa94   : > { %v5086_v15 = vmul.f32 %v4993_v11, %v4806_v10  ;;  %5814 = vmatpush1.bf16.msra.mxu1 %v7354_v3  ;;  %v7706_v6 = vpop.eup %7705  ;;  %7727 = vrcp.f32 %v4664_v57  ;;  %v4817_v3 = vmul.f32 %v10216_v51, %v9927_v58  ;;  %v4675_v13 = vadd.f32 1.0, %v7704_v27 }
 0xa95   : > { %v4948_v30 = vpop.permute.xlu0 %4947  ;;  %5815 = vmatprep.subr.bf16.mxu1 %v7359_v2  ;;  %v5115_v47 = vpack.c.bf16 %v10239_v23, %v10222_v21  ;;  %v7708_v37 = vpop.eup %7707  ;;  %v7360_v21 = vld [vmem:[#allocation12 + $0x230] ss:$8 sps:$4 sm:$0xff]   ;;  %7729 = vrcp.f32 %v4663_v26  ;;  %v7368_v23 = vld [vmem:[#allocation12 + $0x254] ss:$8 sps:$4 sm:$0xff]  }
 0xa96   : > { %v10245_v7 = vpop.permute.xlu1 %4949  ;;  %v5116_v5 = vpack.c.bf16 %v5086_v15, %v5080_v55  ;;  %v4997_v49 = vsel %vm1516_vm5, %v10115_v44, %v4948_v30  ;;  %v7710_v22 = vpop.eup %7709  ;;  %v4818_v44 = vmul.f32 %v7706_v6, %v9931_v19  ;;  %7731 = vrcp.f32 %v4669_v25 }
 0xa97   : > { %5781 = vmatmul.mubr.bf16.gmra.mrb[84].mxu1 %v5109_v50  ;;  %v4998_v50 = vsel %vm1516_vm5, %v4948_v30, %v10245_v7  ;;  %v7712_v16 = vpop.eup %7711  ;;  %7733 = vrcp.f32 %v4670_v40  ;;  %v10262_v51 = vmul.f32 %v4997_v49, %v4811_v1  ;;  %v4778_v54 = vmul.f32 %v7710_v22, %v9936_v38 }
 0xa98   : > { %5790 = vmatprep.mubr.bf16.mxu1 %v5116_v5  ;;  %5816 = vmatpush1.bf16.msra.mxu1 %v7357_v36  ;;  %v7714_v58 = vpop.eup %7713  ;;  %7735 = vrcp.f32 %v4676_v63  ;;  %v5092_v19 = vmul.f32 %v4998_v50, %v4812_v61  ;;  %v4777_v46 = vmul.f32 %v7708_v37, %v9933_v39  ;;  %v4784_v32 = vmul.f32 %v7712_v16, %v9941_v0  ;;  %v7371_v37 = vld [vmem:[#allocation12 + $0x264] ss:$8 sps:$4 sm:$0xff]   ;;  %v7369_v50 = vld [vmem:[#allocation12 + $0x260] ss:$8 sps:$4 sm:$0xff]   ;;  %v10633_v16 = vld [vmem:[#allocation26_spill] sm:$0xff] }
 0xa99   : > { %v4960_v24 = vpop.permute.xlu0 %4959  ;;  %5817 = vmatprep.subr.bf16.mxu1 %v7362_v53  ;;  %v7716_v10 = vpop.eup %7715  ;;  %7737 = vrcp.f32 %v4675_v13  ;;  %v4783_v38 = vmul.f32 %v7714_v58, %v9939_v43  ;;  %v7366_v43 = vld [vmem:[#allocation12 + $0x250] ss:$8 sps:$4 sm:$0xff]   ;;  %v7374_v58 = vld [vmem:[#allocation12 + $0x274] ss:$8 sps:$4 sm:$0xff]  }
 0xa9a   : > { %v5002_v4 = vsel %vm1516_vm5, %v10122_v31, %v4960_v24  ;;  %v10260_v56 = vpop.permute.xlu1 %4961  ;;  %v7718_v31 = vpop.eup %7717  ;;  %v4789_v25 = vmul.f32 %v7716_v10, %v9946_v42 }
 0xa9b   : > { %v10264_v2 = vmul.f32 %v5002_v4, %v4817_v3  ;;  %v5003_v12 = vsel %vm1516_vm5, %v4960_v24, %v10260_v56  ;;  %v7720_v29 = vpop.eup %7719  ;;  %v4790_v53 = vmul.f32 %v7718_v31, %v9949_v8 }
 0xa9c   : > { %v5098_v48 = vmul.f32 %v5003_v12, %v4818_v44  ;;  %5818 = vmatpush1.bf16.msra.mxu1 %v7360_v21  ;;  %v7722_v52 = vpop.eup %7721  ;;  %v4796_v5 = vmul.f32 %v7720_v29, %v10621_v18 }
 0xa9d   : > { %v4880_v34 = vpop.permute.xlu0 %4879  ;;  %5819 = vmatprep.subr.bf16.mxu1 %v7365_v35  ;;  %v5121_v11 = vpack.c.bf16 %v10264_v2, %v10262_v51  ;;  %v7724_v30 = vpop.eup %7723  ;;  %v10632_v35 = vld [vmem:[#allocation47_spill] sm:$0xff]  ;;  %v10634_v51 = vld [vmem:[#allocation42_spill] sm:$0xff] }
 0xa9e   : > { %v4969_v57 = vsel %vm1516_vm5, %v10149_v9, %v4880_v34  ;;  %v5058_v55 = vmul.f32 %v4880_v34, %v4778_v54  ;;  %v4892_v15 = vpop.permute.xlu1 %4891  ;;  %v5122_v36 = vpack.c.bf16 %v5098_v48, %v5092_v19  ;;  %v7726_v9 = vpop.eup %7725  ;;  %v7372_v34 = vld [vmem:[#allocation12 + $0x270] ss:$8 sps:$4 sm:$0xff]  }
 0xa9f   : > { %v10276_v39 = vmul.f32 %v4969_v57, %v4777_v46  ;;  %v4974_v0 = vsel %vm1516_vm5, %v10171_v17, %v4892_v15  ;;  %v5064_v26 = vmul.f32 %v4892_v15, %v4784_v32  ;;  %5791 = vmatmul.mubr.bf16.gmra.mrb[88].mxu1 %v5115_v47  ;;  %v7728_v17 = vpop.eup %7727  ;;  %v4795_v47 = vmul.f32 %v7722_v52, %v9952_v14  ;;  %v10636_v57 = vld [vmem:[#allocation45_spill] sm:$0xff] }
 0xaa0   : > { %v10281_v27 = vmul.f32 %v4974_v0, %v4783_v38  ;;  %5800 = vmatprep.mubr.bf16.mxu1 %v5122_v36  ;;  %5820 = vmatpush1.bf16.msra.mxu1 %v7363_v41  ;;  %v7730_v21 = vpop.eup %7729  ;;  %v4802_v14 = vmul.f32 %v7726_v9, %v10623_v59  ;;  %v4808_v61 = vmul.f32 %v7728_v17, %v10633_v16  ;;  %v7377_v15 = vld [vmem:[#allocation12 + $0x284] ss:$8 sps:$4 sm:$0xff]   ;;  %v10637_v17 = vld [vmem:[#allocation30_spill] sm:$0xff] }
 0xaa1   : > { %v5106_v6 = vpack.c.bf16 %v5064_v26, %v5058_v55  ;;  %v4904_v40 = vpop.permute.xlu0 %4903  ;;  %5821 = vmatprep.subr.bf16.mxu1 %v7368_v23  ;;  %v7732_v3 = vpop.eup %7731  ;;  %v4807_v2 = vmul.f32 %v7730_v21, %v10634_v51  ;;  %v10635_v23 = vld [vmem:[#allocation44_spill] sm:$0xff] }
 0xaa2   : > { %v5105_v8 = vpack.c.bf16 %v10281_v27, %v10276_v39  ;;  %v4979_v1 = vsel %vm1516_vm5, %v10190_v45, %v4904_v40  ;;  %v10290_v63 = vmul.f32 %v4904_v40, %v4790_v53  ;;  %v4916_v49 = vpop.permute.xlu1 %4915  ;;  %v7734_v24 = vpop.eup %7733  ;;  %v4801_v45 = vmul.f32 %v7724_v30, %v10632_v35  ;;  %v7386_v40 = vld [vmem:[#allocation12 + $0x2b4] ss:$8 sps:$4 sm:$0xff]   ;;  %v10639_v39 = vld [vmem:[#allocation32_spill] sm:$0xff] }
 0xaa3   : > { %v10292_v42 = vmul.f32 %v4979_v1, %v4789_v25  ;;  %v4984_v18 = vsel %vm1516_vm5, %v10206_v62, %v4916_v49  ;;  %v10296_v22 = vmul.f32 %v4916_v49, %v4796_v5  ;;  %v7736_v62 = vpop.eup %7735  ;;  %v4814_v32 = vmul.f32 %v7734_v24, %v10628_v33  ;;  %v7380_v25 = vld [vmem:[#allocation12 + $0x294] ss:$8 sps:$4 sm:$0xff]  }
 0xaa4   : > { %v5075_v13 = vmul.f32 %v4984_v18, %v4795_v47  ;;  %5822 = vmatpush1.bf16.msra.mxu1 %v7366_v43  ;;  %v7738_v19 = vpop.eup %7737  ;;  %v4820_v55 = vmul.f32 %v7736_v62, %v10636_v57  ;;  %v7375_v43 = vld [vmem:[#allocation12 + $0x280] ss:$8 sps:$4 sm:$0xff]  }
 0xaa5   : > { %v5112_v44 = vpack.c.bf16 %v10296_v22, %v10290_v63  ;;  %v4928_v4 = vpop.permute.xlu0 %4927  ;;  %5823 = vmatprep.subr.bf16.mxu1 %v7371_v37  ;;  %v4819_v36 = vmul.f32 %v7738_v19, %v10630_v20  ;;  %v7378_v20 = vld [vmem:[#allocation12 + $0x290] ss:$8 sps:$4 sm:$0xff]   ;;  %v10638_v63 = vld [vmem:[#allocation29_spill] sm:$0xff] }
 0xaa6   : > { %v4989_v59 = vsel %vm1516_vm5, %v10220_v60, %v4928_v4  ;;  %v5082_v12 = vmul.f32 %v4928_v4, %v4802_v14  ;;  %v4940_v10 = vpop.permute.xlu1 %4939  ;;  %v5111_v54 = vpack.c.bf16 %v5075_v13, %v10292_v42  ;;  %v4813_v60 = vmul.f32 %v7732_v3, %v10635_v23  ;;  %v7384_v37 = vld [vmem:[#allocation12 + $0x2b0] ss:$8 sps:$4 sm:$0xff]   ;;  %v10645_v62 = vld [vmem:[#allocation25_spill] sm:$0xff] }
 0xaa7   : > { %v5081_v48 = vmul.f32 %v4989_v59, %v4801_v45  ;;  %v4994_v41 = vsel %vm1516_vm5, %v10237_v28, %v4940_v10  ;;  %v5088_v31 = vmul.f32 %v4940_v10, %v4808_v61  ;;  %5801 = vmatmul.mubr.bf16.gmra.mrb[92].mxu1 %v5121_v11  ;;  %v10640_v42 = vld [vmem:[#allocation34_spill] sm:$0xff]  ;;  %v10641_v3 = vld [vmem:[#allocation35_spill] sm:$0xff]  ;;  %v10646_v59 = vld [vmem:[#allocation28_spill] sm:$0xff] }
 0xaa8   : > { %v5087_v46 = vmul.f32 %v4994_v41, %v4807_v2  ;;  %5824 = vmatpush1.bf16.msra.mxu1 %v7369_v50  ;;  %6510 = vmatprep.mubr.msk.bf16.mxu1 %vm1516_vm5, %v5106_v6  ;;  %v7383_v6 = vld [vmem:[#allocation12 + $0x2a4] ss:$8 sps:$4 sm:$0xff]   ;;  %v10643_v45 = vld [vmem:[#allocation27_spill] sm:$0xff]  ;;  %v10648_v41 = vld [vmem:[#allocation38_spill] sm:$0xff] }
 0xaa9   : > { %v5118_v29 = vpack.c.bf16 %v5088_v31, %v5082_v12  ;;  %v4952_v38 = vpop.permute.xlu0 %4951  ;;  %5825 = vmatprep.subr.bf16.mxu1 %v7374_v58  ;;  %v10642_v50 = vld [vmem:[#allocation37_spill] sm:$0xff] }
 0xaaa   : > { %v4999_v28 = vsel %vm1516_vm5, %v10245_v7, %v4952_v38  ;;  %v5094_v11 = vmul.f32 %v4952_v38, %v4814_v32  ;;  %v4964_v52 = vpop.permute.xlu1 %4963  ;;  %v5117_v0 = vpack.c.bf16 %v5087_v46, %v5081_v48  ;;  %v7381_v7 = vld [vmem:[#allocation12 + $0x2a0] ss:$8 sps:$4 sm:$0xff]   ;;  %v10649_v32 = vld [vmem:[#allocation31_spill] sm:$0xff] }
 0xaab   : > { %v5093_v26 = vmul.f32 %v4999_v28, %v4813_v60  ;;  %v5004_v33 = vsel %vm1516_vm5, %v10260_v56, %v4964_v52  ;;  %v5100_v30 = vmul.f32 %v4964_v52, %v4820_v55  ;;  %v10650_v60 = vld [vmem:[#allocation48_spill] sm:$0xff]  ;;  %v10651_v57 = vld [vmem:[#allocation41_spill] sm:$0xff] }
 0xaac   : > { %v5099_v53 = vmul.f32 %v5004_v33, %v4819_v36  ;;  %5826 = vmatpush1.bf16.msra.mxu1 %v7372_v34  ;;  %v10653_v36 = vld [vmem:[#allocation49_spill] sm:$0xff] }
 0xaad   : > { %v5124_v9 = vpack.c.bf16 %v5100_v30, %v5094_v11  ;;  %5827 = vmatprep.subr.bf16.mxu1 %v7377_v15 }
 0xaae   : > { %v5123_v5 = vpack.c.bf16 %v5099_v53, %v5093_v26 }
 0xab0   : > { %5828 = vmatpush1.bf16.msra.mxu1 %v7375_v43 }
 0xab1   : > { %5829 = vmatprep.subr.bf16.mxu1 %v7380_v25 }
 0xab4   : > { %5830 = vmatpush1.bf16.msra.mxu1 %v7378_v20 }
 0xab5   : > { %5831 = vmatprep.subr.bf16.mxu1 %v7383_v6 }
 0xab8   : > { %5832 = vmatpush1.bf16.msra.mxu1 %v7381_v7 }
 0xab9   : > { %5833 = vmatprep.subr.bf16.mxu1 %v7386_v40 }
 0xabc   : > { %5834 = vmatpush1.bf16.msra.mxu1 %v7384_v37 }
 0xabf   : > { %5844 = vmatmul.mubr.bf16.vlgmr.msra.gmra.mrb[80].mxu1 %v5105_v8 }
 0xac0   : > { %6511 = vmatprep.mubr.msk.bf16.mxu1 %vm1516_vm5, %v5112_v44  ;;  %v10644_v44 = vld [vmem:[#allocation39_spill] sm:$0xff] }
 0xac7   : > { %5854 = vmatmul.mubr.bf16.gmra.mrb[84].mxu1 %v5111_v54  ;;  %v10647_v54 = vld [vmem:[#allocation36_spill] sm:$0xff] }
 0xac8   : > { %6512 = vmatprep.mubr.msk.bf16.mxu1 %vm1516_vm5, %v5118_v29 }
 0xacf   : > { %5864 = vmatmul.mubr.bf16.gmra.mrb[88].mxu1 %v5117_v0 }
 0xad0   : > { %6513 = vmatprep.mubr.msk.bf16.mxu1 %vm1516_vm5, %v5124_v9 }
 0xad7   : > { %5874 = vmatmul.mubr.bf16.gmra.mrb[92].mxu1 %v5123_v5 }
 0xb92   : > { %v5845_v56 = vpop.f32.mrb[80].mxu1 }
 0xb93   : > { %v5884_v47 = vadd.f32 %v5845_v56, %v10637_v17  ;;  %v5847_v1 = vpop.f32.mrb[81].mxu1 }
 0xb94   : > { %v5885_v49 = vadd.f32 %v5847_v1, %v10638_v63  ;;  %v5849_v21 = vpop.f32.mrb[82].mxu1 }
 0xb95   : > { %5900 = vst [vmem:[%s10328_s27] sm:$0xff] %v5884_v47  ;;  %v5886_v27 = vadd.f32 %v5849_v21, %v10639_v39  ;;  %v5851_v8 = vpop.f32.mrb[83].mxu1 }
 0xb96   : > { %5901 = vst [vmem:[%s10328_s27 + $0x8] sm:$0xff] %v5885_v49  ;;  %v5887_v18 = vadd.f32 %v5851_v8, %v10640_v42 }
 0xb97   : > { %5902 = vst [vmem:[%s10328_s27 + $0x10] sm:$0xff] %v5886_v27 }
 0xb98   : > { %5903 = vst [vmem:[%s10328_s27 + $0x18] sm:$0xff] %v5887_v18 }
 0xb9a   : > { %v5855_v22 = vpop.f32.mrb[84].mxu1 }
 0xb9b   : > { %v5888_v14 = vadd.f32 %v5855_v22, %v10641_v3  ;;  %v5857_v13 = vpop.f32.mrb[85].mxu1 }
 0xb9c   : > { %v5889_v24 = vadd.f32 %v5857_v13, %v10642_v50  ;;  %v5859_v35 = vpop.f32.mrb[86].mxu1 }
 0xb9d   : > { %5904 = vst [vmem:[%s10328_s27 + $0x20] sm:$0xff] %v5888_v14  ;;  %v5890_v16 = vadd.f32 %v5859_v35, %v10643_v45  ;;  %v5861_v61 = vpop.f32.mrb[87].mxu1 }
 0xb9e   : > { %5905 = vst [vmem:[%s10328_s27 + $0x28] sm:$0xff] %v5889_v24  ;;  %v5891_v4 = vadd.f32 %v5861_v61, %v10644_v44 }
 0xb9f   : > { %5906 = vst [vmem:[%s10328_s27 + $0x30] sm:$0xff] %v5890_v16 }
 0xba0   : > { %5907 = vst [vmem:[%s10328_s27 + $0x38] sm:$0xff] %v5891_v4 }
 0xba2   : > { %v5865_v58 = vpop.f32.mrb[88].mxu1 }
 0xba3   : > { %v5892_v51 = vadd.f32 %v5865_v58, %v10645_v62  ;;  %v5867_v2 = vpop.f32.mrb[89].mxu1 }
 0xba4   : > { %v5893_v12 = vadd.f32 %v5867_v2, %v10646_v59  ;;  %v5869_v10 = vpop.f32.mrb[90].mxu1 }
 0xba5   : > { %5908 = vst [vmem:[%s10328_s27 + $0x40] sm:$0xff] %v5892_v51  ;;  %v5894_v19 = vadd.f32 %v5869_v10, %v10647_v54  ;;  %v5871_v48 = vpop.f32.mrb[91].mxu1 }
 0xba6   : > { %5909 = vst [vmem:[%s10328_s27 + $0x48] sm:$0xff] %v5893_v12  ;;  %v5895_v31 = vadd.f32 %v5871_v48, %v10648_v41 }
 0xba7   : > { %5910 = vst [vmem:[%s10328_s27 + $0x50] sm:$0xff] %v5894_v19 }
 0xba8   : > { %5911 = vst [vmem:[%s10328_s27 + $0x58] sm:$0xff] %v5895_v31 }
 0xbaa   : > { %v5875_v46 = vpop.f32.mrb[92].mxu1 }
 0xbab   : > { %v5896_v34 = vadd.f32 %v5875_v46, %v10649_v32  ;;  %v5877_v23 = vpop.f32.mrb[93].mxu1 }
 0xbac   : > { %v5897_v29 = vadd.f32 %v5877_v23, %v10650_v60  ;;  %v5879_v38 = vpop.f32.mrb[94].mxu1 }
 0xbad   : > { %5912 = vst [vmem:[%s10328_s27 + $0x60] sm:$0xff] %v5896_v34  ;;  %v5898_v55 = vadd.f32 %v5879_v38, %v10651_v57  ;;  %v5881_v15 = vpop.f32.mrb[95].mxu1 }
 0xbae   : > { %5913 = vst [vmem:[%s10328_s27 + $0x68] sm:$0xff] %v5897_v29  ;;  %v5899_v28 = vadd.f32 %v5881_v15, %v10653_v36 }
 0xbaf   : > { %5914 = vst [vmem:[%s10328_s27 + $0x70] sm:$0xff] %v5898_v55 }
 0xbb0   : > { %5915 = vst [vmem:[%s10328_s27 + $0x78] sm:$0xff] %v5899_v28 }
 0xbb1   : > { %7954 = shalt.err (!%p7951_p8)
}
 0xbb2   : > { %s7955_s18 = scalar_lea.hbm %s10361_s25, 2048  ;;  %s7959_s12 = scalar_lea.hbm %s10652_s10, 4096 }
 0xbb3   : > { %p7956_p6 = scmp.ne.s32.totalorder %s10361_s25, %s7955_s18  ;;  %p7960_p3 = scmp.lt.u32.totalorder %s10361_s25, %s10652_s10 }
 0xbb4   : > { %p7961_p0 = scmp.lt.u32.totalorder %s7959_s12, %s7955_s18  ;;  %p7963_p2 = scmp.lt.u32.totalorder %s7955_s18, %s10361_s25 }
 0xbb5   : > { %p7957_p9 = pnand %p7956_p6, %p10654_p7 }
 0xbb6   : > { %p7962_p5 = por %p7961_p0, %p7960_p3 }
 0xbb7   : > { %p7958_p4 = pneg %p7957_p9 }
 0xbb8   : > { %p7964_p10 = por %p7963_p2, %p7962_p5 }
 0xbba   : > { %p7965_p1 = pnand %p7964_p10, %p7958_p4 }
 0xbbc   : > { %7968 = shalt.err (!%p7965_p1)
}
 0xbbd   : > { %s8039_s26 = smov 256   ;;  %s8040_s23 = smov 16  }
 0xbbe   : > { %6767 = dma.vmem_to_hbm [thread:$0]  (%p10654_p7), %s10363_s20, 2048, %s10361_s25, %s5917_s19, %s8039_s26, %s8039_s26, %s8040_s23  }
 0xbbf PF: > { %s5945_s29 = sand.u32 1, %s8007_s13   ;;  %p10655_p11 = scmp.ne.s32.totalorder %s10494_s21, 0 }
 0xbc0   : > { %p10656_p12 = scmp.ge.s32.totalorder %s8019_s16, 2  ;;  %s5946_s18 = scalar_lea.sflag [#allocation5], %s5945_s29 }
 0xbc2   : > { %p6790_p13 = pnand %p10656_p12, %p10655_p11 }
 0xbc4   : > { %8002 = dma.done.wait (!%p6790_p13), %s5946_s18, 2048  }
 0xbc5   : > { %8004 = vsyncadd (!%p6790_p13), %s5946_s18, 4294965248  ;;  %p26_p8 = scmp.ge.s32.totalorder %s8259_s11, 4   ;;  %s10657_s13 = smov %s8011_s14 }
 0xbc6   : > { %s10658_s14 = smov %s8015_s15  ;;  %s10659_s15 = smov %s8271_s28 }
 0xbc7   : > { %s10660_s16 = smov %s8259_s11  ;;  %28 = sbr.rel (!%p26_p8) target bundleno = 11 (0xb), region = 125 }
 0xbce   :  { %5951 = vsyncpa [#allocation4], 1 }
 0xbcf   :  { %5953 = vsyncpa [#allocation4 + $0x1], 1 }
 0xbd0   :  { %5954 = vsyncpa [#allocation7], 1 }
 0xbd1   :  { %5955 = vsyncpa [#allocation10], 1 }
 0xbd2   :  { %5956 = vsyncpa [#allocation13], 1 }
 0xbd3   :  { %5957 = vsyncpa [#allocation5], 1 }
 0xbd4   :  { %5959 = vsyncpa [#allocation5 + $0x1], 1 }

</bundles_post_ra>
